<compile_context>
chip_gen: v5e
topology: v5e:2x2
jax: 0.10.0
libtpu: 0.0.40
codegen_flags: <defaults>
</compile_context>

<pallas_src>
import functools

import jax
import jax.numpy as jnp
from jax.experimental import pallas as pl
from jax.experimental.pallas import tpu as pltpu

_BN_EPS = 1e-5
_LEAKY_SLOPE = 0.2
_VMEM_LIMIT = 48 * 1024 * 1024  # fits v7x's 64 MiB physical VMEM with headroom


def _round_up(x, m):
    return (x + m - 1) // m * m


# --------------------------------------------------------------------------
# Kernels
# --------------------------------------------------------------------------
def _gemm_act_kernel(a_ref, w_ref, o_ref, *, activation):
    """Tiled im2col-GEMM + activation (no BatchNorm).

    a_ref: [tile_m, K]     bf16 patches
    w_ref: [K, Cout]       bf16 weights (resident across the grid)
    o_ref: [tile_m, Cout]  output (bf16 or f32)
    """
    acc = jnp.dot(a_ref[...], w_ref[...], preferred_element_type=jnp.float32)
    if activation == "leaky":
        acc = jnp.where(acc >= 0, acc, _LEAKY_SLOPE * acc)
    elif activation == "sigmoid":
        acc = pl.reciprocal(1.0 + jnp.exp(-acc), approx=False)
    o_ref[...] = acc.astype(o_ref.dtype)


def _gemm_stats_kernel(a_ref, w_ref, o_ref, stats_ref):
    """Tiled im2col-GEMM that also emits per-tile partial BN statistics.

    o_ref:     [tile_m, Cout] f32 pre-BN conv output
    stats_ref: [1, 8, Cout]   row 0 = sum, row 1 = sum of squares
    """
    acc = jnp.dot(a_ref[...], w_ref[...], preferred_element_type=jnp.float32)
    o_ref[...] = acc

    s = jnp.sum(acc, axis=0, keepdims=True)          # (1, Cout)
    ss = jnp.sum(acc * acc, axis=0, keepdims=True)   # (1, Cout)
    row = jax.lax.broadcasted_iota(jnp.int32, (8, acc.shape[1]), 0)
    block = jnp.where(row == 0, s, jnp.where(row == 1, ss, 0.0))
    stats_ref[...] = block[None, :, :]


def _bn_leaky_kernel(x_ref, scale_ref, shift_ref, o_ref):
    """Per-channel affine (folded BatchNorm) + LeakyReLU(0.2), tiled over M."""
    y = x_ref[...] * scale_ref[...] + shift_ref[...]
    o_ref[...] = jnp.where(y >= 0, y, _LEAKY_SLOPE * y).astype(o_ref.dtype)


# --------------------------------------------------------------------------
# Layer wrapper
# --------------------------------------------------------------------------
def _im2col_nhwc(x, kh, kw, stride, padding):
    """x: [N, H, W, C] -> patches [N*Hout*Wout, kh*kw*C] (cols in (ki,kj,c) order)."""
    n, h, w, c = x.shape
    hout = (h + 2 * padding - kh) // stride + 1
    wout = (w + 2 * padding - kw) // stride + 1
    xp = jnp.pad(x, ((0, 0), (padding, padding), (padding, padding), (0, 0)))
    cols = []
    for ki in range(kh):
        for kj in range(kw):
            cols.append(
                xp[:, ki:ki + stride * hout:stride, kj:kj + stride * wout:stride, :])
    p = jnp.stack(cols, axis=3)                       # [N, Hout, Wout, kh*kw, C]
    p = p.reshape(n * hout * wout, kh * kw * c)
    return p, hout, wout


def _prep_weight(weight, cin_x, cout_pad, k_pad):
    """PyTorch [Cout, Cin, Kh, Kw] -> padded [k_pad, cout_pad] bf16 GEMM matrix."""
    cout, cin, kh, kw = weight.shape
    w = jnp.transpose(weight, (2, 3, 1, 0))           # [kh, kw, cin, cout]
    w = jnp.pad(w, ((0, 0), (0, 0), (0, cin_x - cin), (0, cout_pad - cout)))
    w = w.reshape(kh * kw * cin_x, cout_pad)
    if k_pad > w.shape[0]:
        w = jnp.pad(w, ((0, k_pad - w.shape[0]), (0, 0)))
    return w.astype(jnp.bfloat16)


def conv_layer(x, weight, *, stride, padding, gamma=None, beta=None,
               activation="leaky", out_dtype=jnp.bfloat16):
    """One discriminator block on NHWC input (channels may be zero-padded).

    x:      [N, H, W, Cx]   (Cx >= real Cin; extra channels are zero)
    weight: [Cout, Cin, Kh, Kw] (PyTorch layout)
    returns [N, Hout, Wout, Cout_pad] with extra channels zero.
    """
    n, _, _, c = x.shape
    cout, _, kh, kw = weight.shape

    patches, hout, wout = _im2col_nhwc(x, kh, kw, stride, padding)
    m = n * hout * wout
    k = kh * kw * c
    k_pad = _round_up(k, 128)
    cout_pad = _round_up(max(cout, 128), 128)
    tile_m = min(256, _round_up(m, 8))
    m_pad = _round_up(m, tile_m)
    num_m = m_pad // tile_m

    patches = jnp.pad(patches, ((0, m_pad - m), (0, k_pad - k))).astype(jnp.bfloat16)
    w_mat = _prep_weight(weight, c, cout_pad, k_pad)

    a_spec = pl.BlockSpec((tile_m, k_pad), lambda i: (i, 0))
    w_spec = pl.BlockSpec((k_pad, cout_pad), lambda i: (0, 0))   # resident weight
    o_spec = pl.BlockSpec((tile_m, cout_pad), lambda i: (i, 0))
    cparams = pltpu.CompilerParams(dimension_semantics=("parallel",),
                                   vmem_limit_bytes=_VMEM_LIMIT)

    if gamma is None:
        # Fused GEMM + activation (layers without BatchNorm).
        out = pl.pallas_call(
            functools.partial(_gemm_act_kernel, activation=activation),
            grid=(num_m,),
            in_specs=[a_spec, w_spec],
            out_specs=o_spec,
            out_shape=jax.ShapeDtypeStruct((m_pad, cout_pad), out_dtype),
            compiler_params=cparams,
        )(patches, w_mat)
    else:
        # Pass 1: GEMM + per-tile partial (sum, sumsq) for BatchNorm.
        conv_f32, stats = pl.pallas_call(
            _gemm_stats_kernel,
            grid=(num_m,),
            in_specs=[a_spec, w_spec],
            out_specs=(o_spec,
                       pl.BlockSpec((1, 8, cout_pad), lambda i: (i, 0, 0))),
            out_shape=(jax.ShapeDtypeStruct((m_pad, cout_pad), jnp.float32),
                       jax.ShapeDtypeStruct((num_m, 8, cout_pad), jnp.float32)),
            compiler_params=cparams,
        )(patches, w_mat)

        # Tiny per-channel reduction + BN folding in plain JAX (padded rows are
        # zero so they do not perturb the statistics; divide by the real M).
        total = jnp.sum(stats[:, 0, :], axis=0)
        total_sq = jnp.sum(stats[:, 1, :], axis=0)
        mean = total / m
        var = jnp.maximum(total_sq / m - mean * mean, 0.0)   # biased (PyTorch train)
        gamma_p = jnp.pad(gamma.astype(jnp.float32), (0, cout_pad - cout))
        beta_p = jnp.pad(beta.astype(jnp.float32), (0, cout_pad - cout))
        scale = gamma_p * jax.lax.rsqrt(var + _BN_EPS)
        shift = beta_p - mean * scale

        # Pass 2: tiled affine + LeakyReLU.
        out = pl.pallas_call(
            _bn_leaky_kernel,
            grid=(num_m,),
            in_specs=[o_spec,
                      pl.BlockSpec((1, cout_pad), lambda i: (0, 0)),
                      pl.BlockSpec((1, cout_pad), lambda i: (0, 0))],
            out_specs=o_spec,
            out_shape=jax.ShapeDtypeStruct((m_pad, cout_pad), out_dtype),
            compiler_params=cparams,
        )(conv_f32, scale.reshape(1, cout_pad), shift.reshape(1, cout_pad))

    return out[:m].reshape(n, hout, wout, cout_pad)


# --------------------------------------------------------------------------
# Module
# --------------------------------------------------------------------------
def init_discriminator_params(key, num_disc_features, num_img_channels):
    """weights_init semantics: conv ~ N(0, 0.02); BN weight ~ N(1, 0.02), bias=0."""
    ndf, nc = num_disc_features, num_img_channels
    ks = jax.random.split(key, 8)
    p = {}
    p["w1"] = 0.02 * jax.random.normal(ks[0], (ndf, nc, 4, 4), jnp.float32)
    p["w2"] = 0.02 * jax.random.normal(ks[1], (ndf * 2, ndf, 4, 4), jnp.float32)
    p["g2"] = 1.0 + 0.02 * jax.random.normal(ks[2], (ndf * 2,), jnp.float32)
    p["b2"] = jnp.zeros((ndf * 2,), jnp.float32)
    p["w3"] = 0.02 * jax.random.normal(ks[3], (ndf * 4, ndf * 2, 4, 4), jnp.float32)
    p["g3"] = 1.0 + 0.02 * jax.random.normal(ks[4], (ndf * 4,), jnp.float32)
    p["b3"] = jnp.zeros((ndf * 4,), jnp.float32)
    p["w4"] = 0.02 * jax.random.normal(ks[5], (ndf * 8, ndf * 4, 4, 4), jnp.float32)
    p["g4"] = 1.0 + 0.02 * jax.random.normal(ks[6], (ndf * 8,), jnp.float32)
    p["b4"] = jnp.zeros((ndf * 8,), jnp.float32)
    p["w5"] = 0.02 * jax.random.normal(ks[7], (1, ndf * 8, 4, 4), jnp.float32)
    return p


def discriminator_forward(params, x):
    """x: [N, num_img_channels, 64, 64] (NCHW) -> [N, 1, 1, 1], same as PyTorch."""
    h = jnp.transpose(x, (0, 2, 3, 1))  # NCHW -> NHWC, once

    # Conv(nc -> ndf, 4, 2, 1) + LeakyReLU(0.2)
    h = conv_layer(h, params["w1"], stride=2, padding=1,
                   activation="leaky", out_dtype=jnp.bfloat16)
    # Conv(ndf -> 2ndf) + BN + LeakyReLU
    h = conv_layer(h, params["w2"], stride=2, padding=1,
                   gamma=params["g2"], beta=params["b2"], out_dtype=jnp.bfloat16)
    # Conv(2ndf -> 4ndf) + BN + LeakyReLU
    h = conv_layer(h, params["w3"], stride=2, padding=1,
                   gamma=params["g3"], beta=params["b3"], out_dtype=jnp.bfloat16)
    # Conv(4ndf -> 8ndf) + BN + LeakyReLU
    h = conv_layer(h, params["w4"], stride=2, padding=1,
                   gamma=params["g4"], beta=params["b4"], out_dtype=jnp.bfloat16)
    # Conv(8ndf -> 1, 4, 1, 0) + Sigmoid
    h = conv_layer(h, params["w5"], stride=1, padding=0,
                   activation="sigmoid", out_dtype=jnp.float32)

    # h: [N, 1, 1, 128] with only channel 0 real -> NCHW [N, 1, 1, 1]
    out = h[..., :1]
    return jnp.transpose(out, (0, 3, 1, 2))


if __name__ == "__main__":
    num_disc_features = 8   # small ndf
    num_img_channels = 3
    batch = 2

    key = jax.random.PRNGKey(0)
    pkey, xkey = jax.random.split(key)
    params = init_discriminator_params(pkey, num_disc_features, num_img_channels)

    # DCGAN discriminator geometry requires 64x64 inputs so the final 4x4
    # valid conv yields a 1x1 map.
    x = jax.random.normal(xkey, (batch, num_img_channels, 64, 64), jnp.float32)

    out = jax.jit(discriminator_forward)(params, x)
    out = jax.block_until_ready(out)

    assert out.shape == (batch, 1, 1, 1), out.shape
    assert bool(jnp.all(jnp.isfinite(out)))
    assert bool(jnp.all((out >= 0.0) & (out <= 1.0)))  # sigmoid range
    print("KERNEL_OK")
</pallas_src>

<mosaic_0001>
module attributes {stable_mosaic.version = 11 : i64} {
  func.func @_gemm_act_kernel(%arg0: i32, %arg1: memref<256x128xbf16, #tpu.memory_space<vmem>>, %arg2: memref<128x128xbf16, #tpu.memory_space<vmem>>, %arg3: memref<256x128xbf16, #tpu.memory_space<vmem>>) attributes {dimension_semantics = [#tpu.dimension_semantics<parallel>], iteration_bounds = array<i64: 8>, scalar_prefetch = 0 : i64, scratch_operands = 0 : i64, tpu.core_type = #tpu.core_type<tc>, window_params = [{transform_indices = @transform_0, window_bounds = array<i64: 256, 128>}, {pipeline_mode = #tpu.pipeline_mode<synchronous>, transform_indices = @transform_1, window_bounds = array<i64: 128, 128>}, {transform_indices = @transform_2, window_bounds = array<i64: 256, 128>}]} {
    %c0 = arith.constant 0 : index
    %c0_0 = arith.constant 0 : index
    %0 = vector.load %arg1[%c0, %c0_0] : memref<256x128xbf16, #tpu.memory_space<vmem>>, vector<256x128xbf16>
    %c0_1 = arith.constant 0 : index
    %c0_2 = arith.constant 0 : index
    %1 = vector.load %arg2[%c0_1, %c0_2] : memref<128x128xbf16, #tpu.memory_space<vmem>>, vector<128x128xbf16>
    %cst = arith.constant dense<0.000000e+00> : vector<256x128xf32>
    %2 = tpu.matmul %0, %1, %cst {dimension_numbers = #tpu.dot_dimension_numbers<[1], [0], [0], [1], [0, 0, 1, 1], [], []>} : vector<256x128xbf16>, vector<128x128xbf16>, vector<256x128xf32> -> vector<256x128xf32>
    %cst_3 = arith.constant 0.000000e+00 : f32
    %3 = vector.broadcast %cst_3 : f32 to vector<256x128xf32>
    %4 = arith.cmpf oge, %2, %3 : vector<256x128xf32>
    %cst_4 = arith.constant 2.000000e-01 : f32
    %5 = vector.broadcast %cst_4 : f32 to vector<256x128xf32>
    %6 = arith.mulf %5, %2 : vector<256x128xf32>
    %7 = arith.select %4, %2, %6 : vector<256x128xi1>, vector<256x128xf32>
    %8 = arith.truncf %7 : vector<256x128xf32> to vector<256x128xbf16>
    %c0_5 = arith.constant 0 : index
    %c0_6 = arith.constant 0 : index
    %9 = vector.load %arg3[%c0_5, %c0_6] : memref<256x128xbf16, #tpu.memory_space<vmem>>, vector<256x128xbf16>
    tpu.vector_store %arg3[%c0_5, %c0_6], %8 {strides = array<i32>} : memref<256x128xbf16, #tpu.memory_space<vmem>>, vector<256x128xbf16>,
    return
  }
  func.func @transform_0(%arg0: i32) -> (i32, i32) {
    %c0_i32 = arith.constant 0 : i32
    %c0_i32_0 = arith.constant 0 : i32
    return %arg0, %c0_i32 : i32, i32
  }
  func.func @transform_1(%arg0: i32) -> (i32, i32) {
    %c0_i32 = arith.constant 0 : i32
    %c0_i32_0 = arith.constant 0 : i32
    %c0_i32_1 = arith.constant 0 : i32
    return %c0_i32, %c0_i32_0 : i32, i32
  }
  func.func @transform_2(%arg0: i32) -> (i32, i32) {
    %c0_i32 = arith.constant 0 : i32
    %c0_i32_0 = arith.constant 0 : i32
    return %arg0, %c0_i32 : i32, i32
  }
}

module attributes {stable_mosaic.version = 11 : i64} {
  func.func @_gemm_stats_kernel(%arg0: i32, %arg1: memref<256x2048xbf16, #tpu.memory_space<vmem>>, %arg2: memref<2048x128xbf16, #tpu.memory_space<vmem>>, %arg3: memref<256x128xf32, #tpu.memory_space<vmem>>, %arg4: memref<1x8x128xf32, #tpu.memory_space<vmem>>) attributes {dimension_semantics = [#tpu.dimension_semantics<parallel>], iteration_bounds = array<i64: 2>, scalar_prefetch = 0 : i64, scratch_operands = 0 : i64, tpu.core_type = #tpu.core_type<tc>, window_params = [{transform_indices = @transform_0, window_bounds = array<i64: 256, 2048>}, {pipeline_mode = #tpu.pipeline_mode<synchronous>, transform_indices = @transform_1, window_bounds = array<i64: 2048, 128>}, {transform_indices = @transform_2, window_bounds = array<i64: 256, 128>}, {transform_indices = @transform_3, window_bounds = array<i64: 1, 8, 128>}]} {
    %c0 = arith.constant 0 : index
    %c0_0 = arith.constant 0 : index
    %0 = vector.load %arg1[%c0, %c0_0] : memref<256x2048xbf16, #tpu.memory_space<vmem>>, vector<256x2048xbf16>
    %c0_1 = arith.constant 0 : index
    %c0_2 = arith.constant 0 : index
    %1 = vector.load %arg2[%c0_1, %c0_2] : memref<2048x128xbf16, #tpu.memory_space<vmem>>, vector<2048x128xbf16>
    %cst = arith.constant dense<0.000000e+00> : vector<256x128xf32>
    %2 = tpu.matmul %0, %1, %cst {dimension_numbers = #tpu.dot_dimension_numbers<[1], [0], [0], [1], [0, 0, 1, 1], [], []>} : vector<256x2048xbf16>, vector<2048x128xbf16>, vector<256x128xf32> -> vector<256x128xf32>
    %c0_3 = arith.constant 0 : index
    %c0_4 = arith.constant 0 : index
    %3 = vector.load %arg3[%c0_3, %c0_4] : memref<256x128xf32, #tpu.memory_space<vmem>>, vector<256x128xf32>
    tpu.vector_store %arg3[%c0_3, %c0_4], %2 {strides = array<i32>} : memref<256x128xf32, #tpu.memory_space<vmem>>, vector<256x128xf32>,
    %cst_5 = arith.constant dense<0.000000e+00> : vector<128xf32>
    %4 = vector.multi_reduction <add>, %2, %cst_5 [0] : vector<256x128xf32> to vector<128xf32>
    %5 = vector.shape_cast %4 : vector<128xf32> to vector<1x128xf32>
    %6 = arith.mulf %2, %2 : vector<256x128xf32>
    %cst_6 = arith.constant dense<0.000000e+00> : vector<128xf32>
    %7 = vector.multi_reduction <add>, %6, %cst_6 [0] : vector<256x128xf32> to vector<128xf32>
    %8 = vector.shape_cast %7 : vector<128xf32> to vector<1x128xf32>
    %9 = tpu.iota {dimensions = array<i32: 0>} : vector<8x128xi32>
    %c0_i32 = arith.constant 0 : i32
    %10 = vector.broadcast %c0_i32 : i32 to vector<8x128xi32>
    %11 = arith.cmpi eq, %9, %10 : vector<8x128xi32>
    %c1_i32 = arith.constant 1 : i32
    %12 = vector.broadcast %c1_i32 : i32 to vector<8x128xi32>
    %13 = arith.cmpi eq, %9, %12 : vector<8x128xi32>
    %cst_7 = arith.constant 0.000000e+00 : f32
    %14 = vector.shape_cast %8 : vector<1x128xf32> to vector<1x128xf32>
    %15 = vector.broadcast %14 : vector<1x128xf32> to vector<8x128xf32>
    %16 = vector.broadcast %cst_7 : f32 to vector<8x128xf32>
    %17 = arith.select %13, %15, %16 : vector<8x128xi1>, vector<8x128xf32>
    %18 = vector.shape_cast %5 : vector<1x128xf32> to vector<1x128xf32>
    %19 = vector.broadcast %18 : vector<1x128xf32> to vector<8x128xf32>
    %20 = arith.select %11, %19, %17 : vector<8x128xi1>, vector<8x128xf32>
    %21 = vector.shape_cast %20 : vector<8x128xf32> to vector<1x8x128xf32>
    %c0_8 = arith.constant 0 : index
    %c0_9 = arith.constant 0 : index
    %c0_10 = arith.constant 0 : index
    %22 = vector.load %arg4[%c0_8, %c0_9, %c0_10] : memref<1x8x128xf32, #tpu.memory_space<vmem>>, vector<1x8x128xf32>
    tpu.vector_store %arg4[%c0_8, %c0_9, %c0_10], %21 {strides = array<i32>} : memref<1x8x128xf32, #tpu.memory_space<vmem>>, vector<1x8x128xf32>,
    return
  }
  func.func @transform_0(%arg0: i32) -> (i32, i32) {
    %c0_i32 = arith.constant 0 : i32
    %c0_i32_0 = arith.constant 0 : i32
    return %arg0, %c0_i32 : i32, i32
  }
  func.func @transform_1(%arg0: i32) -> (i32, i32) {
    %c0_i32 = arith.constant 0 : i32
    %c0_i32_0 = arith.constant 0 : i32
    %c0_i32_1 = arith.constant 0 : i32
    return %c0_i32, %c0_i32_0 : i32, i32
  }
  func.func @transform_2(%arg0: i32) -> (i32, i32) {
    %c0_i32 = arith.constant 0 : i32
    %c0_i32_0 = arith.constant 0 : i32
    return %arg0, %c0_i32 : i32, i32
  }
  func.func @transform_3(%arg0: i32) -> (i32, i32, i32) {
    %c0_i32 = arith.constant 0 : i32
    %c0_i32_0 = arith.constant 0 : i32
    %c0_i32_1 = arith.constant 0 : i32
    return %arg0, %c0_i32, %c0_i32_0 : i32, i32, i32
  }
}

module attributes {stable_mosaic.version = 11 : i64} {
  func.func @_bn_leaky_kernel(%arg0: i32, %arg1: memref<256x128xf32, #tpu.memory_space<vmem>>, %arg2: memref<1x128xf32, #tpu.memory_space<vmem>>, %arg3: memref<1x128xf32, #tpu.memory_space<vmem>>, %arg4: memref<256x128xbf16, #tpu.memory_space<vmem>>) attributes {dimension_semantics = [#tpu.dimension_semantics<parallel>], iteration_bounds = array<i64: 2>, scalar_prefetch = 0 : i64, scratch_operands = 0 : i64, tpu.core_type = #tpu.core_type<tc>, window_params = [{transform_indices = @transform_0, window_bounds = array<i64: 256, 128>}, {pipeline_mode = #tpu.pipeline_mode<synchronous>, transform_indices = @transform_1, window_bounds = array<i64: 1, 128>}, {pipeline_mode = #tpu.pipeline_mode<synchronous>, transform_indices = @transform_2, window_bounds = array<i64: 1, 128>}, {transform_indices = @transform_3, window_bounds = array<i64: 256, 128>}]} {
    %c0 = arith.constant 0 : index
    %c0_0 = arith.constant 0 : index
    %0 = vector.load %arg1[%c0, %c0_0] : memref<256x128xf32, #tpu.memory_space<vmem>>, vector<256x128xf32>
    %c0_1 = arith.constant 0 : index
    %c0_2 = arith.constant 0 : index
    %1 = vector.load %arg2[%c0_1, %c0_2] : memref<1x128xf32, #tpu.memory_space<vmem>>, vector<1x128xf32>
    %2 = vector.broadcast %1 : vector<1x128xf32> to vector<256x128xf32>
    %3 = arith.mulf %0, %2 : vector<256x128xf32>
    %c0_3 = arith.constant 0 : index
    %c0_4 = arith.constant 0 : index
    %4 = vector.load %arg3[%c0_3, %c0_4] : memref<1x128xf32, #tpu.memory_space<vmem>>, vector<1x128xf32>
    %5 = vector.broadcast %4 : vector<1x128xf32> to vector<256x128xf32>
    %6 = arith.addf %3, %5 : vector<256x128xf32>
    %cst = arith.constant 0.000000e+00 : f32
    %7 = vector.broadcast %cst : f32 to vector<256x128xf32>
    %8 = arith.cmpf oge, %6, %7 : vector<256x128xf32>
    %cst_5 = arith.constant 2.000000e-01 : f32
    %9 = vector.broadcast %cst_5 : f32 to vector<256x128xf32>
    %10 = arith.mulf %9, %6 : vector<256x128xf32>
    %11 = arith.select %8, %6, %10 : vector<256x128xi1>, vector<256x128xf32>
    %12 = arith.truncf %11 : vector<256x128xf32> to vector<256x128xbf16>
    %c0_6 = arith.constant 0 : index
    %c0_7 = arith.constant 0 : index
    %13 = vector.load %arg4[%c0_6, %c0_7] : memref<256x128xbf16, #tpu.memory_space<vmem>>, vector<256x128xbf16>
    tpu.vector_store %arg4[%c0_6, %c0_7], %12 {strides = array<i32>} : memref<256x128xbf16, #tpu.memory_space<vmem>>, vector<256x128xbf16>,
    return
  }
  func.func @transform_0(%arg0: i32) -> (i32, i32) {
    %c0_i32 = arith.constant 0 : i32
    %c0_i32_0 = arith.constant 0 : i32
    return %arg0, %c0_i32 : i32, i32
  }
  func.func @transform_1(%arg0: i32) -> (i32, i32) {
    %c0_i32 = arith.constant 0 : i32
    %c0_i32_0 = arith.constant 0 : i32
    %c0_i32_1 = arith.constant 0 : i32
    return %c0_i32, %c0_i32_0 : i32, i32
  }
  func.func @transform_2(%arg0: i32) -> (i32, i32) {
    %c0_i32 = arith.constant 0 : i32
    %c0_i32_0 = arith.constant 0 : i32
    %c0_i32_1 = arith.constant 0 : i32
    return %c0_i32, %c0_i32_0 : i32, i32
  }
  func.func @transform_3(%arg0: i32) -> (i32, i32) {
    %c0_i32 = arith.constant 0 : i32
    %c0_i32_0 = arith.constant 0 : i32
    return %arg0, %c0_i32 : i32, i32
  }
}

module attributes {stable_mosaic.version = 11 : i64} {
  func.func @_gemm_stats_kernel(%arg0: i32, %arg1: memref<128x2048xbf16, #tpu.memory_space<vmem>>, %arg2: memref<2048x128xbf16, #tpu.memory_space<vmem>>, %arg3: memref<128x128xf32, #tpu.memory_space<vmem>>, %arg4: memref<1x8x128xf32, #tpu.memory_space<vmem>>) attributes {dimension_semantics = [#tpu.dimension_semantics<parallel>], iteration_bounds = array<i64: 1>, scalar_prefetch = 0 : i64, scratch_operands = 0 : i64, tpu.core_type = #tpu.core_type<tc>, window_params = [{transform_indices = @transform_0, window_bounds = array<i64: 128, 2048>}, {pipeline_mode = #tpu.pipeline_mode<synchronous>, transform_indices = @transform_1, window_bounds = array<i64: 2048, 128>}, {transform_indices = @transform_2, window_bounds = array<i64: 128, 128>}, {transform_indices = @transform_3, window_bounds = array<i64: 1, 8, 128>}]} {
    %c0 = arith.constant 0 : index
    %c0_0 = arith.constant 0 : index
    %0 = vector.load %arg1[%c0, %c0_0] : memref<128x2048xbf16, #tpu.memory_space<vmem>>, vector<128x2048xbf16>
    %c0_1 = arith.constant 0 : index
    %c0_2 = arith.constant 0 : index
    %1 = vector.load %arg2[%c0_1, %c0_2] : memref<2048x128xbf16, #tpu.memory_space<vmem>>, vector<2048x128xbf16>
    %cst = arith.constant dense<0.000000e+00> : vector<128x128xf32>
    %2 = tpu.matmul %0, %1, %cst {dimension_numbers = #tpu.dot_dimension_numbers<[1], [0], [0], [1], [0, 0, 1, 1], [], []>} : vector<128x2048xbf16>, vector<2048x128xbf16>, vector<128x128xf32> -> vector<128x128xf32>
    %c0_3 = arith.constant 0 : index
    %c0_4 = arith.constant 0 : index
    %3 = vector.load %arg3[%c0_3, %c0_4] : memref<128x128xf32, #tpu.memory_space<vmem>>, vector<128x128xf32>
    tpu.vector_store %arg3[%c0_3, %c0_4], %2 {strides = array<i32>} : memref<128x128xf32, #tpu.memory_space<vmem>>, vector<128x128xf32>,
    %cst_5 = arith.constant dense<0.000000e+00> : vector<128xf32>
    %4 = vector.multi_reduction <add>, %2, %cst_5 [0] : vector<128x128xf32> to vector<128xf32>
    %5 = vector.shape_cast %4 : vector<128xf32> to vector<1x128xf32>
    %6 = arith.mulf %2, %2 : vector<128x128xf32>
    %cst_6 = arith.constant dense<0.000000e+00> : vector<128xf32>
    %7 = vector.multi_reduction <add>, %6, %cst_6 [0] : vector<128x128xf32> to vector<128xf32>
    %8 = vector.shape_cast %7 : vector<128xf32> to vector<1x128xf32>
    %9 = tpu.iota {dimensions = array<i32: 0>} : vector<8x128xi32>
    %c0_i32 = arith.constant 0 : i32
    %10 = vector.broadcast %c0_i32 : i32 to vector<8x128xi32>
    %11 = arith.cmpi eq, %9, %10 : vector<8x128xi32>
    %c1_i32 = arith.constant 1 : i32
    %12 = vector.broadcast %c1_i32 : i32 to vector<8x128xi32>
    %13 = arith.cmpi eq, %9, %12 : vector<8x128xi32>
    %cst_7 = arith.constant 0.000000e+00 : f32
    %14 = vector.shape_cast %8 : vector<1x128xf32> to vector<1x128xf32>
    %15 = vector.broadcast %14 : vector<1x128xf32> to vector<8x128xf32>
    %16 = vector.broadcast %cst_7 : f32 to vector<8x128xf32>
    %17 = arith.select %13, %15, %16 : vector<8x128xi1>, vector<8x128xf32>
    %18 = vector.shape_cast %5 : vector<1x128xf32> to vector<1x128xf32>
    %19 = vector.broadcast %18 : vector<1x128xf32> to vector<8x128xf32>
    %20 = arith.select %11, %19, %17 : vector<8x128xi1>, vector<8x128xf32>
    %21 = vector.shape_cast %20 : vector<8x128xf32> to vector<1x8x128xf32>
    %c0_8 = arith.constant 0 : index
    %c0_9 = arith.constant 0 : index
    %c0_10 = arith.constant 0 : index
    %22 = vector.load %arg4[%c0_8, %c0_9, %c0_10] : memref<1x8x128xf32, #tpu.memory_space<vmem>>, vector<1x8x128xf32>
    tpu.vector_store %arg4[%c0_8, %c0_9, %c0_10], %21 {strides = array<i32>} : memref<1x8x128xf32, #tpu.memory_space<vmem>>, vector<1x8x128xf32>,
    return
  }
  func.func @transform_0(%arg0: i32) -> (i32, i32) {
    %c0_i32 = arith.constant 0 : i32
    %c0_i32_0 = arith.constant 0 : i32
    return %arg0, %c0_i32 : i32, i32
  }
  func.func @transform_1(%arg0: i32) -> (i32, i32) {
    %c0_i32 = arith.constant 0 : i32
    %c0_i32_0 = arith.constant 0 : i32
    %c0_i32_1 = arith.constant 0 : i32
    return %c0_i32, %c0_i32_0 : i32, i32
  }
  func.func @transform_2(%arg0: i32) -> (i32, i32) {
    %c0_i32 = arith.constant 0 : i32
    %c0_i32_0 = arith.constant 0 : i32
    return %arg0, %c0_i32 : i32, i32
  }
  func.func @transform_3(%arg0: i32) -> (i32, i32, i32) {
    %c0_i32 = arith.constant 0 : i32
    %c0_i32_0 = arith.constant 0 : i32
    %c0_i32_1 = arith.constant 0 : i32
    return %arg0, %c0_i32, %c0_i32_0 : i32, i32, i32
  }
}

module attributes {stable_mosaic.version = 11 : i64} {
  func.func @_bn_leaky_kernel(%arg0: i32, %arg1: memref<128x128xf32, #tpu.memory_space<vmem>>, %arg2: memref<1x128xf32, #tpu.memory_space<vmem>>, %arg3: memref<1x128xf32, #tpu.memory_space<vmem>>, %arg4: memref<128x128xbf16, #tpu.memory_space<vmem>>) attributes {dimension_semantics = [#tpu.dimension_semantics<parallel>], iteration_bounds = array<i64: 1>, scalar_prefetch = 0 : i64, scratch_operands = 0 : i64, tpu.core_type = #tpu.core_type<tc>, window_params = [{transform_indices = @transform_0, window_bounds = array<i64: 128, 128>}, {pipeline_mode = #tpu.pipeline_mode<synchronous>, transform_indices = @transform_1, window_bounds = array<i64: 1, 128>}, {pipeline_mode = #tpu.pipeline_mode<synchronous>, transform_indices = @transform_2, window_bounds = array<i64: 1, 128>}, {transform_indices = @transform_3, window_bounds = array<i64: 128, 128>}]} {
    %c0 = arith.constant 0 : index
    %c0_0 = arith.constant 0 : index
    %0 = vector.load %arg1[%c0, %c0_0] : memref<128x128xf32, #tpu.memory_space<vmem>>, vector<128x128xf32>
    %c0_1 = arith.constant 0 : index
    %c0_2 = arith.constant 0 : index
    %1 = vector.load %arg2[%c0_1, %c0_2] : memref<1x128xf32, #tpu.memory_space<vmem>>, vector<1x128xf32>
    %2 = vector.broadcast %1 : vector<1x128xf32> to vector<128x128xf32>
    %3 = arith.mulf %0, %2 : vector<128x128xf32>
    %c0_3 = arith.constant 0 : index
    %c0_4 = arith.constant 0 : index
    %4 = vector.load %arg3[%c0_3, %c0_4] : memref<1x128xf32, #tpu.memory_space<vmem>>, vector<1x128xf32>
    %5 = vector.broadcast %4 : vector<1x128xf32> to vector<128x128xf32>
    %6 = arith.addf %3, %5 : vector<128x128xf32>
    %cst = arith.constant 0.000000e+00 : f32
    %7 = vector.broadcast %cst : f32 to vector<128x128xf32>
    %8 = arith.cmpf oge, %6, %7 : vector<128x128xf32>
    %cst_5 = arith.constant 2.000000e-01 : f32
    %9 = vector.broadcast %cst_5 : f32 to vector<128x128xf32>
    %10 = arith.mulf %9, %6 : vector<128x128xf32>
    %11 = arith.select %8, %6, %10 : vector<128x128xi1>, vector<128x128xf32>
    %12 = arith.truncf %11 : vector<128x128xf32> to vector<128x128xbf16>
    %c0_6 = arith.constant 0 : index
    %c0_7 = arith.constant 0 : index
    %13 = vector.load %arg4[%c0_6, %c0_7] : memref<128x128xbf16, #tpu.memory_space<vmem>>, vector<128x128xbf16>
    tpu.vector_store %arg4[%c0_6, %c0_7], %12 {strides = array<i32>} : memref<128x128xbf16, #tpu.memory_space<vmem>>, vector<128x128xbf16>,
    return
  }
  func.func @transform_0(%arg0: i32) -> (i32, i32) {
    %c0_i32 = arith.constant 0 : i32
    %c0_i32_0 = arith.constant 0 : i32
    return %arg0, %c0_i32 : i32, i32
  }
  func.func @transform_1(%arg0: i32) -> (i32, i32) {
    %c0_i32 = arith.constant 0 : i32
    %c0_i32_0 = arith.constant 0 : i32
    %c0_i32_1 = arith.constant 0 : i32
    return %c0_i32, %c0_i32_0 : i32, i32
  }
  func.func @transform_2(%arg0: i32) -> (i32, i32) {
    %c0_i32 = arith.constant 0 : i32
    %c0_i32_0 = arith.constant 0 : i32
    %c0_i32_1 = arith.constant 0 : i32
    return %c0_i32, %c0_i32_0 : i32, i32
  }
  func.func @transform_3(%arg0: i32) -> (i32, i32) {
    %c0_i32 = arith.constant 0 : i32
    %c0_i32_0 = arith.constant 0 : i32
    return %arg0, %c0_i32 : i32, i32
  }
}

module attributes {stable_mosaic.version = 11 : i64} {
  func.func @_gemm_stats_kernel(%arg0: i32, %arg1: memref<32x2048xbf16, #tpu.memory_space<vmem>>, %arg2: memref<2048x128xbf16, #tpu.memory_space<vmem>>, %arg3: memref<32x128xf32, #tpu.memory_space<vmem>>, %arg4: memref<1x8x128xf32, #tpu.memory_space<vmem>>) attributes {dimension_semantics = [#tpu.dimension_semantics<parallel>], iteration_bounds = array<i64: 1>, scalar_prefetch = 0 : i64, scratch_operands = 0 : i64, tpu.core_type = #tpu.core_type<tc>, window_params = [{transform_indices = @transform_0, window_bounds = array<i64: 32, 2048>}, {pipeline_mode = #tpu.pipeline_mode<synchronous>, transform_indices = @transform_1, window_bounds = array<i64: 2048, 128>}, {transform_indices = @transform_2, window_bounds = array<i64: 32, 128>}, {transform_indices = @transform_3, window_bounds = array<i64: 1, 8, 128>}]} {
    %c0 = arith.constant 0 : index
    %c0_0 = arith.constant 0 : index
    %0 = vector.load %arg1[%c0, %c0_0] : memref<32x2048xbf16, #tpu.memory_space<vmem>>, vector<32x2048xbf16>
    %c0_1 = arith.constant 0 : index
    %c0_2 = arith.constant 0 : index
    %1 = vector.load %arg2[%c0_1, %c0_2] : memref<2048x128xbf16, #tpu.memory_space<vmem>>, vector<2048x128xbf16>
    %cst = arith.constant dense<0.000000e+00> : vector<32x128xf32>
    %2 = tpu.matmul %0, %1, %cst {dimension_numbers = #tpu.dot_dimension_numbers<[1], [0], [0], [1], [0, 0, 1, 1], [], []>} : vector<32x2048xbf16>, vector<2048x128xbf16>, vector<32x128xf32> -> vector<32x128xf32>
    %c0_3 = arith.constant 0 : index
    %c0_4 = arith.constant 0 : index
    %3 = vector.load %arg3[%c0_3, %c0_4] : memref<32x128xf32, #tpu.memory_space<vmem>>, vector<32x128xf32>
    tpu.vector_store %arg3[%c0_3, %c0_4], %2 {strides = array<i32>} : memref<32x128xf32, #tpu.memory_space<vmem>>, vector<32x128xf32>,
    %cst_5 = arith.constant dense<0.000000e+00> : vector<128xf32>
    %4 = vector.multi_reduction <add>, %2, %cst_5 [0] : vector<32x128xf32> to vector<128xf32>
    %5 = vector.shape_cast %4 : vector<128xf32> to vector<1x128xf32>
    %6 = arith.mulf %2, %2 : vector<32x128xf32>
    %cst_6 = arith.constant dense<0.000000e+00> : vector<128xf32>
    %7 = vector.multi_reduction <add>, %6, %cst_6 [0] : vector<32x128xf32> to vector<128xf32>
    %8 = vector.shape_cast %7 : vector<128xf32> to vector<1x128xf32>
    %9 = tpu.iota {dimensions = array<i32: 0>} : vector<8x128xi32>
    %c0_i32 = arith.constant 0 : i32
    %10 = vector.broadcast %c0_i32 : i32 to vector<8x128xi32>
    %11 = arith.cmpi eq, %9, %10 : vector<8x128xi32>
    %c1_i32 = arith.constant 1 : i32
    %12 = vector.broadcast %c1_i32 : i32 to vector<8x128xi32>
    %13 = arith.cmpi eq, %9, %12 : vector<8x128xi32>
    %cst_7 = arith.constant 0.000000e+00 : f32
    %14 = vector.shape_cast %8 : vector<1x128xf32> to vector<1x128xf32>
    %15 = vector.broadcast %14 : vector<1x128xf32> to vector<8x128xf32>
    %16 = vector.broadcast %cst_7 : f32 to vector<8x128xf32>
    %17 = arith.select %13, %15, %16 : vector<8x128xi1>, vector<8x128xf32>
    %18 = vector.shape_cast %5 : vector<1x128xf32> to vector<1x128xf32>
    %19 = vector.broadcast %18 : vector<1x128xf32> to vector<8x128xf32>
    %20 = arith.select %11, %19, %17 : vector<8x128xi1>, vector<8x128xf32>
    %21 = vector.shape_cast %20 : vector<8x128xf32> to vector<1x8x128xf32>
    %c0_8 = arith.constant 0 : index
    %c0_9 = arith.constant 0 : index
    %c0_10 = arith.constant 0 : index
    %22 = vector.load %arg4[%c0_8, %c0_9, %c0_10] : memref<1x8x128xf32, #tpu.memory_space<vmem>>, vector<1x8x128xf32>
    tpu.vector_store %arg4[%c0_8, %c0_9, %c0_10], %21 {strides = array<i32>} : memref<1x8x128xf32, #tpu.memory_space<vmem>>, vector<1x8x128xf32>,
    return
  }
  func.func @transform_0(%arg0: i32) -> (i32, i32) {
    %c0_i32 = arith.constant 0 : i32
    %c0_i32_0 = arith.constant 0 : i32
    return %arg0, %c0_i32 : i32, i32
  }
  func.func @transform_1(%arg0: i32) -> (i32, i32) {
    %c0_i32 = arith.constant 0 : i32
    %c0_i32_0 = arith.constant 0 : i32
    %c0_i32_1 = arith.constant 0 : i32
    return %c0_i32, %c0_i32_0 : i32, i32
  }
  func.func @transform_2(%arg0: i32) -> (i32, i32) {
    %c0_i32 = arith.constant 0 : i32
    %c0_i32_0 = arith.constant 0 : i32
    return %arg0, %c0_i32 : i32, i32
  }
  func.func @transform_3(%arg0: i32) -> (i32, i32, i32) {
    %c0_i32 = arith.constant 0 : i32
    %c0_i32_0 = arith.constant 0 : i32
    %c0_i32_1 = arith.constant 0 : i32
    return %arg0, %c0_i32, %c0_i32_0 : i32, i32, i32
  }
}

module attributes {stable_mosaic.version = 11 : i64} {
  func.func @_bn_leaky_kernel(%arg0: i32, %arg1: memref<32x128xf32, #tpu.memory_space<vmem>>, %arg2: memref<1x128xf32, #tpu.memory_space<vmem>>, %arg3: memref<1x128xf32, #tpu.memory_space<vmem>>, %arg4: memref<32x128xbf16, #tpu.memory_space<vmem>>) attributes {dimension_semantics = [#tpu.dimension_semantics<parallel>], iteration_bounds = array<i64: 1>, scalar_prefetch = 0 : i64, scratch_operands = 0 : i64, tpu.core_type = #tpu.core_type<tc>, window_params = [{transform_indices = @transform_0, window_bounds = array<i64: 32, 128>}, {pipeline_mode = #tpu.pipeline_mode<synchronous>, transform_indices = @transform_1, window_bounds = array<i64: 1, 128>}, {pipeline_mode = #tpu.pipeline_mode<synchronous>, transform_indices = @transform_2, window_bounds = array<i64: 1, 128>}, {transform_indices = @transform_3, window_bounds = array<i64: 32, 128>}]} {
    %c0 = arith.constant 0 : index
    %c0_0 = arith.constant 0 : index
    %0 = vector.load %arg1[%c0, %c0_0] : memref<32x128xf32, #tpu.memory_space<vmem>>, vector<32x128xf32>
    %c0_1 = arith.constant 0 : index
    %c0_2 = arith.constant 0 : index
    %1 = vector.load %arg2[%c0_1, %c0_2] : memref<1x128xf32, #tpu.memory_space<vmem>>, vector<1x128xf32>
    %2 = vector.broadcast %1 : vector<1x128xf32> to vector<32x128xf32>
    %3 = arith.mulf %0, %2 : vector<32x128xf32>
    %c0_3 = arith.constant 0 : index
    %c0_4 = arith.constant 0 : index
    %4 = vector.load %arg3[%c0_3, %c0_4] : memref<1x128xf32, #tpu.memory_space<vmem>>, vector<1x128xf32>
    %5 = vector.broadcast %4 : vector<1x128xf32> to vector<32x128xf32>
    %6 = arith.addf %3, %5 : vector<32x128xf32>
    %cst = arith.constant 0.000000e+00 : f32
    %7 = vector.broadcast %cst : f32 to vector<32x128xf32>
    %8 = arith.cmpf oge, %6, %7 : vector<32x128xf32>
    %cst_5 = arith.constant 2.000000e-01 : f32
    %9 = vector.broadcast %cst_5 : f32 to vector<32x128xf32>
    %10 = arith.mulf %9, %6 : vector<32x128xf32>
    %11 = arith.select %8, %6, %10 : vector<32x128xi1>, vector<32x128xf32>
    %12 = arith.truncf %11 : vector<32x128xf32> to vector<32x128xbf16>
    %c0_6 = arith.constant 0 : index
    %c0_7 = arith.constant 0 : index
    %13 = vector.load %arg4[%c0_6, %c0_7] : memref<32x128xbf16, #tpu.memory_space<vmem>>, vector<32x128xbf16>
    tpu.vector_store %arg4[%c0_6, %c0_7], %12 {strides = array<i32>} : memref<32x128xbf16, #tpu.memory_space<vmem>>, vector<32x128xbf16>,
    return
  }
  func.func @transform_0(%arg0: i32) -> (i32, i32) {
    %c0_i32 = arith.constant 0 : i32
    %c0_i32_0 = arith.constant 0 : i32
    return %arg0, %c0_i32 : i32, i32
  }
  func.func @transform_1(%arg0: i32) -> (i32, i32) {
    %c0_i32 = arith.constant 0 : i32
    %c0_i32_0 = arith.constant 0 : i32
    %c0_i32_1 = arith.constant 0 : i32
    return %c0_i32, %c0_i32_0 : i32, i32
  }
  func.func @transform_2(%arg0: i32) -> (i32, i32) {
    %c0_i32 = arith.constant 0 : i32
    %c0_i32_0 = arith.constant 0 : i32
    %c0_i32_1 = arith.constant 0 : i32
    return %c0_i32, %c0_i32_0 : i32, i32
  }
  func.func @transform_3(%arg0: i32) -> (i32, i32) {
    %c0_i32 = arith.constant 0 : i32
    %c0_i32_0 = arith.constant 0 : i32
    return %arg0, %c0_i32 : i32, i32
  }
}

module attributes {stable_mosaic.version = 11 : i64} {
  func.func @_gemm_act_kernel(%arg0: i32, %arg1: memref<8x2048xbf16, #tpu.memory_space<vmem>>, %arg2: memref<2048x128xbf16, #tpu.memory_space<vmem>>, %arg3: memref<8x128xf32, #tpu.memory_space<vmem>>) attributes {dimension_semantics = [#tpu.dimension_semantics<parallel>], iteration_bounds = array<i64: 1>, scalar_prefetch = 0 : i64, scratch_operands = 0 : i64, tpu.core_type = #tpu.core_type<tc>, window_params = [{transform_indices = @transform_0, window_bounds = array<i64: 8, 2048>}, {pipeline_mode = #tpu.pipeline_mode<synchronous>, transform_indices = @transform_1, window_bounds = array<i64: 2048, 128>}, {transform_indices = @transform_2, window_bounds = array<i64: 8, 128>}]} {
    %c0 = arith.constant 0 : index
    %c0_0 = arith.constant 0 : index
    %0 = vector.load %arg1[%c0, %c0_0] : memref<8x2048xbf16, #tpu.memory_space<vmem>>, vector<8x2048xbf16>
    %c0_1 = arith.constant 0 : index
    %c0_2 = arith.constant 0 : index
    %1 = vector.load %arg2[%c0_1, %c0_2] : memref<2048x128xbf16, #tpu.memory_space<vmem>>, vector<2048x128xbf16>
    %cst = arith.constant dense<0.000000e+00> : vector<8x128xf32>
    %2 = tpu.matmul %0, %1, %cst {dimension_numbers = #tpu.dot_dimension_numbers<[1], [0], [0], [1], [0, 0, 1, 1], [], []>} : vector<8x2048xbf16>, vector<2048x128xbf16>, vector<8x128xf32> -> vector<8x128xf32>
    %cst_3 = arith.constant 0.000000e+00 : f32
    %3 = vector.broadcast %cst_3 : f32 to vector<8x128xf32>
    %4 = arith.subf %3, %2 : vector<8x128xf32>
    %5 = math.exp %4 : vector<8x128xf32>
    %cst_4 = arith.constant 1.000000e+00 : f32
    %6 = vector.broadcast %cst_4 : f32 to vector<8x128xf32>
    %7 = arith.addf %6, %5 : vector<8x128xf32>
    %8 = tpu.reciprocal %7 : vector<8x128xf32> -> vector<8x128xf32>
    %c0_5 = arith.constant 0 : index
    %c0_6 = arith.constant 0 : index
    %9 = vector.load %arg3[%c0_5, %c0_6] : memref<8x128xf32, #tpu.memory_space<vmem>>, vector<8x128xf32>
    tpu.vector_store %arg3[%c0_5, %c0_6], %8 {strides = array<i32>} : memref<8x128xf32, #tpu.memory_space<vmem>>, vector<8x128xf32>,
    return
  }
  func.func @transform_0(%arg0: i32) -> (i32, i32) {
    %c0_i32 = arith.constant 0 : i32
    %c0_i32_0 = arith.constant 0 : i32
    return %arg0, %c0_i32 : i32, i32
  }
  func.func @transform_1(%arg0: i32) -> (i32, i32) {
    %c0_i32 = arith.constant 0 : i32
    %c0_i32_0 = arith.constant 0 : i32
    %c0_i32_1 = arith.constant 0 : i32
    return %c0_i32, %c0_i32_0 : i32, i32
  }
  func.func @transform_2(%arg0: i32) -> (i32, i32) {
    %c0_i32 = arith.constant 0 : i32
    %c0_i32_0 = arith.constant 0 : i32
    return %arg0, %c0_i32 : i32, i32
  }
}

</mosaic_0001>

<bundles_post_ra>
// kernel: discriminator_forward.8
= control target key start
LH: loop header
LB: loop body
LE: loop exit
PB: predicated region body
PF: predicated region fallthrough
CT: control target
= control target key end

     0   :  { %s925_s9 = smov 0   ;;  %s1009_s0 = inlined_call_operand.vmem [shape: bf16[2048,128], index: 0, kind: input, shape index: {}]   ;;  %s1010_s1 = inlined_call_operand.vmem [shape: bf16[128,128], index: 1, kind: input, shape index: {}]   ;;  %s1011_s2 = inlined_call_operand.vmem [shape: bf16[2048,128], index: 2, kind: output, shape index: {}]  }
   0x1 LB: > { %s644_s10 = sadd.s32 4294967295, %s908_s9   ;;  %p648_p0 = scmp.ge.s32.totalorder %s908_s9, 1  ;;  %s908_s9 = sphi %s925_s9, %s12_s9  }
   0x2   : > { %p113_p1 = scmp.lt.s32.totalorder %s908_s9, 9 }
   0x4   : > { %p114_p2 = pnand %p648_p0, %p113_p1 }
   0x5   : > { %s649_s19 = sshll.u32 (!%p114_p2), %s644_s10, 5 }
   0x6   : > { %117 = sbr.rel (%p114_p2) target bundleno = 239 (0xef), region = 28  ;;  %p136_p3 = scmp.lt.s32.totalorder (!%p114_p2), %s649_s19, 255 }
   0xb   : > { %v774_v0 = vld [vmem:[%s1010_s1 + $0x38] sm:$0xff]  ;;  %v773_v1 = vld [vmem:[%s1010_s1 + $0x30] sm:$0xff]  ;;  %v772_v2 = vld [vmem:[%s1010_s1 + $0x28] sm:$0xff]  ;;  %s1013_s19 = smov (!%p136_p3, %s649_s19), 255 }
   0xc   : > { %339 = vmatpush.bf16.msra.mxu0 %v774_v0  ;;  %870 = vmatpush.bf16.msra.mxu1 %v774_v0  ;;  %v771_v3 = vld [vmem:[%s1010_s1 + $0x20] sm:$0xff]  ;;  %v770_v4 = vld [vmem:[%s1010_s1 + $0x18] sm:$0xff]  ;;  %v769_v5 = vld [vmem:[%s1010_s1 + $0x10] sm:$0xff]  ;;  %s650_s26 = sshll.u32 %s1013_s19, 2 }
   0xd   : > { %871 = vmatpush.bf16.msra.mxu2 %v774_v0  ;;  %872 = vmatpush.bf16.msra.mxu3 %v774_v0  ;;  %v768_v6 = vld [vmem:[%s1010_s1 + $0x8] sm:$0xff]  ;;  %v767_v7 = vld [vmem:[%s1010_s1] sm:$0xff]  ;;  %s965_s3 = scalar_lea.vmem %s1009_s0, %s650_s26  ;;  %s988_s6 = scalar_lea.vmem %s1011_s2, %s650_s26 }
   0xe   : > { %v751_v8 = vld [vmem:[%s965_s3] sm:$0xff]  ;;  %v752_v12 = vld [vmem:[%s965_s3 + $0x8] sm:$0xff]  ;;  %v753_v16 = vld [vmem:[%s965_s3 + $0x10] sm:$0xff] }
   0xf   : > { %v755_v9 = vld [vmem:[%s965_s3 + $0x20] sm:$0xff]  ;;  %v756_v13 = vld [vmem:[%s965_s3 + $0x28] sm:$0xff]  ;;  %v757_v17 = vld [vmem:[%s965_s3 + $0x30] sm:$0xff] }
  0x10   : > { %340 = vmatpush.bf16.msra.mxu0 %v773_v1  ;;  %873 = vmatpush.bf16.msra.mxu1 %v773_v1  ;;  %v759_v10 = vld [vmem:[%s965_s3 + $0x40] sm:$0xff]  ;;  %v760_v14 = vld [vmem:[%s965_s3 + $0x48] sm:$0xff]  ;;  %v761_v18 = vld [vmem:[%s965_s3 + $0x50] sm:$0xff] }
  0x11   : > { %874 = vmatpush.bf16.msra.mxu2 %v773_v1  ;;  %875 = vmatpush.bf16.msra.mxu3 %v773_v1  ;;  %v763_v11 = vld [vmem:[%s965_s3 + $0x60] sm:$0xff]  ;;  %v764_v15 = vld [vmem:[%s965_s3 + $0x68] sm:$0xff]  ;;  %v765_v19 = vld [vmem:[%s965_s3 + $0x70] sm:$0xff] }
  0x12   : > { %v754_v20 = vld [vmem:[%s965_s3 + $0x18] sm:$0xff] }
  0x13   : > { %v758_v21 = vld [vmem:[%s965_s3 + $0x38] sm:$0xff] }
  0x14   : > { %341 = vmatpush.bf16.msra.mxu0 %v772_v2  ;;  %876 = vmatpush.bf16.msra.mxu1 %v772_v2  ;;  %v762_v22 = vld [vmem:[%s965_s3 + $0x58] sm:$0xff] }
  0x15   : > { %877 = vmatpush.bf16.msra.mxu2 %v772_v2  ;;  %878 = vmatpush.bf16.msra.mxu3 %v772_v2  ;;  %v766_v23 = vld [vmem:[%s965_s3 + $0x78] sm:$0xff] }
  0x18   : > { %342 = vmatpush.bf16.msra.mxu0 %v771_v3  ;;  %879 = vmatpush.bf16.msra.mxu1 %v771_v3 }
  0x19   : > { %880 = vmatpush.bf16.msra.mxu2 %v771_v3  ;;  %881 = vmatpush.bf16.msra.mxu3 %v771_v3 }
  0x1c   : > { %343 = vmatpush.bf16.msra.mxu0 %v770_v4  ;;  %882 = vmatpush.bf16.msra.mxu1 %v770_v4 }
  0x1d   : > { %883 = vmatpush.bf16.msra.mxu2 %v770_v4  ;;  %884 = vmatpush.bf16.msra.mxu3 %v770_v4 }
  0x20   : > { %344 = vmatpush.bf16.msra.mxu0 %v769_v5  ;;  %885 = vmatpush.bf16.msra.mxu1 %v769_v5 }
  0x21   : > { %886 = vmatpush.bf16.msra.mxu2 %v769_v5  ;;  %887 = vmatpush.bf16.msra.mxu3 %v769_v5 }
  0x24   : > { %345 = vmatpush.bf16.msra.mxu0 %v768_v6  ;;  %888 = vmatpush.bf16.msra.mxu1 %v768_v6 }
  0x25   : > { %889 = vmatpush.bf16.msra.mxu2 %v768_v6  ;;  %890 = vmatpush.bf16.msra.mxu3 %v768_v6 }
  0x28   : > { %346 = vmatpush.bf16.msra.mxu0 %v767_v7  ;;  %891 = vmatpush.bf16.msra.mxu1 %v767_v7 }
  0x29   : > { %892 = vmatpush.bf16.msra.mxu2 %v767_v7  ;;  %893 = vmatpush.bf16.msra.mxu3 %v767_v7 }
  0x2b   : > { %347 = vmatmul.bf16.vlgmr.msra.gmra.mxu0 %v751_v8  ;;  %367 = vmatmul.bf16.vlgmr.msra.gmra.mxu1 %v755_v9 }
  0x2c   : > { %387 = vmatmul.bf16.vlgmr.msra.gmra.mxu2 %v759_v10  ;;  %407 = vmatmul.bf16.vlgmr.msra.gmra.mxu3 %v763_v11 }
  0x3b   : > { %352 = vmatmul.bf16.gmra.mxu0 %v752_v12  ;;  %372 = vmatmul.bf16.gmra.mxu1 %v756_v13 }
  0x3c   : > { %392 = vmatmul.bf16.gmra.mxu2 %v760_v14  ;;  %412 = vmatmul.bf16.gmra.mxu3 %v764_v15 }
  0x4b   : > { %357 = vmatmul.bf16.gmra.mxu0 %v753_v16  ;;  %377 = vmatmul.bf16.gmra.mxu1 %v757_v17 }
  0x4c   : > { %397 = vmatmul.bf16.gmra.mxu2 %v761_v18  ;;  %417 = vmatmul.bf16.gmra.mxu3 %v765_v19 }
  0x5b   : > { %362 = vmatmul.bf16.gmra.mxu0 %v754_v20  ;;  %382 = vmatmul.bf16.gmra.mxu1 %v758_v21 }
  0x5c   : > { %402 = vmatmul.bf16.gmra.mxu2 %v762_v22  ;;  %422 = vmatmul.bf16.gmra.mxu3 %v766_v23 }
  0xa8   : > { %v348_v24 = vpop.f32.mrf.mxu0  ;;  %v368_v25 = vpop.f32.mrf.mxu1 }
  0xa9   : > { %v460_v26 = vmul.f32 0.2, %v348_v24  ;;  %v468_v27 = vmul.f32 0.2, %v368_v25  ;;  %vm428_vm0 = vcmp.ge.f32.partialorder %v348_v24, 0.0  ;;  %vm436_vm1 = vcmp.ge.f32.partialorder %v368_v25, 0.0 }
  0xab   : > { %v492_v34 = vsel %vm428_vm0, %v348_v24, %v460_v26  ;;  %v500_v35 = vsel %vm436_vm1, %v368_v25, %v468_v27 }
  0xaf   : > { %v388_v28 = vpop.f32.mrf.mxu2  ;;  %v408_v29 = vpop.f32.mrf.mxu3 }
  0xb0   : > { %v350_v30 = vpop.f32.mrf.mxu0  ;;  %v370_v31 = vpop.f32.mrf.mxu1  ;;  %v476_v40 = vmul.f32 0.2, %v388_v28  ;;  %v484_v41 = vmul.f32 0.2, %v408_v29  ;;  %vm444_vm4 = vcmp.ge.f32.partialorder %v388_v28, 0.0  ;;  %vm452_vm5 = vcmp.ge.f32.partialorder %v408_v29, 0.0 }
  0xb1   : > { %vm429_vm2 = vcmp.ge.f32.partialorder %v350_v30, 0.0  ;;  %v461_v32 = vmul.f32 0.2, %v350_v30  ;;  %vm437_vm3 = vcmp.ge.f32.partialorder %v370_v31, 0.0  ;;  %v469_v33 = vmul.f32 0.2, %v370_v31 }
  0xb2   : > { %v508_v48 = vsel %vm444_vm4, %v388_v28, %v476_v40  ;;  %v516_v49 = vsel %vm452_vm5, %v408_v29, %v484_v41 }
  0xb3   : > { %v493_v36 = vsel %vm429_vm2, %v350_v30, %v461_v32  ;;  %v501_v37 = vsel %vm437_vm3, %v370_v31, %v469_v33 }
  0xb4   : > { %v778_v38 = vpack.c.bf16 %v493_v36, %v492_v34  ;;  %v798_v39 = vpack.c.bf16 %v501_v37, %v500_v35 }
  0xb6   : > { %779 = vst [vmem:[%s988_s6] sm:$0xff] %v778_v38  }
  0xb7   : > { %858 = vst [vmem:[%s988_s6 + $0x20] sm:$0xff] %v798_v39   ;;  %v390_v42 = vpop.f32.mrf.mxu2  ;;  %v410_v43 = vpop.f32.mrf.mxu3 }
  0xb8   : > { %vm445_vm6 = vcmp.ge.f32.partialorder %v390_v42, 0.0  ;;  %v477_v44 = vmul.f32 0.2, %v390_v42  ;;  %vm453_vm7 = vcmp.ge.f32.partialorder %v410_v43, 0.0  ;;  %v485_v45 = vmul.f32 0.2, %v410_v43  ;;  %v353_v46 = vpop.f32.mrf.mxu0  ;;  %v373_v47 = vpop.f32.mrf.mxu1 }
  0xb9   : > { %v462_v54 = vmul.f32 0.2, %v353_v46  ;;  %v470_v55 = vmul.f32 0.2, %v373_v47  ;;  %vm430_vm8 = vcmp.ge.f32.partialorder %v353_v46, 0.0  ;;  %vm438_vm9 = vcmp.ge.f32.partialorder %v373_v47, 0.0 }
  0xba   : > { %v509_v50 = vsel %vm445_vm6, %v390_v42, %v477_v44  ;;  %v517_v51 = vsel %vm453_vm7, %v410_v43, %v485_v45 }
  0xbb   : > { %v818_v52 = vpack.c.bf16 %v509_v50, %v508_v48  ;;  %v838_v53 = vpack.c.bf16 %v517_v51, %v516_v49  ;;  %v494_v62 = vsel %vm430_vm8, %v353_v46, %v462_v54  ;;  %v502_v63 = vsel %vm438_vm9, %v373_v47, %v470_v55 }
  0xbd   : > { %862 = vst [vmem:[%s988_s6 + $0x40] sm:$0xff] %v818_v52  }
  0xbe   : > { %866 = vst [vmem:[%s988_s6 + $0x60] sm:$0xff] %v838_v53  }
  0xbf   : > { %v393_v56 = vpop.f32.mrf.mxu2  ;;  %v413_v57 = vpop.f32.mrf.mxu3 }
  0xc0   : > { %v355_v58 = vpop.f32.mrf.mxu0  ;;  %v375_v59 = vpop.f32.mrf.mxu1  ;;  %v478_v4 = vmul.f32 0.2, %v393_v56  ;;  %v486_v5 = vmul.f32 0.2, %v413_v57  ;;  %vm446_vm12 = vcmp.ge.f32.partialorder %v393_v56, 0.0  ;;  %vm454_vm13 = vcmp.ge.f32.partialorder %v413_v57, 0.0 }
  0xc1   : > { %vm431_vm10 = vcmp.ge.f32.partialorder %v355_v58, 0.0  ;;  %v463_v60 = vmul.f32 0.2, %v355_v58  ;;  %vm439_vm11 = vcmp.ge.f32.partialorder %v375_v59, 0.0  ;;  %v471_v61 = vmul.f32 0.2, %v375_v59 }
  0xc2   : > { %v510_v12 = vsel %vm446_vm12, %v393_v56, %v478_v4  ;;  %v518_v13 = vsel %vm454_vm13, %v413_v57, %v486_v5 }
  0xc3   : > { %v495_v0 = vsel %vm431_vm10, %v355_v58, %v463_v60  ;;  %v503_v1 = vsel %vm439_vm11, %v375_v59, %v471_v61 }
  0xc4   : > { %v783_v2 = vpack.c.bf16 %v495_v0, %v494_v62  ;;  %v803_v3 = vpack.c.bf16 %v503_v1, %v502_v63 }
  0xc6   : > { %855 = vst [vmem:[%s988_s6 + $0x8] sm:$0xff] %v783_v2  }
  0xc7   : > { %859 = vst [vmem:[%s988_s6 + $0x28] sm:$0xff] %v803_v3   ;;  %v395_v6 = vpop.f32.mrf.mxu2  ;;  %v415_v7 = vpop.f32.mrf.mxu3 }
  0xc8   : > { %vm447_vm14 = vcmp.ge.f32.partialorder %v395_v6, 0.0  ;;  %v479_v8 = vmul.f32 0.2, %v395_v6  ;;  %vm455_vm15 = vcmp.ge.f32.partialorder %v415_v7, 0.0  ;;  %v487_v9 = vmul.f32 0.2, %v415_v7  ;;  %v358_v10 = vpop.f32.mrf.mxu0  ;;  %v378_v11 = vpop.f32.mrf.mxu1 }
  0xc9   : > { %v464_v18 = vmul.f32 0.2, %v358_v10  ;;  %v472_v19 = vmul.f32 0.2, %v378_v11  ;;  %vm432_vm0 = vcmp.ge.f32.partialorder %v358_v10, 0.0  ;;  %vm440_vm1 = vcmp.ge.f32.partialorder %v378_v11, 0.0 }
  0xca   : > { %v511_v14 = vsel %vm447_vm14, %v395_v6, %v479_v8  ;;  %v519_v15 = vsel %vm455_vm15, %v415_v7, %v487_v9 }
  0xcb   : > { %v823_v16 = vpack.c.bf16 %v511_v14, %v510_v12  ;;  %v843_v17 = vpack.c.bf16 %v519_v15, %v518_v13  ;;  %v496_v26 = vsel %vm432_vm0, %v358_v10, %v464_v18  ;;  %v504_v27 = vsel %vm440_vm1, %v378_v11, %v472_v19 }
  0xcd   : > { %863 = vst [vmem:[%s988_s6 + $0x48] sm:$0xff] %v823_v16  }
  0xce   : > { %867 = vst [vmem:[%s988_s6 + $0x68] sm:$0xff] %v843_v17  }
  0xcf   : > { %v398_v20 = vpop.f32.mrf.mxu2  ;;  %v418_v21 = vpop.f32.mrf.mxu3 }
  0xd0   : > { %v360_v22 = vpop.f32.mrf.mxu0  ;;  %v380_v23 = vpop.f32.mrf.mxu1  ;;  %v480_v32 = vmul.f32 0.2, %v398_v20  ;;  %v488_v33 = vmul.f32 0.2, %v418_v21  ;;  %vm448_vm4 = vcmp.ge.f32.partialorder %v398_v20, 0.0  ;;  %vm456_vm5 = vcmp.ge.f32.partialorder %v418_v21, 0.0 }
  0xd1   : > { %vm433_vm2 = vcmp.ge.f32.partialorder %v360_v22, 0.0  ;;  %v465_v24 = vmul.f32 0.2, %v360_v22  ;;  %vm441_vm3 = vcmp.ge.f32.partialorder %v380_v23, 0.0  ;;  %v473_v25 = vmul.f32 0.2, %v380_v23 }
  0xd2   : > { %v512_v40 = vsel %vm448_vm4, %v398_v20, %v480_v32  ;;  %v520_v41 = vsel %vm456_vm5, %v418_v21, %v488_v33 }
  0xd3   : > { %v497_v28 = vsel %vm433_vm2, %v360_v22, %v465_v24  ;;  %v505_v29 = vsel %vm441_vm3, %v380_v23, %v473_v25 }
  0xd4   : > { %v788_v30 = vpack.c.bf16 %v497_v28, %v496_v26  ;;  %v808_v31 = vpack.c.bf16 %v505_v29, %v504_v27 }
  0xd6   : > { %856 = vst [vmem:[%s988_s6 + $0x10] sm:$0xff] %v788_v30  }
  0xd7   : > { %860 = vst [vmem:[%s988_s6 + $0x30] sm:$0xff] %v808_v31   ;;  %v400_v34 = vpop.f32.mrf.mxu2  ;;  %v420_v35 = vpop.f32.mrf.mxu3 }
  0xd8   : > { %vm449_vm6 = vcmp.ge.f32.partialorder %v400_v34, 0.0  ;;  %v481_v36 = vmul.f32 0.2, %v400_v34  ;;  %vm457_vm7 = vcmp.ge.f32.partialorder %v420_v35, 0.0  ;;  %v489_v37 = vmul.f32 0.2, %v420_v35  ;;  %v363_v38 = vpop.f32.mrf.mxu0  ;;  %v383_v39 = vpop.f32.mrf.mxu1 }
  0xd9   : > { %v466_v46 = vmul.f32 0.2, %v363_v38  ;;  %v474_v47 = vmul.f32 0.2, %v383_v39  ;;  %vm434_vm8 = vcmp.ge.f32.partialorder %v363_v38, 0.0  ;;  %vm442_vm9 = vcmp.ge.f32.partialorder %v383_v39, 0.0 }
  0xda   : > { %v513_v42 = vsel %vm449_vm6, %v400_v34, %v481_v36  ;;  %v521_v43 = vsel %vm457_vm7, %v420_v35, %v489_v37 }
  0xdb   : > { %v828_v44 = vpack.c.bf16 %v513_v42, %v512_v40  ;;  %v848_v45 = vpack.c.bf16 %v521_v43, %v520_v41  ;;  %v498_v54 = vsel %vm434_vm8, %v363_v38, %v466_v46  ;;  %v506_v55 = vsel %vm442_vm9, %v383_v39, %v474_v47 }
  0xdd   : > { %864 = vst [vmem:[%s988_s6 + $0x50] sm:$0xff] %v828_v44  }
  0xde   : > { %868 = vst [vmem:[%s988_s6 + $0x70] sm:$0xff] %v848_v45  }
  0xdf   : > { %v403_v48 = vpop.f32.mrf.mxu2  ;;  %v423_v49 = vpop.f32.mrf.mxu3 }
  0xe0   : > { %v365_v50 = vpop.f32.mrf.mxu0  ;;  %v385_v51 = vpop.f32.mrf.mxu1  ;;  %v482_v60 = vmul.f32 0.2, %v403_v48  ;;  %v490_v61 = vmul.f32 0.2, %v423_v49  ;;  %vm450_vm12 = vcmp.ge.f32.partialorder %v403_v48, 0.0  ;;  %vm458_vm13 = vcmp.ge.f32.partialorder %v423_v49, 0.0 }
  0xe1   : > { %vm435_vm10 = vcmp.ge.f32.partialorder %v365_v50, 0.0  ;;  %v467_v52 = vmul.f32 0.2, %v365_v50  ;;  %vm443_vm11 = vcmp.ge.f32.partialorder %v385_v51, 0.0  ;;  %v475_v53 = vmul.f32 0.2, %v385_v51 }
  0xe2   : > { %v514_v2 = vsel %vm450_vm12, %v403_v48, %v482_v60  ;;  %v522_v3 = vsel %vm458_vm13, %v423_v49, %v490_v61 }
  0xe3   : > { %v499_v56 = vsel %vm435_vm10, %v365_v50, %v467_v52  ;;  %v507_v57 = vsel %vm443_vm11, %v385_v51, %v475_v53 }
  0xe4   : > { %v793_v58 = vpack.c.bf16 %v499_v56, %v498_v54  ;;  %v813_v59 = vpack.c.bf16 %v507_v57, %v506_v55 }
  0xe6   : > { %857 = vst [vmem:[%s988_s6 + $0x18] sm:$0xff] %v793_v58  }
  0xe7   : > { %861 = vst [vmem:[%s988_s6 + $0x38] sm:$0xff] %v813_v59   ;;  %v405_v62 = vpop.f32.mrf.mxu2  ;;  %v425_v63 = vpop.f32.mrf.mxu3 }
  0xe8   : > { %vm451_vm14 = vcmp.ge.f32.partialorder %v405_v62, 0.0  ;;  %v483_v0 = vmul.f32 0.2, %v405_v62  ;;  %vm459_vm15 = vcmp.ge.f32.partialorder %v425_v63, 0.0  ;;  %v491_v1 = vmul.f32 0.2, %v425_v63 }
  0xea   : > { %v515_v4 = vsel %vm451_vm14, %v405_v62, %v483_v0  ;;  %v523_v5 = vsel %vm459_vm15, %v425_v63, %v491_v1 }
  0xeb   : > { %v833_v6 = vpack.c.bf16 %v515_v4, %v514_v2  ;;  %v853_v7 = vpack.c.bf16 %v523_v5, %v522_v3 }
  0xed   : > { %865 = vst [vmem:[%s988_s6 + $0x58] sm:$0xff] %v833_v6  }
  0xee   : > { %869 = vst [vmem:[%s988_s6 + $0x78] sm:$0xff] %v853_v7  }
  0xef PF: > { %s12_s9 = sadd.s32 1, %s908_s9  }
  0xf0   : > { %p9_p4 = scmp.ge.s32.totalorder %s12_s9, 10  }
  0xf2   :  { %11 = sbr.rel (!%p9_p4) target bundleno = 1 (0x1), region = 58 }

// kernel: discriminator_forward.9
= control target key start
LH: loop header
LB: loop body
LE: loop exit
PB: predicated region body
PF: predicated region fallthrough
CT: control target
= control target key end

     0   :  { %s6374_s12 = smov 0   ;;  %s7623_s0 = inlined_call_operand.vmem [shape: bf16[512,2048], index: 0, kind: input, shape index: {}]   ;;  %s7624_s1 = inlined_call_operand.vmem [shape: bf16[2048,128], index: 1, kind: input, shape index: {}]   ;;  %s7625_s2 = inlined_call_operand.vmem [shape: f32[512,128], index: 2, kind: output, shape index: {0}]   ;;  %s7626_s3 = inlined_call_operand.vmem [shape: f32[2,8,128], index: 3, kind: output, shape index: {1}]  }
   0x1 LB: > { %s6380_s13 = sadd.s32 4294967295, %s6352_s12   ;;  %p4408_p0 = scmp.ge.s32.totalorder %s6352_s12, 1  ;;  %s6352_s12 = sphi %s6374_s12, %s14_s12  }
   0x2   : > { %p142_p1 = scmp.lt.s32.totalorder %s6352_s12, 3 }
   0x4   : > { %p143_p2 = pnand %p4408_p0, %p142_p1 }
   0x5   : > { %s4409_s11 = sshll.u32 (!%p143_p2), %s6380_s13, 5  ;;  %p184_p4 = scmp.lt.s32.totalorder (!%p143_p2), %s6380_s13, 1 }
   0x6   : > { %146 = sbr.rel (%p143_p2) target bundleno = 1216 (0x4c0), region = 28  ;;  %p172_p3 = scmp.lt.s32.totalorder (!%p143_p2), %s4409_s11, 63 }
   0xb   : > { %v6217_v0 = vld [vmem:[%s7624_s1 + $0x38] sm:$0xff]  ;;  %v6216_v4 = vld [vmem:[%s7624_s1 + $0x30] sm:$0xff]  ;;  %v6215_v8 = vld [vmem:[%s7624_s1 + $0x28] sm:$0xff]  ;;  %s7628_s11 = smov (!%p172_p3, %s4409_s11), 63  ;;  %s7630_s13 = smov (!%p184_p4, %s6380_s13), 1 }
   0xc   : > { %v6225_v1 = vld [vmem:[%s7624_s1 + $0x78] sm:$0xff]  ;;  %2748 = vmatpush.bf16.msra.mxu0 %v6217_v0  ;;  %v6224_v5 = vld [vmem:[%s7624_s1 + $0x70] sm:$0xff]  ;;  %v6223_v9 = vld [vmem:[%s7624_s1 + $0x68] sm:$0xff]  ;;  %s5953_s14 = sshll.u32 %s7628_s11, 6  ;;  %s4413_s18 = sshll.u32 %s7628_s11, 3 }
   0xd   : > { %v6233_v2 = vld [vmem:[%s7624_s1 + $0xb8] sm:$0xff]  ;;  %2837 = vmatpush.bf16.msra.mxu1 %v6225_v1  ;;  %v6232_v6 = vld [vmem:[%s7624_s1 + $0xb0] sm:$0xff]  ;;  %v6231_v10 = vld [vmem:[%s7624_s1 + $0xa8] sm:$0xff]  ;;  %s6469_s21 = scalar_lea.vmem %s7623_s0, %s5953_s14  ;;  %s7494_s22 = scalar_lea.vmem %s7625_s2, %s4413_s18 }
   0xe   : > { %v6241_v3 = vld [vmem:[%s7624_s1 + $0xf8] sm:$0xff]  ;;  %2926 = vmatpush.bf16.msra.mxu2 %v6233_v2  ;;  %v6240_v7 = vld [vmem:[%s7624_s1 + $0xf0] sm:$0xff]  ;;  %v6239_v11 = vld [vmem:[%s7624_s1 + $0xe8] sm:$0xff]  ;;  %s4414_s11 = sshll.u32 %s7630_s13, 3 }
   0xf   : > { %3015 = vmatpush.bf16.msra.mxu3 %v6241_v3  ;;  %v6214_v12 = vld [vmem:[%s7624_s1 + $0x20] sm:$0xff]  ;;  %v6213_v16 = vld [vmem:[%s7624_s1 + $0x18] sm:$0xff]  ;;  %v6212_v20 = vld [vmem:[%s7624_s1 + $0x10] sm:$0xff]  ;;  %s187_s24 = scalar_lea.vmem %s7626_s3, %s4414_s11 }
  0x10   : > { %2749 = vmatpush.bf16.msra.mxu0 %v6216_v4  ;;  %v6222_v13 = vld [vmem:[%s7624_s1 + $0x60] sm:$0xff]  ;;  %v6221_v17 = vld [vmem:[%s7624_s1 + $0x58] sm:$0xff]  ;;  %v6220_v21 = vld [vmem:[%s7624_s1 + $0x50] sm:$0xff] }
  0x11   : > { %2838 = vmatpush.bf16.msra.mxu1 %v6224_v5  ;;  %v6230_v14 = vld [vmem:[%s7624_s1 + $0xa0] sm:$0xff]  ;;  %v6229_v18 = vld [vmem:[%s7624_s1 + $0x98] sm:$0xff]  ;;  %v6228_v22 = vld [vmem:[%s7624_s1 + $0x90] sm:$0xff] }
  0x12   : > { %2927 = vmatpush.bf16.msra.mxu2 %v6232_v6  ;;  %v6238_v15 = vld [vmem:[%s7624_s1 + $0xe0] sm:$0xff]  ;;  %v6237_v19 = vld [vmem:[%s7624_s1 + $0xd8] sm:$0xff]  ;;  %v6236_v23 = vld [vmem:[%s7624_s1 + $0xd0] sm:$0xff] }
  0x13   : > { %3016 = vmatpush.bf16.msra.mxu3 %v6240_v7  ;;  %v6211_v24 = vld [vmem:[%s7624_s1 + $0x8] sm:$0xff]  ;;  %v6210_v28 = vld [vmem:[%s7624_s1] sm:$0xff]  ;;  %v6265_v40 = vld [vmem:[%s7624_s1 + $0x1b8] sm:$0xff] }
  0x14   : > { %2750 = vmatpush.bf16.msra.mxu0 %v6215_v8  ;;  %v6219_v25 = vld [vmem:[%s7624_s1 + $0x48] sm:$0xff]  ;;  %v6218_v29 = vld [vmem:[%s7624_s1 + $0x40] sm:$0xff]  ;;  %v6249_v41 = vld [vmem:[%s7624_s1 + $0x138] sm:$0xff] }
  0x15   : > { %2839 = vmatpush.bf16.msra.mxu1 %v6223_v9  ;;  %v6227_v26 = vld [vmem:[%s7624_s1 + $0x88] sm:$0xff]  ;;  %v6226_v30 = vld [vmem:[%s7624_s1 + $0x80] sm:$0xff]  ;;  %v6273_v46 = vld [vmem:[%s7624_s1 + $0x1f8] sm:$0xff] }
  0x16   : > { %2928 = vmatpush.bf16.msra.mxu2 %v6231_v10  ;;  %v6235_v27 = vld [vmem:[%s7624_s1 + $0xc8] sm:$0xff]  ;;  %v6234_v31 = vld [vmem:[%s7624_s1 + $0xc0] sm:$0xff]  ;;  %v6257_v47 = vld [vmem:[%s7624_s1 + $0x178] sm:$0xff] }
  0x17   : > { %3017 = vmatpush.bf16.msra.mxu3 %v6239_v11  ;;  %v4417_v32 = vld [vmem:[%s6469_s21] sm:$0xf]  ;;  %v5954_v34 = vld [vmem:[%s6469_s21 + $0x4] sm:$0xf]  ;;  %v4425_v36 = vld [vmem:[%s6469_s21 + $0x8] sm:$0xf] }
  0x18   : > { %2751 = vmatpush.bf16.msra.mxu0 %v6214_v12  ;;  %v5962_v33 = vld [vmem:[%s6469_s21 + $0x3c] sm:$0xf0]  ;;  %v4419_v35 = vld [vmem:[%s6469_s21 + $0x40] sm:$0xf0]  ;;  %v5963_v37 = vld [vmem:[%s6469_s21 + $0x44] sm:$0xf0] }
  0x19   : > { %2840 = vmatpush.bf16.msra.mxu1 %v6222_v13  ;;  %v5955_v38 = vld [vmem:[%s6469_s21 + $0xc] sm:$0xf]  ;;  %v4418_v42 = vor.u32 %v5962_v33, %v4417_v32  ;;  %v4422_v43 = vor.u32 %v5954_v34, %v4419_v35  ;;  %v4426_v44 = vor.u32 %v5963_v37, %v4425_v36  ;;  %v6264_v48 = vld [vmem:[%s7624_s1 + $0x1b0] sm:$0xff]  ;;  %v4481_v52 = vld [vmem:[%s6469_s21 + $0x80] sm:$0xf] }
  0x1a   : > { %2929 = vmatpush.bf16.msra.mxu2 %v6230_v14  ;;  %v4427_v39 = vld [vmem:[%s6469_s21 + $0x48] sm:$0xf0]  ;;  %v6248_v49 = vld [vmem:[%s7624_s1 + $0x130] sm:$0xff]  ;;  %v5978_v53 = vld [vmem:[%s6469_s21 + $0xbc] sm:$0xf0] }
  0x1b   : > { %3018 = vmatpush.bf16.msra.mxu3 %v6238_v15  ;;  %v4430_v45 = vor.u32 %v5955_v38, %v4427_v39  ;;  %v6272_v50 = vld [vmem:[%s7624_s1 + $0x1f0] sm:$0xff]  ;;  %v5970_v54 = vld [vmem:[%s6469_s21 + $0x84] sm:$0xf]  ;;  %v4489_v56 = vld [vmem:[%s6469_s21 + $0x88] sm:$0xf]  ;;  %v4482_v60 = vor.u32 %v5978_v53, %v4481_v52 }
  0x1c   : > { %2752 = vmatpush.bf16.msra.mxu0 %v6213_v16  ;;  %v6256_v51 = vld [vmem:[%s7624_s1 + $0x170] sm:$0xff]  ;;  %v4483_v55 = vld [vmem:[%s6469_s21 + $0xc0] sm:$0xf0]  ;;  %v5979_v57 = vld [vmem:[%s6469_s21 + $0xc4] sm:$0xf0] }
  0x1d   : > { %2841 = vmatpush.bf16.msra.mxu1 %v6221_v17  ;;  %v5971_v58 = vld [vmem:[%s6469_s21 + $0x8c] sm:$0xf]  ;;  %v4486_v61 = vor.u32 %v5970_v54, %v4483_v55  ;;  %v4490_v62 = vor.u32 %v5979_v57, %v4489_v56  ;;  %v4545_v0 = vld [vmem:[%s6469_s21 + $0x100] sm:$0xf]  ;;  %v5986_v2 = vld [vmem:[%s6469_s21 + $0x104] sm:$0xf] }
  0x1e   : > { %2930 = vmatpush.bf16.msra.mxu2 %v6229_v18  ;;  %v4491_v59 = vld [vmem:[%s6469_s21 + $0xc8] sm:$0xf0]  ;;  %v5994_v1 = vld [vmem:[%s6469_s21 + $0x13c] sm:$0xf0]  ;;  %v4547_v3 = vld [vmem:[%s6469_s21 + $0x140] sm:$0xf0] }
  0x1f   : > { %3019 = vmatpush.bf16.msra.mxu3 %v6237_v19  ;;  %v4494_v63 = vor.u32 %v5971_v58, %v4491_v59  ;;  %v4553_v4 = vld [vmem:[%s6469_s21 + $0x108] sm:$0xf]  ;;  %v5987_v6 = vld [vmem:[%s6469_s21 + $0x10c] sm:$0xf]  ;;  %v4546_v8 = vor.u32 %v5994_v1, %v4545_v0  ;;  %v4550_v9 = vor.u32 %v5986_v2, %v4547_v3  ;;  %v4609_v16 = vld [vmem:[%s6469_s21 + $0x180] sm:$0xf] }
  0x20   : > { %2753 = vmatpush.bf16.msra.mxu0 %v6212_v20  ;;  %v5995_v5 = vld [vmem:[%s6469_s21 + $0x144] sm:$0xf0]  ;;  %v4555_v7 = vld [vmem:[%s6469_s21 + $0x148] sm:$0xf0]  ;;  %v6010_v17 = vld [vmem:[%s6469_s21 + $0x1bc] sm:$0xf0] }
  0x21   : > { %2842 = vmatpush.bf16.msra.mxu1 %v6220_v21  ;;  %v4554_v10 = vor.u32 %v5995_v5, %v4553_v4  ;;  %v4558_v11 = vor.u32 %v5987_v6, %v4555_v7  ;;  %v6263_v12 = vld [vmem:[%s7624_s1 + $0x1a8] sm:$0xff]  ;;  %v6002_v18 = vld [vmem:[%s6469_s21 + $0x184] sm:$0xf]  ;;  %v4801_v56 = vld [vmem:[%s6469_s21 + $0x300] sm:$0xf] }
  0x22   : > { %2931 = vmatpush.bf16.msra.mxu2 %v6228_v22  ;;  %v6247_v13 = vld [vmem:[%s7624_s1 + $0x128] sm:$0xff]  ;;  %v4611_v19 = vld [vmem:[%s6469_s21 + $0x1c0] sm:$0xf0]  ;;  %v6058_v57 = vld [vmem:[%s6469_s21 + $0x33c] sm:$0xf0] }
  0x23   : > { %3020 = vmatpush.bf16.msra.mxu3 %v6236_v23  ;;  %v6271_v14 = vld [vmem:[%s7624_s1 + $0x1e8] sm:$0xff]  ;;  %v6050_v58 = vld [vmem:[%s6469_s21 + $0x304] sm:$0xf]  ;;  %v4802_v0 = vor.u32 %v6058_v57, %v4801_v56  ;;  %v6261_v4 = vld [vmem:[%s7624_s1 + $0x198] sm:$0xff] }
  0x24   : > { %2754 = vmatpush.bf16.msra.mxu0 %v6211_v24  ;;  %v6255_v15 = vld [vmem:[%s7624_s1 + $0x168] sm:$0xff]  ;;  %v4610_v24 = vor.u32 %v6010_v17, %v4609_v16  ;;  %v4803_v59 = vld [vmem:[%s6469_s21 + $0x340] sm:$0xf0]  ;;  %v6245_v5 = vld [vmem:[%s7624_s1 + $0x118] sm:$0xff] }
  0x25   : > { %2843 = vmatpush.bf16.msra.mxu1 %v6219_v25  ;;  %v4617_v20 = vld [vmem:[%s6469_s21 + $0x188] sm:$0xf]  ;;  %v6003_v22 = vld [vmem:[%s6469_s21 + $0x18c] sm:$0xf]  ;;  %v4614_v25 = vor.u32 %v6002_v18, %v4611_v19  ;;  %v4806_v1 = vor.u32 %v6050_v58, %v4803_v59  ;;  %v6269_v6 = vld [vmem:[%s7624_s1 + $0x1d8] sm:$0xff] }
  0x26   : > { %2932 = vmatpush.bf16.msra.mxu2 %v6227_v26  ;;  %v6011_v21 = vld [vmem:[%s6469_s21 + $0x1c4] sm:$0xf0]  ;;  %v4619_v23 = vld [vmem:[%s6469_s21 + $0x1c8] sm:$0xf0]  ;;  %v6253_v7 = vld [vmem:[%s7624_s1 + $0x158] sm:$0xff] }
  0x27   : > { %3021 = vmatpush.bf16.msra.mxu3 %v6235_v27  ;;  %v4618_v26 = vor.u32 %v6011_v21, %v4617_v20  ;;  %v4622_v27 = vor.u32 %v6003_v22, %v4619_v23  ;;  %v4681_v32 = vld [vmem:[%s6469_s21 + $0x208] sm:$0xf]  ;;  %v6019_v34 = vld [vmem:[%s6469_s21 + $0x20c] sm:$0xf]  ;;  %v4929_v20 = vld [vmem:[%s6469_s21 + $0x400] sm:$0xf] }
  0x28   : > { %2755 = vmatpush.bf16.msra.mxu0 %v6210_v28  ;;  %v4673_v28 = vld [vmem:[%s6469_s21 + $0x200] sm:$0xf]  ;;  %v6027_v33 = vld [vmem:[%s6469_s21 + $0x244] sm:$0xf0]  ;;  %v4683_v35 = vld [vmem:[%s6469_s21 + $0x248] sm:$0xf0] }
  0x29   : > { %2844 = vmatpush.bf16.msra.mxu1 %v6218_v29  ;;  %v6026_v29 = vld [vmem:[%s6469_s21 + $0x23c] sm:$0xf0]  ;;  %v4682_v38 = vor.u32 %v6027_v33, %v4681_v32  ;;  %v4686_v39 = vor.u32 %v6019_v34, %v4683_v35  ;;  %v6082_v22 = vld [vmem:[%s6469_s21 + $0x404] sm:$0xf]  ;;  %v6260_v35 = vld [vmem:[%s7624_s1 + $0x190] sm:$0xff] }
  0x2a   : > { %2933 = vmatpush.bf16.msra.mxu2 %v6226_v30  ;;  %v6018_v30 = vld [vmem:[%s6469_s21 + $0x204] sm:$0xf]  ;;  %v4674_v36 = vor.u32 %v6026_v29, %v4673_v28  ;;  %v6090_v21 = vld [vmem:[%s6469_s21 + $0x43c] sm:$0xf0] }
  0x2b   : > { %3022 = vmatpush.bf16.msra.mxu3 %v6234_v31  ;;  %2756 = vmatmul.bf16.vlgmr.msra.gmra.mxu0 %v4418_v42  ;;  %v4675_v31 = vld [vmem:[%s6469_s21 + $0x240] sm:$0xf0]  ;;  %v4930_v28 = vor.u32 %v6090_v21, %v4929_v20 }
  0x2c   : > { %3104 = vmatpush.bf16.msrb.mxu0 %v6249_v41  ;;  %2845 = vmatmul.bf16.vlgmr.msra.gmra.mxu1 %v4422_v43  ;;  %v4678_v37 = vor.u32 %v6018_v30, %v4675_v31  ;;  %v6246_v41 = vld [vmem:[%s7624_s1 + $0x120] sm:$0xff] }
  0x2d   : > { %2934 = vmatmul.bf16.vlgmr.msra.gmra.mxu2 %v4426_v44  ;;  %3193 = vmatpush.bf16.msrb.mxu1 %v6257_v47  ;;  %v6270_v42 = vld [vmem:[%s7624_s1 + $0x1e0] sm:$0xff] }
  0x2e   : > { %3282 = vmatpush.bf16.msrb.mxu2 %v6265_v40  ;;  %3023 = vmatmul.bf16.vlgmr.msra.gmra.mxu3 %v4430_v45  ;;  %v6262_v40 = vld [vmem:[%s7624_s1 + $0x1a0] sm:$0xff] }
  0x2f   : > { %3371 = vmatpush.bf16.msrb.mxu3 %v6273_v46  ;;  %v6254_v43 = vld [vmem:[%s7624_s1 + $0x160] sm:$0xff] }
  0x30   : > { %3105 = vmatpush.bf16.msrb.mxu0 %v6248_v49  ;;  %v4737_v44 = vld [vmem:[%s6469_s21 + $0x280] sm:$0xf]  ;;  %v6034_v46 = vld [vmem:[%s6469_s21 + $0x284] sm:$0xf]  ;;  %v6043_v49 = vld [vmem:[%s6469_s21 + $0x2c4] sm:$0xf0] }
  0x31   : > { %3194 = vmatpush.bf16.msrb.mxu1 %v6256_v51  ;;  %v6042_v45 = vld [vmem:[%s6469_s21 + $0x2bc] sm:$0xf0]  ;;  %v4739_v47 = vld [vmem:[%s6469_s21 + $0x2c0] sm:$0xf0]  ;;  %v4747_v51 = vld [vmem:[%s6469_s21 + $0x2c8] sm:$0xf0] }
  0x32   : > { %3283 = vmatpush.bf16.msrb.mxu2 %v6264_v48  ;;  %v4745_v48 = vld [vmem:[%s6469_s21 + $0x288] sm:$0xf]  ;;  %v4738_v52 = vor.u32 %v6042_v45, %v4737_v44  ;;  %v4742_v53 = vor.u32 %v6034_v46, %v4739_v47  ;;  %v4931_v23 = vld [vmem:[%s6469_s21 + $0x440] sm:$0xf0]  ;;  %v6252_v45 = vld [vmem:[%s7624_s1 + $0x150] sm:$0xff] }
  0x33   : > { %3372 = vmatpush.bf16.msrb.mxu3 %v6272_v50  ;;  %v6035_v50 = vld [vmem:[%s6469_s21 + $0x28c] sm:$0xf]  ;;  %v4746_v54 = vor.u32 %v6043_v49, %v4745_v48  ;;  %v4934_v29 = vor.u32 %v6082_v22, %v4931_v23  ;;  %v4993_v46 = vld [vmem:[%s6469_s21 + $0x480] sm:$0xf]  ;;  %v6098_v48 = vld [vmem:[%s6469_s21 + $0x484] sm:$0xf] }
  0x34   : > { %3106 = vmatpush.bf16.msrb.mxu0 %v6247_v13  ;;  %v4750_v55 = vor.u32 %v6035_v50, %v4747_v51  ;;  %v6075_v13 = vld [vmem:[%s6469_s21 + $0x3c4] sm:$0xf0]  ;;  %v6106_v47 = vld [vmem:[%s6469_s21 + $0x4bc] sm:$0xf0]  ;;  %v4995_v49 = vld [vmem:[%s6469_s21 + $0x4c0] sm:$0xf0] }
  0x35   : > { %3195 = vmatpush.bf16.msrb.mxu1 %v6255_v15  ;;  %v4875_v15 = vld [vmem:[%s6469_s21 + $0x3c8] sm:$0xf0]  ;;  %v5001_v50 = vld [vmem:[%s6469_s21 + $0x488] sm:$0xf]  ;;  %v4994_v56 = vor.u32 %v6106_v47, %v4993_v46  ;;  %v4998_v57 = vor.u32 %v6098_v48, %v4995_v49 }
  0x36   : > { %3284 = vmatpush.bf16.msrb.mxu2 %v6263_v12  ;;  %v4873_v12 = vld [vmem:[%s6469_s21 + $0x388] sm:$0xf]  ;;  %v5131_v46 = vld [vmem:[%s6469_s21 + $0x5c8] sm:$0xf0] }
  0x37   : > { %3373 = vmatpush.bf16.msrb.mxu3 %v6271_v14  ;;  %v6067_v14 = vld [vmem:[%s6469_s21 + $0x38c] sm:$0xf]  ;;  %v4874_v18 = vor.u32 %v6075_v13, %v4873_v12  ;;  %v6107_v51 = vld [vmem:[%s6469_s21 + $0x4c4] sm:$0xf0] }
  0x38   : > { %3107 = vmatpush.bf16.msrb.mxu0 %v6246_v41  ;;  %v4878_v19 = vor.u32 %v6067_v14, %v4875_v15  ;;  %v5065_v12 = vld [vmem:[%s6469_s21 + $0x508] sm:$0xf]  ;;  %v6115_v14 = vld [vmem:[%s6469_s21 + $0x50c] sm:$0xf] }
  0x39   : > { %3196 = vmatpush.bf16.msrb.mxu1 %v6254_v43  ;;  %v6123_v13 = vld [vmem:[%s6469_s21 + $0x544] sm:$0xf0]  ;;  %v5067_v15 = vld [vmem:[%s6469_s21 + $0x548] sm:$0xf0] }
  0x3a   : > { %3285 = vmatpush.bf16.msrb.mxu2 %v6262_v40  ;;  %v5066_v23 = vor.u32 %v6123_v13, %v5065_v12 }
  0x3b   : > { %2761 = vmatmul.bf16.gmra.mxu0 %v4482_v60  ;;  %3374 = vmatpush.bf16.msrb.mxu3 %v6270_v42  ;;  %v4809_v60 = vld [vmem:[%s6469_s21 + $0x308] sm:$0xf] }
  0x3c   : > { %2850 = vmatmul.bf16.gmra.mxu1 %v4486_v61  ;;  %v6059_v61 = vld [vmem:[%s6469_s21 + $0x344] sm:$0xf0]  ;;  %3108 = vmatpush.bf16.msrb.mxu0 %v6245_v5 }
  0x3d   : > { %2939 = vmatmul.bf16.gmra.mxu2 %v4490_v62  ;;  %v6051_v62 = vld [vmem:[%s6469_s21 + $0x30c] sm:$0xf]  ;;  %v4810_v2 = vor.u32 %v6059_v61, %v4809_v60  ;;  %3197 = vmatpush.bf16.msrb.mxu1 %v6253_v7  ;;  %v5002_v61 = vor.u32 %v6107_v51, %v5001_v50 }
  0x3e   : > { %3028 = vmatmul.bf16.gmra.mxu3 %v4494_v63  ;;  %v4811_v63 = vld [vmem:[%s6469_s21 + $0x348] sm:$0xf0]  ;;  %3286 = vmatpush.bf16.msrb.mxu2 %v6261_v4 }
  0x3f   : > { %v4814_v3 = vor.u32 %v6051_v62, %v4811_v63  ;;  %3375 = vmatpush.bf16.msrb.mxu3 %v6269_v6 }
  0x41   : > { %3198 = vmatpush.bf16.msrb.mxu1 %v6252_v45  ;;  %v6131_v45 = vld [vmem:[%s6469_s21 + $0x58c] sm:$0xf] }
  0x42   : > { %3287 = vmatpush.bf16.msrb.mxu2 %v6260_v35 }
  0x4b   : > { %2766 = vmatmul.bf16.gmra.mxu0 %v4546_v8  ;;  %v4865_v8 = vld [vmem:[%s6469_s21 + $0x380] sm:$0xf] }
  0x4c   : > { %2855 = vmatmul.bf16.gmra.mxu1 %v4550_v9  ;;  %v6074_v9 = vld [vmem:[%s6469_s21 + $0x3bc] sm:$0xf0] }
  0x4d   : > { %2944 = vmatmul.bf16.gmra.mxu2 %v4554_v10  ;;  %v6066_v10 = vld [vmem:[%s6469_s21 + $0x384] sm:$0xf]  ;;  %v4866_v16 = vor.u32 %v6074_v9, %v4865_v8  ;;  %v5057_v8 = vld [vmem:[%s6469_s21 + $0x500] sm:$0xf] }
  0x4e   : > { %3033 = vmatmul.bf16.gmra.mxu3 %v4558_v11  ;;  %v4867_v11 = vld [vmem:[%s6469_s21 + $0x3c0] sm:$0xf0]  ;;  %v6122_v9 = vld [vmem:[%s6469_s21 + $0x53c] sm:$0xf0] }
  0x4f   : > { %v4870_v17 = vor.u32 %v6066_v10, %v4867_v11  ;;  %v6114_v10 = vld [vmem:[%s6469_s21 + $0x504] sm:$0xf] }
  0x50   : > { %v5059_v11 = vld [vmem:[%s6469_s21 + $0x540] sm:$0xf0] }
  0x5b   : > { %2771 = vmatmul.bf16.gmra.mxu0 %v4610_v24  ;;  %v4937_v24 = vld [vmem:[%s6469_s21 + $0x408] sm:$0xf] }
  0x5c   : > { %2860 = vmatmul.bf16.gmra.mxu1 %v4614_v25  ;;  %v6091_v25 = vld [vmem:[%s6469_s21 + $0x444] sm:$0xf0] }
  0x5d   : > { %2949 = vmatmul.bf16.gmra.mxu2 %v4618_v26  ;;  %v6083_v26 = vld [vmem:[%s6469_s21 + $0x40c] sm:$0xf]  ;;  %v4938_v32 = vor.u32 %v6091_v25, %v4937_v24  ;;  %v5070_v24 = vor.u32 %v6115_v14, %v5067_v15 }
  0x5e   : > { %3038 = vmatmul.bf16.gmra.mxu3 %v4622_v27  ;;  %v4939_v27 = vld [vmem:[%s6469_s21 + $0x448] sm:$0xf0] }
  0x5f   : > { %v4942_v33 = vor.u32 %v6083_v26, %v4939_v27  ;;  %v6259_v27 = vld [vmem:[%s7624_s1 + $0x188] sm:$0xff] }
  0x60   : > { %3288 = vmatpush.bf16.msrb.mxu2 %v6259_v27 }
  0x6b   : > { %2776 = vmatmul.bf16.gmra.mxu0 %v4674_v36  ;;  %v6244_v36 = vld [vmem:[%s7624_s1 + $0x110] sm:$0xff] }
  0x6c   : > { %2865 = vmatmul.bf16.gmra.mxu1 %v4678_v37  ;;  %v6268_v37 = vld [vmem:[%s7624_s1 + $0x1d0] sm:$0xff]  ;;  %3109 = vmatpush.bf16.msrb.mxu0 %v6244_v36 }
  0x6d   : > { %2954 = vmatmul.bf16.gmra.mxu2 %v4682_v38  ;;  %3376 = vmatpush.bf16.msrb.mxu3 %v6268_v37  ;;  %v6251_v37 = vld [vmem:[%s7624_s1 + $0x148] sm:$0xff] }
  0x6e   : > { %3043 = vmatmul.bf16.gmra.mxu3 %v4686_v39  ;;  %3199 = vmatpush.bf16.msrb.mxu1 %v6251_v37  ;;  %v6162_v37 = vld [vmem:[%s6469_s21 + $0x684] sm:$0xf] }
  0x7b   : > { %2781 = vmatmul.bf16.gmra.mxu0 %v4738_v52  ;;  %v6099_v52 = vld [vmem:[%s6469_s21 + $0x48c] sm:$0xf] }
  0x7c   : > { %2870 = vmatmul.bf16.gmra.mxu1 %v4742_v53  ;;  %v5003_v53 = vld [vmem:[%s6469_s21 + $0x4c8] sm:$0xf0] }
  0x7d   : > { %2959 = vmatmul.bf16.gmra.mxu2 %v4746_v54  ;;  %v5006_v62 = vor.u32 %v6099_v52, %v5003_v53 }
  0x7e   : > { %3048 = vmatmul.bf16.gmra.mxu3 %v4750_v55 }
  0x8b   : > { %2786 = vmatmul.bf16.gmra.mxu0 %v4802_v0 }
  0x8c   : > { %2875 = vmatmul.bf16.gmra.mxu1 %v4806_v1 }
  0x8d   : > { %2964 = vmatmul.bf16.gmra.mxu2 %v4810_v2 }
  0x8e   : > { %3053 = vmatmul.bf16.gmra.mxu3 %v4814_v3 }
  0x9b   : > { %2791 = vmatmul.bf16.gmra.mxu0 %v4866_v16 }
  0x9c   : > { %2880 = vmatmul.bf16.gmra.mxu1 %v4870_v17 }
  0x9d   : > { %2969 = vmatmul.bf16.gmra.mxu2 %v4874_v18  ;;  %v5058_v18 = vor.u32 %v6122_v9, %v5057_v8  ;;  %v6155_v8 = vld [vmem:[%s6469_s21 + $0x644] sm:$0xf0]  ;;  %v6147_v9 = vld [vmem:[%s6469_s21 + $0x60c] sm:$0xf] }
  0x9e   : > { %3058 = vmatmul.bf16.gmra.mxu3 %v4878_v19  ;;  %v5062_v19 = vor.u32 %v6114_v10, %v5059_v11  ;;  %v5195_v10 = vld [vmem:[%s6469_s21 + $0x648] sm:$0xf0] }
  0xa8   : > { %v2757_v30 = vpop.f32.mrf.mxu0 }
  0xa9   : > { %v2846_v31 = vpop.f32.mrf.mxu1 }
  0xaa   : > { %v2847_v34 = vadd.f32 %v2846_v31, %v2757_v30 }
  0xab   : > { %2796 = vmatmul.bf16.gmra.mxu0 %v4930_v28  ;;  %v6243_v28 = vld [vmem:[%s7624_s1 + $0x108] sm:$0xff] }
  0xac   : > { %2885 = vmatmul.bf16.gmra.mxu1 %v4934_v29  ;;  %v6267_v29 = vld [vmem:[%s7624_s1 + $0x1c8] sm:$0xff]  ;;  %3110 = vmatpush.bf16.msrb.mxu0 %v6243_v28 }
  0xad   : > { %2974 = vmatmul.bf16.gmra.mxu2 %v4938_v32  ;;  %3377 = vmatpush.bf16.msrb.mxu3 %v6267_v29 }
  0xae   : > { %3063 = vmatmul.bf16.gmra.mxu3 %v4942_v33 }
  0xb0   : > { %v2935_v38 = vpop.f32.mrf.mxu2  ;;  %v2759_v41 = vpop.f32.mrf.mxu0 }
  0xb1   : > { %v3024_v39 = vpop.f32.mrf.mxu3  ;;  %v2936_v40 = vadd.f32 %v2935_v38, %v2847_v34  ;;  %v2848_v42 = vpop.f32.mrf.mxu1  ;;  %v5121_v38 = vld [vmem:[%s6469_s21 + $0x580] sm:$0xf] }
  0xb2   : > { %v2849_v43 = vadd.f32 %v2848_v42, %v2759_v41  ;;  %v5123_v41 = vld [vmem:[%s6469_s21 + $0x5c0] sm:$0xf0]  ;;  %v5129_v42 = vld [vmem:[%s6469_s21 + $0x588] sm:$0xf] }
  0xb3   : > { %v6630_v44 = vadd.f32 %v3024_v39, %v2936_v40  ;;  %v6138_v39 = vld [vmem:[%s6469_s21 + $0x5bc] sm:$0xf0]  ;;  %v6130_v40 = vld [vmem:[%s6469_s21 + $0x584] sm:$0xf] }
  0xb4   : > { %v5122_v49 = vor.u32 %v6138_v39, %v5121_v38  ;;  %v5126_v50 = vor.u32 %v6130_v40, %v5123_v41  ;;  %v5251_v38 = vld [vmem:[%s6469_s21 + $0x6c0] sm:$0xf0]  ;;  %v5257_v39 = vld [vmem:[%s6469_s21 + $0x688] sm:$0xf]  ;;  %v6163_v41 = vld [vmem:[%s6469_s21 + $0x68c] sm:$0xf] }
  0xb5   : > { %v6171_v40 = vld [vmem:[%s6469_s21 + $0x6c4] sm:$0xf0] }
  0xb8   : > { %v2937_v54 = vpop.f32.mrf.mxu2  ;;  %v2762_v59 = vpop.f32.mrf.mxu0 }
  0xb9   : > { %v3026_v55 = vpop.f32.mrf.mxu3  ;;  %v2938_v58 = vadd.f32 %v2937_v54, %v2849_v43  ;;  %v2851_v60 = vpop.f32.mrf.mxu1  ;;  %v6139_v43 = vld [vmem:[%s6469_s21 + $0x5c4] sm:$0xf0] }
  0xba   : > { %v2852_v63 = vadd.f32 %v2851_v60, %v2762_v59  ;;  %v5130_v54 = vor.u32 %v6139_v43, %v5129_v42  ;;  %v5259_v42 = vld [vmem:[%s6469_s21 + $0x6c8] sm:$0xf0] }
  0xbb   : > { %v6643_v0 = vadd.f32 %v3026_v55, %v2938_v58  ;;  %2801 = vmatmul.bf16.gmra.mxu0 %v4994_v56  ;;  %v5134_v55 = vor.u32 %v6131_v45, %v5131_v46 }
  0xbc   : > { %2890 = vmatmul.bf16.gmra.mxu1 %v4998_v57 }
  0xbd   : > { %2979 = vmatmul.bf16.gmra.mxu2 %v5002_v61 }
  0xbe   : > { %3068 = vmatmul.bf16.gmra.mxu3 %v5006_v62 }
  0xc0   : > { %v2940_v1 = vpop.f32.mrf.mxu2  ;;  %v2764_v4 = vpop.f32.mrf.mxu0 }
  0xc1   : > { %v3029_v2 = vpop.f32.mrf.mxu3  ;;  %v2941_v3 = vadd.f32 %v2940_v1, %v2852_v63  ;;  %v2853_v5 = vpop.f32.mrf.mxu1 }
  0xc2   : > { %v2854_v6 = vadd.f32 %v2853_v5, %v2764_v4  ;;  %v6146_v4 = vld [vmem:[%s6469_s21 + $0x604] sm:$0xf] }
  0xc3   : > { %v6645_v7 = vadd.f32 %v3029_v2, %v2941_v3  ;;  %v5185_v2 = vld [vmem:[%s6469_s21 + $0x600] sm:$0xf]  ;;  %v5187_v5 = vld [vmem:[%s6469_s21 + $0x640] sm:$0xf0] }
  0xc4   : > { %v6154_v3 = vld [vmem:[%s6469_s21 + $0x63c] sm:$0xf0]  ;;  %v5190_v14 = vor.u32 %v6146_v4, %v5187_v5  ;;  %v5315_v4 = vld [vmem:[%s6469_s21 + $0x740] sm:$0xf0]  ;;  %v5321_v5 = vld [vmem:[%s6469_s21 + $0x708] sm:$0xf] }
  0xc5   : > { %v5186_v13 = vor.u32 %v6154_v3, %v5185_v2  ;;  %v6186_v2 = vld [vmem:[%s6469_s21 + $0x73c] sm:$0xf0]  ;;  %v6178_v3 = vld [vmem:[%s6469_s21 + $0x704] sm:$0xf] }
  0xc8   : > { %v2942_v16 = vpop.f32.mrf.mxu2  ;;  %v2767_v21 = vpop.f32.mrf.mxu0 }
  0xc9   : > { %v3031_v17 = vpop.f32.mrf.mxu3  ;;  %v2943_v20 = vadd.f32 %v2942_v16, %v2854_v6  ;;  %v2856_v22 = vpop.f32.mrf.mxu1  ;;  %v5193_v6 = vld [vmem:[%s6469_s21 + $0x608] sm:$0xf] }
  0xca   : > { %v2857_v25 = vadd.f32 %v2856_v22, %v2767_v21  ;;  %v6258_v22 = vld [vmem:[%s7624_s1 + $0x180] sm:$0xff] }
  0xcb   : > { %v6655_v26 = vadd.f32 %v3031_v17, %v2943_v20  ;;  %2806 = vmatmul.bf16.gmra.mxu0 %v5058_v18  ;;  %v5194_v18 = vor.u32 %v6155_v8, %v5193_v6  ;;  %3289 = vmatpush.bf16.msrb.mxu2 %v6258_v22  ;;  %v6187_v6 = vld [vmem:[%s6469_s21 + $0x744] sm:$0xf0]  ;;  %v6179_v8 = vld [vmem:[%s6469_s21 + $0x70c] sm:$0xf]  ;;  %v6297_v22 = vld [vmem:[%s7624_s1 + $0x2b8] sm:$0xff] }
  0xcc   : > { %2895 = vmatmul.bf16.gmra.mxu1 %v5062_v19  ;;  %v5198_v19 = vor.u32 %v6147_v9, %v5195_v10  ;;  %v5323_v9 = vld [vmem:[%s6469_s21 + $0x748] sm:$0xf0] }
  0xcd   : > { %2984 = vmatmul.bf16.gmra.mxu2 %v5066_v23  ;;  %v6242_v23 = vld [vmem:[%s7624_s1 + $0x100] sm:$0xff] }
  0xce   : > { %3073 = vmatmul.bf16.gmra.mxu3 %v5070_v24  ;;  %v6266_v24 = vld [vmem:[%s7624_s1 + $0x1c0] sm:$0xff]  ;;  %3111 = vmatpush.bf16.msrb.mxu0 %v6242_v23  ;;  %v6281_v23 = vld [vmem:[%s7624_s1 + $0x238] sm:$0xff] }
  0xcf   : > { %3378 = vmatpush.bf16.msrb.mxu3 %v6266_v24  ;;  %v6305_v24 = vld [vmem:[%s7624_s1 + $0x2f8] sm:$0xff]  ;;  %3638 = vmatpush.bf16.msra.mxu2 %v6297_v22 }
  0xd0   : > { %v2945_v30 = vpop.f32.mrf.mxu2  ;;  %v2769_v33 = vpop.f32.mrf.mxu0 }
  0xd1   : > { %v3034_v31 = vpop.f32.mrf.mxu3  ;;  %v2946_v32 = vadd.f32 %v2945_v30, %v2857_v25  ;;  %v2858_v34 = vpop.f32.mrf.mxu1 }
  0xd2   : > { %v2859_v35 = vadd.f32 %v2858_v34, %v2769_v33  ;;  %v6250_v33 = vld [vmem:[%s7624_s1 + $0x140] sm:$0xff]  ;;  %3460 = vmatpush.bf16.msra.mxu0 %v6281_v23 }
  0xd3   : > { %v6666_v36 = vadd.f32 %v3034_v31, %v2946_v32  ;;  %v5249_v34 = vld [vmem:[%s6469_s21 + $0x680] sm:$0xf]  ;;  %3200 = vmatpush.bf16.msrb.mxu1 %v6250_v33  ;;  %3727 = vmatpush.bf16.msra.mxu3 %v6305_v24 }
  0xd8   : > { %v2947_v47 = vpop.f32.mrf.mxu2  ;;  %v2772_v52 = vpop.f32.mrf.mxu0 }
  0xd9   : > { %v3036_v48 = vpop.f32.mrf.mxu3  ;;  %v2948_v51 = vadd.f32 %v2947_v47, %v2859_v35  ;;  %v2861_v53 = vpop.f32.mrf.mxu1  ;;  %v6170_v35 = vld [vmem:[%s6469_s21 + $0x6bc] sm:$0xf0]  ;;  %v5254_v47 = vor.u32 %v6162_v37, %v5251_v38  ;;  %v6194_v38 = vld [vmem:[%s6469_s21 + $0x784] sm:$0xf] }
  0xda   : > { %v2862_v56 = vadd.f32 %v2861_v53, %v2772_v52  ;;  %v5250_v46 = vor.u32 %v6170_v35, %v5249_v34  ;;  %v5262_v52 = vor.u32 %v6163_v41, %v5259_v42  ;;  %v6289_v34 = vld [vmem:[%s7624_s1 + $0x278] sm:$0xff]  ;;  %v5377_v35 = vld [vmem:[%s6469_s21 + $0x780] sm:$0xf]  ;;  %v6203_v41 = vld [vmem:[%s6469_s21 + $0x7c4] sm:$0xf0] }
  0xdb   : > { %v6679_v57 = vadd.f32 %v3036_v48, %v2948_v51  ;;  %2811 = vmatmul.bf16.gmra.mxu0 %v5122_v49  ;;  %v5258_v51 = vor.u32 %v6171_v40, %v5257_v39  ;;  %v6202_v37 = vld [vmem:[%s6469_s21 + $0x7bc] sm:$0xf0]  ;;  %v5379_v39 = vld [vmem:[%s6469_s21 + $0x7c0] sm:$0xf0]  ;;  %v5385_v40 = vld [vmem:[%s6469_s21 + $0x788] sm:$0xf]  ;;  %3549 = vmatpush.bf16.msra.mxu1 %v6289_v34 }
  0xdc   : > { %2900 = vmatmul.bf16.gmra.mxu1 %v5126_v50  ;;  %v6195_v42 = vld [vmem:[%s6469_s21 + $0x78c] sm:$0xf] }
  0xdd   : > { %2989 = vmatmul.bf16.gmra.mxu2 %v5130_v54 }
  0xde   : > { %3078 = vmatmul.bf16.gmra.mxu3 %v5134_v55 }
  0xe0   : > { %v2950_v58 = vpop.f32.mrf.mxu2  ;;  %v2774_v61 = vpop.f32.mrf.mxu0 }
  0xe1   : > { %v3039_v59 = vpop.f32.mrf.mxu3  ;;  %v2951_v60 = vadd.f32 %v2950_v58, %v2862_v56  ;;  %v2863_v62 = vpop.f32.mrf.mxu1 }
  0xe2   : > { %v2864_v63 = vadd.f32 %v2863_v62, %v2774_v61 }
  0xe3   : > { %v6681_v1 = vadd.f32 %v3039_v59, %v2951_v60 }
  0xe8   : > { %v2952_v11 = vpop.f32.mrf.mxu2  ;;  %v2777_v16 = vpop.f32.mrf.mxu0 }
  0xe9   : > { %v3041_v12 = vpop.f32.mrf.mxu3  ;;  %v2953_v15 = vadd.f32 %v2952_v11, %v2864_v63  ;;  %v2866_v17 = vpop.f32.mrf.mxu1  ;;  %v5313_v63 = vld [vmem:[%s6469_s21 + $0x700] sm:$0xf] }
  0xea   : > { %v2867_v20 = vadd.f32 %v2866_v17, %v2777_v16  ;;  %v5322_v17 = vor.u32 %v6187_v6, %v5321_v5  ;;  %v5964_v5 = vld [vmem:[%s6469_s21 + $0x4c] sm:$0xf0]  ;;  %v5956_v6 = vld [vmem:[%s6469_s21 + $0x14] sm:$0xf] }
  0xeb   : > { %v6691_v21 = vadd.f32 %v3041_v12, %v2953_v15  ;;  %2816 = vmatmul.bf16.gmra.mxu0 %v5186_v13  ;;  %v5314_v12 = vor.u32 %v6186_v2, %v5313_v63  ;;  %v5318_v13 = vor.u32 %v6178_v3, %v5315_v4  ;;  %v4433_v4 = vld [vmem:[%s6469_s21 + $0x10] sm:$0xf] }
  0xec   : > { %2905 = vmatmul.bf16.gmra.mxu1 %v5190_v14 }
  0xed   : > { %2994 = vmatmul.bf16.gmra.mxu2 %v5194_v18  ;;  %v5326_v18 = vor.u32 %v6179_v8, %v5323_v9  ;;  %v4435_v8 = vld [vmem:[%s6469_s21 + $0x50] sm:$0xf0]  ;;  %v4441_v9 = vld [vmem:[%s6469_s21 + $0x18] sm:$0xf] }
  0xee   : > { %3083 = vmatmul.bf16.gmra.mxu3 %v5198_v19 }
  0xf0   : > { %v2955_v25 = vpop.f32.mrf.mxu2  ;;  %v2779_v29 = vpop.f32.mrf.mxu0 }
  0xf1   : > { %v3044_v27 = vpop.f32.mrf.mxu3  ;;  %v2956_v28 = vadd.f32 %v2955_v25, %v2867_v20  ;;  %v2868_v30 = vpop.f32.mrf.mxu1 }
  0xf2   : > { %v2869_v31 = vadd.f32 %v2868_v30, %v2779_v29 }
  0xf3   : > { %v6702_v32 = vadd.f32 %v3044_v27, %v2956_v28 }
  0xf8   : > { %v2957_v43 = vpop.f32.mrf.mxu2  ;;  %v2782_v49 = vpop.f32.mrf.mxu0 }
  0xf9   : > { %v3046_v45 = vpop.f32.mrf.mxu3  ;;  %v2958_v48 = vadd.f32 %v2957_v43, %v2869_v31  ;;  %v2871_v50 = vpop.f32.mrf.mxu1  ;;  %v5387_v43 = vld [vmem:[%s6469_s21 + $0x7c8] sm:$0xf0] }
  0xfa   : > { %v2872_v53 = vadd.f32 %v2871_v50, %v2782_v49 }
  0xfb   : > { %v6715_v54 = vadd.f32 %v3046_v45, %v2958_v48  ;;  %2821 = vmatmul.bf16.gmra.mxu0 %v5250_v46  ;;  %v5382_v48 = vor.u32 %v6194_v38, %v5379_v39 }
  0xfc   : > { %2910 = vmatmul.bf16.gmra.mxu1 %v5254_v47  ;;  %v5378_v47 = vor.u32 %v6202_v37, %v5377_v35 }
  0xfd   : > { %2999 = vmatmul.bf16.gmra.mxu2 %v5258_v51 }
  0xfe   : > { %3088 = vmatmul.bf16.gmra.mxu3 %v5262_v52  ;;  %v5386_v52 = vor.u32 %v6203_v41, %v5385_v40  ;;  %v6288_v40 = vld [vmem:[%s7624_s1 + $0x270] sm:$0xff] }
  0xff   : > { %v4497_v41 = vld [vmem:[%s6469_s21 + $0x90] sm:$0xf]  ;;  %3550 = vmatpush.bf16.msra.mxu1 %v6288_v40  ;;  %v6279_v40 = vld [vmem:[%s7624_s1 + $0x228] sm:$0xff] }
 0x100   : > { %v2960_v55 = vpop.f32.mrf.mxu2  ;;  %v2784_v59 = vpop.f32.mrf.mxu0 }
 0x101   : > { %v3049_v56 = vpop.f32.mrf.mxu3  ;;  %v2961_v58 = vadd.f32 %v2960_v55, %v2872_v53  ;;  %v2873_v60 = vpop.f32.mrf.mxu1  ;;  %v5390_v53 = vor.u32 %v6195_v42, %v5387_v43  ;;  %v5980_v42 = vld [vmem:[%s6469_s21 + $0xcc] sm:$0xf0]  ;;  %v5972_v43 = vld [vmem:[%s6469_s21 + $0x94] sm:$0xf] }
 0x102   : > { %v2874_v61 = vadd.f32 %v2873_v60, %v2784_v59 }
 0x103   : > { %v6717_v62 = vadd.f32 %v3049_v56, %v2961_v58 }
 0x108   : > { %v2962_v10 = vpop.f32.mrf.mxu2  ;;  %v2787_v15 = vpop.f32.mrf.mxu0 }
 0x109   : > { %v3051_v11 = vpop.f32.mrf.mxu3  ;;  %v2963_v14 = vadd.f32 %v2962_v10, %v2874_v61  ;;  %v2876_v16 = vpop.f32.mrf.mxu1  ;;  %v5965_v10 = vld [vmem:[%s6469_s21 + $0x54] sm:$0xf0] }
 0x10a   : > { %v2877_v19 = vadd.f32 %v2876_v16, %v2787_v15  ;;  %v4434_v15 = vor.u32 %v5964_v5, %v4433_v4  ;;  %v4438_v16 = vor.u32 %v5956_v6, %v4435_v8  ;;  %v4442_v22 = vor.u32 %v5965_v10, %v4441_v9 }
 0x10b   : > { %v6727_v20 = vadd.f32 %v3051_v11, %v2963_v14  ;;  %2826 = vmatmul.bf16.gmra.mxu0 %v5314_v12  ;;  %v5957_v11 = vld [vmem:[%s6469_s21 + $0x1c] sm:$0xf] }
 0x10c   : > { %2915 = vmatmul.bf16.gmra.mxu1 %v5318_v13  ;;  %v4443_v12 = vld [vmem:[%s6469_s21 + $0x58] sm:$0xf0] }
 0x10d   : > { %3004 = vmatmul.bf16.gmra.mxu2 %v5322_v17  ;;  %v4446_v23 = vor.u32 %v5957_v11, %v4443_v12  ;;  %v4561_v12 = vld [vmem:[%s6469_s21 + $0x110] sm:$0xf] }
 0x10e   : > { %3093 = vmatmul.bf16.gmra.mxu3 %v5326_v18 }
 0x110   : > { %v2965_v25 = vpop.f32.mrf.mxu2  ;;  %v2789_v29 = vpop.f32.mrf.mxu0 }
 0x111   : > { %v3054_v27 = vpop.f32.mrf.mxu3  ;;  %v2966_v28 = vadd.f32 %v2965_v25, %v2877_v19  ;;  %v2878_v30 = vpop.f32.mrf.mxu1 }
 0x112   : > { %v2879_v31 = vadd.f32 %v2878_v30, %v2789_v29  ;;  %v6304_v29 = vld [vmem:[%s7624_s1 + $0x2f0] sm:$0xff] }
 0x113   : > { %v6738_v33 = vadd.f32 %v3054_v27, %v2966_v28  ;;  %v6296_v27 = vld [vmem:[%s7624_s1 + $0x2b0] sm:$0xff]  ;;  %3728 = vmatpush.bf16.msra.mxu3 %v6304_v29 }
 0x114   : > { %v6280_v28 = vld [vmem:[%s7624_s1 + $0x230] sm:$0xff]  ;;  %3639 = vmatpush.bf16.msra.mxu2 %v6296_v27 }
 0x115   : > { %3461 = vmatpush.bf16.msra.mxu0 %v6280_v28 }
 0x118   : > { %v2967_v45 = vpop.f32.mrf.mxu2  ;;  %v2792_v50 = vpop.f32.mrf.mxu0 }
 0x119   : > { %v3056_v46 = vpop.f32.mrf.mxu3  ;;  %v2968_v49 = vadd.f32 %v2967_v45, %v2879_v31  ;;  %v2881_v51 = vpop.f32.mrf.mxu1  ;;  %v4499_v45 = vld [vmem:[%s6469_s21 + $0xd0] sm:$0xf0]  ;;  %3462 = vmatpush.bf16.msra.mxu0 %v6279_v40 }
 0x11a   : > { %v2882_v55 = vadd.f32 %v2881_v51, %v2792_v50 }
 0x11b   : > { %v6751_v56 = vadd.f32 %v3056_v46, %v2968_v49  ;;  %2831 = vmatmul.bf16.gmra.mxu0 %v5378_v47  ;;  %v4505_v46 = vld [vmem:[%s6469_s21 + $0x98] sm:$0xf]  ;;  %v4507_v49 = vld [vmem:[%s6469_s21 + $0xd8] sm:$0xf0] }
 0x11c   : > { %2920 = vmatmul.bf16.gmra.mxu1 %v5382_v48  ;;  %v5981_v47 = vld [vmem:[%s6469_s21 + $0xd4] sm:$0xf0]  ;;  %v5973_v48 = vld [vmem:[%s6469_s21 + $0x9c] sm:$0xf] }
 0x11d   : > { %3009 = vmatmul.bf16.gmra.mxu2 %v5386_v52  ;;  %v4498_v52 = vor.u32 %v5980_v42, %v4497_v41  ;;  %v6303_v41 = vld [vmem:[%s7624_s1 + $0x2e8] sm:$0xff] }
 0x11e   : > { %3098 = vmatmul.bf16.gmra.mxu3 %v5390_v53  ;;  %v4502_v53 = vor.u32 %v5972_v43, %v4499_v45 }
 0x11f   : > { %3729 = vmatpush.bf16.msra.mxu3 %v6303_v41 }
 0x120   : > { %v2970_v58 = vpop.f32.mrf.mxu2  ;;  %v2794_v61 = vpop.f32.mrf.mxu0 }
 0x121   : > { %v3059_v59 = vpop.f32.mrf.mxu3  ;;  %v2971_v60 = vadd.f32 %v2970_v58, %v2882_v55  ;;  %v2883_v63 = vpop.f32.mrf.mxu1 }
 0x122   : > { %v2884_v2 = vadd.f32 %v2883_v63, %v2794_v61  ;;  %v4510_v61 = vor.u32 %v5973_v48, %v4507_v49 }
 0x123   : > { %v6753_v3 = vadd.f32 %v3059_v59, %v2971_v60  ;;  %v4506_v60 = vor.u32 %v5981_v47, %v4505_v46 }
 0x128   : > { %v2972_v13 = vpop.f32.mrf.mxu2  ;;  %v2797_v18 = vpop.f32.mrf.mxu0 }
 0x129   : > { %v3061_v14 = vpop.f32.mrf.mxu3  ;;  %v2973_v17 = vadd.f32 %v2972_v13, %v2884_v2  ;;  %v2886_v19 = vpop.f32.mrf.mxu1  ;;  %v5996_v13 = vld [vmem:[%s6469_s21 + $0x14c] sm:$0xf0] }
 0x12a   : > { %v2887_v24 = vadd.f32 %v2886_v19, %v2797_v18  ;;  %v5989_v18 = vld [vmem:[%s6469_s21 + $0x11c] sm:$0xf] }
 0x12b   : > { %v6763_v25 = vadd.f32 %v3061_v14, %v2973_v17  ;;  %3112 = vmatmul.bf16.vlgmr.msrb.gmra.mxu0 %v4434_v15  ;;  %v5988_v14 = vld [vmem:[%s6469_s21 + $0x114] sm:$0xf]  ;;  %v5997_v17 = vld [vmem:[%s6469_s21 + $0x154] sm:$0xf0]  ;;  %v4571_v19 = vld [vmem:[%s6469_s21 + $0x158] sm:$0xf0] }
 0x12c   : > { %3201 = vmatmul.bf16.vlgmr.msrb.gmra.mxu1 %v4438_v16  ;;  %v4563_v15 = vld [vmem:[%s6469_s21 + $0x150] sm:$0xf0]  ;;  %v4569_v16 = vld [vmem:[%s6469_s21 + $0x118] sm:$0xf] }
 0x12d   : > { %3290 = vmatmul.bf16.vlgmr.msrb.gmra.mxu2 %v4442_v22  ;;  %v4566_v27 = vor.u32 %v5988_v14, %v4563_v15 }
 0x12e   : > { %3379 = vmatmul.bf16.vlgmr.msrb.gmra.mxu3 %v4446_v23 }
 0x130   : > { %v2975_v30 = vpop.f32.mrf.mxu2  ;;  %v2799_v35 = vpop.f32.mrf.mxu0 }
 0x131   : > { %v3064_v31 = vpop.f32.mrf.mxu3  ;;  %v2976_v34 = vadd.f32 %v2975_v30, %v2887_v24  ;;  %v2888_v37 = vpop.f32.mrf.mxu1  ;;  %v4562_v24 = vor.u32 %v5996_v13, %v4561_v12 }
 0x132   : > { %v2889_v38 = vadd.f32 %v2888_v37, %v2799_v35 }
 0x133   : > { %v6774_v39 = vadd.f32 %v3064_v31, %v2976_v34  ;;  %v4570_v31 = vor.u32 %v5997_v17, %v4569_v16  ;;  %v4574_v34 = vor.u32 %v5989_v18, %v4571_v19 }
 0x138   : > { %v2977_v50 = vpop.f32.mrf.mxu2  ;;  %v2802_v58 = vpop.f32.mrf.mxu0 }
 0x139   : > { %v3066_v51 = vpop.f32.mrf.mxu3  ;;  %v2978_v55 = vadd.f32 %v2977_v50, %v2889_v38  ;;  %v2891_v59 = vpop.f32.mrf.mxu1  ;;  %v6295_v38 = vld [vmem:[%s7624_s1 + $0x2a8] sm:$0xff] }
 0x13a   : > { %v2892_v63 = vadd.f32 %v2891_v59, %v2802_v58  ;;  %3640 = vmatpush.bf16.msra.mxu2 %v6295_v38  ;;  %v6287_v50 = vld [vmem:[%s7624_s1 + $0x268] sm:$0xff]  ;;  %v4633_v58 = vld [vmem:[%s6469_s21 + $0x198] sm:$0xf]  ;;  %v4699_v38 = vld [vmem:[%s6469_s21 + $0x258] sm:$0xf0] }
 0x13b   : > { %v6787_v2 = vadd.f32 %v3066_v51, %v2978_v55  ;;  %3117 = vmatmul.bf16.gmra.mxu0 %v4498_v52  ;;  %v4625_v51 = vld [vmem:[%s6469_s21 + $0x190] sm:$0xf]  ;;  %v4627_v55 = vld [vmem:[%s6469_s21 + $0x1d0] sm:$0xf0]  ;;  %3551 = vmatpush.bf16.msra.mxu1 %v6287_v50  ;;  %v6013_v59 = vld [vmem:[%s6469_s21 + $0x1d4] sm:$0xf0] }
 0x13c   : > { %3206 = vmatmul.bf16.gmra.mxu1 %v4502_v53  ;;  %v6012_v52 = vld [vmem:[%s6469_s21 + $0x1cc] sm:$0xf0]  ;;  %v6004_v53 = vld [vmem:[%s6469_s21 + $0x194] sm:$0xf]  ;;  %v4634_v12 = vor.u32 %v6013_v59, %v4633_v58  ;;  %v6302_v58 = vld [vmem:[%s7624_s1 + $0x2e0] sm:$0xff] }
 0x13d   : > { %3295 = vmatmul.bf16.gmra.mxu2 %v4506_v60  ;;  %v6005_v60 = vld [vmem:[%s6469_s21 + $0x19c] sm:$0xf]  ;;  %3730 = vmatpush.bf16.msra.mxu3 %v6302_v58  ;;  %v6061_v58 = vld [vmem:[%s6469_s21 + $0x354] sm:$0xf0] }
 0x13e   : > { %3384 = vmatmul.bf16.gmra.mxu3 %v4510_v61  ;;  %v4635_v61 = vld [vmem:[%s6469_s21 + $0x1d8] sm:$0xf0] }
 0x13f   : > { %v4638_v13 = vor.u32 %v6005_v60, %v4635_v61 }
 0x140   : > { %v2980_v4 = vpop.f32.mrf.mxu2  ;;  %v2804_v8 = vpop.f32.mrf.mxu0 }
 0x141   : > { %v3069_v5 = vpop.f32.mrf.mxu3  ;;  %v2981_v6 = vadd.f32 %v2980_v4, %v2892_v63  ;;  %v2893_v9 = vpop.f32.mrf.mxu1 }
 0x142   : > { %v2894_v10 = vadd.f32 %v2893_v9, %v2804_v8 }
 0x143   : > { %v6789_v11 = vadd.f32 %v3069_v5, %v2981_v6  ;;  %v4626_v5 = vor.u32 %v6012_v52, %v4625_v51  ;;  %v4630_v6 = vor.u32 %v6004_v53, %v4627_v55  ;;  %v6294_v53 = vld [vmem:[%s7624_s1 + $0x2a0] sm:$0xff] }
 0x144   : > { %v6278_v55 = vld [vmem:[%s7624_s1 + $0x220] sm:$0xff]  ;;  %3641 = vmatpush.bf16.msra.mxu2 %v6294_v53  ;;  %v4819_v53 = vld [vmem:[%s6469_s21 + $0x350] sm:$0xf0] }
 0x145   : > { %3463 = vmatpush.bf16.msra.mxu0 %v6278_v55  ;;  %v4825_v55 = vld [vmem:[%s6469_s21 + $0x318] sm:$0xf] }
 0x148   : > { %v2982_v22 = vpop.f32.mrf.mxu2  ;;  %v2807_v29 = vpop.f32.mrf.mxu0 }
 0x149   : > { %v3071_v23 = vpop.f32.mrf.mxu3  ;;  %v2983_v28 = vadd.f32 %v2982_v22, %v2894_v10  ;;  %v2896_v30 = vpop.f32.mrf.mxu1 }
 0x14a   : > { %v2897_v35 = vadd.f32 %v2896_v30, %v2807_v29  ;;  %v6020_v29 = vld [vmem:[%s6469_s21 + $0x214] sm:$0xf] }
 0x14b   : > { %v6799_v37 = vadd.f32 %v3071_v23, %v2983_v28  ;;  %3122 = vmatmul.bf16.gmra.mxu0 %v4562_v24  ;;  %v6028_v28 = vld [vmem:[%s6469_s21 + $0x24c] sm:$0xf0]  ;;  %v4691_v30 = vld [vmem:[%s6469_s21 + $0x250] sm:$0xf0] }
 0x14c   : > { %3211 = vmatmul.bf16.gmra.mxu1 %v4566_v27  ;;  %v4689_v27 = vld [vmem:[%s6469_s21 + $0x210] sm:$0xf] }
 0x14d   : > { %3300 = vmatmul.bf16.gmra.mxu2 %v4570_v31  ;;  %v4697_v31 = vld [vmem:[%s6469_s21 + $0x218] sm:$0xf] }
 0x14e   : > { %3389 = vmatmul.bf16.gmra.mxu3 %v4574_v34  ;;  %v6029_v34 = vld [vmem:[%s6469_s21 + $0x254] sm:$0xf0] }
 0x150   : > { %v2985_v42 = vpop.f32.mrf.mxu2  ;;  %v2809_v46 = vpop.f32.mrf.mxu0 }
 0x151   : > { %v3074_v43 = vpop.f32.mrf.mxu3  ;;  %v2986_v45 = vadd.f32 %v2985_v42, %v2897_v35  ;;  %v2898_v47 = vpop.f32.mrf.mxu1  ;;  %v6021_v35 = vld [vmem:[%s6469_s21 + $0x21c] sm:$0xf]  ;;  %v4690_v42 = vor.u32 %v6028_v28, %v4689_v27 }
 0x152   : > { %v2899_v48 = vadd.f32 %v2898_v47, %v2809_v46  ;;  %v4702_v50 = vor.u32 %v6021_v35, %v4699_v38 }
 0x153   : > { %v6810_v49 = vadd.f32 %v3074_v43, %v2986_v45  ;;  %v4694_v43 = vor.u32 %v6020_v29, %v4691_v30 }
 0x158   : > { %v2987_v63 = vpop.f32.mrf.mxu2  ;;  %v2812_v9 = vpop.f32.mrf.mxu0 }
 0x159   : > { %v3076_v4 = vpop.f32.mrf.mxu3  ;;  %v2988_v8 = vadd.f32 %v2987_v63, %v2899_v48  ;;  %v2901_v10 = vpop.f32.mrf.mxu1  ;;  %v4698_v48 = vor.u32 %v6029_v34, %v4697_v31 }
 0x15a   : > { %v2902_v14 = vadd.f32 %v2901_v10, %v2812_v9  ;;  %v4753_v9 = vld [vmem:[%s6469_s21 + $0x290] sm:$0xf] }
 0x15b   : > { %v6823_v15 = vadd.f32 %v3076_v4, %v2988_v8  ;;  %3127 = vmatmul.bf16.gmra.mxu0 %v4626_v5  ;;  %v6286_v8 = vld [vmem:[%s7624_s1 + $0x260] sm:$0xff]  ;;  %v6044_v10 = vld [vmem:[%s6469_s21 + $0x2cc] sm:$0xf0] }
 0x15c   : > { %3216 = vmatmul.bf16.gmra.mxu1 %v4630_v6 }
 0x15d   : > { %3305 = vmatmul.bf16.gmra.mxu2 %v4634_v12  ;;  %v6036_v12 = vld [vmem:[%s6469_s21 + $0x294] sm:$0xf]  ;;  %3552 = vmatpush.bf16.msra.mxu1 %v6286_v8 }
 0x15e   : > { %3394 = vmatmul.bf16.gmra.mxu3 %v4638_v13  ;;  %v4755_v13 = vld [vmem:[%s6469_s21 + $0x2d0] sm:$0xf0] }
 0x15f   : > { %v4758_v27 = vor.u32 %v6036_v12, %v4755_v13  ;;  %v4826_v12 = vor.u32 %v6061_v58, %v4825_v55 }
 0x160   : > { %v2990_v16 = vpop.f32.mrf.mxu2  ;;  %v2814_v19 = vpop.f32.mrf.mxu0 }
 0x161   : > { %v3079_v17 = vpop.f32.mrf.mxu3  ;;  %v2991_v18 = vadd.f32 %v2990_v16, %v2902_v14  ;;  %v2903_v22 = vpop.f32.mrf.mxu1  ;;  %v4761_v14 = vld [vmem:[%s6469_s21 + $0x298] sm:$0xf] }
 0x162   : > { %v2904_v23 = vadd.f32 %v2903_v22, %v2814_v19  ;;  %v6045_v16 = vld [vmem:[%s6469_s21 + $0x2d4] sm:$0xf0] }
 0x163   : > { %v6825_v24 = vadd.f32 %v3079_v17, %v2991_v18  ;;  %v6037_v17 = vld [vmem:[%s6469_s21 + $0x29c] sm:$0xf]  ;;  %v4762_v31 = vor.u32 %v6045_v16, %v4761_v14 }
 0x164   : > { %v4763_v18 = vld [vmem:[%s6469_s21 + $0x2d8] sm:$0xf0] }
 0x165   : > { %v4766_v34 = vor.u32 %v6037_v17, %v4763_v18  ;;  %v6293_v17 = vld [vmem:[%s7624_s1 + $0x298] sm:$0xff] }
 0x166   : > { %v6277_v18 = vld [vmem:[%s7624_s1 + $0x218] sm:$0xff]  ;;  %3642 = vmatpush.bf16.msra.mxu2 %v6293_v17 }
 0x167   : > { %3464 = vmatpush.bf16.msra.mxu0 %v6277_v18  ;;  %v4945_v18 = vld [vmem:[%s6469_s21 + $0x410] sm:$0xf] }
 0x168   : > { %v2992_v40 = vpop.f32.mrf.mxu2  ;;  %v2817_v46 = vpop.f32.mrf.mxu0 }
 0x169   : > { %v3081_v41 = vpop.f32.mrf.mxu3  ;;  %v2993_v45 = vadd.f32 %v2992_v40, %v2904_v23  ;;  %v2906_v47 = vpop.f32.mrf.mxu1  ;;  %v4754_v23 = vor.u32 %v6044_v10, %v4753_v9 }
 0x16a   : > { %v2907_v51 = vadd.f32 %v2906_v47, %v2817_v46 }
 0x16b   : > { %v6835_v52 = vadd.f32 %v3081_v41, %v2993_v45  ;;  %3132 = vmatmul.bf16.gmra.mxu0 %v4690_v42 }
 0x16c   : > { %3221 = vmatmul.bf16.gmra.mxu1 %v4694_v43 }
 0x16d   : > { %3310 = vmatmul.bf16.gmra.mxu2 %v4698_v48  ;;  %v4817_v48 = vld [vmem:[%s6469_s21 + $0x310] sm:$0xf] }
 0x16e   : > { %3399 = vmatmul.bf16.gmra.mxu3 %v4702_v50  ;;  %v6060_v50 = vld [vmem:[%s6469_s21 + $0x34c] sm:$0xf0] }
 0x170   : > { %v2995_v59 = vpop.f32.mrf.mxu2  ;;  %v2819_v63 = vpop.f32.mrf.mxu0 }
 0x171   : > { %v3084_v60 = vpop.f32.mrf.mxu3  ;;  %v2996_v61 = vadd.f32 %v2995_v59, %v2907_v51  ;;  %v2908_v4 = vpop.f32.mrf.mxu1  ;;  %v6052_v51 = vld [vmem:[%s6469_s21 + $0x314] sm:$0xf]  ;;  %v6053_v59 = vld [vmem:[%s6469_s21 + $0x31c] sm:$0xf] }
 0x172   : > { %v2909_v5 = vadd.f32 %v2908_v4, %v2819_v63  ;;  %v4818_v4 = vor.u32 %v6060_v50, %v4817_v48  ;;  %v4891_v48 = vld [vmem:[%s6469_s21 + $0x3d8] sm:$0xf0] }
 0x173   : > { %v6846_v6 = vadd.f32 %v3084_v60, %v2996_v61  ;;  %v4827_v60 = vld [vmem:[%s6469_s21 + $0x358] sm:$0xf0] }
 0x174   : > { %v4830_v13 = vor.u32 %v6053_v59, %v4827_v60 }
 0x178   : > { %v2997_v19 = vpop.f32.mrf.mxu2  ;;  %v2822_v29 = vpop.f32.mrf.mxu0 }
 0x179   : > { %v3086_v22 = vpop.f32.mrf.mxu3  ;;  %v2998_v28 = vadd.f32 %v2997_v19, %v2909_v5  ;;  %v2911_v30 = vpop.f32.mrf.mxu1  ;;  %v4822_v5 = vor.u32 %v6052_v51, %v4819_v53  ;;  %v6301_v19 = vld [vmem:[%s7624_s1 + $0x2d8] sm:$0xff] }
 0x17a   : > { %v2912_v35 = vadd.f32 %v2911_v30, %v2822_v29  ;;  %3731 = vmatpush.bf16.msra.mxu3 %v6301_v19  ;;  %v6092_v19 = vld [vmem:[%s6469_s21 + $0x44c] sm:$0xf0] }
 0x17b   : > { %v6859_v38 = vadd.f32 %v3086_v22, %v2998_v28  ;;  %3137 = vmatmul.bf16.gmra.mxu0 %v4754_v23 }
 0x17c   : > { %3226 = vmatmul.bf16.gmra.mxu1 %v4758_v27 }
 0x17d   : > { %3315 = vmatmul.bf16.gmra.mxu2 %v4762_v31 }
 0x17e   : > { %3404 = vmatmul.bf16.gmra.mxu3 %v4766_v34  ;;  %v6285_v34 = vld [vmem:[%s7624_s1 + $0x258] sm:$0xff] }
 0x17f   : > { %3553 = vmatpush.bf16.msra.mxu1 %v6285_v34 }
 0x180   : > { %v3000_v40 = vpop.f32.mrf.mxu2  ;;  %v2824_v43 = vpop.f32.mrf.mxu0 }
 0x181   : > { %v3089_v41 = vpop.f32.mrf.mxu3  ;;  %v3001_v42 = vadd.f32 %v3000_v40, %v2912_v35  ;;  %v2913_v45 = vpop.f32.mrf.mxu1  ;;  %v4881_v35 = vld [vmem:[%s6469_s21 + $0x390] sm:$0xf] }
 0x182   : > { %v2914_v46 = vadd.f32 %v2913_v45, %v2824_v43  ;;  %v6076_v40 = vld [vmem:[%s6469_s21 + $0x3cc] sm:$0xf0]  ;;  %v4889_v43 = vld [vmem:[%s6469_s21 + $0x398] sm:$0xf] }
 0x183   : > { %v6861_v47 = vadd.f32 %v3089_v41, %v3001_v42  ;;  %v6068_v41 = vld [vmem:[%s6469_s21 + $0x394] sm:$0xf]  ;;  %v6077_v45 = vld [vmem:[%s6469_s21 + $0x3d4] sm:$0xf0]  ;;  %v4882_v53 = vor.u32 %v6076_v40, %v4881_v35  ;;  %v4946_v40 = vor.u32 %v6092_v19, %v4945_v18 }
 0x184   : > { %v4883_v42 = vld [vmem:[%s6469_s21 + $0x3d0] sm:$0xf0] }
 0x185   : > { %v4886_v55 = vor.u32 %v6068_v41, %v4883_v42  ;;  %v6100_v18 = vld [vmem:[%s6469_s21 + $0x494] sm:$0xf] }
 0x186   : > { %v5011_v19 = vld [vmem:[%s6469_s21 + $0x4d0] sm:$0xf0] }
 0x188   : > { %v3002_v61 = vpop.f32.mrf.mxu2  ;;  %v2827_v9 = vpop.f32.mrf.mxu0 }
 0x189   : > { %v3091_v63 = vpop.f32.mrf.mxu3  ;;  %v3003_v8 = vadd.f32 %v3002_v61, %v2914_v46  ;;  %v2916_v10 = vpop.f32.mrf.mxu1  ;;  %v6069_v46 = vld [vmem:[%s6469_s21 + $0x39c] sm:$0xf]  ;;  %v4890_v61 = vor.u32 %v6077_v45, %v4889_v43 }
 0x18a   : > { %v2917_v14 = vadd.f32 %v2916_v10, %v2827_v9 }
 0x18b   : > { %v6871_v16 = vadd.f32 %v3091_v63, %v3003_v8  ;;  %3142 = vmatmul.bf16.gmra.mxu0 %v4818_v4  ;;  %v4894_v63 = vor.u32 %v6069_v46, %v4891_v48 }
 0x18c   : > { %3231 = vmatmul.bf16.gmra.mxu1 %v4822_v5 }
 0x18d   : > { %3320 = vmatmul.bf16.gmra.mxu2 %v4826_v12 }
 0x18e   : > { %3409 = vmatmul.bf16.gmra.mxu3 %v4830_v13 }
 0x190   : > { %v3005_v22 = vpop.f32.mrf.mxu2  ;;  %v2829_v28 = vpop.f32.mrf.mxu0 }
 0x191   : > { %v3094_v23 = vpop.f32.mrf.mxu3  ;;  %v3006_v27 = vadd.f32 %v3005_v22, %v2917_v14  ;;  %v2918_v29 = vpop.f32.mrf.mxu1  ;;  %v6084_v22 = vld [vmem:[%s6469_s21 + $0x414] sm:$0xf] }
 0x192   : > { %v2919_v30 = vadd.f32 %v2918_v29, %v2829_v28  ;;  %v6093_v28 = vld [vmem:[%s6469_s21 + $0x454] sm:$0xf0]  ;;  %v6085_v29 = vld [vmem:[%s6469_s21 + $0x41c] sm:$0xf] }
 0x193   : > { %v6882_v31 = vadd.f32 %v3094_v23, %v3006_v27  ;;  %v4947_v23 = vld [vmem:[%s6469_s21 + $0x450] sm:$0xf0]  ;;  %v4953_v27 = vld [vmem:[%s6469_s21 + $0x418] sm:$0xf] }
 0x194   : > { %v4950_v41 = vor.u32 %v6084_v22, %v4947_v23  ;;  %v4954_v46 = vor.u32 %v6093_v28, %v4953_v27  ;;  %v5017_v22 = vld [vmem:[%s6469_s21 + $0x498] sm:$0xf]  ;;  %v6101_v27 = vld [vmem:[%s6469_s21 + $0x49c] sm:$0xf] }
 0x195   : > { %v6109_v23 = vld [vmem:[%s6469_s21 + $0x4d4] sm:$0xf0]  ;;  %v5019_v28 = vld [vmem:[%s6469_s21 + $0x4d8] sm:$0xf0] }
 0x198   : > { %v3007_v50 = vpop.f32.mrf.mxu2  ;;  %v2832_v59 = vpop.f32.mrf.mxu0 }
 0x199   : > { %v3096_v51 = vpop.f32.mrf.mxu3  ;;  %v3008_v58 = vadd.f32 %v3007_v50, %v2919_v30  ;;  %v2921_v60 = vpop.f32.mrf.mxu1  ;;  %v4955_v30 = vld [vmem:[%s6469_s21 + $0x458] sm:$0xf0] }
 0x19a   : > { %v2922_v4 = vadd.f32 %v2921_v60, %v2832_v59  ;;  %v4958_v48 = vor.u32 %v6085_v29, %v4955_v30 }
 0x19b   : > { %v6895_v5 = vadd.f32 %v3096_v51, %v3008_v58  ;;  %3147 = vmatmul.bf16.gmra.mxu0 %v4882_v53  ;;  %v6276_v58 = vld [vmem:[%s7624_s1 + $0x210] sm:$0xff] }
 0x19c   : > { %3236 = vmatmul.bf16.gmra.mxu1 %v4886_v55  ;;  %v6292_v55 = vld [vmem:[%s7624_s1 + $0x290] sm:$0xff]  ;;  %3465 = vmatpush.bf16.msra.mxu0 %v6276_v58 }
 0x19d   : > { %3325 = vmatmul.bf16.gmra.mxu2 %v4890_v61 }
 0x19e   : > { %3414 = vmatmul.bf16.gmra.mxu3 %v4894_v63  ;;  %3643 = vmatpush.bf16.msra.mxu2 %v6292_v55 }
 0x1a0   : > { %v3010_v8 = vpop.f32.mrf.mxu2  ;;  %v2834_v12 = vpop.f32.mrf.mxu0 }
 0x1a1   : > { %v3099_v9 = vpop.f32.mrf.mxu3  ;;  %v3011_v10 = vadd.f32 %v3010_v8, %v2922_v4  ;;  %v2923_v13 = vpop.f32.mrf.mxu1 }
 0x1a2   : > { %v2924_v14 = vadd.f32 %v2923_v13, %v2834_v12  ;;  %v5009_v13 = vld [vmem:[%s6469_s21 + $0x490] sm:$0xf] }
 0x1a3   : > { %v6897_v17 = vadd.f32 %v3099_v9, %v3011_v10  ;;  %v6284_v10 = vld [vmem:[%s7624_s1 + $0x250] sm:$0xff] }
 0x1a4   : > { %3554 = vmatpush.bf16.msra.mxu1 %v6284_v10  ;;  %v5081_v10 = vld [vmem:[%s6469_s21 + $0x518] sm:$0xf] }
 0x1a8   : > { %v3012_v34 = vpop.f32.mrf.mxu2  ;;  %v3113_v43 = vpop.f32.mrf.mxu0 }
 0x1a9   : > { %v3101_v35 = vpop.f32.mrf.mxu3  ;;  %v3013_v42 = vadd.f32 %v3012_v34, %v2924_v14  ;;  %v3202_v45 = vpop.f32.mrf.mxu1  ;;  %v3114_v50 = vadd.f32 %v3113_v43, %v6630_v44  ;;  %v6300_v44 = vld [vmem:[%s7624_s1 + $0x2d0] sm:$0xff]  ;;  %v5022_v43 = vor.u32 %v6101_v27, %v5019_v28 }
 0x1aa   : > { %3732 = vmatpush.bf16.msra.mxu3 %v6300_v44  ;;  %v6108_v14 = vld [vmem:[%s6469_s21 + $0x4cc] sm:$0xf0] }
 0x1ab   : > { %v6908_v51 = vadd.f32 %v3101_v35, %v3013_v42  ;;  %v3203_v53 = vadd.f32 %v3202_v45, %v3114_v50  ;;  %3152 = vmatmul.bf16.gmra.mxu0 %v4946_v40  ;;  %v5010_v34 = vor.u32 %v6108_v14, %v5009_v13  ;;  %v5018_v42 = vor.u32 %v6109_v23, %v5017_v22  ;;  %v6117_v13 = vld [vmem:[%s6469_s21 + $0x51c] sm:$0xf] }
 0x1ac   : > { %3241 = vmatmul.bf16.gmra.mxu1 %v4950_v41  ;;  %v5083_v14 = vld [vmem:[%s6469_s21 + $0x558] sm:$0xf0] }
 0x1ad   : > { %3330 = vmatmul.bf16.gmra.mxu2 %v4954_v46 }
 0x1ae   : > { %3419 = vmatmul.bf16.gmra.mxu3 %v4958_v48 }
 0x1b0   : > { %v3291_v59 = vpop.f32.mrf.mxu2  ;;  %v3115_v63 = vpop.f32.mrf.mxu0 }
 0x1b1   : > { %v3380_v60 = vpop.f32.mrf.mxu3  ;;  %v3292_v61 = vadd.f32 %v3291_v59, %v3203_v53  ;;  %v3204_v4 = vpop.f32.mrf.mxu1  ;;  %v3116_v8 = vadd.f32 %v3115_v63, %v6643_v0  ;;  %v5014_v0 = vor.u32 %v6100_v18, %v5011_v19  ;;  %v6124_v63 = vld [vmem:[%s6469_s21 + $0x54c] sm:$0xf0] }
 0x1b3   : > { %v6920_v9 = vadd.f32 %v3380_v60, %v3292_v61  ;;  %v3205_v12 = vadd.f32 %v3204_v4, %v3116_v8  ;;  %v5073_v61 = vld [vmem:[%s6469_s21 + $0x510] sm:$0xf]  ;;  %v6116_v4 = vld [vmem:[%s6469_s21 + $0x514] sm:$0xf] }
 0x1b4   : > { %v5075_v8 = vld [vmem:[%s6469_s21 + $0x550] sm:$0xf0]  ;;  %v5074_v22 = vor.u32 %v6124_v63, %v5073_v61 }
 0x1b5   : > { %v5078_v23 = vor.u32 %v6116_v4, %v5075_v8  ;;  %v6132_v61 = vld [vmem:[%s6469_s21 + $0x594] sm:$0xf]  ;;  %v5145_v4 = vld [vmem:[%s6469_s21 + $0x598] sm:$0xf] }
 0x1b6   : > { %v5139_v63 = vld [vmem:[%s6469_s21 + $0x5d0] sm:$0xf0]  ;;  %v6141_v8 = vld [vmem:[%s6469_s21 + $0x5d4] sm:$0xf0] }
 0x1b8   : > { %v3293_v29 = vpop.f32.mrf.mxu2  ;;  %v3118_v40 = vpop.f32.mrf.mxu0 }
 0x1b9   : > { %v3382_v30 = vpop.f32.mrf.mxu3  ;;  %v3294_v35 = vadd.f32 %v3293_v29, %v3205_v12  ;;  %v3207_v41 = vpop.f32.mrf.mxu1  ;;  %v3119_v45 = vadd.f32 %v3118_v40, %v6645_v7  ;;  %v6125_v12 = vld [vmem:[%s6469_s21 + $0x554] sm:$0xf0]  ;;  %v6291_v40 = vld [vmem:[%s7624_s1 + $0x288] sm:$0xff] }
 0x1ba   : > { %3644 = vmatpush.bf16.msra.mxu2 %v6291_v40 }
 0x1bb   : > { %v6934_v46 = vadd.f32 %v3382_v30, %v3294_v35  ;;  %v3208_v48 = vadd.f32 %v3207_v41, %v3119_v45  ;;  %3157 = vmatmul.bf16.gmra.mxu0 %v5010_v34  ;;  %v5082_v30 = vor.u32 %v6125_v12, %v5081_v10  ;;  %v6275_v41 = vld [vmem:[%s7624_s1 + $0x208] sm:$0xff]  ;;  %v6133_v10 = vld [vmem:[%s6469_s21 + $0x59c] sm:$0xf] }
 0x1bc   : > { %3246 = vmatmul.bf16.gmra.mxu1 %v5014_v0  ;;  %3466 = vmatpush.bf16.msra.mxu0 %v6275_v41  ;;  %v5147_v12 = vld [vmem:[%s6469_s21 + $0x5d8] sm:$0xf0] }
 0x1bd   : > { %3335 = vmatmul.bf16.gmra.mxu2 %v5018_v42 }
 0x1be   : > { %3424 = vmatmul.bf16.gmra.mxu3 %v5022_v43 }
 0x1c0   : > { %v3296_v50 = vpop.f32.mrf.mxu2  ;;  %v3120_v58 = vpop.f32.mrf.mxu0 }
 0x1c1   : > { %v3385_v53 = vpop.f32.mrf.mxu3  ;;  %v3297_v55 = vadd.f32 %v3296_v50, %v3208_v48  ;;  %v3209_v44 = vpop.f32.mrf.mxu1  ;;  %v3121_v7 = vadd.f32 %v3120_v58, %v6655_v26  ;;  %v5086_v26 = vor.u32 %v6117_v13, %v5083_v14  ;;  %v6283_v58 = vld [vmem:[%s7624_s1 + $0x248] sm:$0xff] }
 0x1c2   : > { %3555 = vmatpush.bf16.msra.mxu1 %v6283_v58  ;;  %v5209_v58 = vld [vmem:[%s6469_s21 + $0x618] sm:$0xf] }
 0x1c3   : > { %v6937_v59 = vadd.f32 %v3385_v53, %v3297_v55  ;;  %v3210_v60 = vadd.f32 %v3209_v44, %v3121_v7  ;;  %v5137_v7 = vld [vmem:[%s6469_s21 + $0x590] sm:$0xf] }
 0x1c8   : > { %v3298_v18 = vpop.f32.mrf.mxu2  ;;  %v3123_v28 = vpop.f32.mrf.mxu0 }
 0x1c9   : > { %v3387_v19 = vpop.f32.mrf.mxu3  ;;  %v3299_v27 = vadd.f32 %v3298_v18, %v3210_v60  ;;  %v3212_v29 = vpop.f32.mrf.mxu1  ;;  %v3124_v34 = vadd.f32 %v3123_v28, %v6666_v36  ;;  %v6299_v36 = vld [vmem:[%s7624_s1 + $0x2c8] sm:$0xff]  ;;  %v6140_v60 = vld [vmem:[%s6469_s21 + $0x5cc] sm:$0xf0]  ;;  %v5150_v28 = vor.u32 %v6133_v10, %v5147_v12 }
 0x1ca   : > { %3733 = vmatpush.bf16.msra.mxu3 %v6299_v36  ;;  %v5138_v18 = vor.u32 %v6140_v60, %v5137_v7  ;;  %v6149_v7 = vld [vmem:[%s6469_s21 + $0x61c] sm:$0xf] }
 0x1cb   : > { %v6948_v0 = vadd.f32 %v3387_v19, %v3299_v27  ;;  %v3213_v35 = vadd.f32 %v3212_v29, %v3124_v34  ;;  %3162 = vmatmul.bf16.gmra.mxu0 %v5074_v22  ;;  %v5146_v27 = vor.u32 %v6141_v8, %v5145_v4  ;;  %v5211_v60 = vld [vmem:[%s6469_s21 + $0x658] sm:$0xf0] }
 0x1cc   : > { %3251 = vmatmul.bf16.gmra.mxu1 %v5078_v23 }
 0x1cd   : > { %3340 = vmatmul.bf16.gmra.mxu2 %v5082_v30 }
 0x1ce   : > { %3429 = vmatmul.bf16.gmra.mxu3 %v5086_v26 }
 0x1d0   : > { %v3301_v42 = vpop.f32.mrf.mxu2  ;;  %v3125_v48 = vpop.f32.mrf.mxu0 }
 0x1d1   : > { %v3390_v43 = vpop.f32.mrf.mxu3  ;;  %v3302_v45 = vadd.f32 %v3301_v42, %v3213_v35  ;;  %v3214_v50 = vpop.f32.mrf.mxu1  ;;  %v3126_v53 = vadd.f32 %v3125_v48, %v6679_v57  ;;  %v5142_v57 = vor.u32 %v6132_v61, %v5139_v63  ;;  %v6156_v48 = vld [vmem:[%s6469_s21 + $0x64c] sm:$0xf0] }
 0x1d3   : > { %v6960_v55 = vadd.f32 %v3390_v43, %v3302_v45  ;;  %v3215_v44 = vadd.f32 %v3214_v50, %v3126_v53  ;;  %v5201_v45 = vld [vmem:[%s6469_s21 + $0x610] sm:$0xf]  ;;  %v6148_v50 = vld [vmem:[%s6469_s21 + $0x614] sm:$0xf] }
 0x1d4   : > { %v5203_v53 = vld [vmem:[%s6469_s21 + $0x650] sm:$0xf0]  ;;  %v5202_v4 = vor.u32 %v6156_v48, %v5201_v45 }
 0x1d5   : > { %v5206_v8 = vor.u32 %v6148_v50, %v5203_v53  ;;  %v6164_v45 = vld [vmem:[%s6469_s21 + $0x694] sm:$0xf]  ;;  %v5273_v50 = vld [vmem:[%s6469_s21 + $0x698] sm:$0xf] }
 0x1d6   : > { %v5267_v48 = vld [vmem:[%s6469_s21 + $0x6d0] sm:$0xf0]  ;;  %v6173_v53 = vld [vmem:[%s6469_s21 + $0x6d4] sm:$0xf0] }
 0x1d8   : > { %v3303_v13 = vpop.f32.mrf.mxu2  ;;  %v3128_v22 = vpop.f32.mrf.mxu0 }
 0x1d9   : > { %v3392_v14 = vpop.f32.mrf.mxu3  ;;  %v3304_v19 = vadd.f32 %v3303_v13, %v3215_v44  ;;  %v3217_v23 = vpop.f32.mrf.mxu1  ;;  %v3129_v29 = vadd.f32 %v3128_v22, %v6681_v1  ;;  %v6157_v44 = vld [vmem:[%s6469_s21 + $0x654] sm:$0xf0]  ;;  %v6290_v22 = vld [vmem:[%s7624_s1 + $0x280] sm:$0xff] }
 0x1da   : > { %3645 = vmatpush.bf16.msra.mxu2 %v6290_v22 }
 0x1db   : > { %v6974_v30 = vadd.f32 %v3392_v14, %v3304_v19  ;;  %v3218_v26 = vadd.f32 %v3217_v23, %v3129_v29  ;;  %3167 = vmatmul.bf16.gmra.mxu0 %v5138_v18  ;;  %v5210_v14 = vor.u32 %v6157_v44, %v5209_v58  ;;  %v6274_v23 = vld [vmem:[%s7624_s1 + $0x200] sm:$0xff]  ;;  %v6165_v58 = vld [vmem:[%s6469_s21 + $0x69c] sm:$0xf] }
 0x1dc   : > { %3256 = vmatmul.bf16.gmra.mxu1 %v5142_v57  ;;  %3467 = vmatpush.bf16.msra.mxu0 %v6274_v23  ;;  %v5275_v44 = vld [vmem:[%s6469_s21 + $0x6d8] sm:$0xf0] }
 0x1dd   : > { %3345 = vmatmul.bf16.gmra.mxu2 %v5146_v27 }
 0x1de   : > { %3434 = vmatmul.bf16.gmra.mxu3 %v5150_v28 }
 0x1e0   : > { %v3306_v34 = vpop.f32.mrf.mxu2  ;;  %v3130_v41 = vpop.f32.mrf.mxu0 }
 0x1e1   : > { %v3395_v35 = vpop.f32.mrf.mxu3  ;;  %v3307_v40 = vadd.f32 %v3306_v34, %v3218_v26  ;;  %v3219_v36 = vpop.f32.mrf.mxu1  ;;  %v3131_v1 = vadd.f32 %v3130_v41, %v6691_v21  ;;  %v5214_v21 = vor.u32 %v6149_v7, %v5211_v60  ;;  %v6282_v41 = vld [vmem:[%s7624_s1 + $0x240] sm:$0xff] }
 0x1e2   : > { %3556 = vmatpush.bf16.msra.mxu1 %v6282_v41  ;;  %v5337_v41 = vld [vmem:[%s6469_s21 + $0x718] sm:$0xf] }
 0x1e3   : > { %v6977_v42 = vadd.f32 %v3395_v35, %v3307_v40  ;;  %v3220_v43 = vadd.f32 %v3219_v36, %v3131_v1  ;;  %v5265_v1 = vld [vmem:[%s6469_s21 + $0x690] sm:$0xf] }
 0x1e8   : > { %v3308_v61 = vpop.f32.mrf.mxu2  ;;  %v3133_v12 = vpop.f32.mrf.mxu0 }
 0x1e9   : > { %v3397_v63 = vpop.f32.mrf.mxu3  ;;  %v3309_v10 = vadd.f32 %v3308_v61, %v3220_v43  ;;  %v3222_v13 = vpop.f32.mrf.mxu1  ;;  %v3134_v18 = vadd.f32 %v3133_v12, %v6702_v32  ;;  %v6298_v32 = vld [vmem:[%s7624_s1 + $0x2c0] sm:$0xff]  ;;  %v6172_v43 = vld [vmem:[%s6469_s21 + $0x6cc] sm:$0xf0]  ;;  %v5278_v12 = vor.u32 %v6165_v58, %v5275_v44 }
 0x1ea   : > { %3734 = vmatpush.bf16.msra.mxu3 %v6298_v32  ;;  %v5266_v61 = vor.u32 %v6172_v43, %v5265_v1  ;;  %v6181_v1 = vld [vmem:[%s6469_s21 + $0x71c] sm:$0xf] }
 0x1eb   : > { %v6988_v57 = vadd.f32 %v3397_v63, %v3309_v10  ;;  %v3223_v19 = vadd.f32 %v3222_v13, %v3134_v18  ;;  %3172 = vmatmul.bf16.gmra.mxu0 %v5202_v4  ;;  %v5274_v10 = vor.u32 %v6173_v53, %v5273_v50  ;;  %v5339_v43 = vld [vmem:[%s6469_s21 + $0x758] sm:$0xf0] }
 0x1ec   : > { %3261 = vmatmul.bf16.gmra.mxu1 %v5206_v8 }
 0x1ed   : > { %3350 = vmatmul.bf16.gmra.mxu2 %v5210_v14 }
 0x1ee   : > { %3439 = vmatmul.bf16.gmra.mxu3 %v5214_v21 }
 0x1f0   : > { %v3311_v27 = vpop.f32.mrf.mxu2  ;;  %v3135_v26 = vpop.f32.mrf.mxu0 }
 0x1f1   : > { %v3400_v28 = vpop.f32.mrf.mxu3  ;;  %v3312_v29 = vadd.f32 %v3311_v27, %v3223_v19  ;;  %v3224_v34 = vpop.f32.mrf.mxu1  ;;  %v3136_v35 = vadd.f32 %v3135_v26, %v6715_v54  ;;  %v5270_v54 = vor.u32 %v6164_v45, %v5267_v48  ;;  %v6188_v26 = vld [vmem:[%s6469_s21 + $0x74c] sm:$0xf0] }
 0x1f3   : > { %v7000_v40 = vadd.f32 %v3400_v28, %v3312_v29  ;;  %v3225_v36 = vadd.f32 %v3224_v34, %v3136_v35  ;;  %v5329_v29 = vld [vmem:[%s6469_s21 + $0x710] sm:$0xf]  ;;  %v6180_v34 = vld [vmem:[%s6469_s21 + $0x714] sm:$0xf] }
 0x1f4   : > { %v5331_v35 = vld [vmem:[%s6469_s21 + $0x750] sm:$0xf0]  ;;  %v5330_v50 = vor.u32 %v6188_v26, %v5329_v29 }
 0x1f5   : > { %v5334_v53 = vor.u32 %v6180_v34, %v5331_v35  ;;  %v6196_v29 = vld [vmem:[%s6469_s21 + $0x794] sm:$0xf]  ;;  %v5401_v34 = vld [vmem:[%s6469_s21 + $0x798] sm:$0xf] }
 0x1f6   : > { %v5395_v26 = vld [vmem:[%s6469_s21 + $0x7d0] sm:$0xf0]  ;;  %v6205_v35 = vld [vmem:[%s6469_s21 + $0x7d4] sm:$0xf0] }
 0x1f8   : > { %v3313_v7 = vpop.f32.mrf.mxu2  ;;  %v3138_v4 = vpop.f32.mrf.mxu0 }
 0x1f9   : > { %v3402_v60 = vpop.f32.mrf.mxu3  ;;  %v3314_v63 = vadd.f32 %v3313_v7, %v3225_v36  ;;  %v3227_v8 = vpop.f32.mrf.mxu1  ;;  %v3139_v13 = vadd.f32 %v3138_v4, %v6717_v62  ;;  %v6189_v36 = vld [vmem:[%s6469_s21 + $0x754] sm:$0xf0] }
 0x1fa   : > { %v6329_v4 = vld [vmem:[%s7624_s1 + $0x3b8] sm:$0xff] }
 0x1fb   : > { %v7014_v14 = vadd.f32 %v3402_v60, %v3314_v63  ;;  %v3228_v21 = vadd.f32 %v3227_v8, %v3139_v13  ;;  %3177 = vmatmul.bf16.gmra.mxu0 %v5266_v61  ;;  %v5338_v60 = vor.u32 %v6189_v36, %v5337_v41  ;;  %v6313_v8 = vld [vmem:[%s7624_s1 + $0x338] sm:$0xff]  ;;  %3994 = vmatpush.bf16.msrb.mxu2 %v6329_v4 }
 0x1fc   : > { %3266 = vmatmul.bf16.gmra.mxu1 %v5270_v54  ;;  %3816 = vmatpush.bf16.msrb.mxu0 %v6313_v8  ;;  %v6197_v41 = vld [vmem:[%s6469_s21 + $0x79c] sm:$0xf] }
 0x1fd   : > { %3355 = vmatmul.bf16.gmra.mxu2 %v5274_v10  ;;  %v5403_v36 = vld [vmem:[%s6469_s21 + $0x7d8] sm:$0xf0] }
 0x1fe   : > { %3444 = vmatmul.bf16.gmra.mxu3 %v5278_v12 }
 0x200   : > { %v3316_v18 = vpop.f32.mrf.mxu2  ;;  %v3140_v23 = vpop.f32.mrf.mxu0 }
 0x201   : > { %v3405_v19 = vpop.f32.mrf.mxu3  ;;  %v3317_v22 = vadd.f32 %v3316_v18, %v3228_v21  ;;  %v3229_v32 = vpop.f32.mrf.mxu1  ;;  %v3141_v62 = vadd.f32 %v3140_v23, %v6727_v20  ;;  %v5342_v20 = vor.u32 %v6181_v1, %v5339_v43  ;;  %v6321_v23 = vld [vmem:[%s7624_s1 + $0x378] sm:$0xff] }
 0x202   : > { %3905 = vmatpush.bf16.msrb.mxu1 %v6321_v23  ;;  %v4457_v23 = vld [vmem:[%s6469_s21 + $0x28] sm:$0xf] }
 0x203   : > { %v7017_v27 = vadd.f32 %v3405_v19, %v3317_v22  ;;  %v3230_v28 = vadd.f32 %v3229_v32, %v3141_v62  ;;  %v5393_v62 = vld [vmem:[%s6469_s21 + $0x790] sm:$0xf] }
 0x208   : > { %v3318_v45 = vpop.f32.mrf.mxu2  ;;  %v3143_v44 = vpop.f32.mrf.mxu0 }
 0x209   : > { %v3407_v48 = vpop.f32.mrf.mxu3  ;;  %v3319_v58 = vadd.f32 %v3318_v45, %v3230_v28  ;;  %v3232_v7 = vpop.f32.mrf.mxu1  ;;  %v3144_v61 = vadd.f32 %v3143_v44, %v6738_v33  ;;  %v6337_v33 = vld [vmem:[%s7624_s1 + $0x3f8] sm:$0xff]  ;;  %v6204_v28 = vld [vmem:[%s6469_s21 + $0x7cc] sm:$0xf0]  ;;  %v5406_v44 = vor.u32 %v6197_v41, %v5403_v36 }
 0x20a   : > { %4083 = vmatpush.bf16.msrb.mxu3 %v6337_v33  ;;  %v5394_v45 = vor.u32 %v6204_v28, %v5393_v62  ;;  %v5959_v62 = vld [vmem:[%s6469_s21 + $0x2c] sm:$0xf] }
 0x20b   : > { %v7028_v54 = vadd.f32 %v3407_v48, %v3319_v58  ;;  %v3233_v63 = vadd.f32 %v3232_v7, %v3144_v61  ;;  %3182 = vmatmul.bf16.gmra.mxu0 %v5330_v50  ;;  %v5402_v58 = vor.u32 %v6205_v35, %v5401_v34  ;;  %v4459_v28 = vld [vmem:[%s6469_s21 + $0x68] sm:$0xf0] }
 0x20c   : > { %3271 = vmatmul.bf16.gmra.mxu1 %v5334_v53 }
 0x20d   : > { %3360 = vmatmul.bf16.gmra.mxu2 %v5338_v60 }
 0x20e   : > { %3449 = vmatmul.bf16.gmra.mxu3 %v5342_v20 }
 0x210   : > { %v3321_v10 = vpop.f32.mrf.mxu2  ;;  %v3145_v21 = vpop.f32.mrf.mxu0 }
 0x211   : > { %v3410_v12 = vpop.f32.mrf.mxu3  ;;  %v3322_v13 = vadd.f32 %v3321_v10, %v3233_v63  ;;  %v3234_v18 = vpop.f32.mrf.mxu1  ;;  %v3146_v19 = vadd.f32 %v3145_v21, %v6751_v56  ;;  %v5398_v56 = vor.u32 %v6196_v29, %v5395_v26  ;;  %v5966_v21 = vld [vmem:[%s6469_s21 + $0x5c] sm:$0xf0] }
 0x213   : > { %v7040_v22 = vadd.f32 %v3410_v12, %v3322_v13  ;;  %v3235_v32 = vadd.f32 %v3234_v18, %v3146_v19  ;;  %v4449_v13 = vld [vmem:[%s6469_s21 + $0x20] sm:$0xf]  ;;  %v5958_v18 = vld [vmem:[%s6469_s21 + $0x24] sm:$0xf] }
 0x214   : > { %v4451_v19 = vld [vmem:[%s6469_s21 + $0x60] sm:$0xf0]  ;;  %v4450_v34 = vor.u32 %v5966_v21, %v4449_v13 }
 0x215   : > { %v4454_v35 = vor.u32 %v5958_v18, %v4451_v19  ;;  %v5974_v13 = vld [vmem:[%s6469_s21 + $0xa4] sm:$0xf]  ;;  %v4521_v18 = vld [vmem:[%s6469_s21 + $0xa8] sm:$0xf] }
 0x216   : > { %v4515_v21 = vld [vmem:[%s6469_s21 + $0xe0] sm:$0xf0]  ;;  %v5983_v19 = vld [vmem:[%s6469_s21 + $0xe4] sm:$0xf0] }
 0x218   : > { %v3323_v1 = vpop.f32.mrf.mxu2  ;;  %v3148_v50 = vpop.f32.mrf.mxu0 }
 0x219   : > { %v3412_v43 = vpop.f32.mrf.mxu3  ;;  %v3324_v48 = vadd.f32 %v3323_v1, %v3235_v32  ;;  %v3237_v53 = vpop.f32.mrf.mxu1  ;;  %v3149_v7 = vadd.f32 %v3148_v50, %v6753_v3  ;;  %v5967_v32 = vld [vmem:[%s6469_s21 + $0x64] sm:$0xf0]  ;;  %v6328_v50 = vld [vmem:[%s7624_s1 + $0x3b0] sm:$0xff] }
 0x21a   : > { %3995 = vmatpush.bf16.msrb.mxu2 %v6328_v50 }
 0x21b   : > { %v7054_v60 = vadd.f32 %v3412_v43, %v3324_v48  ;;  %v3238_v20 = vadd.f32 %v3237_v53, %v3149_v7  ;;  %3187 = vmatmul.bf16.gmra.mxu0 %v5394_v45  ;;  %v4458_v43 = vor.u32 %v5967_v32, %v4457_v23  ;;  %v6312_v53 = vld [vmem:[%s7624_s1 + $0x330] sm:$0xff]  ;;  %v5975_v23 = vld [vmem:[%s6469_s21 + $0xac] sm:$0xf] }
 0x21c   : > { %3276 = vmatmul.bf16.gmra.mxu1 %v5398_v56  ;;  %3817 = vmatpush.bf16.msrb.mxu0 %v6312_v53  ;;  %v4523_v32 = vld [vmem:[%s6469_s21 + $0xe8] sm:$0xf0] }
 0x21d   : > { %3365 = vmatmul.bf16.gmra.mxu2 %v5402_v58 }
 0x21e   : > { %3454 = vmatmul.bf16.gmra.mxu3 %v5406_v44 }
 0x220   : > { %v3326_v61 = vpop.f32.mrf.mxu2  ;;  %v3150_v8 = vpop.f32.mrf.mxu0 }
 0x221   : > { %v3415_v63 = vpop.f32.mrf.mxu3  ;;  %v3327_v4 = vadd.f32 %v3326_v61, %v3238_v20  ;;  %v3239_v33 = vpop.f32.mrf.mxu1  ;;  %v3151_v3 = vadd.f32 %v3150_v8, %v6763_v25  ;;  %v4462_v25 = vor.u32 %v5959_v62, %v4459_v28  ;;  %v6320_v8 = vld [vmem:[%s7624_s1 + $0x370] sm:$0xff] }
 0x222   : > { %3906 = vmatpush.bf16.msrb.mxu1 %v6320_v8  ;;  %v4585_v8 = vld [vmem:[%s6469_s21 + $0x128] sm:$0xf] }
 0x223   : > { %v7057_v10 = vadd.f32 %v3415_v63, %v3327_v4  ;;  %v3240_v12 = vadd.f32 %v3239_v33, %v3151_v3  ;;  %v4513_v3 = vld [vmem:[%s6469_s21 + $0xa0] sm:$0xf] }
 0x228   : > { %v3328_v29 = vpop.f32.mrf.mxu2  ;;  %v3153_v36 = vpop.f32.mrf.mxu0 }
 0x229   : > { %v3417_v26 = vpop.f32.mrf.mxu3  ;;  %v3329_v41 = vadd.f32 %v3328_v29, %v3240_v12  ;;  %v3242_v1 = vpop.f32.mrf.mxu1  ;;  %v3154_v45 = vadd.f32 %v3153_v36, %v6774_v39  ;;  %v6336_v39 = vld [vmem:[%s7624_s1 + $0x3f0] sm:$0xff]  ;;  %v5982_v12 = vld [vmem:[%s6469_s21 + $0xdc] sm:$0xf0]  ;;  %v4526_v36 = vor.u32 %v5975_v23, %v4523_v32 }
 0x22a   : > { %4084 = vmatpush.bf16.msrb.mxu3 %v6336_v39  ;;  %v4514_v29 = vor.u32 %v5982_v12, %v4513_v3  ;;  %v5991_v3 = vld [vmem:[%s6469_s21 + $0x12c] sm:$0xf] }
 0x22b   : > { %v7068_v56 = vadd.f32 %v3417_v26, %v3329_v41  ;;  %v3243_v48 = vadd.f32 %v3242_v1, %v3154_v45  ;;  %3468 = vmatmul.bf16.vlgmr.msra.gmra.mxu0 %v4450_v34  ;;  %v4522_v41 = vor.u32 %v5983_v19, %v4521_v18  ;;  %v4587_v12 = vld [vmem:[%s6469_s21 + $0x168] sm:$0xf0] }
 0x22c   : > { %3557 = vmatmul.bf16.vlgmr.msra.gmra.mxu1 %v4454_v35 }
 0x22d   : > { %3646 = vmatmul.bf16.vlgmr.msra.gmra.mxu2 %v4458_v43 }
 0x22e   : > { %3735 = vmatmul.bf16.vlgmr.msra.gmra.mxu3 %v4462_v25 }
 0x230   : > { %v3331_v58 = vpop.f32.mrf.mxu2  ;;  %v3155_v20 = vpop.f32.mrf.mxu0 }
 0x231   : > { %v3420_v44 = vpop.f32.mrf.mxu3  ;;  %v3332_v7 = vadd.f32 %v3331_v58, %v3243_v48  ;;  %v3244_v61 = vpop.f32.mrf.mxu1  ;;  %v3156_v63 = vadd.f32 %v3155_v20, %v6787_v2  ;;  %v4518_v2 = vor.u32 %v5974_v13, %v4515_v21  ;;  %v5998_v20 = vld [vmem:[%s6469_s21 + $0x15c] sm:$0xf0] }
 0x233   : > { %v7080_v4 = vadd.f32 %v3420_v44, %v3332_v7  ;;  %v3245_v33 = vadd.f32 %v3244_v61, %v3156_v63  ;;  %v4577_v7 = vld [vmem:[%s6469_s21 + $0x120] sm:$0xf]  ;;  %v5990_v61 = vld [vmem:[%s6469_s21 + $0x124] sm:$0xf] }
 0x234   : > { %v4579_v63 = vld [vmem:[%s6469_s21 + $0x160] sm:$0xf0]  ;;  %v4578_v18 = vor.u32 %v5998_v20, %v4577_v7 }
 0x235   : > { %v4582_v19 = vor.u32 %v5990_v61, %v4579_v63  ;;  %v6006_v7 = vld [vmem:[%s6469_s21 + $0x1a4] sm:$0xf]  ;;  %v4649_v61 = vld [vmem:[%s6469_s21 + $0x1a8] sm:$0xf] }
 0x236   : > { %v4643_v20 = vld [vmem:[%s6469_s21 + $0x1e0] sm:$0xf0]  ;;  %v6015_v63 = vld [vmem:[%s6469_s21 + $0x1e4] sm:$0xf0] }
 0x238   : > { %v3333_v62 = vpop.f32.mrf.mxu2  ;;  %v3158_v34 = vpop.f32.mrf.mxu0 }
 0x239   : > { %v3422_v28 = vpop.f32.mrf.mxu3  ;;  %v3334_v26 = vadd.f32 %v3333_v62, %v3245_v33  ;;  %v3247_v35 = vpop.f32.mrf.mxu1  ;;  %v3159_v1 = vadd.f32 %v3158_v34, %v6789_v11  ;;  %v5999_v33 = vld [vmem:[%s6469_s21 + $0x164] sm:$0xf0] }
 0x23a   : > { %v6327_v34 = vld [vmem:[%s7624_s1 + $0x3a8] sm:$0xff] }
 0x23b   : > { %v7094_v43 = vadd.f32 %v3422_v28, %v3334_v26  ;;  %v3248_v25 = vadd.f32 %v3247_v35, %v3159_v1  ;;  %3473 = vmatmul.bf16.gmra.mxu0 %v4514_v29  ;;  %v4586_v28 = vor.u32 %v5999_v33, %v4585_v8  ;;  %v6311_v35 = vld [vmem:[%s7624_s1 + $0x328] sm:$0xff]  ;;  %3996 = vmatpush.bf16.msrb.mxu2 %v6327_v34 }
 0x23c   : > { %3562 = vmatmul.bf16.gmra.mxu1 %v4518_v2  ;;  %3818 = vmatpush.bf16.msrb.mxu0 %v6311_v35  ;;  %v6007_v8 = vld [vmem:[%s6469_s21 + $0x1ac] sm:$0xf] }
 0x23d   : > { %3651 = vmatmul.bf16.gmra.mxu2 %v4522_v41  ;;  %v4651_v33 = vld [vmem:[%s6469_s21 + $0x1e8] sm:$0xf0] }
 0x23e   : > { %3740 = vmatmul.bf16.gmra.mxu3 %v4526_v36 }
 0x240   : > { %v3336_v45 = vpop.f32.mrf.mxu2  ;;  %v3160_v53 = vpop.f32.mrf.mxu0 }
 0x241   : > { %v3425_v48 = vpop.f32.mrf.mxu3  ;;  %v3337_v50 = vadd.f32 %v3336_v45, %v3248_v25  ;;  %v3249_v39 = vpop.f32.mrf.mxu1  ;;  %v3161_v11 = vadd.f32 %v3160_v53, %v6799_v37  ;;  %v4590_v37 = vor.u32 %v5991_v3, %v4587_v12  ;;  %v6319_v53 = vld [vmem:[%s7624_s1 + $0x368] sm:$0xff] }
 0x242   : > { %3907 = vmatpush.bf16.msrb.mxu1 %v6319_v53  ;;  %v4713_v53 = vld [vmem:[%s6469_s21 + $0x228] sm:$0xf] }
 0x243   : > { %v7097_v58 = vadd.f32 %v3425_v48, %v3337_v50  ;;  %v3250_v44 = vadd.f32 %v3249_v39, %v3161_v11  ;;  %v4641_v11 = vld [vmem:[%s6469_s21 + $0x1a0] sm:$0xf] }
 0x248   : > { %v3338_v13 = vpop.f32.mrf.mxu2  ;;  %v3163_v32 = vpop.f32.mrf.mxu0 }
 0x249   : > { %v3427_v21 = vpop.f32.mrf.mxu3  ;;  %v3339_v23 = vadd.f32 %v3338_v13, %v3250_v44  ;;  %v3252_v62 = vpop.f32.mrf.mxu1  ;;  %v3164_v29 = vadd.f32 %v3163_v32, %v6810_v49  ;;  %v6335_v49 = vld [vmem:[%s7624_s1 + $0x3e8] sm:$0xff]  ;;  %v6014_v44 = vld [vmem:[%s6469_s21 + $0x1dc] sm:$0xf0]  ;;  %v4654_v32 = vor.u32 %v6007_v8, %v4651_v33 }
 0x24a   : > { %4085 = vmatpush.bf16.msrb.mxu3 %v6335_v49  ;;  %v4642_v13 = vor.u32 %v6014_v44, %v4641_v11  ;;  %v6023_v11 = vld [vmem:[%s6469_s21 + $0x22c] sm:$0xf] }
 0x24b   : > { %v7108_v2 = vadd.f32 %v3427_v21, %v3339_v23  ;;  %v3253_v26 = vadd.f32 %v3252_v62, %v3164_v29  ;;  %3478 = vmatmul.bf16.gmra.mxu0 %v4578_v18  ;;  %v4650_v23 = vor.u32 %v6015_v63, %v4649_v61  ;;  %v4715_v44 = vld [vmem:[%s6469_s21 + $0x268] sm:$0xf0] }
 0x24c   : > { %3567 = vmatmul.bf16.gmra.mxu1 %v4582_v19 }
 0x24d   : > { %3656 = vmatmul.bf16.gmra.mxu2 %v4586_v28 }
 0x24e   : > { %3745 = vmatmul.bf16.gmra.mxu3 %v4590_v37 }
 0x250   : > { %v3341_v41 = vpop.f32.mrf.mxu2  ;;  %v3165_v25 = vpop.f32.mrf.mxu0 }
 0x251   : > { %v3430_v36 = vpop.f32.mrf.mxu3  ;;  %v3342_v1 = vadd.f32 %v3341_v41, %v3253_v26  ;;  %v3254_v45 = vpop.f32.mrf.mxu1  ;;  %v3166_v48 = vadd.f32 %v3165_v25, %v6823_v15  ;;  %v4646_v15 = vor.u32 %v6006_v7, %v4643_v20  ;;  %v6030_v25 = vld [vmem:[%s6469_s21 + $0x25c] sm:$0xf0] }
 0x253   : > { %v7120_v50 = vadd.f32 %v3430_v36, %v3342_v1  ;;  %v3255_v39 = vadd.f32 %v3254_v45, %v3166_v48  ;;  %v4705_v1 = vld [vmem:[%s6469_s21 + $0x220] sm:$0xf]  ;;  %v6022_v45 = vld [vmem:[%s6469_s21 + $0x224] sm:$0xf] }
 0x254   : > { %v4707_v48 = vld [vmem:[%s6469_s21 + $0x260] sm:$0xf0]  ;;  %v4706_v61 = vor.u32 %v6030_v25, %v4705_v1 }
 0x255   : > { %v4710_v63 = vor.u32 %v6022_v45, %v4707_v48  ;;  %v6038_v1 = vld [vmem:[%s6469_s21 + $0x2a4] sm:$0xf]  ;;  %v4777_v45 = vld [vmem:[%s6469_s21 + $0x2a8] sm:$0xf] }
 0x256   : > { %v4771_v25 = vld [vmem:[%s6469_s21 + $0x2e0] sm:$0xf0]  ;;  %v6047_v48 = vld [vmem:[%s6469_s21 + $0x2e4] sm:$0xf0] }
 0x258   : > { %v3343_v3 = vpop.f32.mrf.mxu2  ;;  %v3168_v18 = vpop.f32.mrf.mxu0 }
 0x259   : > { %v3432_v12 = vpop.f32.mrf.mxu3  ;;  %v3344_v21 = vadd.f32 %v3343_v3, %v3255_v39  ;;  %v3257_v19 = vpop.f32.mrf.mxu1  ;;  %v3169_v62 = vadd.f32 %v3168_v18, %v6825_v24  ;;  %v6031_v39 = vld [vmem:[%s6469_s21 + $0x264] sm:$0xf0]  ;;  %v6326_v18 = vld [vmem:[%s7624_s1 + $0x3a0] sm:$0xff] }
 0x25a   : > { %3997 = vmatpush.bf16.msrb.mxu2 %v6326_v18 }
 0x25b   : > { %v7134_v28 = vadd.f32 %v3432_v12, %v3344_v21  ;;  %v3258_v37 = vadd.f32 %v3257_v19, %v3169_v62  ;;  %3483 = vmatmul.bf16.gmra.mxu0 %v4642_v13  ;;  %v4714_v12 = vor.u32 %v6031_v39, %v4713_v53  ;;  %v6310_v19 = vld [vmem:[%s7624_s1 + $0x320] sm:$0xff]  ;;  %v6039_v53 = vld [vmem:[%s6469_s21 + $0x2ac] sm:$0xf] }
 0x25c   : > { %3572 = vmatmul.bf16.gmra.mxu1 %v4646_v15  ;;  %3819 = vmatpush.bf16.msrb.mxu0 %v6310_v19  ;;  %v4779_v39 = vld [vmem:[%s6469_s21 + $0x2e8] sm:$0xf0] }
 0x25d   : > { %3661 = vmatmul.bf16.gmra.mxu2 %v4650_v23 }
 0x25e   : > { %3750 = vmatmul.bf16.gmra.mxu3 %v4654_v32 }
 0x260   : > { %v3346_v29 = vpop.f32.mrf.mxu2  ;;  %v3170_v35 = vpop.f32.mrf.mxu0 }
 0x261   : > { %v3435_v26 = vpop.f32.mrf.mxu3  ;;  %v3347_v34 = vadd.f32 %v3346_v29, %v3258_v37  ;;  %v3259_v49 = vpop.f32.mrf.mxu1  ;;  %v3171_v24 = vadd.f32 %v3170_v35, %v6835_v52  ;;  %v4718_v52 = vor.u32 %v6023_v11, %v4715_v44  ;;  %v6318_v35 = vld [vmem:[%s7624_s1 + $0x360] sm:$0xff] }
 0x262   : > { %3908 = vmatpush.bf16.msrb.mxu1 %v6318_v35  ;;  %v4841_v35 = vld [vmem:[%s6469_s21 + $0x328] sm:$0xf] }
 0x263   : > { %v7137_v41 = vadd.f32 %v3435_v26, %v3347_v34  ;;  %v3260_v36 = vadd.f32 %v3259_v49, %v3171_v24  ;;  %v4769_v24 = vld [vmem:[%s6469_s21 + $0x2a0] sm:$0xf] }
 0x268   : > { %v3348_v7 = vpop.f32.mrf.mxu2  ;;  %v3173_v33 = vpop.f32.mrf.mxu0 }
 0x269   : > { %v3437_v20 = vpop.f32.mrf.mxu3  ;;  %v3349_v8 = vadd.f32 %v3348_v7, %v3260_v36  ;;  %v3262_v3 = vpop.f32.mrf.mxu1  ;;  %v3174_v13 = vadd.f32 %v3173_v33, %v6846_v6  ;;  %v6334_v6 = vld [vmem:[%s7624_s1 + $0x3e0] sm:$0xff]  ;;  %v4782_v33 = vor.u32 %v6039_v53, %v4779_v39 }
 0x26a   : > { %4086 = vmatpush.bf16.msrb.mxu3 %v6334_v6  ;;  %v6046_v36 = vld [vmem:[%s6469_s21 + $0x2dc] sm:$0xf0] }
 0x26b   : > { %v7148_v15 = vadd.f32 %v3437_v20, %v3349_v8  ;;  %v3263_v21 = vadd.f32 %v3262_v3, %v3174_v13  ;;  %3488 = vmatmul.bf16.gmra.mxu0 %v4706_v61  ;;  %v4770_v7 = vor.u32 %v6046_v36, %v4769_v24  ;;  %v4778_v8 = vor.u32 %v6047_v48, %v4777_v45  ;;  %v6055_v24 = vld [vmem:[%s6469_s21 + $0x32c] sm:$0xf] }
 0x26c   : > { %3577 = vmatmul.bf16.gmra.mxu1 %v4710_v63  ;;  %v4843_v36 = vld [vmem:[%s6469_s21 + $0x368] sm:$0xf0] }
 0x26d   : > { %3666 = vmatmul.bf16.gmra.mxu2 %v4714_v12 }
 0x26e   : > { %3755 = vmatmul.bf16.gmra.mxu3 %v4718_v52 }
 0x270   : > { %v3351_v23 = vpop.f32.mrf.mxu2  ;;  %v3175_v37 = vpop.f32.mrf.mxu0 }
 0x271   : > { %v3440_v32 = vpop.f32.mrf.mxu3  ;;  %v3352_v62 = vadd.f32 %v3351_v23, %v3263_v21  ;;  %v3264_v29 = vpop.f32.mrf.mxu1  ;;  %v3176_v26 = vadd.f32 %v3175_v37, %v6859_v38  ;;  %v4774_v38 = vor.u32 %v6038_v1, %v4771_v25  ;;  %v6062_v37 = vld [vmem:[%s6469_s21 + $0x35c] sm:$0xf0] }
 0x273   : > { %v7160_v34 = vadd.f32 %v3440_v32, %v3352_v62  ;;  %v3265_v49 = vadd.f32 %v3264_v29, %v3176_v26  ;;  %v4833_v62 = vld [vmem:[%s6469_s21 + $0x320] sm:$0xf]  ;;  %v6054_v29 = vld [vmem:[%s6469_s21 + $0x324] sm:$0xf] }
 0x274   : > { %v4835_v26 = vld [vmem:[%s6469_s21 + $0x360] sm:$0xf0]  ;;  %v4834_v45 = vor.u32 %v6062_v37, %v4833_v62 }
 0x275   : > { %v4838_v48 = vor.u32 %v6054_v29, %v4835_v26  ;;  %v6070_v62 = vld [vmem:[%s6469_s21 + $0x3a4] sm:$0xf]  ;;  %v4905_v29 = vld [vmem:[%s6469_s21 + $0x3a8] sm:$0xf] }
 0x276   : > { %v4899_v37 = vld [vmem:[%s6469_s21 + $0x3e0] sm:$0xf0]  ;;  %v6079_v26 = vld [vmem:[%s6469_s21 + $0x3e4] sm:$0xf0] }
 0x278   : > { %v3353_v11 = vpop.f32.mrf.mxu2  ;;  %v3178_v61 = vpop.f32.mrf.mxu0 }
 0x279   : > { %v3442_v44 = vpop.f32.mrf.mxu3  ;;  %v3354_v20 = vadd.f32 %v3353_v11, %v3265_v49  ;;  %v3267_v63 = vpop.f32.mrf.mxu1  ;;  %v3179_v3 = vadd.f32 %v3178_v61, %v6861_v47  ;;  %v6063_v49 = vld [vmem:[%s6469_s21 + $0x364] sm:$0xf0]  ;;  %v6325_v61 = vld [vmem:[%s7624_s1 + $0x398] sm:$0xff] }
 0x27a   : > { %3998 = vmatpush.bf16.msrb.mxu2 %v6325_v61 }
 0x27b   : > { %v7174_v12 = vadd.f32 %v3442_v44, %v3354_v20  ;;  %v3268_v52 = vadd.f32 %v3267_v63, %v3179_v3  ;;  %3493 = vmatmul.bf16.gmra.mxu0 %v4770_v7  ;;  %v4842_v44 = vor.u32 %v6063_v49, %v4841_v35  ;;  %v6309_v63 = vld [vmem:[%s7624_s1 + $0x318] sm:$0xff]  ;;  %v6071_v35 = vld [vmem:[%s6469_s21 + $0x3ac] sm:$0xf] }
 0x27c   : > { %3582 = vmatmul.bf16.gmra.mxu1 %v4774_v38  ;;  %3820 = vmatpush.bf16.msrb.mxu0 %v6309_v63  ;;  %v4907_v49 = vld [vmem:[%s6469_s21 + $0x3e8] sm:$0xf0] }
 0x27d   : > { %3671 = vmatmul.bf16.gmra.mxu2 %v4778_v8 }
 0x27e   : > { %3760 = vmatmul.bf16.gmra.mxu3 %v4782_v33 }
 0x280   : > { %v3356_v13 = vpop.f32.mrf.mxu2  ;;  %v3180_v19 = vpop.f32.mrf.mxu0 }
 0x281   : > { %v3445_v21 = vpop.f32.mrf.mxu3  ;;  %v3357_v18 = vadd.f32 %v3356_v13, %v3268_v52  ;;  %v3269_v6 = vpop.f32.mrf.mxu1  ;;  %v3181_v47 = vadd.f32 %v3180_v19, %v6871_v16  ;;  %v4846_v16 = vor.u32 %v6055_v24, %v4843_v36  ;;  %v6317_v19 = vld [vmem:[%s7624_s1 + $0x358] sm:$0xff] }
 0x282   : > { %3909 = vmatpush.bf16.msrb.mxu1 %v6317_v19  ;;  %v4969_v19 = vld [vmem:[%s6469_s21 + $0x428] sm:$0xf] }
 0x283   : > { %v7177_v23 = vadd.f32 %v3445_v21, %v3357_v18  ;;  %v3270_v32 = vadd.f32 %v3269_v6, %v3181_v47  ;;  %v4897_v47 = vld [vmem:[%s6469_s21 + $0x3a0] sm:$0xf] }
 0x288   : > { %v3358_v1 = vpop.f32.mrf.mxu2  ;;  %v3183_v39 = vpop.f32.mrf.mxu0 }
 0x289   : > { %v3447_v25 = vpop.f32.mrf.mxu3  ;;  %v3359_v53 = vadd.f32 %v3358_v1, %v3270_v32  ;;  %v3272_v11 = vpop.f32.mrf.mxu1  ;;  %v3184_v7 = vadd.f32 %v3183_v39, %v6882_v31  ;;  %v6333_v31 = vld [vmem:[%s7624_s1 + $0x3d8] sm:$0xff]  ;;  %v6078_v32 = vld [vmem:[%s6469_s21 + $0x3dc] sm:$0xf0]  ;;  %v4910_v39 = vor.u32 %v6071_v35, %v4907_v49 }
 0x28a   : > { %4087 = vmatpush.bf16.msrb.mxu3 %v6333_v31  ;;  %v4898_v1 = vor.u32 %v6078_v32, %v4897_v47  ;;  %v6087_v47 = vld [vmem:[%s6469_s21 + $0x42c] sm:$0xf] }
 0x28b   : > { %v7188_v38 = vadd.f32 %v3447_v25, %v3359_v53  ;;  %v3273_v20 = vadd.f32 %v3272_v11, %v3184_v7  ;;  %3498 = vmatmul.bf16.gmra.mxu0 %v4834_v45  ;;  %v4906_v53 = vor.u32 %v6079_v26, %v4905_v29  ;;  %v4971_v32 = vld [vmem:[%s6469_s21 + $0x468] sm:$0xf0] }
 0x28c   : > { %3587 = vmatmul.bf16.gmra.mxu1 %v4838_v48 }
 0x28d   : > { %3676 = vmatmul.bf16.gmra.mxu2 %v4842_v44 }
 0x28e   : > { %3765 = vmatmul.bf16.gmra.mxu3 %v4846_v16 }
 0x290   : > { %v3361_v8 = vpop.f32.mrf.mxu2  ;;  %v3185_v52 = vpop.f32.mrf.mxu0 }
 0x291   : > { %v3450_v33 = vpop.f32.mrf.mxu3  ;;  %v3362_v3 = vadd.f32 %v3361_v8, %v3273_v20  ;;  %v3274_v13 = vpop.f32.mrf.mxu1  ;;  %v3186_v21 = vadd.f32 %v3185_v52, %v6895_v5  ;;  %v4902_v5 = vor.u32 %v6070_v62, %v4899_v37  ;;  %v6094_v52 = vld [vmem:[%s6469_s21 + $0x45c] sm:$0xf0] }
 0x293   : > { %v7200_v18 = vadd.f32 %v3450_v33, %v3362_v3  ;;  %v3275_v6 = vadd.f32 %v3274_v13, %v3186_v21  ;;  %v4961_v3 = vld [vmem:[%s6469_s21 + $0x420] sm:$0xf]  ;;  %v6086_v13 = vld [vmem:[%s6469_s21 + $0x424] sm:$0xf] }
 0x294   : > { %v4963_v21 = vld [vmem:[%s6469_s21 + $0x460] sm:$0xf0]  ;;  %v4962_v29 = vor.u32 %v6094_v52, %v4961_v3 }
 0x295   : > { %v4966_v26 = vor.u32 %v6086_v13, %v4963_v21  ;;  %v6102_v3 = vld [vmem:[%s6469_s21 + $0x4a4] sm:$0xf]  ;;  %v5033_v13 = vld [vmem:[%s6469_s21 + $0x4a8] sm:$0xf] }
 0x296   : > { %v5027_v52 = vld [vmem:[%s6469_s21 + $0x4e0] sm:$0xf0]  ;;  %v6111_v21 = vld [vmem:[%s6469_s21 + $0x4e4] sm:$0xf0] }
 0x298   : > { %v3363_v24 = vpop.f32.mrf.mxu2  ;;  %v3188_v45 = vpop.f32.mrf.mxu0 }
 0x299   : > { %v3452_v36 = vpop.f32.mrf.mxu3  ;;  %v3364_v25 = vadd.f32 %v3363_v24, %v3275_v6  ;;  %v3277_v48 = vpop.f32.mrf.mxu1  ;;  %v3189_v11 = vadd.f32 %v3188_v45, %v6897_v17  ;;  %v6095_v6 = vld [vmem:[%s6469_s21 + $0x464] sm:$0xf0]  ;;  %v6324_v45 = vld [vmem:[%s7624_s1 + $0x390] sm:$0xff] }
 0x29a   : > { %3999 = vmatpush.bf16.msrb.mxu2 %v6324_v45 }
 0x29b   : > { %v7214_v44 = vadd.f32 %v3452_v36, %v3364_v25  ;;  %v3278_v16 = vadd.f32 %v3277_v48, %v3189_v11  ;;  %3503 = vmatmul.bf16.gmra.mxu0 %v4898_v1  ;;  %v4970_v36 = vor.u32 %v6095_v6, %v4969_v19  ;;  %v6308_v48 = vld [vmem:[%s7624_s1 + $0x310] sm:$0xff]  ;;  %v6103_v19 = vld [vmem:[%s6469_s21 + $0x4ac] sm:$0xf] }
 0x29c   : > { %3592 = vmatmul.bf16.gmra.mxu1 %v4902_v5  ;;  %3821 = vmatpush.bf16.msrb.mxu0 %v6308_v48  ;;  %v5035_v6 = vld [vmem:[%s6469_s21 + $0x4e8] sm:$0xf0] }
 0x29d   : > { %3681 = vmatmul.bf16.gmra.mxu2 %v4906_v53 }
 0x29e   : > { %3770 = vmatmul.bf16.gmra.mxu3 %v4910_v39 }
 0x2a0   : > { %v3366_v7 = vpop.f32.mrf.mxu2  ;;  %v3190_v63 = vpop.f32.mrf.mxu0 }
 0x2a1   : > { %v3455_v20 = vpop.f32.mrf.mxu3  ;;  %v3367_v61 = vadd.f32 %v3366_v7, %v3278_v16  ;;  %v3279_v31 = vpop.f32.mrf.mxu1  ;;  %v3191_v17 = vadd.f32 %v3190_v63, %v6908_v51  ;;  %v4974_v51 = vor.u32 %v6087_v47, %v4971_v32  ;;  %v6316_v63 = vld [vmem:[%s7624_s1 + $0x350] sm:$0xff] }
 0x2a2   : > { %3910 = vmatpush.bf16.msrb.mxu1 %v6316_v63  ;;  %v5097_v63 = vld [vmem:[%s6469_s21 + $0x528] sm:$0xf] }
 0x2a3   : > { %v7217_v8 = vadd.f32 %v3455_v20, %v3367_v61  ;;  %v3280_v33 = vadd.f32 %v3279_v31, %v3191_v17  ;;  %v5025_v17 = vld [vmem:[%s6469_s21 + $0x4a0] sm:$0xf] }
 0x2a8   : > { %v3368_v62 = vpop.f32.mrf.mxu2  ;;  %v3469_v49 = vpop.f32.mrf.mxu0 }
 0x2a9   : > { %v3457_v37 = vpop.f32.mrf.mxu3  ;;  %v3369_v35 = vadd.f32 %v3368_v62, %v3280_v33  ;;  %v3558_v24 = vpop.f32.mrf.mxu1  ;;  %v3470_v1 = vadd.f32 %v3469_v49, %v6920_v9  ;;  %v6332_v9 = vld [vmem:[%s7624_s1 + $0x3d0] sm:$0xff]  ;;  %v6110_v33 = vld [vmem:[%s6469_s21 + $0x4dc] sm:$0xf0]  ;;  %v5038_v49 = vor.u32 %v6103_v19, %v5035_v6 }
 0x2aa   : > { %4088 = vmatpush.bf16.msrb.mxu3 %v6332_v9  ;;  %v5026_v62 = vor.u32 %v6110_v33, %v5025_v17  ;;  %v6119_v17 = vld [vmem:[%s6469_s21 + $0x52c] sm:$0xf] }
 0x2ab   : > { %v7228_v5 = vadd.f32 %v3457_v37, %v3369_v35  ;;  %v3559_v25 = vadd.f32 %v3558_v24, %v3470_v1  ;;  %3508 = vmatmul.bf16.gmra.mxu0 %v4962_v29  ;;  %v5034_v35 = vor.u32 %v6111_v21, %v5033_v13  ;;  %v5099_v33 = vld [vmem:[%s6469_s21 + $0x568] sm:$0xf0] }
 0x2ac   : > { %3597 = vmatmul.bf16.gmra.mxu1 %v4966_v26 }
 0x2ad   : > { %3686 = vmatmul.bf16.gmra.mxu2 %v4970_v36 }
 0x2ae   : > { %3775 = vmatmul.bf16.gmra.mxu3 %v4974_v51 }
 0x2b0   : > { %v3647_v53 = vpop.f32.mrf.mxu2  ;;  %v3471_v16 = vpop.f32.mrf.mxu0 }
 0x2b1   : > { %v3736_v39 = vpop.f32.mrf.mxu3  ;;  %v3648_v11 = vadd.f32 %v3647_v53, %v3559_v25  ;;  %v3560_v7 = vpop.f32.mrf.mxu1  ;;  %v3472_v20 = vadd.f32 %v3471_v16, %v6934_v46  ;;  %v5030_v46 = vor.u32 %v6102_v3, %v5027_v52  ;;  %v6126_v16 = vld [vmem:[%s6469_s21 + $0x55c] sm:$0xf0] }
 0x2b3   : > { %v7240_v61 = vadd.f32 %v3736_v39, %v3648_v11  ;;  %v3561_v31 = vadd.f32 %v3560_v7, %v3472_v20  ;;  %v5089_v11 = vld [vmem:[%s6469_s21 + $0x520] sm:$0xf]  ;;  %v6118_v7 = vld [vmem:[%s6469_s21 + $0x524] sm:$0xf] }
 0x2b4   : > { %v5091_v20 = vld [vmem:[%s6469_s21 + $0x560] sm:$0xf0]  ;;  %v5090_v13 = vor.u32 %v6126_v16, %v5089_v11 }
 0x2b5   : > { %v5094_v21 = vor.u32 %v6118_v7, %v5091_v20  ;;  %v6134_v11 = vld [vmem:[%s6469_s21 + $0x5a4] sm:$0xf]  ;;  %v5161_v7 = vld [vmem:[%s6469_s21 + $0x5a8] sm:$0xf] }
 0x2b6   : > { %v5155_v16 = vld [vmem:[%s6469_s21 + $0x5e0] sm:$0xf0]  ;;  %v6143_v20 = vld [vmem:[%s6469_s21 + $0x5e4] sm:$0xf0] }
 0x2b8   : > { %v3649_v47 = vpop.f32.mrf.mxu2  ;;  %v3474_v29 = vpop.f32.mrf.mxu0 }
 0x2b9   : > { %v3738_v32 = vpop.f32.mrf.mxu3  ;;  %v3650_v37 = vadd.f32 %v3649_v47, %v3561_v31  ;;  %v3563_v26 = vpop.f32.mrf.mxu1  ;;  %v3475_v24 = vadd.f32 %v3474_v29, %v6937_v59  ;;  %v6127_v31 = vld [vmem:[%s6469_s21 + $0x564] sm:$0xf0] }
 0x2ba   : > { %v6323_v29 = vld [vmem:[%s7624_s1 + $0x388] sm:$0xff] }
 0x2bb   : > { %v7254_v36 = vadd.f32 %v3738_v32, %v3650_v37  ;;  %v3564_v51 = vadd.f32 %v3563_v26, %v3475_v24  ;;  %3513 = vmatmul.bf16.gmra.mxu0 %v5026_v62  ;;  %v5098_v32 = vor.u32 %v6127_v31, %v5097_v63  ;;  %v6307_v26 = vld [vmem:[%s7624_s1 + $0x308] sm:$0xff]  ;;  %4000 = vmatpush.bf16.msrb.mxu2 %v6323_v29 }
 0x2bc   : > { %3602 = vmatmul.bf16.gmra.mxu1 %v5030_v46  ;;  %3822 = vmatpush.bf16.msrb.mxu0 %v6307_v26  ;;  %v6135_v63 = vld [vmem:[%s6469_s21 + $0x5ac] sm:$0xf] }
 0x2bd   : > { %3691 = vmatmul.bf16.gmra.mxu2 %v5034_v35  ;;  %v5163_v31 = vld [vmem:[%s6469_s21 + $0x5e8] sm:$0xf0] }
 0x2be   : > { %3780 = vmatmul.bf16.gmra.mxu3 %v5038_v49 }
 0x2c0   : > { %v3652_v1 = vpop.f32.mrf.mxu2  ;;  %v3476_v48 = vpop.f32.mrf.mxu0 }
 0x2c1   : > { %v3741_v25 = vpop.f32.mrf.mxu3  ;;  %v3653_v45 = vadd.f32 %v3652_v1, %v3564_v51  ;;  %v3565_v9 = vpop.f32.mrf.mxu1  ;;  %v3477_v59 = vadd.f32 %v3476_v48, %v6948_v0  ;;  %v5102_v0 = vor.u32 %v6119_v17, %v5099_v33  ;;  %v6315_v48 = vld [vmem:[%s7624_s1 + $0x348] sm:$0xff] }
 0x2c2   : > { %3911 = vmatpush.bf16.msrb.mxu1 %v6315_v48  ;;  %v5225_v48 = vld [vmem:[%s6469_s21 + $0x628] sm:$0xf] }
 0x2c3   : > { %v7257_v53 = vadd.f32 %v3741_v25, %v3653_v45  ;;  %v3566_v39 = vadd.f32 %v3565_v9, %v3477_v59  ;;  %v5153_v59 = vld [vmem:[%s6469_s21 + $0x5a0] sm:$0xf] }
 0x2c8   : > { %v3654_v3 = vpop.f32.mrf.mxu2  ;;  %v3479_v6 = vpop.f32.mrf.mxu0 }
 0x2c9   : > { %v3743_v52 = vpop.f32.mrf.mxu3  ;;  %v3655_v19 = vadd.f32 %v3654_v3, %v3566_v39  ;;  %v3568_v47 = vpop.f32.mrf.mxu1  ;;  %v3480_v62 = vadd.f32 %v3479_v6, %v6960_v55  ;;  %v6331_v55 = vld [vmem:[%s7624_s1 + $0x3c8] sm:$0xff]  ;;  %v6142_v39 = vld [vmem:[%s6469_s21 + $0x5dc] sm:$0xf0]  ;;  %v5166_v6 = vor.u32 %v6135_v63, %v5163_v31 }
 0x2ca   : > { %4089 = vmatpush.bf16.msrb.mxu3 %v6331_v55  ;;  %v5154_v3 = vor.u32 %v6142_v39, %v5153_v59  ;;  %v6151_v59 = vld [vmem:[%s6469_s21 + $0x62c] sm:$0xf] }
 0x2cb   : > { %v7268_v46 = vadd.f32 %v3743_v52, %v3655_v19  ;;  %v3569_v37 = vadd.f32 %v3568_v47, %v3480_v62  ;;  %3518 = vmatmul.bf16.gmra.mxu0 %v5090_v13  ;;  %v5162_v19 = vor.u32 %v6143_v20, %v5161_v7  ;;  %v5227_v39 = vld [vmem:[%s6469_s21 + $0x668] sm:$0xf0] }
 0x2cc   : > { %3607 = vmatmul.bf16.gmra.mxu1 %v5094_v21 }
 0x2cd   : > { %3696 = vmatmul.bf16.gmra.mxu2 %v5098_v32 }
 0x2ce   : > { %3785 = vmatmul.bf16.gmra.mxu3 %v5102_v0 }
 0x2d0   : > { %v3657_v35 = vpop.f32.mrf.mxu2  ;;  %v3481_v51 = vpop.f32.mrf.mxu0 }
 0x2d1   : > { %v3746_v49 = vpop.f32.mrf.mxu3  ;;  %v3658_v24 = vadd.f32 %v3657_v35, %v3569_v37  ;;  %v3570_v1 = vpop.f32.mrf.mxu1  ;;  %v3482_v25 = vadd.f32 %v3481_v51, %v6974_v30  ;;  %v5158_v30 = vor.u32 %v6134_v11, %v5155_v16  ;;  %v6158_v51 = vld [vmem:[%s6469_s21 + $0x65c] sm:$0xf0] }
 0x2d3   : > { %v7280_v45 = vadd.f32 %v3746_v49, %v3658_v24  ;;  %v3571_v9 = vadd.f32 %v3570_v1, %v3482_v25  ;;  %v5217_v24 = vld [vmem:[%s6469_s21 + $0x620] sm:$0xf]  ;;  %v6150_v1 = vld [vmem:[%s6469_s21 + $0x624] sm:$0xf] }
 0x2d4   : > { %v5219_v25 = vld [vmem:[%s6469_s21 + $0x660] sm:$0xf0]  ;;  %v5218_v7 = vor.u32 %v6158_v51, %v5217_v24 }
 0x2d5   : > { %v5222_v20 = vor.u32 %v6150_v1, %v5219_v25  ;;  %v6166_v24 = vld [vmem:[%s6469_s21 + $0x6a4] sm:$0xf]  ;;  %v5289_v1 = vld [vmem:[%s6469_s21 + $0x6a8] sm:$0xf] }
 0x2d6   : > { %v5283_v51 = vld [vmem:[%s6469_s21 + $0x6e0] sm:$0xf0]  ;;  %v6175_v25 = vld [vmem:[%s6469_s21 + $0x6e4] sm:$0xf0] }
 0x2d8   : > { %v3659_v17 = vpop.f32.mrf.mxu2  ;;  %v3484_v13 = vpop.f32.mrf.mxu0 }
 0x2d9   : > { %v3748_v33 = vpop.f32.mrf.mxu3  ;;  %v3660_v52 = vadd.f32 %v3659_v17, %v3571_v9  ;;  %v3573_v21 = vpop.f32.mrf.mxu1  ;;  %v3485_v47 = vadd.f32 %v3484_v13, %v6977_v42  ;;  %v6159_v9 = vld [vmem:[%s6469_s21 + $0x664] sm:$0xf0]  ;;  %v6322_v13 = vld [vmem:[%s7624_s1 + $0x380] sm:$0xff] }
 0x2da   : > { %4001 = vmatpush.bf16.msrb.mxu2 %v6322_v13 }
 0x2db   : > { %v7294_v32 = vadd.f32 %v3748_v33, %v3660_v52  ;;  %v3574_v0 = vadd.f32 %v3573_v21, %v3485_v47  ;;  %3523 = vmatmul.bf16.gmra.mxu0 %v5154_v3  ;;  %v5226_v33 = vor.u32 %v6159_v9, %v5225_v48  ;;  %v6306_v21 = vld [vmem:[%s7624_s1 + $0x300] sm:$0xff]  ;;  %v6167_v48 = vld [vmem:[%s6469_s21 + $0x6ac] sm:$0xf] }
 0x2dc   : > { %3612 = vmatmul.bf16.gmra.mxu1 %v5158_v30  ;;  %3823 = vmatpush.bf16.msrb.mxu0 %v6306_v21  ;;  %v5291_v9 = vld [vmem:[%s6469_s21 + $0x6e8] sm:$0xf0] }
 0x2dd   : > { %3701 = vmatmul.bf16.gmra.mxu2 %v5162_v19 }
 0x2de   : > { %3790 = vmatmul.bf16.gmra.mxu3 %v5166_v6 }
 0x2e0   : > { %v3662_v62 = vpop.f32.mrf.mxu2  ;;  %v3486_v26 = vpop.f32.mrf.mxu0 }
 0x2e1   : > { %v3751_v37 = vpop.f32.mrf.mxu3  ;;  %v3663_v29 = vadd.f32 %v3662_v62, %v3574_v0  ;;  %v3575_v55 = vpop.f32.mrf.mxu1  ;;  %v3487_v42 = vadd.f32 %v3486_v26, %v6988_v57  ;;  %v5230_v57 = vor.u32 %v6151_v59, %v5227_v39  ;;  %v6314_v26 = vld [vmem:[%s7624_s1 + $0x340] sm:$0xff] }
 0x2e2   : > { %3912 = vmatpush.bf16.msrb.mxu1 %v6314_v26  ;;  %v5353_v26 = vld [vmem:[%s6469_s21 + $0x728] sm:$0xf] }
 0x2e3   : > { %v7297_v35 = vadd.f32 %v3751_v37, %v3663_v29  ;;  %v3576_v49 = vadd.f32 %v3575_v55, %v3487_v42  ;;  %v5281_v42 = vld [vmem:[%s6469_s21 + $0x6a0] sm:$0xf] }
 0x2e8   : > { %v3664_v11 = vpop.f32.mrf.mxu2  ;;  %v3489_v31 = vpop.f32.mrf.mxu0 }
 0x2e9   : > { %v3753_v16 = vpop.f32.mrf.mxu3  ;;  %v3665_v63 = vadd.f32 %v3664_v11, %v3576_v49  ;;  %v3578_v17 = vpop.f32.mrf.mxu1  ;;  %v3490_v3 = vadd.f32 %v3489_v31, %v7000_v40  ;;  %v6330_v40 = vld [vmem:[%s7624_s1 + $0x3c0] sm:$0xff]  ;;  %v5294_v31 = vor.u32 %v6167_v48, %v5291_v9 }
 0x2ea   : > { %4090 = vmatpush.bf16.msrb.mxu3 %v6330_v40  ;;  %v6174_v49 = vld [vmem:[%s6469_s21 + $0x6dc] sm:$0xf0] }
 0x2eb   : > { %v7308_v30 = vadd.f32 %v3753_v16, %v3665_v63  ;;  %v3579_v52 = vadd.f32 %v3578_v17, %v3490_v3  ;;  %3528 = vmatmul.bf16.gmra.mxu0 %v5218_v7  ;;  %v5282_v11 = vor.u32 %v6174_v49, %v5281_v42  ;;  %v5290_v63 = vor.u32 %v6175_v25, %v5289_v1  ;;  %v6183_v42 = vld [vmem:[%s6469_s21 + $0x72c] sm:$0xf] }
 0x2ec   : > { %3617 = vmatmul.bf16.gmra.mxu1 %v5222_v20  ;;  %v5355_v49 = vld [vmem:[%s6469_s21 + $0x768] sm:$0xf0] }
 0x2ed   : > { %3706 = vmatmul.bf16.gmra.mxu2 %v5226_v33 }
 0x2ee   : > { %3795 = vmatmul.bf16.gmra.mxu3 %v5230_v57 }
 0x2f0   : > { %v3667_v19 = vpop.f32.mrf.mxu2  ;;  %v3491_v0 = vpop.f32.mrf.mxu0 }
 0x2f1   : > { %v3756_v6 = vpop.f32.mrf.mxu3  ;;  %v3668_v47 = vadd.f32 %v3667_v19, %v3579_v52  ;;  %v3580_v62 = vpop.f32.mrf.mxu1  ;;  %v3492_v37 = vadd.f32 %v3491_v0, %v7014_v14  ;;  %v5286_v14 = vor.u32 %v6166_v24, %v5283_v51  ;;  %v6190_v0 = vld [vmem:[%s6469_s21 + $0x75c] sm:$0xf0] }
 0x2f3   : > { %v7320_v29 = vadd.f32 %v3756_v6, %v3668_v47  ;;  %v3581_v55 = vadd.f32 %v3580_v62, %v3492_v37  ;;  %v5345_v47 = vld [vmem:[%s6469_s21 + $0x720] sm:$0xf]  ;;  %v6182_v62 = vld [vmem:[%s6469_s21 + $0x724] sm:$0xf] }
 0x2f4   : > { %v5347_v37 = vld [vmem:[%s6469_s21 + $0x760] sm:$0xf0]  ;;  %v5346_v1 = vor.u32 %v6190_v0, %v5345_v47  ;;  %v6199_v47 = vld [vmem:[%s6469_s21 + $0x7ac] sm:$0xf] }
 0x2f5   : > { %v5350_v25 = vor.u32 %v6182_v62, %v5347_v37  ;;  %v5419_v0 = vld [vmem:[%s6469_s21 + $0x7e8] sm:$0xf0] }
 0x2f8   : > { %v3669_v59 = vpop.f32.mrf.mxu2  ;;  %v3494_v7 = vpop.f32.mrf.mxu0 }
 0x2f9   : > { %v3758_v39 = vpop.f32.mrf.mxu3  ;;  %v3670_v16 = vadd.f32 %v3669_v59, %v3581_v55  ;;  %v3583_v20 = vpop.f32.mrf.mxu1  ;;  %v3495_v17 = vadd.f32 %v3494_v7, %v7017_v27  ;;  %v6191_v55 = vld [vmem:[%s6469_s21 + $0x764] sm:$0xf0] }
 0x2fb   : > { %v7334_v33 = vadd.f32 %v3758_v39, %v3670_v16  ;;  %v3584_v57 = vadd.f32 %v3583_v20, %v3495_v17  ;;  %3533 = vmatmul.bf16.gmra.mxu0 %v5282_v11  ;;  %v5354_v39 = vor.u32 %v6191_v55, %v5353_v26 }
 0x2fc   : > { %3622 = vmatmul.bf16.gmra.mxu1 %v5286_v14 }
 0x2fd   : > { %3711 = vmatmul.bf16.gmra.mxu2 %v5290_v63 }
 0x2fe   : > { %3800 = vmatmul.bf16.gmra.mxu3 %v5294_v31 }
 0x300   : > { %v3672_v3 = vpop.f32.mrf.mxu2  ;;  %v3496_v21 = vpop.f32.mrf.mxu0 }
 0x301   : > { %v3761_v52 = vpop.f32.mrf.mxu3  ;;  %v3673_v13 = vadd.f32 %v3672_v3, %v3584_v57  ;;  %v3585_v40 = vpop.f32.mrf.mxu1  ;;  %v3497_v27 = vadd.f32 %v3496_v21, %v7028_v54  ;;  %v5358_v54 = vor.u32 %v6183_v42, %v5355_v49  ;;  %v6198_v21 = vld [vmem:[%s6469_s21 + $0x7a4] sm:$0xf] }
 0x303   : > { %v7337_v19 = vadd.f32 %v3761_v52, %v3673_v13  ;;  %v3586_v6 = vadd.f32 %v3585_v40, %v3497_v27  ;;  %v5409_v52 = vld [vmem:[%s6469_s21 + $0x7a0] sm:$0xf]  ;;  %v5411_v40 = vld [vmem:[%s6469_s21 + $0x7e0] sm:$0xf0]  ;;  %v5417_v27 = vld [vmem:[%s6469_s21 + $0x7a8] sm:$0xf] }
 0x304   : > { %v6206_v13 = vld [vmem:[%s6469_s21 + $0x7dc] sm:$0xf0]  ;;  %v5414_v55 = vor.u32 %v6198_v21, %v5411_v40 }
 0x305   : > { %v5410_v26 = vor.u32 %v6206_v13, %v5409_v52  ;;  %v5961_v52 = vld [vmem:[%s6469_s21 + $0x3c] sm:$0xf] }
 0x306   : > { %v4475_v13 = vld [vmem:[%s6469_s21 + $0x78] sm:$0xf0] }
 0x308   : > { %v3674_v24 = vpop.f32.mrf.mxu2  ;;  %v3499_v9 = vpop.f32.mrf.mxu0 }
 0x309   : > { %v3763_v51 = vpop.f32.mrf.mxu3  ;;  %v3675_v48 = vadd.f32 %v3674_v24, %v3586_v6  ;;  %v3588_v59 = vpop.f32.mrf.mxu1  ;;  %v3500_v11 = vadd.f32 %v3499_v9, %v7040_v22  ;;  %v6207_v6 = vld [vmem:[%s6469_s21 + $0x7e4] sm:$0xf0] }
 0x30b   : > { %v7348_v14 = vadd.f32 %v3763_v51, %v3675_v48  ;;  %v3589_v16 = vadd.f32 %v3588_v59, %v3500_v11  ;;  %3538 = vmatmul.bf16.gmra.mxu0 %v5346_v1  ;;  %v5418_v51 = vor.u32 %v6207_v6, %v5417_v27 }
 0x30c   : > { %3627 = vmatmul.bf16.gmra.mxu1 %v5350_v25 }
 0x30d   : > { %3716 = vmatmul.bf16.gmra.mxu2 %v5354_v39 }
 0x30e   : > { %3805 = vmatmul.bf16.gmra.mxu3 %v5358_v54 }
 0x310   : > { %v3677_v7 = vpop.f32.mrf.mxu2  ;;  %v3501_v31 = vpop.f32.mrf.mxu0 }
 0x311   : > { %v3766_v20 = vpop.f32.mrf.mxu3  ;;  %v3678_v63 = vadd.f32 %v3677_v7, %v3589_v16  ;;  %v3590_v17 = vpop.f32.mrf.mxu1  ;;  %v3502_v22 = vadd.f32 %v3501_v31, %v7054_v60  ;;  %v5422_v60 = vor.u32 %v6199_v47, %v5419_v0  ;;  %v5960_v31 = vld [vmem:[%s6469_s21 + $0x34] sm:$0xf] }
 0x313   : > { %v7351_v57 = vadd.f32 %v3766_v20, %v3678_v63  ;;  %v3591_v3 = vadd.f32 %v3590_v17, %v3502_v22  ;;  %v4465_v20 = vld [vmem:[%s6469_s21 + $0x30] sm:$0xf]  ;;  %v4467_v17 = vld [vmem:[%s6469_s21 + $0x70] sm:$0xf0]  ;;  %v4473_v22 = vld [vmem:[%s6469_s21 + $0x38] sm:$0xf] }
 0x314   : > { %v5968_v63 = vld [vmem:[%s6469_s21 + $0x6c] sm:$0xf0]  ;;  %v4470_v6 = vor.u32 %v5960_v31, %v4467_v17 }
 0x315   : > { %v4466_v27 = vor.u32 %v5968_v63, %v4465_v20  ;;  %v5977_v20 = vld [vmem:[%s6469_s21 + $0xbc] sm:$0xf] }
 0x316   : > { %v4539_v63 = vld [vmem:[%s6469_s21 + $0xf8] sm:$0xf0] }
 0x318   : > { %v3679_v62 = vpop.f32.mrf.mxu2  ;;  %v3504_v49 = vpop.f32.mrf.mxu0 }
 0x319   : > { %v3768_v37 = vpop.f32.mrf.mxu3  ;;  %v3680_v42 = vadd.f32 %v3679_v62, %v3591_v3  ;;  %v3593_v24 = vpop.f32.mrf.mxu1  ;;  %v3505_v1 = vadd.f32 %v3504_v49, %v7057_v10  ;;  %v5969_v3 = vld [vmem:[%s6469_s21 + $0x74] sm:$0xf0] }
 0x31b   : > { %v7362_v25 = vadd.f32 %v3768_v37, %v3680_v42  ;;  %v3594_v48 = vadd.f32 %v3593_v24, %v3505_v1  ;;  %3543 = vmatmul.bf16.gmra.mxu0 %v5410_v26  ;;  %v4474_v37 = vor.u32 %v5969_v3, %v4473_v22 }
 0x31c   : > { %3632 = vmatmul.bf16.gmra.mxu1 %v5414_v55 }
 0x31d   : > { %3721 = vmatmul.bf16.gmra.mxu2 %v5418_v51 }
 0x31e   : > { %3810 = vmatmul.bf16.gmra.mxu3 %v5422_v60 }
 0x320   : > { %v3682_v9 = vpop.f32.mrf.mxu2  ;;  %v3506_v54 = vpop.f32.mrf.mxu0 }
 0x321   : > { %v3771_v59 = vpop.f32.mrf.mxu3  ;;  %v3683_v39 = vadd.f32 %v3682_v9, %v3594_v48  ;;  %v3595_v11 = vpop.f32.mrf.mxu1  ;;  %v3507_v10 = vadd.f32 %v3506_v54, %v7068_v56  ;;  %v4478_v56 = vor.u32 %v5961_v52, %v4475_v13  ;;  %v5976_v54 = vld [vmem:[%s6469_s21 + $0xb4] sm:$0xf] }
 0x323   : > { %v7365_v16 = vadd.f32 %v3771_v59, %v3683_v39  ;;  %v3596_v7 = vadd.f32 %v3595_v11, %v3507_v10  ;;  %v4529_v59 = vld [vmem:[%s6469_s21 + $0xb0] sm:$0xf]  ;;  %v4531_v11 = vld [vmem:[%s6469_s21 + $0xf0] sm:$0xf0]  ;;  %v4537_v10 = vld [vmem:[%s6469_s21 + $0xb8] sm:$0xf] }
 0x324   : > { %v5984_v39 = vld [vmem:[%s6469_s21 + $0xec] sm:$0xf0]  ;;  %v4534_v3 = vor.u32 %v5976_v54, %v4531_v11 }
 0x325   : > { %v4530_v22 = vor.u32 %v5984_v39, %v4529_v59  ;;  %v5993_v59 = vld [vmem:[%s6469_s21 + $0x13c] sm:$0xf] }
 0x326   : > { %v4603_v39 = vld [vmem:[%s6469_s21 + $0x178] sm:$0xf0] }
 0x328   : > { %v3684_v21 = vpop.f32.mrf.mxu2  ;;  %v3509_v0 = vpop.f32.mrf.mxu0 }
 0x329   : > { %v3773_v40 = vpop.f32.mrf.mxu3  ;;  %v3685_v47 = vadd.f32 %v3684_v21, %v3596_v7  ;;  %v3598_v62 = vpop.f32.mrf.mxu1  ;;  %v3510_v26 = vadd.f32 %v3509_v0, %v7080_v4  ;;  %v5985_v7 = vld [vmem:[%s6469_s21 + $0xf4] sm:$0xf0] }
 0x32b   : > { %v7376_v55 = vadd.f32 %v3773_v40, %v3685_v47  ;;  %v3599_v42 = vadd.f32 %v3598_v62, %v3510_v26  ;;  %3824 = vmatmul.bf16.vlgmr.msrb.gmra.mxu0 %v4466_v27  ;;  %v4538_v40 = vor.u32 %v5985_v7, %v4537_v10 }
 0x32c   : > { %3913 = vmatmul.bf16.vlgmr.msrb.gmra.mxu1 %v4470_v6 }
 0x32d   : > { %4002 = vmatmul.bf16.vlgmr.msrb.gmra.mxu2 %v4474_v37 }
 0x32e   : > { %4091 = vmatmul.bf16.vlgmr.msrb.gmra.mxu3 %v4478_v56 }
 0x330   : > { %v3687_v49 = vpop.f32.mrf.mxu2  ;;  %v3511_v60 = vpop.f32.mrf.mxu0 }
 0x331   : > { %v3776_v24 = vpop.f32.mrf.mxu3  ;;  %v3688_v51 = vadd.f32 %v3687_v49, %v3599_v42  ;;  %v3600_v1 = vpop.f32.mrf.mxu1  ;;  %v3512_v4 = vadd.f32 %v3511_v60, %v7094_v43  ;;  %v4542_v43 = vor.u32 %v5977_v20, %v4539_v63  ;;  %v5992_v60 = vld [vmem:[%s6469_s21 + $0x134] sm:$0xf] }
 0x333   : > { %v7379_v48 = vadd.f32 %v3776_v24, %v3688_v51  ;;  %v3601_v9 = vadd.f32 %v3600_v1, %v3512_v4  ;;  %v4593_v24 = vld [vmem:[%s6469_s21 + $0x130] sm:$0xf]  ;;  %v4595_v1 = vld [vmem:[%s6469_s21 + $0x170] sm:$0xf0]  ;;  %v4601_v4 = vld [vmem:[%s6469_s21 + $0x138] sm:$0xf] }
 0x334   : > { %v6000_v51 = vld [vmem:[%s6469_s21 + $0x16c] sm:$0xf0]  ;;  %v4598_v7 = vor.u32 %v5992_v60, %v4595_v1 }
 0x335   : > { %v4594_v10 = vor.u32 %v6000_v51, %v4593_v24  ;;  %v6009_v24 = vld [vmem:[%s6469_s21 + $0x1bc] sm:$0xf] }
 0x336   : > { %v4667_v51 = vld [vmem:[%s6469_s21 + $0x1f8] sm:$0xf0] }
 0x338   : > { %v3689_v31 = vpop.f32.mrf.mxu2  ;;  %v3514_v13 = vpop.f32.mrf.mxu0 }
 0x339   : > { %v3778_v17 = vpop.f32.mrf.mxu3  ;;  %v3690_v52 = vadd.f32 %v3689_v31, %v3601_v9  ;;  %v3603_v21 = vpop.f32.mrf.mxu1  ;;  %v3515_v27 = vadd.f32 %v3514_v13, %v7097_v58  ;;  %v6001_v9 = vld [vmem:[%s6469_s21 + $0x174] sm:$0xf0] }
 0x33b   : > { %v7390_v6 = vadd.f32 %v3778_v17, %v3690_v52  ;;  %v3604_v47 = vadd.f32 %v3603_v21, %v3515_v27  ;;  %3829 = vmatmul.bf16.gmra.mxu0 %v4530_v22  ;;  %v4602_v17 = vor.u32 %v6001_v9, %v4601_v4 }
 0x33c   : > { %3918 = vmatmul.bf16.gmra.mxu1 %v4534_v3 }
 0x33d   : > { %4007 = vmatmul.bf16.gmra.mxu2 %v4538_v40 }
 0x33e   : > { %4096 = vmatmul.bf16.gmra.mxu3 %v4542_v43 }
 0x340   : > { %v3692_v0 = vpop.f32.mrf.mxu2  ;;  %v3516_v56 = vpop.f32.mrf.mxu0 }
 0x341   : > { %v3781_v62 = vpop.f32.mrf.mxu3  ;;  %v3693_v37 = vadd.f32 %v3692_v0, %v3604_v47  ;;  %v3605_v26 = vpop.f32.mrf.mxu1  ;;  %v3517_v58 = vadd.f32 %v3516_v56, %v7108_v2  ;;  %v4606_v2 = vor.u32 %v5993_v59, %v4603_v39  ;;  %v6008_v56 = vld [vmem:[%s6469_s21 + $0x1b4] sm:$0xf] }
 0x343   : > { %v7393_v42 = vadd.f32 %v3781_v62, %v3693_v37  ;;  %v3606_v49 = vadd.f32 %v3605_v26, %v3517_v58  ;;  %v4657_v62 = vld [vmem:[%s6469_s21 + $0x1b0] sm:$0xf]  ;;  %v4659_v26 = vld [vmem:[%s6469_s21 + $0x1f0] sm:$0xf0]  ;;  %v4665_v58 = vld [vmem:[%s6469_s21 + $0x1b8] sm:$0xf] }
 0x344   : > { %v6016_v37 = vld [vmem:[%s6469_s21 + $0x1ec] sm:$0xf0]  ;;  %v4662_v9 = vor.u32 %v6008_v56, %v4659_v26 }
 0x345   : > { %v4658_v4 = vor.u32 %v6016_v37, %v4657_v62  ;;  %v6025_v62 = vld [vmem:[%s6469_s21 + $0x23c] sm:$0xf] }
 0x346   : > { %v4731_v37 = vld [vmem:[%s6469_s21 + $0x278] sm:$0xf0] }
 0x348   : > { %v3694_v54 = vpop.f32.mrf.mxu2  ;;  %v3519_v63 = vpop.f32.mrf.mxu0 }
 0x349   : > { %v3783_v11 = vpop.f32.mrf.mxu3  ;;  %v3695_v20 = vadd.f32 %v3694_v54, %v3606_v49  ;;  %v3608_v31 = vpop.f32.mrf.mxu1  ;;  %v3520_v22 = vadd.f32 %v3519_v63, %v7120_v50  ;;  %v6017_v49 = vld [vmem:[%s6469_s21 + $0x1f4] sm:$0xf0] }
 0x34b   : > { %v7404_v3 = vadd.f32 %v3783_v11, %v3695_v20  ;;  %v3609_v52 = vadd.f32 %v3608_v31, %v3520_v22  ;;  %3834 = vmatmul.bf16.gmra.mxu0 %v4594_v10  ;;  %v4666_v11 = vor.u32 %v6017_v49, %v4665_v58 }
 0x34c   : > { %3923 = vmatmul.bf16.gmra.mxu1 %v4598_v7 }
 0x34d   : > { %4012 = vmatmul.bf16.gmra.mxu2 %v4602_v17 }
 0x34e   : > { %4101 = vmatmul.bf16.gmra.mxu3 %v4606_v2 }
 0x350   : > { %v3697_v13 = vpop.f32.mrf.mxu2  ;;  %v3521_v43 = vpop.f32.mrf.mxu0 }
 0x351   : > { %v3786_v21 = vpop.f32.mrf.mxu3  ;;  %v3698_v40 = vadd.f32 %v3697_v13, %v3609_v52  ;;  %v3610_v27 = vpop.f32.mrf.mxu1  ;;  %v3522_v50 = vadd.f32 %v3521_v43, %v7134_v28  ;;  %v4670_v28 = vor.u32 %v6009_v24, %v4667_v51  ;;  %v6024_v43 = vld [vmem:[%s6469_s21 + $0x234] sm:$0xf] }
 0x353   : > { %v7407_v47 = vadd.f32 %v3786_v21, %v3698_v40  ;;  %v3611_v0 = vadd.f32 %v3610_v27, %v3522_v50  ;;  %v4721_v21 = vld [vmem:[%s6469_s21 + $0x230] sm:$0xf]  ;;  %v4723_v27 = vld [vmem:[%s6469_s21 + $0x270] sm:$0xf0]  ;;  %v4729_v50 = vld [vmem:[%s6469_s21 + $0x238] sm:$0xf] }
 0x354   : > { %v6032_v40 = vld [vmem:[%s6469_s21 + $0x26c] sm:$0xf0]  ;;  %v4726_v49 = vor.u32 %v6024_v43, %v4723_v27 }
 0x355   : > { %v4722_v58 = vor.u32 %v6032_v40, %v4721_v21  ;;  %v6041_v21 = vld [vmem:[%s6469_s21 + $0x2bc] sm:$0xf] }
 0x356   : > { %v4795_v40 = vld [vmem:[%s6469_s21 + $0x2f8] sm:$0xf0] }
 0x358   : > { %v3699_v60 = vpop.f32.mrf.mxu2  ;;  %v3524_v39 = vpop.f32.mrf.mxu0 }
 0x359   : > { %v3788_v1 = vpop.f32.mrf.mxu3  ;;  %v3700_v59 = vadd.f32 %v3699_v60, %v3611_v0  ;;  %v3613_v54 = vpop.f32.mrf.mxu1  ;;  %v3525_v10 = vadd.f32 %v3524_v39, %v7137_v41  ;;  %v6033_v0 = vld [vmem:[%s6469_s21 + $0x274] sm:$0xf0] }
 0x35b   : > { %v7418_v7 = vadd.f32 %v3788_v1, %v3700_v59  ;;  %v3614_v20 = vadd.f32 %v3613_v54, %v3525_v10  ;;  %3839 = vmatmul.bf16.gmra.mxu0 %v4658_v4  ;;  %v4730_v1 = vor.u32 %v6033_v0, %v4729_v50 }
 0x35c   : > { %3928 = vmatmul.bf16.gmra.mxu1 %v4662_v9 }
 0x35d   : > { %4017 = vmatmul.bf16.gmra.mxu2 %v4666_v11 }
 0x35e   : > { %4106 = vmatmul.bf16.gmra.mxu3 %v4670_v28 }
 0x360   : > { %v3702_v63 = vpop.f32.mrf.mxu2  ;;  %v3526_v2 = vpop.f32.mrf.mxu0 }
 0x361   : > { %v3791_v31 = vpop.f32.mrf.mxu3  ;;  %v3703_v17 = vadd.f32 %v3702_v63, %v3614_v20  ;;  %v3615_v22 = vpop.f32.mrf.mxu1  ;;  %v3527_v41 = vadd.f32 %v3526_v2, %v7148_v15  ;;  %v4734_v15 = vor.u32 %v6025_v62, %v4731_v37  ;;  %v6040_v2 = vld [vmem:[%s6469_s21 + $0x2b4] sm:$0xf] }
 0x363   : > { %v7421_v52 = vadd.f32 %v3791_v31, %v3703_v17  ;;  %v3616_v13 = vadd.f32 %v3615_v22, %v3527_v41  ;;  %v4785_v31 = vld [vmem:[%s6469_s21 + $0x2b0] sm:$0xf]  ;;  %v4787_v22 = vld [vmem:[%s6469_s21 + $0x2f0] sm:$0xf0]  ;;  %v4793_v41 = vld [vmem:[%s6469_s21 + $0x2b8] sm:$0xf] }
 0x364   : > { %v6048_v17 = vld [vmem:[%s6469_s21 + $0x2ec] sm:$0xf0]  ;;  %v4790_v0 = vor.u32 %v6040_v2, %v4787_v22 }
 0x365   : > { %v4786_v50 = vor.u32 %v6048_v17, %v4785_v31  ;;  %v6057_v31 = vld [vmem:[%s6469_s21 + $0x33c] sm:$0xf] }
 0x366   : > { %v4859_v17 = vld [vmem:[%s6469_s21 + $0x378] sm:$0xf0] }
 0x368   : > { %v3704_v56 = vpop.f32.mrf.mxu2  ;;  %v3529_v51 = vpop.f32.mrf.mxu0 }
 0x369   : > { %v3793_v26 = vpop.f32.mrf.mxu3  ;;  %v3705_v24 = vadd.f32 %v3704_v56, %v3616_v13  ;;  %v3618_v60 = vpop.f32.mrf.mxu1  ;;  %v3530_v4 = vadd.f32 %v3529_v51, %v7160_v34  ;;  %v6049_v13 = vld [vmem:[%s6469_s21 + $0x2f4] sm:$0xf0] }
 0x36b   : > { %v7432_v9 = vadd.f32 %v3793_v26, %v3705_v24  ;;  %v3619_v59 = vadd.f32 %v3618_v60, %v3530_v4  ;;  %3844 = vmatmul.bf16.gmra.mxu0 %v4722_v58  ;;  %v4794_v26 = vor.u32 %v6049_v13, %v4793_v41 }
 0x36c   : > { %3933 = vmatmul.bf16.gmra.mxu1 %v4726_v49 }
 0x36d   : > { %4022 = vmatmul.bf16.gmra.mxu2 %v4730_v1 }
 0x36e   : > { %4111 = vmatmul.bf16.gmra.mxu3 %v4734_v15 }
 0x370   : > { %v3707_v39 = vpop.f32.mrf.mxu2  ;;  %v3531_v28 = vpop.f32.mrf.mxu0 }
 0x371   : > { %v3796_v54 = vpop.f32.mrf.mxu3  ;;  %v3708_v11 = vadd.f32 %v3707_v39, %v3619_v59  ;;  %v3620_v10 = vpop.f32.mrf.mxu1  ;;  %v3532_v34 = vadd.f32 %v3531_v28, %v7174_v12  ;;  %v4798_v12 = vor.u32 %v6041_v21, %v4795_v40  ;;  %v6056_v28 = vld [vmem:[%s6469_s21 + $0x334] sm:$0xf] }
 0x373   : > { %v7435_v20 = vadd.f32 %v3796_v54, %v3708_v11  ;;  %v3621_v63 = vadd.f32 %v3620_v10, %v3532_v34  ;;  %v4849_v54 = vld [vmem:[%s6469_s21 + $0x330] sm:$0xf]  ;;  %v4851_v10 = vld [vmem:[%s6469_s21 + $0x370] sm:$0xf0]  ;;  %v4857_v34 = vld [vmem:[%s6469_s21 + $0x338] sm:$0xf] }
 0x374   : > { %v6064_v11 = vld [vmem:[%s6469_s21 + $0x36c] sm:$0xf0]  ;;  %v4854_v13 = vor.u32 %v6056_v28, %v4851_v10 }
 0x375   : > { %v4850_v41 = vor.u32 %v6064_v11, %v4849_v54  ;;  %v6073_v54 = vld [vmem:[%s6469_s21 + $0x3bc] sm:$0xf] }
 0x376   : > { %v4923_v11 = vld [vmem:[%s6469_s21 + $0x3f8] sm:$0xf0] }
 0x378   : > { %v3709_v43 = vpop.f32.mrf.mxu2  ;;  %v3534_v37 = vpop.f32.mrf.mxu0 }
 0x379   : > { %v3798_v27 = vpop.f32.mrf.mxu3  ;;  %v3710_v62 = vadd.f32 %v3709_v43, %v3621_v63  ;;  %v3623_v56 = vpop.f32.mrf.mxu1  ;;  %v3535_v58 = vadd.f32 %v3534_v37, %v7177_v23  ;;  %v6065_v63 = vld [vmem:[%s6469_s21 + $0x374] sm:$0xf0] }
 0x37b   : > { %v7446_v49 = vadd.f32 %v3798_v27, %v3710_v62  ;;  %v3624_v24 = vadd.f32 %v3623_v56, %v3535_v58  ;;  %3849 = vmatmul.bf16.gmra.mxu0 %v4786_v50  ;;  %v4858_v27 = vor.u32 %v6065_v63, %v4857_v34 }
 0x37c   : > { %3938 = vmatmul.bf16.gmra.mxu1 %v4790_v0 }
 0x37d   : > { %4027 = vmatmul.bf16.gmra.mxu2 %v4794_v26 }
 0x37e   : > { %4116 = vmatmul.bf16.gmra.mxu3 %v4798_v12 }
 0x380   : > { %v3712_v51 = vpop.f32.mrf.mxu2  ;;  %v3536_v15 = vpop.f32.mrf.mxu0 }
 0x381   : > { %v3801_v60 = vpop.f32.mrf.mxu3  ;;  %v3713_v1 = vadd.f32 %v3712_v51, %v3624_v24  ;;  %v3625_v4 = vpop.f32.mrf.mxu1  ;;  %v3537_v23 = vadd.f32 %v3536_v15, %v7188_v38  ;;  %v4862_v38 = vor.u32 %v6057_v31, %v4859_v17  ;;  %v6072_v15 = vld [vmem:[%s6469_s21 + $0x3b4] sm:$0xf] }
 0x383   : > { %v7449_v59 = vadd.f32 %v3801_v60, %v3713_v1  ;;  %v3626_v39 = vadd.f32 %v3625_v4, %v3537_v23  ;;  %v4913_v60 = vld [vmem:[%s6469_s21 + $0x3b0] sm:$0xf]  ;;  %v4915_v4 = vld [vmem:[%s6469_s21 + $0x3f0] sm:$0xf0]  ;;  %v4921_v23 = vld [vmem:[%s6469_s21 + $0x3b8] sm:$0xf] }
 0x384   : > { %v6080_v1 = vld [vmem:[%s6469_s21 + $0x3ec] sm:$0xf0]  ;;  %v4918_v63 = vor.u32 %v6072_v15, %v4915_v4 }
 0x385   : > { %v4914_v34 = vor.u32 %v6080_v1, %v4913_v60  ;;  %v6089_v60 = vld [vmem:[%s6469_s21 + $0x43c] sm:$0xf] }
 0x386   : > { %v4987_v1 = vld [vmem:[%s6469_s21 + $0x478] sm:$0xf0] }
 0x388   : > { %v3714_v2 = vpop.f32.mrf.mxu2  ;;  %v3539_v40 = vpop.f32.mrf.mxu0 }
 0x389   : > { %v3803_v22 = vpop.f32.mrf.mxu3  ;;  %v3715_v21 = vadd.f32 %v3714_v2, %v3626_v39  ;;  %v3628_v43 = vpop.f32.mrf.mxu1  ;;  %v3540_v50 = vadd.f32 %v3539_v40, %v7200_v18  ;;  %v6081_v39 = vld [vmem:[%s6469_s21 + $0x3f4] sm:$0xf0] }
 0x38b   : > { %v7460_v0 = vadd.f32 %v3803_v22, %v3715_v21  ;;  %v3629_v62 = vadd.f32 %v3628_v43, %v3540_v50  ;;  %3854 = vmatmul.bf16.gmra.mxu0 %v4850_v41  ;;  %v4922_v22 = vor.u32 %v6081_v39, %v4921_v23 }
 0x38c   : > { %3943 = vmatmul.bf16.gmra.mxu1 %v4854_v13 }
 0x38d   : > { %4032 = vmatmul.bf16.gmra.mxu2 %v4858_v27 }
 0x38e   : > { %4121 = vmatmul.bf16.gmra.mxu3 %v4862_v38 }
 0x390   : > { %v3717_v37 = vpop.f32.mrf.mxu2  ;;  %v3541_v12 = vpop.f32.mrf.mxu0 }
 0x391   : > { %v3806_v56 = vpop.f32.mrf.mxu3  ;;  %v3718_v26 = vadd.f32 %v3717_v37, %v3629_v62  ;;  %v3630_v58 = vpop.f32.mrf.mxu1  ;;  %v3542_v18 = vadd.f32 %v3541_v12, %v7214_v44  ;;  %v4926_v44 = vor.u32 %v6073_v54, %v4923_v11  ;;  %v6088_v12 = vld [vmem:[%s6469_s21 + $0x434] sm:$0xf] }
 0x393   : > { %v7463_v24 = vadd.f32 %v3806_v56, %v3718_v26  ;;  %v3631_v51 = vadd.f32 %v3630_v58, %v3542_v18  ;;  %v4977_v56 = vld [vmem:[%s6469_s21 + $0x430] sm:$0xf]  ;;  %v4979_v58 = vld [vmem:[%s6469_s21 + $0x470] sm:$0xf0]  ;;  %v4985_v18 = vld [vmem:[%s6469_s21 + $0x438] sm:$0xf] }
 0x394   : > { %v6096_v26 = vld [vmem:[%s6469_s21 + $0x46c] sm:$0xf0]  ;;  %v4982_v39 = vor.u32 %v6088_v12, %v4979_v58 }
 0x395   : > { %v4978_v23 = vor.u32 %v6096_v26, %v4977_v56  ;;  %v5051_v56 = vld [vmem:[%s6469_s21 + $0x4f8] sm:$0xf0] }
 0x398   : > { %v3719_v28 = vpop.f32.mrf.mxu2  ;;  %v3544_v17 = vpop.f32.mrf.mxu0 }
 0x399   : > { %v3808_v10 = vpop.f32.mrf.mxu3  ;;  %v3720_v31 = vadd.f32 %v3719_v28, %v3631_v51  ;;  %v3633_v2 = vpop.f32.mrf.mxu1  ;;  %v3545_v41 = vadd.f32 %v3544_v17, %v7217_v8  ;;  %v6097_v51 = vld [vmem:[%s6469_s21 + $0x474] sm:$0xf0] }
 0x39b   : > { %v7474_v13 = vadd.f32 %v3808_v10, %v3720_v31  ;;  %v3634_v21 = vadd.f32 %v3633_v2, %v3545_v41  ;;  %3859 = vmatmul.bf16.gmra.mxu0 %v4914_v34  ;;  %v4990_v10 = vor.u32 %v6089_v60, %v4987_v1 }
 0x39c   : > { %3948 = vmatmul.bf16.gmra.mxu1 %v4918_v63 }
 0x39d   : > { %4037 = vmatmul.bf16.gmra.mxu2 %v4922_v22 }
 0x39e   : > { %4126 = vmatmul.bf16.gmra.mxu3 %v4926_v44 }
 0x3a0   : > { %v3722_v40 = vpop.f32.mrf.mxu2  ;;  %v3546_v38 = vpop.f32.mrf.mxu0 }
 0x3a1   : > { %v3811_v43 = vpop.f32.mrf.mxu3  ;;  %v3723_v27 = vadd.f32 %v3722_v40, %v3634_v21  ;;  %v3635_v50 = vpop.f32.mrf.mxu1  ;;  %v3547_v8 = vadd.f32 %v3546_v38, %v7228_v5  ;;  %v4986_v5 = vor.u32 %v6097_v51, %v4985_v18  ;;  %v5041_v40 = vld [vmem:[%s6469_s21 + $0x4b0] sm:$0xf]  ;;  %v5043_v38 = vld [vmem:[%s6469_s21 + $0x4f0] sm:$0xf0] }
 0x3a3   : > { %v7477_v62 = vadd.f32 %v3811_v43, %v3723_v27  ;;  %v3636_v37 = vadd.f32 %v3635_v50, %v3547_v8  ;;  %v6112_v43 = vld [vmem:[%s6469_s21 + $0x4ec] sm:$0xf0]  ;;  %v6104_v27 = vld [vmem:[%s6469_s21 + $0x4b4] sm:$0xf]  ;;  %v5049_v50 = vld [vmem:[%s6469_s21 + $0x4b8] sm:$0xf] }
 0x3a4   : > { %v6113_v8 = vld [vmem:[%s6469_s21 + $0x4f4] sm:$0xf0]  ;;  %v5042_v18 = vor.u32 %v6112_v43, %v5041_v40  ;;  %v5046_v51 = vor.u32 %v6104_v27, %v5043_v38  ;;  %v5107_v27 = vld [vmem:[%s6469_s21 + $0x570] sm:$0xf0] }
 0x3a5   : > { %v5113_v38 = vld [vmem:[%s6469_s21 + $0x538] sm:$0xf] }
 0x3a8   : > { %v3724_v15 = vpop.f32.mrf.mxu2  ;;  %v3825_v11 = vpop.f32.mrf.mxu0 }
 0x3a9   : > { %v3813_v4 = vpop.f32.mrf.mxu3  ;;  %v3725_v54 = vadd.f32 %v3724_v15, %v3636_v37  ;;  %v3914_v28 = vpop.f32.mrf.mxu1  ;;  %v3826_v63 = vadd.f32 %v3825_v11, %v7240_v61  ;;  %v6105_v37 = vld [vmem:[%s6469_s21 + $0x4bc] sm:$0xf] }
 0x3ab   : > { %v7487_v34 = vadd.f32 %v3813_v4, %v3725_v54  ;;  %3864 = vmatmul.bf16.gmra.mxu0 %v4978_v23  ;;  %v3915_v31 = vadd.f32 %v3914_v28, %v3826_v63  ;;  %v5050_v4 = vor.u32 %v6113_v8, %v5049_v50  ;;  %v6129_v50 = vld [vmem:[%s6469_s21 + $0x574] sm:$0xf0]  ;;  %v6121_v8 = vld [vmem:[%s6469_s21 + $0x53c] sm:$0xf] }
 0x3ac   : > { %3953 = vmatmul.bf16.gmra.mxu1 %v4982_v39 }
 0x3ad   : > { %4042 = vmatmul.bf16.gmra.mxu2 %v4986_v5 }
 0x3ae   : > { %4131 = vmatmul.bf16.gmra.mxu3 %v4990_v10 }
 0x3b0   : > { %v4003_v17 = vpop.f32.mrf.mxu2  ;;  %v3827_v44 = vpop.f32.mrf.mxu0 }
 0x3b1   : > { %v4092_v2 = vpop.f32.mrf.mxu3  ;;  %v4004_v22 = vadd.f32 %v4003_v17, %v3915_v31  ;;  %v3916_v41 = vpop.f32.mrf.mxu1  ;;  %v3828_v21 = vadd.f32 %v3827_v44, %v7254_v36  ;;  %v5054_v36 = vor.u32 %v6105_v37, %v5051_v56  ;;  %v5115_v37 = vld [vmem:[%s6469_s21 + $0x578] sm:$0xf0] }
 0x3b3   : > { %v4093_v61 = vadd.f32 %v4092_v2, %v4004_v22  ;;  %v3917_v26 = vadd.f32 %v3916_v41, %v3828_v21  ;;  %v5105_v41 = vld [vmem:[%s6469_s21 + $0x530] sm:$0xf]  ;;  %v6120_v21 = vld [vmem:[%s6469_s21 + $0x534] sm:$0xf] }
 0x3b5   : > { %4172 = vst [vmem:[%s7494_s22] sm:$0xff] %v4093_v61  ;;  %v4241_v54 = vmul.f32 %v4093_v61, %v4093_v61 }
 0x3b8   : > { %v4005_v12 = vpop.f32.mrf.mxu2  ;;  %v3830_v1 = vpop.f32.mrf.mxu0 }
 0x3b9   : > { %v4094_v58 = vpop.f32.mrf.mxu3  ;;  %v4006_v60 = vadd.f32 %v4005_v12, %v3917_v26  ;;  %v3919_v15 = vpop.f32.mrf.mxu1  ;;  %v3831_v39 = vadd.f32 %v3830_v1, %v7257_v53 }
 0x3bb   : > { %v4095_v23 = vadd.f32 %v4094_v58, %v4006_v60  ;;  %3869 = vmatmul.bf16.gmra.mxu0 %v5042_v18  ;;  %v3920_v10 = vadd.f32 %v3919_v15, %v3831_v39  ;;  %v5114_v15 = vor.u32 %v6129_v50, %v5113_v38  ;;  %v5179_v38 = vld [vmem:[%s6469_s21 + $0x5f8] sm:$0xf0] }
 0x3bc   : > { %3958 = vmatmul.bf16.gmra.mxu1 %v5046_v51  ;;  %v5110_v51 = vor.u32 %v6120_v21, %v5107_v27  ;;  %v5171_v21 = vld [vmem:[%s6469_s21 + $0x5f0] sm:$0xf0]  ;;  %v6137_v27 = vld [vmem:[%s6469_s21 + $0x5bc] sm:$0xf] }
 0x3bd   : > { %4173 = vst [vmem:[%s7494_s22 + $0x8] sm:$0xff] %v4095_v23  ;;  %v4204_v11 = vadd.f32 %v4095_v23, %v4093_v61  ;;  %v4242_v28 = vmul.f32 %v4095_v23, %v4095_v23  ;;  %4047 = vmatmul.bf16.gmra.mxu2 %v5050_v4  ;;  %v6128_v61 = vld [vmem:[%s6469_s21 + $0x56c] sm:$0xf0]  ;;  %v5118_v4 = vor.u32 %v6121_v8, %v5115_v37 }
 0x3be   : > { %4136 = vmatmul.bf16.gmra.mxu3 %v5054_v36  ;;  %v5106_v18 = vor.u32 %v6128_v61, %v5105_v41 }
 0x3bf   : > { %v4273_v5 = vadd.f32 %v4242_v28, %v4241_v54 }
 0x3c0   : > { %v4008_v63 = vpop.f32.mrf.mxu2  ;;  %v3832_v17 = vpop.f32.mrf.mxu0 }
 0x3c1   : > { %v4097_v53 = vpop.f32.mrf.mxu3  ;;  %v4009_v31 = vadd.f32 %v4008_v63, %v3920_v10  ;;  %v3921_v2 = vpop.f32.mrf.mxu1  ;;  %v3833_v44 = vadd.f32 %v3832_v17, %v7268_v46 }
 0x3c3   : > { %v4098_v22 = vadd.f32 %v4097_v53, %v4009_v31  ;;  %v3922_v26 = vadd.f32 %v3921_v2, %v3833_v44  ;;  %v5169_v2 = vld [vmem:[%s6469_s21 + $0x5b0] sm:$0xf]  ;;  %v6136_v44 = vld [vmem:[%s6469_s21 + $0x5b4] sm:$0xf] }
 0x3c5   : > { %4174 = vst [vmem:[%s7494_s22 + $0x10] sm:$0xff] %v4098_v22  ;;  %v4205_v40 = vadd.f32 %v4204_v11, %v4098_v22  ;;  %v4243_v43 = vmul.f32 %v4098_v22, %v4098_v22  ;;  %v6144_v22 = vld [vmem:[%s6469_s21 + $0x5ec] sm:$0xf0] }
 0x3c7   : > { %v4274_v56 = vadd.f32 %v4273_v5, %v4243_v43  ;;  %v6145_v43 = vld [vmem:[%s6469_s21 + $0x5f4] sm:$0xf0] }
 0x3c8   : > { %v4010_v12 = vpop.f32.mrf.mxu2  ;;  %v3835_v46 = vpop.f32.mrf.mxu0 }
 0x3c9   : > { %v4099_v58 = vpop.f32.mrf.mxu3  ;;  %v4011_v60 = vadd.f32 %v4010_v12, %v3922_v26  ;;  %v3924_v1 = vpop.f32.mrf.mxu1  ;;  %v3836_v23 = vadd.f32 %v3835_v46, %v7280_v45  ;;  %v5170_v26 = vor.u32 %v6144_v22, %v5169_v2  ;;  %v5174_v12 = vor.u32 %v6136_v44, %v5171_v21  ;;  %v5235_v2 = vld [vmem:[%s6469_s21 + $0x670] sm:$0xf0]  ;;  %v5241_v22 = vld [vmem:[%s6469_s21 + $0x638] sm:$0xf] }
 0x3ca   : > { %v6161_v44 = vld [vmem:[%s6469_s21 + $0x674] sm:$0xf0] }
 0x3cb   : > { %v4100_v36 = vadd.f32 %v4099_v58, %v4011_v60  ;;  %3874 = vmatmul.bf16.gmra.mxu0 %v5106_v18  ;;  %v3925_v28 = vadd.f32 %v3924_v1, %v3836_v23  ;;  %v5182_v60 = vor.u32 %v6137_v27, %v5179_v38 }
 0x3cc   : > { %3963 = vmatmul.bf16.gmra.mxu1 %v5110_v51 }
 0x3cd   : > { %4175 = vst [vmem:[%s7494_s22 + $0x18] sm:$0xff] %v4100_v36  ;;  %v4206_v39 = vadd.f32 %v4205_v40, %v4100_v36  ;;  %v4244_v54 = vmul.f32 %v4100_v36, %v4100_v36  ;;  %4052 = vmatmul.bf16.gmra.mxu2 %v5114_v15  ;;  %v5177_v40 = vld [vmem:[%s6469_s21 + $0x5b8] sm:$0xf] }
 0x3ce   : > { %4141 = vmatmul.bf16.gmra.mxu3 %v5118_v4  ;;  %v5178_v51 = vor.u32 %v6145_v43, %v5177_v40 }
 0x3cf   : > { %v4275_v11 = vadd.f32 %v4274_v56, %v4244_v54 }
 0x3d0   : > { %v4013_v5 = vpop.f32.mrf.mxu2  ;;  %v3837_v63 = vpop.f32.mrf.mxu0 }
 0x3d1   : > { %v4102_v10 = vpop.f32.mrf.mxu3  ;;  %v4014_v45 = vadd.f32 %v4013_v5, %v3925_v28  ;;  %v3926_v53 = vpop.f32.mrf.mxu1  ;;  %v3838_v17 = vadd.f32 %v3837_v63, %v7294_v32  ;;  %v6160_v63 = vld [vmem:[%s6469_s21 + $0x66c] sm:$0xf0] }
 0x3d3   : > { %v4103_v31 = vadd.f32 %v4102_v10, %v4014_v45  ;;  %v3927_v8 = vadd.f32 %v3926_v53, %v3838_v17  ;;  %v5233_v45 = vld [vmem:[%s6469_s21 + $0x630] sm:$0xf]  ;;  %v6152_v53 = vld [vmem:[%s6469_s21 + $0x634] sm:$0xf] }
 0x3d4   : > { %v5234_v38 = vor.u32 %v6160_v63, %v5233_v45  ;;  %v6177_v45 = vld [vmem:[%s6469_s21 + $0x6f4] sm:$0xf0]  ;;  %v6169_v63 = vld [vmem:[%s6469_s21 + $0x6bc] sm:$0xf] }
 0x3d5   : > { %4176 = vst [vmem:[%s7494_s22 + $0x20] sm:$0xff] %v4103_v31  ;;  %v4207_v41 = vadd.f32 %v4206_v39, %v4103_v31  ;;  %v4245_v61 = vmul.f32 %v4103_v31, %v4103_v31 }
 0x3d7   : > { %v4276_v50 = vadd.f32 %v4275_v11, %v4245_v61  ;;  %v5243_v61 = vld [vmem:[%s6469_s21 + $0x678] sm:$0xf0] }
 0x3d8   : > { %v4015_v37 = vpop.f32.mrf.mxu2  ;;  %v3840_v32 = vpop.f32.mrf.mxu0 }
 0x3d9   : > { %v4104_v56 = vpop.f32.mrf.mxu3  ;;  %v4016_v58 = vadd.f32 %v4015_v37, %v3927_v8  ;;  %v3929_v18 = vpop.f32.mrf.mxu1  ;;  %v3841_v1 = vadd.f32 %v3840_v32, %v7297_v35 }
 0x3db   : > { %v4105_v46 = vadd.f32 %v4104_v56, %v4016_v58  ;;  %3879 = vmatmul.bf16.gmra.mxu0 %v5170_v26  ;;  %v3930_v23 = vadd.f32 %v3929_v18, %v3841_v1  ;;  %v5242_v56 = vor.u32 %v6161_v44, %v5241_v22 }
 0x3dc   : > { %3968 = vmatmul.bf16.gmra.mxu1 %v5174_v12 }
 0x3dd   : > { %4177 = vst [vmem:[%s7494_s22 + $0x28] sm:$0xff] %v4105_v46  ;;  %v4208_v15 = vadd.f32 %v4207_v41, %v4105_v46  ;;  %v4246_v4 = vmul.f32 %v4105_v46, %v4105_v46  ;;  %4057 = vmatmul.bf16.gmra.mxu2 %v5178_v51  ;;  %v6153_v41 = vld [vmem:[%s6469_s21 + $0x63c] sm:$0xf] }
 0x3de   : > { %4146 = vmatmul.bf16.gmra.mxu3 %v5182_v60  ;;  %v5246_v26 = vor.u32 %v6153_v41, %v5243_v61 }
 0x3df   : > { %v4277_v36 = vadd.f32 %v4276_v50, %v4246_v4  ;;  %v5238_v50 = vor.u32 %v6152_v53, %v5235_v2  ;;  %v5307_v53 = vld [vmem:[%s6469_s21 + $0x6f8] sm:$0xf0] }
 0x3e0   : > { %v4018_v39 = vpop.f32.mrf.mxu2  ;;  %v3842_v11 = vpop.f32.mrf.mxu0 }
 0x3e1   : > { %v4107_v54 = vpop.f32.mrf.mxu3  ;;  %v4019_v35 = vadd.f32 %v4018_v39, %v3930_v23  ;;  %v3931_v28 = vpop.f32.mrf.mxu1  ;;  %v3843_v10 = vadd.f32 %v3842_v11, %v7308_v30  ;;  %v5297_v39 = vld [vmem:[%s6469_s21 + $0x6b0] sm:$0xf] }
 0x3e3   : > { %v4108_v5 = vadd.f32 %v4107_v54, %v4019_v35  ;;  %v3932_v40 = vadd.f32 %v3931_v28, %v3843_v10  ;;  %v6176_v54 = vld [vmem:[%s6469_s21 + $0x6ec] sm:$0xf0]  ;;  %v6168_v35 = vld [vmem:[%s6469_s21 + $0x6b4] sm:$0xf]  ;;  %v5305_v10 = vld [vmem:[%s6469_s21 + $0x6b8] sm:$0xf] }
 0x3e4   : > { %v5298_v44 = vor.u32 %v6176_v54, %v5297_v39  ;;  %v5371_v39 = vld [vmem:[%s6469_s21 + $0x778] sm:$0xf0] }
 0x3e5   : > { %4178 = vst [vmem:[%s7494_s22 + $0x30] sm:$0xff] %v4108_v5  ;;  %v4209_v31 = vadd.f32 %v4208_v15, %v4108_v5  ;;  %v4247_v17 = vmul.f32 %v4108_v5, %v4108_v5  ;;  %v5299_v5 = vld [vmem:[%s6469_s21 + $0x6f0] sm:$0xf0] }
 0x3e6   : > { %v5302_v41 = vor.u32 %v6168_v35, %v5299_v5 }
 0x3e7   : > { %v4278_v21 = vadd.f32 %v4277_v36, %v4247_v17 }
 0x3e8   : > { %v4020_v43 = vpop.f32.mrf.mxu2  ;;  %v3845_v30 = vpop.f32.mrf.mxu0 }
 0x3e9   : > { %v4109_v27 = vpop.f32.mrf.mxu3  ;;  %v4021_v8 = vadd.f32 %v4020_v43, %v3932_v40  ;;  %v3934_v37 = vpop.f32.mrf.mxu1  ;;  %v3846_v58 = vadd.f32 %v3845_v30, %v7320_v29  ;;  %v5306_v40 = vor.u32 %v6177_v45, %v5305_v10  ;;  %v5310_v43 = vor.u32 %v6169_v63, %v5307_v53 }
 0x3eb   : > { %v4110_v12 = vadd.f32 %v4109_v27, %v4021_v8  ;;  %3884 = vmatmul.bf16.gmra.mxu0 %v5234_v38  ;;  %v3935_v60 = vadd.f32 %v3934_v37, %v3846_v58 }
 0x3ec   : > { %3973 = vmatmul.bf16.gmra.mxu1 %v5238_v50 }
 0x3ed   : > { %4179 = vst [vmem:[%s7494_s22 + $0x38] sm:$0xff] %v4110_v12  ;;  %v4210_v32 = vadd.f32 %v4209_v31, %v4110_v12  ;;  %v4248_v18 = vmul.f32 %v4110_v12, %v4110_v12  ;;  %4062 = vmatmul.bf16.gmra.mxu2 %v5242_v56 }
 0x3ee   : > { %4151 = vmatmul.bf16.gmra.mxu3 %v5246_v26 }
 0x3ef   : > { %v4279_v51 = vadd.f32 %v4278_v21, %v4248_v18 }
 0x3f0   : > { %v4023_v46 = vpop.f32.mrf.mxu2  ;;  %v3847_v15 = vpop.f32.mrf.mxu0 }
 0x3f1   : > { %v4112_v1 = vpop.f32.mrf.mxu3  ;;  %v4024_v29 = vadd.f32 %v4023_v46, %v3935_v60  ;;  %v3936_v4 = vpop.f32.mrf.mxu1  ;;  %v3848_v23 = vadd.f32 %v3847_v15, %v7334_v33  ;;  %v6192_v60 = vld [vmem:[%s6469_s21 + $0x76c] sm:$0xf0]  ;;  %v6184_v46 = vld [vmem:[%s6469_s21 + $0x734] sm:$0xf] }
 0x3f2   : > { %v5363_v15 = vld [vmem:[%s6469_s21 + $0x770] sm:$0xf0] }
 0x3f3   : > { %v4113_v36 = vadd.f32 %v4112_v1, %v4024_v29  ;;  %v3937_v17 = vadd.f32 %v3936_v4, %v3848_v23  ;;  %v5369_v4 = vld [vmem:[%s6469_s21 + $0x738] sm:$0xf]  ;;  %v6185_v23 = vld [vmem:[%s6469_s21 + $0x73c] sm:$0xf]  ;;  %v5366_v10 = vor.u32 %v6184_v46, %v5363_v15 }
 0x3f5   : > { %4180 = vst [vmem:[%s7494_s22 + $0x40] sm:$0xff] %v4113_v36  ;;  %v4211_v11 = vadd.f32 %v4210_v32, %v4113_v36  ;;  %v4249_v28 = vmul.f32 %v4113_v36, %v4113_v36  ;;  %v6193_v36 = vld [vmem:[%s6469_s21 + $0x774] sm:$0xf0] }
 0x3f6   : > { %v5370_v53 = vor.u32 %v6193_v36, %v5369_v4 }
 0x3f7   : > { %v4280_v31 = vadd.f32 %v4279_v51, %v4249_v28  ;;  %v5361_v51 = vld [vmem:[%s6469_s21 + $0x730] sm:$0xf] }
 0x3f8   : > { %v4025_v2 = vpop.f32.mrf.mxu2  ;;  %v3850_v33 = vpop.f32.mrf.mxu0  ;;  %v5362_v5 = vor.u32 %v6192_v60, %v5361_v51 }
 0x3f9   : > { %v4114_v22 = vpop.f32.mrf.mxu3  ;;  %v4026_v61 = vadd.f32 %v4025_v2, %v3937_v17  ;;  %v3939_v21 = vpop.f32.mrf.mxu1  ;;  %v3851_v38 = vadd.f32 %v3850_v33, %v7337_v19 }
 0x3fb   : > { %v4115_v27 = vadd.f32 %v4114_v22, %v4026_v61  ;;  %3889 = vmatmul.bf16.gmra.mxu0 %v5298_v44  ;;  %v3940_v37 = vadd.f32 %v3939_v21, %v3851_v38 }
 0x3fc   : > { %3978 = vmatmul.bf16.gmra.mxu1 %v5302_v41 }
 0x3fd   : > { %4181 = vst [vmem:[%s7494_s22 + $0x48] sm:$0xff] %v4115_v27  ;;  %v4212_v50 = vadd.f32 %v4211_v11, %v4115_v27  ;;  %v4250_v8 = vmul.f32 %v4115_v27, %v4115_v27  ;;  %4067 = vmatmul.bf16.gmra.mxu2 %v5306_v40 }
 0x3fe   : > { %4156 = vmatmul.bf16.gmra.mxu3 %v5310_v43 }
 0x3ff   : > { %v4281_v30 = vadd.f32 %v4280_v31, %v4250_v8  ;;  %v5374_v31 = vor.u32 %v6185_v23, %v5371_v39  ;;  %v6208_v8 = vld [vmem:[%s6469_s21 + $0x7ec] sm:$0xf0] }
 0x400   : > { %v4028_v56 = vpop.f32.mrf.mxu2  ;;  %v3852_v12 = vpop.f32.mrf.mxu0 }
 0x401   : > { %v4117_v26 = vpop.f32.mrf.mxu3  ;;  %v4029_v19 = vadd.f32 %v4028_v56, %v3940_v37  ;;  %v3941_v58 = vpop.f32.mrf.mxu1  ;;  %v3853_v18 = vadd.f32 %v3852_v12, %v7348_v14  ;;  %v6209_v12 = vld [vmem:[%s6469_s21 + $0x7f4] sm:$0xf0] }
 0x403   : > { %v4118_v32 = vadd.f32 %v4117_v26, %v4029_v19  ;;  %v3942_v35 = vadd.f32 %v3941_v58, %v3853_v18  ;;  %v5427_v26 = vld [vmem:[%s6469_s21 + $0x7f0] sm:$0xf0]  ;;  %v5433_v19 = vld [vmem:[%s6469_s21 + $0x7b8] sm:$0xf]  ;;  %v6201_v58 = vld [vmem:[%s6469_s21 + $0x7bc] sm:$0xf] }
 0x404   : > { %v5434_v36 = vor.u32 %v6209_v12, %v5433_v19 }
 0x405   : > { %4182 = vst [vmem:[%s7494_s22 + $0x50] sm:$0xff] %v4118_v32  ;;  %v4213_v1 = vadd.f32 %v4212_v50, %v4118_v32  ;;  %v4251_v29 = vmul.f32 %v4118_v32, %v4118_v32  ;;  %v5425_v50 = vld [vmem:[%s6469_s21 + $0x7b0] sm:$0xf]  ;;  %v5435_v32 = vld [vmem:[%s6469_s21 + $0x7f8] sm:$0xf0] }
 0x406   : > { %v5438_v23 = vor.u32 %v6201_v58, %v5435_v32 }
 0x407   : > { %v4282_v54 = vadd.f32 %v4281_v30, %v4251_v29  ;;  %v6200_v30 = vld [vmem:[%s6469_s21 + $0x7b4] sm:$0xf] }
 0x408   : > { %v4030_v11 = vpop.f32.mrf.mxu2  ;;  %v3855_v14 = vpop.f32.mrf.mxu0  ;;  %v5430_v29 = vor.u32 %v6200_v30, %v5427_v26 }
 0x409   : > { %v4119_v28 = vpop.f32.mrf.mxu3  ;;  %v4031_v45 = vadd.f32 %v4030_v11, %v3942_v35  ;;  %v3944_v63 = vpop.f32.mrf.mxu1  ;;  %v3856_v2 = vadd.f32 %v3855_v14, %v7351_v57 }
 0x40b   : > { %v4120_v17 = vadd.f32 %v4119_v28, %v4031_v45  ;;  %3894 = vmatmul.bf16.gmra.mxu0 %v5362_v5  ;;  %v3945_v61 = vadd.f32 %v3944_v63, %v3856_v2 }
 0x40c   : > { %3983 = vmatmul.bf16.gmra.mxu1 %v5366_v10 }
 0x40d   : > { %4183 = vst [vmem:[%s7494_s22 + $0x58] sm:$0xff] %v4120_v17  ;;  %v4214_v22 = vadd.f32 %v4213_v1, %v4120_v17  ;;  %v4252_v44 = vmul.f32 %v4120_v17, %v4120_v17  ;;  %4072 = vmatmul.bf16.gmra.mxu2 %v5370_v53  ;;  %v5426_v1 = vor.u32 %v6208_v8, %v5425_v50 }
 0x40e   : > { %4161 = vmatmul.bf16.gmra.mxu3 %v5374_v31 }
 0x40f   : > { %v4283_v41 = vadd.f32 %v4282_v54, %v4252_v44 }
 0x410   : > { %v4033_v33 = vpop.f32.mrf.mxu2  ;;  %v3857_v40 = vpop.f32.mrf.mxu0 }
 0x411   : > { %v4122_v21 = vpop.f32.mrf.mxu3  ;;  %v4034_v57 = vadd.f32 %v4033_v33, %v3945_v61  ;;  %v3946_v43 = vpop.f32.mrf.mxu1  ;;  %v3858_v38 = vadd.f32 %v3857_v40, %v7362_v25 }
 0x413   : > { %v4123_v27 = vadd.f32 %v4122_v21, %v4034_v57  ;;  %v3947_v51 = vadd.f32 %v3946_v43, %v3858_v38 }
 0x415   : > { %4184 = vst [vmem:[%s7494_s22 + $0x60] sm:$0xff] %v4123_v27  ;;  %v4215_v37 = vadd.f32 %v4214_v22, %v4123_v27  ;;  %v4253_v56 = vmul.f32 %v4123_v27, %v4123_v27 }
 0x417   : > { %v4284_v18 = vadd.f32 %v4283_v41, %v4253_v56 }
 0x418   : > { %v4035_v60 = vpop.f32.mrf.mxu2  ;;  %v3860_v25 = vpop.f32.mrf.mxu0 }
 0x419   : > { %v4124_v46 = vpop.f32.mrf.mxu3  ;;  %v4036_v15 = vadd.f32 %v4035_v60, %v3947_v51  ;;  %v3949_v4 = vpop.f32.mrf.mxu1  ;;  %v3861_v54 = vadd.f32 %v3860_v25, %v7365_v16 }
 0x41b   : > { %v4125_v39 = vadd.f32 %v4124_v46, %v4036_v15  ;;  %3899 = vmatmul.bf16.gmra.mxu0 %v5426_v1  ;;  %v3950_v5 = vadd.f32 %v3949_v4, %v3861_v54 }
 0x41c   : > { %3988 = vmatmul.bf16.gmra.mxu1 %v5430_v29 }
 0x41d   : > { %4185 = vst [vmem:[%s7494_s22 + $0x68] sm:$0xff] %v4125_v39  ;;  %v4216_v35 = vadd.f32 %v4215_v37, %v4125_v39  ;;  %v4254_v11 = vmul.f32 %v4125_v39, %v4125_v39  ;;  %4077 = vmatmul.bf16.gmra.mxu2 %v5434_v36 }
 0x41e   : > { %4166 = vmatmul.bf16.gmra.mxu3 %v5438_v23 }
 0x41f   : > { %v4285_v28 = vadd.f32 %v4284_v18, %v4254_v11 }
 0x420   : > { %v4038_v10 = vpop.f32.mrf.mxu2  ;;  %v3862_v63 = vpop.f32.mrf.mxu0 }
 0x421   : > { %v4127_v45 = vpop.f32.mrf.mxu3  ;;  %v4039_v14 = vadd.f32 %v4038_v10, %v3950_v5  ;;  %v3951_v53 = vpop.f32.mrf.mxu1  ;;  %v3863_v17 = vadd.f32 %v3862_v63, %v7376_v55 }
 0x423   : > { %v4128_v31 = vadd.f32 %v4127_v45, %v4039_v14  ;;  %v3952_v44 = vadd.f32 %v3951_v53, %v3863_v17 }
 0x425   : > { %4186 = vst [vmem:[%s7494_s22 + $0x70] sm:$0xff] %v4128_v31  ;;  %v4217_v16 = vadd.f32 %v4216_v35, %v4128_v31  ;;  %v4255_v2 = vmul.f32 %v4128_v31, %v4128_v31 }
 0x427   : > { %v4286_v22 = vadd.f32 %v4285_v28, %v4255_v2 }
 0x428   : > { %v4040_v41 = vpop.f32.mrf.mxu2  ;;  %v3865_v21 = vpop.f32.mrf.mxu0 }
 0x429   : > { %v4129_v61 = vpop.f32.mrf.mxu3  ;;  %v4041_v33 = vadd.f32 %v4040_v41, %v3952_v44  ;;  %v3954_v57 = vpop.f32.mrf.mxu1  ;;  %v3866_v43 = vadd.f32 %v3865_v21, %v7379_v48 }
 0x42b   : > { %v4130_v40 = vadd.f32 %v4129_v61, %v4041_v33  ;;  %v3955_v8 = vadd.f32 %v3954_v57, %v3866_v43 }
 0x42d   : > { %4187 = vst [vmem:[%s7494_s22 + $0x78] sm:$0xff] %v4130_v40  ;;  %v4218_v27 = vadd.f32 %v4217_v16, %v4130_v40  ;;  %v4256_v38 = vmul.f32 %v4130_v40, %v4130_v40 }
 0x42f   : > { %v4287_v50 = vadd.f32 %v4286_v22, %v4256_v38 }
 0x430   : > { %v4043_v55 = vpop.f32.mrf.mxu2  ;;  %v3867_v56 = vpop.f32.mrf.mxu0 }
 0x431   : > { %v4132_v30 = vpop.f32.mrf.mxu3  ;;  %v4044_v37 = vadd.f32 %v4043_v55, %v3955_v8  ;;  %v3956_v26 = vpop.f32.mrf.mxu1  ;;  %v3868_v12 = vadd.f32 %v3867_v56, %v7390_v6 }
 0x433   : > { %v4133_v19 = vadd.f32 %v4132_v30, %v4044_v37  ;;  %v3957_v51 = vadd.f32 %v3956_v26, %v3868_v12 }
 0x435   : > { %4188 = vst [vmem:[%s7494_s22 + $0x80] sm:$0xff] %v4133_v19  ;;  %v4219_v58 = vadd.f32 %v4218_v27, %v4133_v19  ;;  %v4257_v32 = vmul.f32 %v4133_v19, %v4133_v19 }
 0x437   : > { %v4288_v18 = vadd.f32 %v4287_v50, %v4257_v32 }
 0x438   : > { %v4045_v48 = vpop.f32.mrf.mxu2  ;;  %v3870_v1 = vpop.f32.mrf.mxu0 }
 0x439   : > { %v4134_v60 = vpop.f32.mrf.mxu3  ;;  %v4046_v46 = vadd.f32 %v4045_v48, %v3957_v51  ;;  %v3959_v29 = vpop.f32.mrf.mxu1  ;;  %v3871_v25 = vadd.f32 %v3870_v1, %v7393_v42 }
 0x43b   : > { %v4135_v15 = vadd.f32 %v4134_v60, %v4046_v46  ;;  %v3960_v39 = vadd.f32 %v3959_v29, %v3871_v25 }
 0x43d   : > { %4189 = vst [vmem:[%s7494_s22 + $0x88] sm:$0xff] %v4135_v15  ;;  %v4220_v4 = vadd.f32 %v4219_v58, %v4135_v15  ;;  %v4258_v36 = vmul.f32 %v4135_v15, %v4135_v15 }
 0x43f   : > { %v4289_v23 = vadd.f32 %v4288_v18, %v4258_v36 }
 0x440   : > { %v4048_v6 = vpop.f32.mrf.mxu2  ;;  %v3872_v11 = vpop.f32.mrf.mxu0 }
 0x441   : > { %v4137_v54 = vpop.f32.mrf.mxu3  ;;  %v4049_v35 = vadd.f32 %v4048_v6, %v3960_v39  ;;  %v3961_v28 = vpop.f32.mrf.mxu1  ;;  %v3873_v10 = vadd.f32 %v3872_v11, %v7404_v3 }
 0x443   : > { %v4138_v5 = vadd.f32 %v4137_v54, %v4049_v35  ;;  %v3962_v53 = vadd.f32 %v3961_v28, %v3873_v10 }
 0x445   : > { %4190 = vst [vmem:[%s7494_s22 + $0x90] sm:$0xff] %v4138_v5  ;;  %v4221_v45 = vadd.f32 %v4220_v4, %v4138_v5  ;;  %v4259_v14 = vmul.f32 %v4138_v5, %v4138_v5 }
 0x447   : > { %v4290_v63 = vadd.f32 %v4289_v23, %v4259_v14 }
 0x448   : > { %v4050_v42 = vpop.f32.mrf.mxu2  ;;  %v3875_v16 = vpop.f32.mrf.mxu0 }
 0x449   : > { %v4139_v31 = vpop.f32.mrf.mxu3  ;;  %v4051_v17 = vadd.f32 %v4050_v42, %v3962_v53  ;;  %v3964_v2 = vpop.f32.mrf.mxu1  ;;  %v3876_v44 = vadd.f32 %v3875_v16, %v7407_v47 }
 0x44b   : > { %v4140_v22 = vadd.f32 %v4139_v31, %v4051_v17  ;;  %v3965_v21 = vadd.f32 %v3964_v2, %v3876_v44 }
 0x44d   : > { %4191 = vst [vmem:[%s7494_s22 + $0x98] sm:$0xff] %v4140_v22  ;;  %v4222_v41 = vadd.f32 %v4221_v45, %v4140_v22  ;;  %v4260_v61 = vmul.f32 %v4140_v22, %v4140_v22 }
 0x44f   : > { %v4291_v33 = vadd.f32 %v4290_v63, %v4260_v61 }
 0x450   : > { %v4053_v3 = vpop.f32.mrf.mxu2  ;;  %v3877_v43 = vpop.f32.mrf.mxu0 }
 0x451   : > { %v4142_v57 = vpop.f32.mrf.mxu3  ;;  %v4054_v40 = vadd.f32 %v4053_v3, %v3965_v21  ;;  %v3966_v27 = vpop.f32.mrf.mxu1  ;;  %v3878_v50 = vadd.f32 %v3877_v43, %v7418_v7 }
 0x453   : > { %v4143_v38 = vadd.f32 %v4142_v57, %v4054_v40  ;;  %v3967_v37 = vadd.f32 %v3966_v27, %v3878_v50 }
 0x455   : > { %4192 = vst [vmem:[%s7494_s22 + $0xa0] sm:$0xff] %v4143_v38  ;;  %v4223_v8 = vadd.f32 %v4222_v41, %v4143_v38  ;;  %v4261_v55 = vmul.f32 %v4143_v38, %v4143_v38 }
 0x457   : > { %v4292_v30 = vadd.f32 %v4291_v33, %v4261_v55 }
 0x458   : > { %v4055_v47 = vpop.f32.mrf.mxu2  ;;  %v3880_v19 = vpop.f32.mrf.mxu0 }
 0x459   : > { %v4144_v56 = vpop.f32.mrf.mxu3  ;;  %v4056_v26 = vadd.f32 %v4055_v47, %v3967_v37  ;;  %v3969_v12 = vpop.f32.mrf.mxu1  ;;  %v3881_v32 = vadd.f32 %v3880_v19, %v7421_v52 }
 0x45b   : > { %v4145_v58 = vadd.f32 %v4144_v56, %v4056_v26  ;;  %v3970_v60 = vadd.f32 %v3969_v12, %v3881_v32 }
 0x45d   : > { %4193 = vst [vmem:[%s7494_s22 + $0xa8] sm:$0xff] %v4145_v58  ;;  %v4224_v18 = vadd.f32 %v4223_v8, %v4145_v58  ;;  %v4262_v51 = vmul.f32 %v4145_v58, %v4145_v58 }
 0x45f   : > { %v4293_v48 = vadd.f32 %v4292_v30, %v4262_v51 }
 0x460   : > { %v4058_v7 = vpop.f32.mrf.mxu2  ;;  %v3882_v29 = vpop.f32.mrf.mxu0 }
 0x461   : > { %v4147_v46 = vpop.f32.mrf.mxu3  ;;  %v4059_v1 = vadd.f32 %v4058_v7, %v3970_v60  ;;  %v3971_v15 = vpop.f32.mrf.mxu1  ;;  %v3883_v4 = vadd.f32 %v3882_v29, %v7432_v9 }
 0x463   : > { %v4148_v25 = vadd.f32 %v4147_v46, %v4059_v1  ;;  %v3972_v6 = vadd.f32 %v3971_v15, %v3883_v4 }
 0x465   : > { %4194 = vst [vmem:[%s7494_s22 + $0xb0] sm:$0xff] %v4148_v25  ;;  %v4225_v36 = vadd.f32 %v4224_v18, %v4148_v25  ;;  %v4263_v23 = vmul.f32 %v4148_v25, %v4148_v25 }
 0x467   : > { %v4294_v39 = vadd.f32 %v4293_v48, %v4263_v23 }
 0x468   : > { %v4060_v52 = vpop.f32.mrf.mxu2  ;;  %v3885_v11 = vpop.f32.mrf.mxu0 }
 0x469   : > { %v4149_v54 = vpop.f32.mrf.mxu3  ;;  %v4061_v35 = vadd.f32 %v4060_v52, %v3972_v6  ;;  %v3974_v28 = vpop.f32.mrf.mxu1  ;;  %v3886_v10 = vadd.f32 %v3885_v11, %v7435_v20 }
 0x46b   : > { %v4150_v5 = vadd.f32 %v4149_v54, %v4061_v35  ;;  %v3975_v53 = vadd.f32 %v3974_v28, %v3886_v10 }
 0x46d   : > { %4195 = vst [vmem:[%s7494_s22 + $0xb8] sm:$0xff] %v4150_v5  ;;  %v4226_v45 = vadd.f32 %v4225_v36, %v4150_v5  ;;  %v4264_v14 = vmul.f32 %v4150_v5, %v4150_v5 }
 0x46f   : > { %v4295_v63 = vadd.f32 %v4294_v39, %v4264_v14 }
 0x470   : > { %v4063_v9 = vpop.f32.mrf.mxu2  ;;  %v3887_v17 = vpop.f32.mrf.mxu0 }
 0x471   : > { %v4152_v42 = vpop.f32.mrf.mxu3  ;;  %v4064_v31 = vadd.f32 %v4063_v9, %v3975_v53  ;;  %v3976_v16 = vpop.f32.mrf.mxu1  ;;  %v3888_v22 = vadd.f32 %v3887_v17, %v7446_v49 }
 0x473   : > { %v4153_v2 = vadd.f32 %v4152_v42, %v4064_v31  ;;  %v3977_v33 = vadd.f32 %v3976_v16, %v3888_v22 }
 0x475   : > { %4196 = vst [vmem:[%s7494_s22 + $0xc0] sm:$0xff] %v4153_v2  ;;  %v4227_v44 = vadd.f32 %v4226_v45, %v4153_v2  ;;  %v4265_v41 = vmul.f32 %v4153_v2, %v4153_v2 }
 0x477   : > { %v4296_v61 = vadd.f32 %v4295_v63, %v4265_v41 }
 0x478   : > { %v4065_v20 = vpop.f32.mrf.mxu2  ;;  %v3890_v57 = vpop.f32.mrf.mxu0 }
 0x479   : > { %v4154_v21 = vpop.f32.mrf.mxu3  ;;  %v4066_v3 = vadd.f32 %v4065_v20, %v3977_v33  ;;  %v3979_v40 = vpop.f32.mrf.mxu1  ;;  %v3891_v27 = vadd.f32 %v3890_v57, %v7449_v59 }
 0x47b   : > { %v4155_v43 = vadd.f32 %v4154_v21, %v4066_v3  ;;  %v3980_v55 = vadd.f32 %v3979_v40, %v3891_v27 }
 0x47d   : > { %4197 = vst [vmem:[%s7494_s22 + $0xc8] sm:$0xff] %v4155_v43  ;;  %v4228_v38 = vadd.f32 %v4227_v44, %v4155_v43  ;;  %v4266_v50 = vmul.f32 %v4155_v43, %v4155_v43 }
 0x47f   : > { %v4297_v8 = vadd.f32 %v4296_v61, %v4266_v50 }
 0x480   : > { %v4068_v49 = vpop.f32.mrf.mxu2  ;;  %v3892_v47 = vpop.f32.mrf.mxu0 }
 0x481   : > { %v4157_v30 = vpop.f32.mrf.mxu3  ;;  %v4069_v37 = vadd.f32 %v4068_v49, %v3980_v55  ;;  %v3981_v56 = vpop.f32.mrf.mxu1  ;;  %v3893_v19 = vadd.f32 %v3892_v47, %v7460_v0 }
 0x483   : > { %v4158_v26 = vadd.f32 %v4157_v30, %v4069_v37  ;;  %v3982_v18 = vadd.f32 %v3981_v56, %v3893_v19  ;;  %v4310_v30 = vlaneseq }
 0x485   : > { %4198 = vst [vmem:[%s7494_s22 + $0xd0] sm:$0xff] %v4158_v26  ;;  %v4229_v12 = vadd.f32 %v4228_v38, %v4158_v26  ;;  %v4267_v58 = vmul.f32 %v4158_v26, %v4158_v26  ;;  %v4311_v19 = vshrl.u32 %v4310_v30, 7 }
 0x487   : > { %v4298_v32 = vadd.f32 %v4297_v8, %v4267_v58  ;;  %vm4313_vm0 = vcmp.eq.s32.totalorder %v4311_v19, 1  ;;  %vm4312_vm1 = vcmp.eq.s32.totalorder %v4311_v19, 0 }
 0x488   : > { %v4070_v59 = vpop.f32.mrf.mxu2  ;;  %v3895_v60 = vpop.f32.mrf.mxu0 }
 0x489   : > { %v4159_v51 = vpop.f32.mrf.mxu3  ;;  %v4071_v48 = vadd.f32 %v4070_v59, %v3982_v18  ;;  %v3984_v7 = vpop.f32.mrf.mxu1  ;;  %v3896_v1 = vadd.f32 %v3895_v60, %v7463_v24 }
 0x48b   : > { %v4160_v46 = vadd.f32 %v4159_v51, %v4071_v48  ;;  %v3985_v4 = vadd.f32 %v3984_v7, %v3896_v1 }
 0x48d   : > { %4199 = vst [vmem:[%s7494_s22 + $0xd8] sm:$0xff] %v4160_v46  ;;  %v4230_v29 = vadd.f32 %v4229_v12, %v4160_v46  ;;  %v4268_v15 = vmul.f32 %v4160_v46, %v4160_v46 }
 0x48f   : > { %v4299_v25 = vadd.f32 %v4298_v32, %v4268_v15 }
 0x490   : > { %v4073_v0 = vpop.f32.mrf.mxu2  ;;  %v3897_v39 = vpop.f32.mrf.mxu0 }
 0x491   : > { %v4162_v36 = vpop.f32.mrf.mxu3  ;;  %v4074_v23 = vadd.f32 %v4073_v0, %v3985_v4  ;;  %v3986_v6 = vpop.f32.mrf.mxu1  ;;  %v3898_v54 = vadd.f32 %v3897_v39, %v7474_v13 }
 0x493   : > { %v4163_v52 = vadd.f32 %v4162_v36, %v4074_v23  ;;  %v3987_v5 = vadd.f32 %v3986_v6, %v3898_v54 }
 0x495   : > { %4200 = vst [vmem:[%s7494_s22 + $0xe0] sm:$0xff] %v4163_v52  ;;  %v4231_v35 = vadd.f32 %v4230_v29, %v4163_v52  ;;  %v4269_v11 = vmul.f32 %v4163_v52, %v4163_v52 }
 0x497   : > { %v4300_v28 = vadd.f32 %v4299_v25, %v4269_v11 }
 0x498   : > { %v4075_v24 = vpop.f32.mrf.mxu2  ;;  %v3900_v14 = vpop.f32.mrf.mxu0 }
 0x499   : > { %v4164_v10 = vpop.f32.mrf.mxu3  ;;  %v4076_v45 = vadd.f32 %v4075_v24, %v3987_v5  ;;  %v3901_v53 = vadd.f32 %v3900_v14, %v7477_v62  ;;  %v3989_v9 = vpop.f32.mrf.mxu1 }
 0x49b   : > { %v4165_v63 = vadd.f32 %v4164_v10, %v4076_v45  ;;  %v3990_v16 = vadd.f32 %v3989_v9, %v3901_v53 }
 0x49d   : > { %4201 = vst [vmem:[%s7494_s22 + $0xe8] sm:$0xff] %v4165_v63  ;;  %v4232_v42 = vadd.f32 %v4231_v35, %v4165_v63  ;;  %v4270_v31 = vmul.f32 %v4165_v63, %v4165_v63 }
 0x49f   : > { %v4301_v17 = vadd.f32 %v4300_v28, %v4270_v31 }
 0x4a0   : > { %v4078_v13 = vpop.f32.mrf.mxu2  ;;  %v3902_v44 = vpop.f32.mrf.mxu0 }
 0x4a1   : > { %v4167_v2 = vpop.f32.mrf.mxu3  ;;  %v4079_v22 = vadd.f32 %v4078_v13, %v3990_v16  ;;  %v3903_v61 = vadd.f32 %v3902_v44, %v7487_v34  ;;  %v3991_v21 = vpop.f32.mrf.mxu1 }
 0x4a3   : > { %v4168_v41 = vadd.f32 %v4167_v2, %v4079_v22  ;;  %v3992_v3 = vadd.f32 %v3991_v21, %v3903_v61 }
 0x4a5   : > { %4202 = vst [vmem:[%s7494_s22 + $0xf0] sm:$0xff] %v4168_v41  ;;  %v4233_v33 = vadd.f32 %v4232_v42, %v4168_v41  ;;  %v4271_v20 = vmul.f32 %v4168_v41, %v4168_v41 }
 0x4a7   : > { %v4302_v62 = vadd.f32 %v4301_v17, %v4271_v20 }
 0x4a8   : > { %v4080_v57 = vpop.f32.mrf.mxu2 }
 0x4a9   : > { %v4081_v40 = vadd.f32 %v4080_v57, %v3992_v3  ;;  %v4169_v43 = vpop.f32.mrf.mxu3 }
 0x4ab   : > { %v4170_v27 = vadd.f32 %v4169_v43, %v4081_v40 }
 0x4ad   : > { %4203 = vst [vmem:[%s7494_s22 + $0xf8] sm:$0xff] %v4170_v27  ;;  %v4234_v38 = vadd.f32 %v4233_v33, %v4170_v27  ;;  %v4272_v50 = vmul.f32 %v4170_v27, %v4170_v27 }
 0x4af   : > { %v4235_v8 = vrot.slane %v4234_v38, 4  ;;  %v4303_v55 = vadd.f32 %v4302_v62, %v4272_v50 }
 0x4b1   : > { %v4236_v49 = vadd.f32 %v4235_v8, %v4234_v38  ;;  %v4304_v34 = vrot.slane %v4303_v55, 4 }
 0x4b3   : > { %v4237_v37 = vrot.slane %v4236_v49, 2  ;;  %v4305_v47 = vadd.f32 %v4304_v34, %v4303_v55 }
 0x4b5   : > { %v4238_v56 = vadd.f32 %v4237_v37, %v4236_v49  ;;  %v4306_v26 = vrot.slane %v4305_v47, 2 }
 0x4b7   : > { %v4307_v12 = vadd.f32 %v4306_v26, %v4305_v47  ;;  %v4239_v58 = vrot.slane %v4238_v56, 1 }
 0x4b9   : > { %v4308_v32 = vrot.slane %v4307_v12, 1  ;;  %v4240_v59 = vadd.f32 %v4239_v58, %v4238_v56 }
 0x4bb   : > { %v4309_v18 = vadd.f32 %v4308_v32, %v4307_v12 }
 0x4bd   : > { %v4314_v51 = vsel %vm4313_vm0, %v4309_v18, 0.0 }
 0x4be   : > { %v4315_v48 = vsel %vm4312_vm1, %v4240_v59, %v4314_v51 }
 0x4bf   : > { %4316 = vst [vmem:[%s187_s24] sm:$0xff] %v4315_v48 }
 0x4c0 PF: > { %s14_s12 = sadd.s32 1, %s6352_s12  }
 0x4c1   : > { %p11_p5 = scmp.ge.s32.totalorder %s14_s12, 4  }
 0x4c3   :  { %13 = sbr.rel (!%p11_p5) target bundleno = 1 (0x1), region = 70 }

// kernel: discriminator_forward.10
= control target key start
LH: loop header
LB: loop body
LE: loop exit
PB: predicated region body
PF: predicated region fallthrough
CT: control target
= control target key end

     0   :  { %s638_s12 = smov 0   ;;  %s786_s0 = inlined_call_operand.vmem [shape: f32[512,128], index: 0, kind: input, shape index: {}]   ;;  %s787_s1 = inlined_call_operand.vmem [shape: f32[1,128], index: 1, kind: input, shape index: {}]   ;;  %s788_s2 = inlined_call_operand.vmem [shape: f32[1,128], index: 2, kind: input, shape index: {}]   ;;  %s789_s3 = inlined_call_operand.vmem [shape: bf16[512,128], index: 3, kind: output, shape index: {}]  }
   0x1 LB: > { %s494_s13 = sadd.s32 4294967295, %s616_s12   ;;  %p498_p0 = scmp.ge.s32.totalorder %s616_s12, 1  ;;  %s616_s12 = sphi %s638_s12, %s13_s12  }
   0x2   : > { %p138_p1 = scmp.lt.s32.totalorder %s616_s12, 3 }
   0x4   : > { %p139_p2 = pnand %p498_p0, %p138_p1 }
   0x5   : > { %s499_s14 = sshll.u32 (!%p139_p2), %s494_s13, 5 }
   0x6   : > { %142 = sbr.rel (%p139_p2) target bundleno = 65 (0x41), region = 32  ;;  %p163_p3 = scmp.lt.s32.totalorder (!%p139_p2), %s499_s14, 63 }
   0xb   : > { %s791_s14 = smov (!%p163_p3, %s499_s14), 63  ;;  %v651_v0 = vld [vmem:[%s787_s1] ss:$0 sm:$0xff] }
   0xc   : > { %s500_s17 = sshll.u32 %s791_s14, 3  ;;  %v662_v1 = vld [vmem:[%s788_s2] ss:$0 sm:$0xff]  ;;  %s502_s23 = sshll.u32 %s791_s14, 2 }
   0xd   : > { %s657_s20 = scalar_lea.vmem %s786_s0, %s500_s17  ;;  %s690_s26 = scalar_lea.vmem %s789_s3, %s502_s23 }
   0xe   : > { %v174_v2 = vld [vmem:[%s657_s20] sm:$0xff]  ;;  %v175_v3 = vld [vmem:[%s657_s20 + $0x8] sm:$0xff]  ;;  %v176_v4 = vld [vmem:[%s657_s20 + $0x10] sm:$0xff] }
   0xf   : > { %v210_v5 = vmul.f32 %v651_v0, %v174_v2  ;;  %v211_v6 = vmul.f32 %v651_v0, %v175_v3  ;;  %v177_v7 = vld [vmem:[%s657_s20 + $0x18] sm:$0xff]  ;;  %v212_v8 = vmul.f32 %v651_v0, %v176_v4  ;;  %v178_v9 = vld [vmem:[%s657_s20 + $0x20] sm:$0xff]  ;;  %v179_v10 = vld [vmem:[%s657_s20 + $0x28] sm:$0xff] }
  0x10   : > { %v213_v11 = vmul.f32 %v651_v0, %v177_v7  ;;  %v214_v12 = vmul.f32 %v651_v0, %v178_v9  ;;  %v215_v13 = vmul.f32 %v651_v0, %v179_v10  ;;  %v180_v14 = vld [vmem:[%s657_s20 + $0x30] sm:$0xff]  ;;  %v181_v15 = vld [vmem:[%s657_s20 + $0x38] sm:$0xff]  ;;  %v182_v30 = vld [vmem:[%s657_s20 + $0x40] sm:$0xff] }
  0x11   : > { %v246_v16 = vadd.f32 %v662_v1, %v210_v5  ;;  %v247_v17 = vadd.f32 %v662_v1, %v211_v6  ;;  %v248_v18 = vadd.f32 %v662_v1, %v212_v8  ;;  %v216_v19 = vmul.f32 %v651_v0, %v180_v14  ;;  %v183_v31 = vld [vmem:[%s657_s20 + $0x48] sm:$0xff]  ;;  %v184_v32 = vld [vmem:[%s657_s20 + $0x50] sm:$0xff]  ;;  %v185_v44 = vld [vmem:[%s657_s20 + $0x58] sm:$0xff] }
  0x12   : > { %v249_v20 = vadd.f32 %v662_v1, %v213_v11  ;;  %v250_v21 = vadd.f32 %v662_v1, %v214_v12  ;;  %v251_v22 = vadd.f32 %v662_v1, %v215_v13  ;;  %v217_v23 = vmul.f32 %v651_v0, %v181_v15  ;;  %v186_v46 = vld [vmem:[%s657_s20 + $0x60] sm:$0xff]  ;;  %v187_v56 = vld [vmem:[%s657_s20 + $0x68] sm:$0xff]  ;;  %v188_v60 = vld [vmem:[%s657_s20 + $0x70] sm:$0xff] }
  0x13   : > { %vm278_vm0 = vcmp.ge.f32.partialorder %v246_v16, 0.0  ;;  %vm279_vm1 = vcmp.ge.f32.partialorder %v247_v17, 0.0  ;;  %v310_v24 = vmul.f32 0.2, %v246_v16  ;;  %v311_v25 = vmul.f32 0.2, %v247_v17 }
  0x14   : > { %vm280_vm2 = vcmp.ge.f32.partialorder %v248_v18, 0.0  ;;  %vm281_vm3 = vcmp.ge.f32.partialorder %v249_v20, 0.0  ;;  %v312_v26 = vmul.f32 0.2, %v248_v18  ;;  %v313_v27 = vmul.f32 0.2, %v249_v20 }
  0x15   : > { %v342_v28 = vsel %vm278_vm0, %v246_v16, %v310_v24  ;;  %v343_v29 = vsel %vm279_vm1, %v247_v17, %v311_v25  ;;  %vm282_vm4 = vcmp.ge.f32.partialorder %v250_v21, 0.0  ;;  %vm283_vm5 = vcmp.ge.f32.partialorder %v251_v22, 0.0  ;;  %v189_v6 = vld [vmem:[%s657_s20 + $0x78] sm:$0xff]  ;;  %v190_v10 = vld [vmem:[%s657_s20 + $0x80] sm:$0xff] }
  0x16   : > { %v508_v33 = vpack.c.bf16 %v343_v29, %v342_v28  ;;  %v344_v34 = vsel %vm280_vm2, %v248_v18, %v312_v26  ;;  %v345_v35 = vsel %vm281_vm3, %v249_v20, %v313_v27  ;;  %v314_v36 = vmul.f32 0.2, %v250_v21  ;;  %v191_v18 = vld [vmem:[%s657_s20 + $0x88] sm:$0xff]  ;;  %v193_v26 = vld [vmem:[%s657_s20 + $0x98] sm:$0xff] }
  0x17   : > { %v513_v37 = vpack.c.bf16 %v345_v35, %v344_v34  ;;  %v315_v38 = vmul.f32 0.2, %v251_v22  ;;  %v252_v39 = vadd.f32 %v662_v1, %v216_v19  ;;  %v253_v40 = vadd.f32 %v662_v1, %v217_v23  ;;  %v192_v19 = vld [vmem:[%s657_s20 + $0x90] sm:$0xff] }
  0x18   : > { %509 = vst [vmem:[%s690_s26] sm:$0xff] %v508_v33   ;;  %v346_v41 = vsel %vm282_vm4, %v250_v21, %v314_v36  ;;  %v218_v42 = vmul.f32 %v651_v0, %v182_v30  ;;  %v219_v43 = vmul.f32 %v651_v0, %v183_v31  ;;  %v220_v45 = vmul.f32 %v651_v0, %v184_v32  ;;  %v194_v31 = vld [vmem:[%s657_s20 + $0xa0] sm:$0xff]  ;;  %v195_v32 = vld [vmem:[%s657_s20 + $0xa8] sm:$0xff] }
  0x19   : > { %585 = vst [vmem:[%s690_s26 + $0x8] sm:$0xff] %v513_v37   ;;  %v347_v47 = vsel %vm283_vm5, %v251_v22, %v315_v38  ;;  %vm284_vm6 = vcmp.ge.f32.partialorder %v252_v39, 0.0  ;;  %vm285_vm7 = vcmp.ge.f32.partialorder %v253_v40, 0.0  ;;  %v316_v48 = vmul.f32 0.2, %v252_v39 }
  0x1a   : > { %v518_v49 = vpack.c.bf16 %v347_v47, %v346_v41  ;;  %v317_v50 = vmul.f32 0.2, %v253_v40  ;;  %v254_v51 = vadd.f32 %v662_v1, %v218_v42  ;;  %v255_v52 = vadd.f32 %v662_v1, %v219_v43  ;;  %v196_v43 = vld [vmem:[%s657_s20 + $0xb0] sm:$0xff] }
  0x1b   : > { %v348_v53 = vsel %vm284_vm6, %v252_v39, %v316_v48  ;;  %v221_v54 = vmul.f32 %v651_v0, %v185_v44  ;;  %v256_v55 = vadd.f32 %v662_v1, %v220_v45  ;;  %v222_v57 = vmul.f32 %v651_v0, %v186_v46  ;;  %v197_v44 = vld [vmem:[%s657_s20 + $0xb8] sm:$0xff] }
  0x1c   : > { %586 = vst [vmem:[%s690_s26 + $0x10] sm:$0xff] %v518_v49   ;;  %v349_v58 = vsel %vm285_vm7, %v253_v40, %v317_v50  ;;  %vm286_vm8 = vcmp.ge.f32.partialorder %v254_v51, 0.0  ;;  %vm287_vm9 = vcmp.ge.f32.partialorder %v255_v52, 0.0  ;;  %v318_v59 = vmul.f32 0.2, %v254_v51 }
  0x1d   : > { %v523_v61 = vpack.c.bf16 %v349_v58, %v348_v53  ;;  %v319_v62 = vmul.f32 0.2, %v255_v52  ;;  %v257_v63 = vadd.f32 %v662_v1, %v221_v54  ;;  %vm288_vm10 = vcmp.ge.f32.partialorder %v256_v55, 0.0 }
  0x1e   : > { %v350_v2 = vsel %vm286_vm8, %v254_v51, %v318_v59  ;;  %v320_v3 = vmul.f32 0.2, %v256_v55  ;;  %v223_v4 = vmul.f32 %v651_v0, %v187_v56  ;;  %v258_v5 = vadd.f32 %v662_v1, %v222_v57  ;;  %v199_v59 = vld [vmem:[%s657_s20 + $0xc8] sm:$0xff] }
  0x1f   : > { %587 = vst [vmem:[%s690_s26 + $0x18] sm:$0xff] %v523_v61   ;;  %v351_v7 = vsel %vm287_vm9, %v255_v52, %v319_v62  ;;  %vm289_vm11 = vcmp.ge.f32.partialorder %v257_v63, 0.0  ;;  %v321_v8 = vmul.f32 0.2, %v257_v63  ;;  %v224_v9 = vmul.f32 %v651_v0, %v188_v60 }
  0x20   : > { %v528_v11 = vpack.c.bf16 %v351_v7, %v350_v2  ;;  %v352_v12 = vsel %vm288_vm10, %v256_v55, %v320_v3  ;;  %v259_v13 = vadd.f32 %v662_v1, %v223_v4  ;;  %vm290_vm12 = vcmp.ge.f32.partialorder %v258_v5, 0.0  ;;  %v198_v55 = vld [vmem:[%s657_s20 + $0xc0] sm:$0xff]  ;;  %v200_v4 = vld [vmem:[%s657_s20 + $0xd0] sm:$0xff] }
  0x21   : > { %v353_v14 = vsel %vm289_vm11, %v257_v63, %v321_v8  ;;  %v322_v15 = vmul.f32 0.2, %v258_v5  ;;  %v225_v16 = vmul.f32 %v651_v0, %v189_v6  ;;  %v260_v17 = vadd.f32 %v662_v1, %v224_v9  ;;  %v201_v9 = vld [vmem:[%s657_s20 + $0xd8] sm:$0xff] }
  0x22   : > { %588 = vst [vmem:[%s690_s26 + $0x20] sm:$0xff] %v528_v11   ;;  %v533_v20 = vpack.c.bf16 %v353_v14, %v352_v12  ;;  %vm291_vm13 = vcmp.ge.f32.partialorder %v259_v13, 0.0  ;;  %v323_v21 = vmul.f32 0.2, %v259_v13  ;;  %v226_v22 = vmul.f32 %v651_v0, %v190_v10  ;;  %v202_v10 = vld [vmem:[%s657_s20 + $0xe0] sm:$0xff]  ;;  %v203_v11 = vld [vmem:[%s657_s20 + $0xe8] sm:$0xff] }
  0x23   : > { %v354_v23 = vsel %vm290_vm12, %v258_v5, %v322_v15  ;;  %v261_v24 = vadd.f32 %v662_v1, %v225_v16  ;;  %vm292_vm14 = vcmp.ge.f32.partialorder %v260_v17, 0.0  ;;  %v324_v25 = vmul.f32 0.2, %v260_v17 }
  0x24   : > { %589 = vst [vmem:[%s690_s26 + $0x28] sm:$0xff] %v533_v20   ;;  %v355_v27 = vsel %vm291_vm13, %v259_v13, %v323_v21  ;;  %v227_v28 = vmul.f32 %v651_v0, %v191_v18  ;;  %v262_v29 = vadd.f32 %v662_v1, %v226_v22  ;;  %v228_v30 = vmul.f32 %v651_v0, %v192_v19  ;;  %v204_v22 = vld [vmem:[%s657_s20 + $0xf0] sm:$0xff] }
  0x25   : > { %v538_v33 = vpack.c.bf16 %v355_v27, %v354_v23  ;;  %vm293_vm15 = vcmp.ge.f32.partialorder %v261_v24, 0.0  ;;  %v325_v34 = vmul.f32 0.2, %v261_v24  ;;  %v356_v35 = vsel %vm292_vm14, %v260_v17, %v324_v25 }
  0x26   : > { %v263_v36 = vadd.f32 %v662_v1, %v227_v28  ;;  %vm294_vm0 = vcmp.ge.f32.partialorder %v262_v29, 0.0  ;;  %v326_v37 = vmul.f32 0.2, %v262_v29  ;;  %v229_v38 = vmul.f32 %v651_v0, %v193_v26 }
  0x27   : > { %590 = vst [vmem:[%s690_s26 + $0x30] sm:$0xff] %v538_v33   ;;  %v357_v39 = vsel %vm293_vm15, %v261_v24, %v325_v34  ;;  %v264_v40 = vadd.f32 %v662_v1, %v228_v30  ;;  %v230_v41 = vmul.f32 %v651_v0, %v194_v31  ;;  %v231_v42 = vmul.f32 %v651_v0, %v195_v32  ;;  %v205_v32 = vld [vmem:[%s657_s20 + $0xf8] sm:$0xff] }
  0x28   : > { %v543_v45 = vpack.c.bf16 %v357_v39, %v356_v35  ;;  %vm295_vm1 = vcmp.ge.f32.partialorder %v263_v36, 0.0  ;;  %v327_v46 = vmul.f32 0.2, %v263_v36  ;;  %v358_v47 = vsel %vm294_vm0, %v262_v29, %v326_v37 }
  0x29   : > { %v265_v48 = vadd.f32 %v662_v1, %v229_v38  ;;  %vm296_vm2 = vcmp.ge.f32.partialorder %v264_v40, 0.0  ;;  %v328_v49 = vmul.f32 0.2, %v264_v40  ;;  %v266_v50 = vadd.f32 %v662_v1, %v230_v41 }
  0x2a   : > { %591 = vst [vmem:[%s690_s26 + $0x38] sm:$0xff] %v543_v45   ;;  %v359_v51 = vsel %vm295_vm1, %v263_v36, %v327_v46  ;;  %v267_v52 = vadd.f32 %v662_v1, %v231_v42  ;;  %v232_v53 = vmul.f32 %v651_v0, %v196_v43  ;;  %v233_v54 = vmul.f32 %v651_v0, %v197_v44 }
  0x2b   : > { %v548_v56 = vpack.c.bf16 %v359_v51, %v358_v47  ;;  %vm297_vm3 = vcmp.ge.f32.partialorder %v265_v48, 0.0  ;;  %v329_v57 = vmul.f32 0.2, %v265_v48  ;;  %v360_v58 = vsel %vm296_vm2, %v264_v40, %v328_v49 }
  0x2c   : > { %vm298_vm4 = vcmp.ge.f32.partialorder %v266_v50, 0.0  ;;  %vm299_vm5 = vcmp.ge.f32.partialorder %v267_v52, 0.0  ;;  %v330_v60 = vmul.f32 0.2, %v266_v50  ;;  %v331_v61 = vmul.f32 0.2, %v267_v52 }
  0x2d   : > { %592 = vst [vmem:[%s690_s26 + $0x40] sm:$0xff] %v548_v56   ;;  %v361_v62 = vsel %vm297_vm3, %v265_v48, %v329_v57  ;;  %v268_v63 = vadd.f32 %v662_v1, %v232_v53  ;;  %v269_v2 = vadd.f32 %v662_v1, %v233_v54  ;;  %v234_v3 = vmul.f32 %v651_v0, %v198_v55 }
  0x2e   : > { %v553_v5 = vpack.c.bf16 %v361_v62, %v360_v58  ;;  %v362_v6 = vsel %vm298_vm4, %v266_v50, %v330_v60  ;;  %v363_v7 = vsel %vm299_vm5, %v267_v52, %v331_v61  ;;  %v235_v8 = vmul.f32 %v651_v0, %v199_v59 }
  0x2f   : > { %v558_v12 = vpack.c.bf16 %v363_v7, %v362_v6  ;;  %vm300_vm6 = vcmp.ge.f32.partialorder %v268_v63, 0.0  ;;  %vm301_vm7 = vcmp.ge.f32.partialorder %v269_v2, 0.0  ;;  %v332_v13 = vmul.f32 0.2, %v268_v63 }
  0x30   : > { %593 = vst [vmem:[%s690_s26 + $0x48] sm:$0xff] %v553_v5   ;;  %v333_v14 = vmul.f32 0.2, %v269_v2  ;;  %v270_v15 = vadd.f32 %v662_v1, %v234_v3  ;;  %v271_v16 = vadd.f32 %v662_v1, %v235_v8  ;;  %v236_v17 = vmul.f32 %v651_v0, %v200_v4 }
  0x31   : > { %594 = vst [vmem:[%s690_s26 + $0x50] sm:$0xff] %v558_v12   ;;  %v364_v18 = vsel %vm300_vm6, %v268_v63, %v332_v13  ;;  %v237_v19 = vmul.f32 %v651_v0, %v201_v9  ;;  %v238_v20 = vmul.f32 %v651_v0, %v202_v10  ;;  %v239_v21 = vmul.f32 %v651_v0, %v203_v11 }
  0x32   : > { %v365_v23 = vsel %vm301_vm7, %v269_v2, %v333_v14  ;;  %vm302_vm8 = vcmp.ge.f32.partialorder %v270_v15, 0.0  ;;  %vm303_vm9 = vcmp.ge.f32.partialorder %v271_v16, 0.0  ;;  %v334_v24 = vmul.f32 0.2, %v270_v15 }
  0x33   : > { %v563_v25 = vpack.c.bf16 %v365_v23, %v364_v18  ;;  %v335_v26 = vmul.f32 0.2, %v271_v16  ;;  %v272_v27 = vadd.f32 %v662_v1, %v236_v17  ;;  %v273_v28 = vadd.f32 %v662_v1, %v237_v19 }
  0x34   : > { %v366_v29 = vsel %vm302_vm8, %v270_v15, %v334_v24  ;;  %v274_v30 = vadd.f32 %v662_v1, %v238_v20  ;;  %v275_v31 = vadd.f32 %v662_v1, %v239_v21  ;;  %v240_v33 = vmul.f32 %v651_v0, %v204_v22 }
  0x35   : > { %595 = vst [vmem:[%s690_s26 + $0x58] sm:$0xff] %v563_v25   ;;  %v367_v34 = vsel %vm303_vm9, %v271_v16, %v335_v26  ;;  %vm304_vm10 = vcmp.ge.f32.partialorder %v272_v27, 0.0  ;;  %vm305_vm11 = vcmp.ge.f32.partialorder %v273_v28, 0.0  ;;  %v336_v35 = vmul.f32 0.2, %v272_v27 }
  0x36   : > { %v568_v36 = vpack.c.bf16 %v367_v34, %v366_v29  ;;  %v337_v37 = vmul.f32 0.2, %v273_v28  ;;  %vm306_vm12 = vcmp.ge.f32.partialorder %v274_v30, 0.0  ;;  %vm307_vm13 = vcmp.ge.f32.partialorder %v275_v31, 0.0 }
  0x37   : > { %v368_v38 = vsel %vm304_vm10, %v272_v27, %v336_v35  ;;  %v338_v39 = vmul.f32 0.2, %v274_v30  ;;  %v339_v40 = vmul.f32 0.2, %v275_v31  ;;  %v241_v41 = vmul.f32 %v651_v0, %v205_v32 }
  0x38   : > { %596 = vst [vmem:[%s690_s26 + $0x60] sm:$0xff] %v568_v36   ;;  %v369_v42 = vsel %vm305_vm11, %v273_v28, %v337_v37  ;;  %v276_v43 = vadd.f32 %v662_v1, %v240_v33 }
  0x39   : > { %v573_v44 = vpack.c.bf16 %v369_v42, %v368_v38  ;;  %v370_v45 = vsel %vm306_vm12, %v274_v30, %v338_v39  ;;  %v371_v46 = vsel %vm307_vm13, %v275_v31, %v339_v40  ;;  %v277_v47 = vadd.f32 %v662_v1, %v241_v41 }
  0x3a   : > { %v578_v48 = vpack.c.bf16 %v371_v46, %v370_v45  ;;  %vm308_vm14 = vcmp.ge.f32.partialorder %v276_v43, 0.0  ;;  %v340_v49 = vmul.f32 0.2, %v276_v43 }
  0x3b   : > { %597 = vst [vmem:[%s690_s26 + $0x68] sm:$0xff] %v573_v44   ;;  %vm309_vm15 = vcmp.ge.f32.partialorder %v277_v47, 0.0  ;;  %v341_v50 = vmul.f32 0.2, %v277_v47 }
  0x3c   : > { %598 = vst [vmem:[%s690_s26 + $0x70] sm:$0xff] %v578_v48   ;;  %v372_v51 = vsel %vm308_vm14, %v276_v43, %v340_v49 }
  0x3d   : > { %v373_v52 = vsel %vm309_vm15, %v277_v47, %v341_v50 }
  0x3e   : > { %v583_v0 = vpack.c.bf16 %v373_v52, %v372_v51 }
  0x40   : > { %599 = vst [vmem:[%s690_s26 + $0x78] sm:$0xff] %v583_v0  }
  0x41 PF: > { %s13_s12 = sadd.s32 1, %s616_s12  }
  0x42   : > { %p10_p4 = scmp.ge.s32.totalorder %s13_s12, 4  }
  0x44   :  { %12 = sbr.rel (!%p10_p4) target bundleno = 1 (0x1), region = 62 }

// kernel: discriminator_forward.12
= control target key start
LH: loop header
LB: loop body
LE: loop exit
PB: predicated region body
PF: predicated region fallthrough
CT: control target
= control target key end

     0   :  { %s338_s0 = inlined_call_operand.vmem [shape: f32[128,128], index: 0, kind: input, shape index: {}]   ;;  %s339_s1 = inlined_call_operand.vmem [shape: f32[1,128], index: 1, kind: input, shape index: {}]   ;;  %s340_s2 = inlined_call_operand.vmem [shape: f32[1,128], index: 2, kind: input, shape index: {}]   ;;  %s341_s3 = inlined_call_operand.vmem [shape: bf16[128,128], index: 3, kind: output, shape index: {}]  }
   0x1   :  { %v14_v0 = vld [vmem:[%s338_s0] sm:$0xff]  ;;  %v15_v1 = vld [vmem:[%s338_s0 + $0x8] sm:$0xff]  ;;  %v16_v4 = vld [vmem:[%s338_s0 + $0x10] sm:$0xff] }
   0x2   :  { %v232_v2 = vld [vmem:[%s339_s1] ss:$0 sm:$0xff]  ;;  %v17_v5 = vld [vmem:[%s338_s0 + $0x18] sm:$0xff]  ;;  %v19_v11 = vld [vmem:[%s338_s0 + $0x28] sm:$0xff] }
   0x3   :  { %v237_v3 = vld [vmem:[%s340_s2] ss:$0 sm:$0xff]  ;;  %v34_v7 = vmul.f32 %v232_v2, %v14_v0  ;;  %v35_v8 = vmul.f32 %v232_v2, %v15_v1  ;;  %v36_v9 = vmul.f32 %v232_v2, %v16_v4  ;;  %v37_v10 = vmul.f32 %v232_v2, %v17_v5  ;;  %v20_v12 = vld [vmem:[%s338_s0 + $0x30] sm:$0xff]  ;;  %v21_v13 = vld [vmem:[%s338_s0 + $0x38] sm:$0xff] }
   0x4   :  { %v18_v6 = vld [vmem:[%s338_s0 + $0x20] sm:$0xff]  ;;  %v39_v15 = vmul.f32 %v232_v2, %v19_v11  ;;  %v40_v16 = vmul.f32 %v232_v2, %v20_v12  ;;  %v41_v17 = vmul.f32 %v232_v2, %v21_v13  ;;  %v23_v37 = vld [vmem:[%s338_s0 + $0x48] sm:$0xff]  ;;  %v24_v38 = vld [vmem:[%s338_s0 + $0x50] sm:$0xff] }
   0x5   :  { %v38_v14 = vmul.f32 %v232_v2, %v18_v6  ;;  %v54_v18 = vadd.f32 %v237_v3, %v34_v7  ;;  %v55_v19 = vadd.f32 %v237_v3, %v35_v8  ;;  %v56_v20 = vadd.f32 %v237_v3, %v36_v9  ;;  %v22_v32 = vld [vmem:[%s338_s0 + $0x40] sm:$0xff]  ;;  %v25_v39 = vld [vmem:[%s338_s0 + $0x58] sm:$0xff]  ;;  %v27_v51 = vld [vmem:[%s338_s0 + $0x68] sm:$0xff] }
   0x6   :  { %v57_v21 = vadd.f32 %v237_v3, %v37_v10  ;;  %v59_v23 = vadd.f32 %v237_v3, %v39_v15  ;;  %v60_v24 = vadd.f32 %v237_v3, %v40_v16  ;;  %v61_v25 = vadd.f32 %v237_v3, %v41_v17  ;;  %v26_v50 = vld [vmem:[%s338_s0 + $0x60] sm:$0xff]  ;;  %v28_v63 = vld [vmem:[%s338_s0 + $0x70] sm:$0xff]  ;;  %v29_v0 = vld [vmem:[%s338_s0 + $0x78] sm:$0xff] }
   0x7   :  { %v58_v22 = vadd.f32 %v237_v3, %v38_v14  ;;  %vm70_vm0 = vcmp.ge.f32.partialorder %v54_v18, 0.0  ;;  %vm71_vm1 = vcmp.ge.f32.partialorder %v55_v19, 0.0  ;;  %v86_v26 = vmul.f32 0.2, %v54_v18 }
   0x8   :  { %v87_v27 = vmul.f32 0.2, %v55_v19  ;;  %vm72_vm2 = vcmp.ge.f32.partialorder %v56_v20, 0.0  ;;  %vm73_vm3 = vcmp.ge.f32.partialorder %v57_v21, 0.0  ;;  %v88_v28 = vmul.f32 0.2, %v56_v20 }
   0x9   :  { %v89_v29 = vmul.f32 0.2, %v57_v21  ;;  %v102_v30 = vsel %vm70_vm0, %v54_v18, %v86_v26  ;;  %vm74_vm4 = vcmp.ge.f32.partialorder %v58_v22, 0.0  ;;  %vm75_vm5 = vcmp.ge.f32.partialorder %v59_v23, 0.0 }
   0xa   :  { %v103_v31 = vsel %vm71_vm1, %v55_v19, %v87_v27  ;;  %v104_v34 = vsel %vm72_vm2, %v56_v20, %v88_v28  ;;  %v90_v36 = vmul.f32 0.2, %v58_v22  ;;  %v91_v41 = vmul.f32 0.2, %v59_v23 }
   0xb   :  { %v157_v33 = vpack.c.bf16 %v103_v31, %v102_v30  ;;  %v105_v35 = vsel %vm73_vm3, %v57_v21, %v89_v29  ;;  %vm76_vm6 = vcmp.ge.f32.partialorder %v60_v24, 0.0  ;;  %vm77_vm7 = vcmp.ge.f32.partialorder %v61_v25, 0.0 }
   0xc   :  { %v162_v40 = vpack.c.bf16 %v105_v35, %v104_v34  ;;  %v106_v42 = vsel %vm74_vm4, %v58_v22, %v90_v36  ;;  %v92_v43 = vmul.f32 0.2, %v60_v24  ;;  %v93_v44 = vmul.f32 0.2, %v61_v25 }
   0xd   :  { %158 = vst [vmem:[%s341_s3] sm:$0xff] %v157_v33   ;;  %v42_v45 = vmul.f32 %v232_v2, %v22_v32  ;;  %v107_v46 = vsel %vm75_vm5, %v59_v23, %v91_v41  ;;  %v43_v47 = vmul.f32 %v232_v2, %v23_v37  ;;  %v44_v48 = vmul.f32 %v232_v2, %v24_v38 }
   0xe   :  { %194 = vst [vmem:[%s341_s3 + $0x8] sm:$0xff] %v162_v40   ;;  %v45_v49 = vmul.f32 %v232_v2, %v25_v39  ;;  %v167_v52 = vpack.c.bf16 %v107_v46, %v106_v42  ;;  %v108_v53 = vsel %vm76_vm6, %v60_v24, %v92_v43  ;;  %v109_v54 = vsel %vm77_vm7, %v61_v25, %v93_v44 }
   0xf   :  { %v62_v55 = vadd.f32 %v237_v3, %v42_v45  ;;  %v172_v56 = vpack.c.bf16 %v109_v54, %v108_v53  ;;  %v63_v57 = vadd.f32 %v237_v3, %v43_v47  ;;  %v64_v58 = vadd.f32 %v237_v3, %v44_v48 }
  0x10   :  { %v65_v59 = vadd.f32 %v237_v3, %v45_v49  ;;  %195 = vst [vmem:[%s341_s3 + $0x10] sm:$0xff] %v167_v52   ;;  %v46_v61 = vmul.f32 %v232_v2, %v26_v50  ;;  %v47_v62 = vmul.f32 %v232_v2, %v27_v51  ;;  %v48_v10 = vmul.f32 %v232_v2, %v28_v63 }
  0x11   :  { %vm78_vm8 = vcmp.ge.f32.partialorder %v62_v55, 0.0  ;;  %v94_v60 = vmul.f32 0.2, %v62_v55  ;;  %196 = vst [vmem:[%s341_s3 + $0x18] sm:$0xff] %v172_v56   ;;  %vm79_vm9 = vcmp.ge.f32.partialorder %v63_v57, 0.0  ;;  %vm80_vm10 = vcmp.ge.f32.partialorder %v64_v58, 0.0 }
  0x12   :  { %v95_v1 = vmul.f32 0.2, %v63_v57  ;;  %vm81_vm11 = vcmp.ge.f32.partialorder %v65_v59, 0.0  ;;  %v96_v5 = vmul.f32 0.2, %v64_v58  ;;  %v66_v7 = vadd.f32 %v237_v3, %v46_v61 }
  0x13   :  { %v110_v4 = vsel %vm78_vm8, %v62_v55, %v94_v60  ;;  %v97_v6 = vmul.f32 0.2, %v65_v59  ;;  %v67_v9 = vadd.f32 %v237_v3, %v47_v62  ;;  %v49_v11 = vmul.f32 %v232_v2, %v29_v0 }
  0x14   :  { %v111_v8 = vsel %vm79_vm9, %v63_v57, %v95_v1  ;;  %v112_v13 = vsel %vm80_vm10, %v64_v58, %v96_v5  ;;  %vm82_vm12 = vcmp.ge.f32.partialorder %v66_v7, 0.0  ;;  %v98_v16 = vmul.f32 0.2, %v66_v7 }
  0x15   :  { %v177_v12 = vpack.c.bf16 %v111_v8, %v110_v4  ;;  %v113_v14 = vsel %vm81_vm11, %v65_v59, %v97_v6  ;;  %vm83_vm13 = vcmp.ge.f32.partialorder %v67_v9, 0.0  ;;  %v99_v17 = vmul.f32 0.2, %v67_v9 }
  0x16   :  { %v182_v15 = vpack.c.bf16 %v113_v14, %v112_v13  ;;  %v68_v18 = vadd.f32 %v237_v3, %v48_v10  ;;  %v69_v19 = vadd.f32 %v237_v3, %v49_v11  ;;  %v114_v2 = vsel %vm82_vm12, %v66_v7, %v98_v16 }
  0x17   :  { %197 = vst [vmem:[%s341_s3 + $0x20] sm:$0xff] %v177_v12   ;;  %v115_v20 = vsel %vm83_vm13, %v67_v9, %v99_v17 }
  0x18   :  { %198 = vst [vmem:[%s341_s3 + $0x28] sm:$0xff] %v182_v15   ;;  %v187_v21 = vpack.c.bf16 %v115_v20, %v114_v2  ;;  %vm84_vm14 = vcmp.ge.f32.partialorder %v68_v18, 0.0  ;;  %vm85_vm15 = vcmp.ge.f32.partialorder %v69_v19, 0.0  ;;  %v100_v22 = vmul.f32 0.2, %v68_v18 }
  0x19   :  { %v101_v23 = vmul.f32 0.2, %v69_v19 }
  0x1a   :  { %199 = vst [vmem:[%s341_s3 + $0x30] sm:$0xff] %v187_v21   ;;  %v116_v24 = vsel %vm84_vm14, %v68_v18, %v100_v22 }
  0x1b   :  { %v117_v25 = vsel %vm85_vm15, %v69_v19, %v101_v23 }
  0x1c   :  { %v192_v26 = vpack.c.bf16 %v117_v25, %v116_v24 }
  0x1e   :  { %200 = vst [vmem:[%s341_s3 + $0x38] sm:$0xff] %v192_v26  }

// kernel: discriminator_forward.11
= control target key start
LH: loop header
LB: loop body
LE: loop exit
PB: predicated region body
PF: predicated region fallthrough
CT: control target
= control target key end

     0   :  { %s5325_s1 = inlined_call_operand.vmem [shape: bf16[2048,128], index: 1, kind: input, shape index: {}]   ;;  %s5326_s0 = inlined_call_operand.vmem [shape: bf16[128,2048], index: 0, kind: input, shape index: {}]   ;;  %s5327_s2 = inlined_call_operand.vmem [shape: f32[128,128], index: 2, kind: output, shape index: {0}]   ;;  %s5328_s3 = inlined_call_operand.vmem [shape: f32[1,8,128], index: 3, kind: output, shape index: {1}]  }
   0x1   :  { %v3837_v0 = vld [vmem:[%s5325_s1 + $0x38] sm:$0xff]  ;;  %v3836_v4 = vld [vmem:[%s5325_s1 + $0x30] sm:$0xff]  ;;  %v3835_v8 = vld [vmem:[%s5325_s1 + $0x28] sm:$0xff] }
   0x2   :  { %v3845_v1 = vld [vmem:[%s5325_s1 + $0x78] sm:$0xff]  ;;  %1805 = vmatpush.bf16.msra.mxu0 %v3837_v0  ;;  %v3844_v5 = vld [vmem:[%s5325_s1 + $0x70] sm:$0xff]  ;;  %v3843_v9 = vld [vmem:[%s5325_s1 + $0x68] sm:$0xff] }
   0x3   :  { %v3853_v2 = vld [vmem:[%s5325_s1 + $0xb8] sm:$0xff]  ;;  %1854 = vmatpush.bf16.msra.mxu1 %v3845_v1  ;;  %v3852_v6 = vld [vmem:[%s5325_s1 + $0xb0] sm:$0xff]  ;;  %v3851_v10 = vld [vmem:[%s5325_s1 + $0xa8] sm:$0xff] }
   0x4   :  { %v3861_v3 = vld [vmem:[%s5325_s1 + $0xf8] sm:$0xff]  ;;  %1903 = vmatpush.bf16.msra.mxu2 %v3853_v2  ;;  %v3860_v7 = vld [vmem:[%s5325_s1 + $0xf0] sm:$0xff]  ;;  %v3859_v11 = vld [vmem:[%s5325_s1 + $0xe8] sm:$0xff] }
   0x5   :  { %1952 = vmatpush.bf16.msra.mxu3 %v3861_v3  ;;  %v3834_v12 = vld [vmem:[%s5325_s1 + $0x20] sm:$0xff]  ;;  %v3833_v16 = vld [vmem:[%s5325_s1 + $0x18] sm:$0xff]  ;;  %v3832_v20 = vld [vmem:[%s5325_s1 + $0x10] sm:$0xff] }
   0x6   :  { %1806 = vmatpush.bf16.msra.mxu0 %v3836_v4  ;;  %v3842_v13 = vld [vmem:[%s5325_s1 + $0x60] sm:$0xff]  ;;  %v3841_v17 = vld [vmem:[%s5325_s1 + $0x58] sm:$0xff]  ;;  %v3840_v21 = vld [vmem:[%s5325_s1 + $0x50] sm:$0xff] }
   0x7   :  { %1855 = vmatpush.bf16.msra.mxu1 %v3844_v5  ;;  %v3850_v14 = vld [vmem:[%s5325_s1 + $0xa0] sm:$0xff]  ;;  %v3849_v18 = vld [vmem:[%s5325_s1 + $0x98] sm:$0xff]  ;;  %v3848_v22 = vld [vmem:[%s5325_s1 + $0x90] sm:$0xff] }
   0x8   :  { %1904 = vmatpush.bf16.msra.mxu2 %v3852_v6  ;;  %v3858_v15 = vld [vmem:[%s5325_s1 + $0xe0] sm:$0xff]  ;;  %v3857_v19 = vld [vmem:[%s5325_s1 + $0xd8] sm:$0xff]  ;;  %v3856_v23 = vld [vmem:[%s5325_s1 + $0xd0] sm:$0xff] }
   0x9   :  { %1953 = vmatpush.bf16.msra.mxu3 %v3860_v7  ;;  %v3831_v24 = vld [vmem:[%s5325_s1 + $0x8] sm:$0xff]  ;;  %v3830_v28 = vld [vmem:[%s5325_s1] sm:$0xff]  ;;  %v3885_v40 = vld [vmem:[%s5325_s1 + $0x1b8] sm:$0xff] }
   0xa   :  { %1807 = vmatpush.bf16.msra.mxu0 %v3835_v8  ;;  %v3839_v25 = vld [vmem:[%s5325_s1 + $0x48] sm:$0xff]  ;;  %v3838_v29 = vld [vmem:[%s5325_s1 + $0x40] sm:$0xff]  ;;  %v3869_v41 = vld [vmem:[%s5325_s1 + $0x138] sm:$0xff] }
   0xb   :  { %1856 = vmatpush.bf16.msra.mxu1 %v3843_v9  ;;  %v3847_v26 = vld [vmem:[%s5325_s1 + $0x88] sm:$0xff]  ;;  %v3846_v30 = vld [vmem:[%s5325_s1 + $0x80] sm:$0xff]  ;;  %v3893_v46 = vld [vmem:[%s5325_s1 + $0x1f8] sm:$0xff] }
   0xc   :  { %1905 = vmatpush.bf16.msra.mxu2 %v3851_v10  ;;  %v3855_v27 = vld [vmem:[%s5325_s1 + $0xc8] sm:$0xff]  ;;  %v3854_v31 = vld [vmem:[%s5325_s1 + $0xc0] sm:$0xff]  ;;  %v3877_v47 = vld [vmem:[%s5325_s1 + $0x178] sm:$0xff] }
   0xd   :  { %1954 = vmatpush.bf16.msra.mxu3 %v3859_v11  ;;  %v2680_v32 = vld [vmem:[%s5326_s0] sm:$0xf]  ;;  %v3702_v34 = vld [vmem:[%s5326_s0 + $0x4] sm:$0xf]  ;;  %v2688_v36 = vld [vmem:[%s5326_s0 + $0x8] sm:$0xf] }
   0xe   :  { %1808 = vmatpush.bf16.msra.mxu0 %v3834_v12  ;;  %v3710_v33 = vld [vmem:[%s5326_s0 + $0x3c] sm:$0xf0]  ;;  %v2682_v35 = vld [vmem:[%s5326_s0 + $0x40] sm:$0xf0]  ;;  %v3711_v37 = vld [vmem:[%s5326_s0 + $0x44] sm:$0xf0] }
   0xf   :  { %1857 = vmatpush.bf16.msra.mxu1 %v3842_v13  ;;  %v3703_v38 = vld [vmem:[%s5326_s0 + $0xc] sm:$0xf]  ;;  %v2681_v42 = vor.u32 %v3710_v33, %v2680_v32  ;;  %v2685_v43 = vor.u32 %v3702_v34, %v2682_v35  ;;  %v2689_v44 = vor.u32 %v3711_v37, %v2688_v36  ;;  %v3884_v48 = vld [vmem:[%s5325_s1 + $0x1b0] sm:$0xff]  ;;  %v2744_v56 = vld [vmem:[%s5326_s0 + $0x80] sm:$0xf] }
  0x10   :  { %1906 = vmatpush.bf16.msra.mxu2 %v3850_v14  ;;  %v2690_v39 = vld [vmem:[%s5326_s0 + $0x48] sm:$0xf0]  ;;  %v3868_v49 = vld [vmem:[%s5325_s1 + $0x130] sm:$0xff]  ;;  %v3726_v57 = vld [vmem:[%s5326_s0 + $0xbc] sm:$0xf0] }
  0x11   :  { %1955 = vmatpush.bf16.msra.mxu3 %v3858_v15  ;;  %v2693_v45 = vor.u32 %v3703_v38, %v2690_v39  ;;  %v3892_v50 = vld [vmem:[%s5325_s1 + $0x1f0] sm:$0xff]  ;;  %v3883_v52 = vld [vmem:[%s5325_s1 + $0x1a8] sm:$0xff]  ;;  %v3718_v58 = vld [vmem:[%s5326_s0 + $0x84] sm:$0xf]  ;;  %v2745_v0 = vor.u32 %v3726_v57, %v2744_v56 }
  0x12   :  { %1809 = vmatpush.bf16.msra.mxu0 %v3833_v16  ;;  %v3876_v51 = vld [vmem:[%s5325_s1 + $0x170] sm:$0xff]  ;;  %v3867_v53 = vld [vmem:[%s5325_s1 + $0x128] sm:$0xff]  ;;  %v2746_v59 = vld [vmem:[%s5326_s0 + $0xc0] sm:$0xf0] }
  0x13   :  { %1858 = vmatpush.bf16.msra.mxu1 %v3841_v17  ;;  %v3891_v54 = vld [vmem:[%s5325_s1 + $0x1e8] sm:$0xff]  ;;  %v2749_v1 = vor.u32 %v3718_v58, %v2746_v59  ;;  %v3882_v4 = vld [vmem:[%s5325_s1 + $0x1a0] sm:$0xff]  ;;  %v3880_v36 = vld [vmem:[%s5325_s1 + $0x190] sm:$0xff] }
  0x14   :  { %1907 = vmatpush.bf16.msra.mxu2 %v3849_v18  ;;  %v3875_v55 = vld [vmem:[%s5325_s1 + $0x168] sm:$0xff]  ;;  %v3866_v5 = vld [vmem:[%s5325_s1 + $0x120] sm:$0xff]  ;;  %v3864_v37 = vld [vmem:[%s5325_s1 + $0x110] sm:$0xff] }
  0x15   :  { %1956 = vmatpush.bf16.msra.mxu3 %v3857_v19  ;;  %v2752_v60 = vld [vmem:[%s5326_s0 + $0x88] sm:$0xf]  ;;  %v3719_v62 = vld [vmem:[%s5326_s0 + $0x8c] sm:$0xf]  ;;  %v3890_v6 = vld [vmem:[%s5325_s1 + $0x1e0] sm:$0xff] }
  0x16   :  { %1810 = vmatpush.bf16.msra.mxu0 %v3832_v20  ;;  %v3727_v61 = vld [vmem:[%s5326_s0 + $0xc4] sm:$0xf0]  ;;  %v2754_v63 = vld [vmem:[%s5326_s0 + $0xc8] sm:$0xf0]  ;;  %v3874_v7 = vld [vmem:[%s5325_s1 + $0x160] sm:$0xff] }
  0x17   :  { %1859 = vmatpush.bf16.msra.mxu1 %v3840_v21  ;;  %v2753_v2 = vor.u32 %v3727_v61, %v2752_v60  ;;  %v2757_v3 = vor.u32 %v3719_v62, %v2754_v63  ;;  %v2808_v8 = vld [vmem:[%s5326_s0 + $0x100] sm:$0xf]  ;;  %v3734_v10 = vld [vmem:[%s5326_s0 + $0x104] sm:$0xf]  ;;  %v2816_v12 = vld [vmem:[%s5326_s0 + $0x108] sm:$0xf] }
  0x18   :  { %1908 = vmatpush.bf16.msra.mxu2 %v3848_v22  ;;  %v3742_v9 = vld [vmem:[%s5326_s0 + $0x13c] sm:$0xf0]  ;;  %v2810_v11 = vld [vmem:[%s5326_s0 + $0x140] sm:$0xf0]  ;;  %v3743_v13 = vld [vmem:[%s5326_s0 + $0x144] sm:$0xf0] }
  0x19   :  { %1957 = vmatpush.bf16.msra.mxu3 %v3856_v23  ;;  %v3735_v14 = vld [vmem:[%s5326_s0 + $0x10c] sm:$0xf]  ;;  %v2809_v16 = vor.u32 %v3742_v9, %v2808_v8  ;;  %v2813_v17 = vor.u32 %v3734_v10, %v2810_v11  ;;  %v2817_v18 = vor.u32 %v3743_v13, %v2816_v12  ;;  %v3881_v20 = vld [vmem:[%s5325_s1 + $0x198] sm:$0xff]  ;;  %v3888_v38 = vld [vmem:[%s5325_s1 + $0x1d0] sm:$0xff] }
  0x1a   :  { %1811 = vmatpush.bf16.msra.mxu0 %v3831_v24  ;;  %v2818_v15 = vld [vmem:[%s5326_s0 + $0x148] sm:$0xf0]  ;;  %v3865_v21 = vld [vmem:[%s5325_s1 + $0x118] sm:$0xff]  ;;  %v2872_v24 = vld [vmem:[%s5326_s0 + $0x180] sm:$0xf] }
  0x1b   :  { %1860 = vmatpush.bf16.msra.mxu1 %v3839_v25  ;;  %v2821_v19 = vor.u32 %v3735_v14, %v2818_v15  ;;  %v3889_v22 = vld [vmem:[%s5325_s1 + $0x1d8] sm:$0xff]  ;;  %v3758_v25 = vld [vmem:[%s5326_s0 + $0x1bc] sm:$0xf0]  ;;  %v3872_v39 = vld [vmem:[%s5325_s1 + $0x150] sm:$0xff] }
  0x1c   :  { %1909 = vmatpush.bf16.msra.mxu2 %v3847_v26  ;;  %v3873_v23 = vld [vmem:[%s5325_s1 + $0x158] sm:$0xff]  ;;  %v3750_v26 = vld [vmem:[%s5326_s0 + $0x184] sm:$0xf]  ;;  %v2873_v32 = vor.u32 %v3758_v25, %v2872_v24  ;;  %v3000_v56 = vld [vmem:[%s5326_s0 + $0x280] sm:$0xf] }
  0x1d   :  { %1958 = vmatpush.bf16.msra.mxu3 %v3855_v27  ;;  %v2874_v27 = vld [vmem:[%s5326_s0 + $0x1c0] sm:$0xf0]  ;;  %v3790_v57 = vld [vmem:[%s5326_s0 + $0x2bc] sm:$0xf0]  ;;  %v3008_v60 = vld [vmem:[%s5326_s0 + $0x288] sm:$0xf] }
  0x1e   :  { %1812 = vmatpush.bf16.msra.mxu0 %v3830_v28  ;;  %v2880_v28 = vld [vmem:[%s5326_s0 + $0x188] sm:$0xf]  ;;  %v2877_v33 = vor.u32 %v3750_v26, %v2874_v27  ;;  %v3782_v58 = vld [vmem:[%s5326_s0 + $0x284] sm:$0xf]  ;;  %v3783_v62 = vld [vmem:[%s5326_s0 + $0x28c] sm:$0xf] }
  0x1f   :  { %1861 = vmatpush.bf16.msra.mxu1 %v3838_v29  ;;  %v3759_v29 = vld [vmem:[%s5326_s0 + $0x1c4] sm:$0xf0]  ;;  %v3002_v59 = vld [vmem:[%s5326_s0 + $0x2c0] sm:$0xf0]  ;;  %v3010_v63 = vld [vmem:[%s5326_s0 + $0x2c8] sm:$0xf0] }
  0x20   :  { %1910 = vmatpush.bf16.msra.mxu2 %v3846_v30  ;;  %v3751_v30 = vld [vmem:[%s5326_s0 + $0x18c] sm:$0xf]  ;;  %v2881_v34 = vor.u32 %v3759_v29, %v2880_v28  ;;  %v3791_v61 = vld [vmem:[%s5326_s0 + $0x2c4] sm:$0xf0]  ;;  %v3064_v8 = vld [vmem:[%s5326_s0 + $0x300] sm:$0xf] }
  0x21   :  { %1959 = vmatpush.bf16.msra.mxu3 %v3854_v31  ;;  %1813 = vmatmul.bf16.vlgmr.msra.gmra.mxu0 %v2681_v42  ;;  %v2882_v31 = vld [vmem:[%s5326_s0 + $0x1c8] sm:$0xf0]  ;;  %v3766_v42 = vld [vmem:[%s5326_s0 + $0x204] sm:$0xf]  ;;  %v3806_v9 = vld [vmem:[%s5326_s0 + $0x33c] sm:$0xf0] }
  0x22   :  { %2001 = vmatpush.bf16.msrb.mxu0 %v3869_v41  ;;  %1862 = vmatmul.bf16.vlgmr.msra.gmra.mxu1 %v2685_v43  ;;  %v2885_v35 = vor.u32 %v3751_v30, %v2882_v31  ;;  %v3774_v41 = vld [vmem:[%s5326_s0 + $0x23c] sm:$0xf0]  ;;  %v2938_v43 = vld [vmem:[%s5326_s0 + $0x240] sm:$0xf0]  ;;  %v3072_v12 = vld [vmem:[%s5326_s0 + $0x308] sm:$0xf] }
  0x23   :  { %1911 = vmatmul.bf16.vlgmr.msra.gmra.mxu2 %v2689_v44  ;;  %2050 = vmatpush.bf16.msrb.mxu1 %v3877_v47  ;;  %v2944_v44 = vld [vmem:[%s5326_s0 + $0x208] sm:$0xf]  ;;  %v2946_v47 = vld [vmem:[%s5326_s0 + $0x248] sm:$0xf0]  ;;  %v3798_v10 = vld [vmem:[%s5326_s0 + $0x304] sm:$0xf] }
  0x24   :  { %2099 = vmatpush.bf16.msrb.mxu2 %v3885_v40  ;;  %1960 = vmatmul.bf16.vlgmr.msra.gmra.mxu3 %v2693_v45  ;;  %v2936_v40 = vld [vmem:[%s5326_s0 + $0x200] sm:$0xf]  ;;  %v3775_v45 = vld [vmem:[%s5326_s0 + $0x244] sm:$0xf0]  ;;  %v3066_v11 = vld [vmem:[%s5326_s0 + $0x340] sm:$0xf0] }
  0x25   :  { %2148 = vmatpush.bf16.msrb.mxu3 %v3893_v46  ;;  %v3767_v46 = vld [vmem:[%s5326_s0 + $0x20c] sm:$0xf]  ;;  %v3807_v13 = vld [vmem:[%s5326_s0 + $0x344] sm:$0xf0]  ;;  %v3128_v24 = vld [vmem:[%s5326_s0 + $0x380] sm:$0xf] }
  0x26   :  { %2002 = vmatpush.bf16.msrb.mxu0 %v3868_v49  ;;  %v2941_v49 = vor.u32 %v3766_v42, %v2938_v43  ;;  %v3799_v14 = vld [vmem:[%s5326_s0 + $0x30c] sm:$0xf]  ;;  %v3822_v25 = vld [vmem:[%s5326_s0 + $0x3bc] sm:$0xf0]  ;;  %v3814_v26 = vld [vmem:[%s5326_s0 + $0x384] sm:$0xf] }
  0x27   :  { %2051 = vmatpush.bf16.msrb.mxu1 %v3876_v51  ;;  %v2949_v51 = vor.u32 %v3767_v46, %v2946_v47  ;;  %v3074_v15 = vld [vmem:[%s5326_s0 + $0x348] sm:$0xf0]  ;;  %v3130_v27 = vld [vmem:[%s5326_s0 + $0x3c0] sm:$0xf0]  ;;  %v3136_v28 = vld [vmem:[%s5326_s0 + $0x388] sm:$0xf] }
  0x28   :  { %2100 = vmatpush.bf16.msrb.mxu2 %v3884_v48  ;;  %v2937_v48 = vor.u32 %v3774_v41, %v2936_v40  ;;  %v3823_v29 = vld [vmem:[%s5326_s0 + $0x3c4] sm:$0xf0]  ;;  %v3815_v30 = vld [vmem:[%s5326_s0 + $0x38c] sm:$0xf]  ;;  %v2696_v40 = vld [vmem:[%s5326_s0 + $0x10] sm:$0xf] }
  0x29   :  { %2149 = vmatpush.bf16.msrb.mxu3 %v3892_v50  ;;  %v2945_v50 = vor.u32 %v3775_v45, %v2944_v44  ;;  %v3138_v31 = vld [vmem:[%s5326_s0 + $0x3c8] sm:$0xf0]  ;;  %v3712_v41 = vld [vmem:[%s5326_s0 + $0x4c] sm:$0xf0]  ;;  %v3704_v42 = vld [vmem:[%s5326_s0 + $0x14] sm:$0xf] }
  0x2a   :  { %2003 = vmatpush.bf16.msrb.mxu0 %v3867_v53  ;;  %v3863_v53 = vld [vmem:[%s5325_s1 + $0x108] sm:$0xff]  ;;  %v2698_v43 = vld [vmem:[%s5326_s0 + $0x50] sm:$0xf0]  ;;  %v2704_v44 = vld [vmem:[%s5326_s0 + $0x18] sm:$0xf] }
  0x2b   :  { %2052 = vmatpush.bf16.msrb.mxu1 %v3875_v55  ;;  %v3871_v55 = vld [vmem:[%s5325_s1 + $0x148] sm:$0xff]  ;;  %v3713_v45 = vld [vmem:[%s5326_s0 + $0x54] sm:$0xf0]  ;;  %v3705_v46 = vld [vmem:[%s5326_s0 + $0x1c] sm:$0xf] }
  0x2c   :  { %2101 = vmatpush.bf16.msrb.mxu2 %v3883_v52  ;;  %v3879_v52 = vld [vmem:[%s5325_s1 + $0x188] sm:$0xff]  ;;  %v2706_v47 = vld [vmem:[%s5326_s0 + $0x58] sm:$0xf0] }
  0x2d   :  { %2150 = vmatpush.bf16.msrb.mxu3 %v3891_v54  ;;  %v3887_v54 = vld [vmem:[%s5325_s1 + $0x1c8] sm:$0xff] }
  0x2e   :  { %2004 = vmatpush.bf16.msrb.mxu0 %v3866_v5  ;;  %v3862_v5 = vld [vmem:[%s5325_s1 + $0x100] sm:$0xff] }
  0x2f   :  { %2053 = vmatpush.bf16.msrb.mxu1 %v3874_v7  ;;  %v3870_v7 = vld [vmem:[%s5325_s1 + $0x140] sm:$0xff] }
  0x30   :  { %2102 = vmatpush.bf16.msrb.mxu2 %v3882_v4  ;;  %v3878_v4 = vld [vmem:[%s5325_s1 + $0x180] sm:$0xff] }
  0x31   :  { %1818 = vmatmul.bf16.gmra.mxu0 %v2745_v0  ;;  %2151 = vmatpush.bf16.msrb.mxu3 %v3890_v6  ;;  %v3001_v0 = vor.u32 %v3790_v57, %v3000_v56  ;;  %v3886_v6 = vld [vmem:[%s5325_s1 + $0x1c0] sm:$0xff]  ;;  %v3899_v56 = vld [vmem:[%s5325_s1 + $0x228] sm:$0xff] }
  0x32   :  { %1867 = vmatmul.bf16.gmra.mxu1 %v2749_v1  ;;  %2005 = vmatpush.bf16.msrb.mxu0 %v3865_v21  ;;  %v3005_v1 = vor.u32 %v3782_v58, %v3002_v59  ;;  %v3901_v21 = vld [vmem:[%s5325_s1 + $0x238] sm:$0xff]  ;;  %v3923_v57 = vld [vmem:[%s5325_s1 + $0x2e8] sm:$0xff] }
  0x33   :  { %1916 = vmatmul.bf16.gmra.mxu2 %v2753_v2  ;;  %2054 = vmatpush.bf16.msrb.mxu1 %v3873_v23  ;;  %v3009_v2 = vor.u32 %v3791_v61, %v3008_v60  ;;  %v3909_v23 = vld [vmem:[%s5325_s1 + $0x278] sm:$0xff] }
  0x34   :  { %1965 = vmatmul.bf16.gmra.mxu3 %v2757_v3  ;;  %2103 = vmatpush.bf16.msrb.mxu2 %v3881_v20  ;;  %v3013_v3 = vor.u32 %v3783_v62, %v3010_v63  ;;  %v3917_v20 = vld [vmem:[%s5325_s1 + $0x2b8] sm:$0xff] }
  0x35   :  { %2152 = vmatpush.bf16.msrb.mxu3 %v3889_v22  ;;  %v3925_v22 = vld [vmem:[%s5325_s1 + $0x2f8] sm:$0xff] }
  0x36   :  { %2006 = vmatpush.bf16.msrb.mxu0 %v3864_v37  ;;  %v3900_v37 = vld [vmem:[%s5325_s1 + $0x230] sm:$0xff] }
  0x37   :  { %2055 = vmatpush.bf16.msrb.mxu1 %v3872_v39  ;;  %v3908_v39 = vld [vmem:[%s5325_s1 + $0x270] sm:$0xff] }
  0x38   :  { %2104 = vmatpush.bf16.msrb.mxu2 %v3880_v36  ;;  %v3916_v36 = vld [vmem:[%s5325_s1 + $0x2b0] sm:$0xff] }
  0x39   :  { %2153 = vmatpush.bf16.msrb.mxu3 %v3888_v38  ;;  %v3924_v38 = vld [vmem:[%s5325_s1 + $0x2f0] sm:$0xff] }
  0x3a   :  { %2007 = vmatpush.bf16.msrb.mxu0 %v3863_v53  ;;  %v2709_v53 = vor.u32 %v3705_v46, %v2706_v47 }
  0x3b   :  { %2056 = vmatpush.bf16.msrb.mxu1 %v3871_v55  ;;  %v3915_v55 = vld [vmem:[%s5325_s1 + $0x2a8] sm:$0xff] }
  0x3c   :  { %2105 = vmatpush.bf16.msrb.mxu2 %v3879_v52  ;;  %v2705_v52 = vor.u32 %v3713_v45, %v2704_v44 }
  0x3d   :  { %2154 = vmatpush.bf16.msrb.mxu3 %v3887_v54 }
  0x3e   :  { %2008 = vmatpush.bf16.msrb.mxu0 %v3862_v5  ;;  %v2762_v5 = vld [vmem:[%s5326_s0 + $0xd0] sm:$0xf0] }
  0x3f   :  { %2057 = vmatpush.bf16.msrb.mxu1 %v3870_v7  ;;  %v3729_v7 = vld [vmem:[%s5326_s0 + $0xd4] sm:$0xf0] }
  0x40   :  { %2106 = vmatpush.bf16.msrb.mxu2 %v3878_v4  ;;  %v3720_v4 = vld [vmem:[%s5326_s0 + $0x94] sm:$0xf] }
  0x41   :  { %1823 = vmatmul.bf16.gmra.mxu0 %v2809_v16  ;;  %2155 = vmatpush.bf16.msrb.mxu3 %v3886_v6  ;;  %v3065_v16 = vor.u32 %v3806_v9, %v3064_v8  ;;  %v2768_v6 = vld [vmem:[%s5326_s0 + $0x98] sm:$0xf]  ;;  %v3721_v8 = vld [vmem:[%s5326_s0 + $0x9c] sm:$0xf] }
  0x42   :  { %1872 = vmatmul.bf16.gmra.mxu1 %v2813_v17  ;;  %v3069_v17 = vor.u32 %v3798_v10, %v3066_v11  ;;  %2197 = vmatpush.bf16.msra.mxu0 %v3901_v21  ;;  %v2770_v9 = vld [vmem:[%s5326_s0 + $0xd8] sm:$0xf0]  ;;  %v3914_v21 = vld [vmem:[%s5325_s1 + $0x2a0] sm:$0xff] }
  0x43   :  { %1921 = vmatmul.bf16.gmra.mxu2 %v2817_v18  ;;  %v3073_v18 = vor.u32 %v3807_v13, %v3072_v12  ;;  %2246 = vmatpush.bf16.msra.mxu1 %v3909_v23  ;;  %v2765_v13 = vor.u32 %v3720_v4, %v2762_v5  ;;  %v3922_v23 = vld [vmem:[%s5325_s1 + $0x2e0] sm:$0xff]  ;;  %v3761_v4 = vld [vmem:[%s5326_s0 + $0x1d4] sm:$0xf0]  ;;  %v3753_v5 = vld [vmem:[%s5326_s0 + $0x19c] sm:$0xf] }
  0x44   :  { %1970 = vmatmul.bf16.gmra.mxu3 %v2821_v19  ;;  %v3077_v19 = vor.u32 %v3799_v14, %v3074_v15  ;;  %2295 = vmatpush.bf16.msra.mxu2 %v3917_v20 }
  0x45   :  { %2344 = vmatpush.bf16.msra.mxu3 %v3925_v22  ;;  %v3898_v22 = vld [vmem:[%s5325_s1 + $0x220] sm:$0xff] }
  0x46   :  { %2198 = vmatpush.bf16.msra.mxu0 %v3900_v37  ;;  %v3745_v37 = vld [vmem:[%s5326_s0 + $0x154] sm:$0xf0] }
  0x47   :  { %2247 = vmatpush.bf16.msra.mxu1 %v3908_v39  ;;  %v2834_v39 = vld [vmem:[%s5326_s0 + $0x158] sm:$0xf0] }
  0x48   :  { %2296 = vmatpush.bf16.msra.mxu2 %v3916_v36  ;;  %v2832_v36 = vld [vmem:[%s5326_s0 + $0x118] sm:$0xf] }
  0x49   :  { %2345 = vmatpush.bf16.msra.mxu3 %v3924_v38  ;;  %v3737_v38 = vld [vmem:[%s5326_s0 + $0x11c] sm:$0xf]  ;;  %v2833_v47 = vor.u32 %v3745_v37, %v2832_v36  ;;  %v3777_v36 = vld [vmem:[%s5326_s0 + $0x254] sm:$0xf0] }
  0x4a   :  { %2199 = vmatpush.bf16.msra.mxu0 %v3899_v56  ;;  %v3769_v37 = vld [vmem:[%s5326_s0 + $0x21c] sm:$0xf] }
  0x4c   :  { %2297 = vmatpush.bf16.msra.mxu2 %v3915_v55 }
  0x4d   :  { %2346 = vmatpush.bf16.msra.mxu3 %v3923_v57 }
  0x4e   :  { %2200 = vmatpush.bf16.msra.mxu0 %v3898_v22 }
  0x50   :  { %2298 = vmatpush.bf16.msra.mxu2 %v3914_v21  ;;  %v3920_v21 = vld [vmem:[%s5325_s1 + $0x2d0] sm:$0xff] }
  0x51   :  { %1828 = vmatmul.bf16.gmra.mxu0 %v2873_v32  ;;  %v3129_v32 = vor.u32 %v3822_v25, %v3128_v24  ;;  %2347 = vmatpush.bf16.msra.mxu3 %v3922_v23 }
  0x52   :  { %1877 = vmatmul.bf16.gmra.mxu1 %v2877_v33  ;;  %v3133_v33 = vor.u32 %v3814_v26, %v3130_v27 }
  0x53   :  { %1926 = vmatmul.bf16.gmra.mxu2 %v2881_v34  ;;  %v3137_v34 = vor.u32 %v3823_v29, %v3136_v28 }
  0x54   :  { %1975 = vmatmul.bf16.gmra.mxu3 %v2885_v35  ;;  %v3141_v35 = vor.u32 %v3815_v30, %v3138_v31  ;;  %v3906_v31 = vld [vmem:[%s5325_s1 + $0x260] sm:$0xff] }
  0x61   :  { %1833 = vmatmul.bf16.gmra.mxu0 %v2937_v48  ;;  %v2697_v48 = vor.u32 %v3712_v41, %v2696_v40 }
  0x62   :  { %1882 = vmatmul.bf16.gmra.mxu1 %v2941_v49  ;;  %v2701_v49 = vor.u32 %v3704_v42, %v2698_v43 }
  0x63   :  { %1931 = vmatmul.bf16.gmra.mxu2 %v2945_v50 }
  0x64   :  { %1980 = vmatmul.bf16.gmra.mxu3 %v2949_v51 }
  0x71   :  { %1838 = vmatmul.bf16.gmra.mxu0 %v3001_v0 }
  0x72   :  { %1887 = vmatmul.bf16.gmra.mxu1 %v3005_v1  ;;  %v3907_v1 = vld [vmem:[%s5325_s1 + $0x268] sm:$0xff] }
  0x73   :  { %1936 = vmatmul.bf16.gmra.mxu2 %v3009_v2  ;;  %v2760_v2 = vld [vmem:[%s5326_s0 + $0x90] sm:$0xf]  ;;  %2248 = vmatpush.bf16.msra.mxu1 %v3907_v1  ;;  %v3752_v1 = vld [vmem:[%s5326_s0 + $0x194] sm:$0xf] }
  0x74   :  { %1985 = vmatmul.bf16.gmra.mxu3 %v3013_v3  ;;  %v3728_v3 = vld [vmem:[%s5326_s0 + $0xcc] sm:$0xf0] }
  0x75   :  { %v2761_v12 = vor.u32 %v3728_v3, %v2760_v2  ;;  %v2890_v2 = vld [vmem:[%s5326_s0 + $0x1d0] sm:$0xf0]  ;;  %v2896_v3 = vld [vmem:[%s5326_s0 + $0x198] sm:$0xf] }
  0x77   :  { %2249 = vmatpush.bf16.msra.mxu1 %v3906_v31  ;;  %v2952_v31 = vld [vmem:[%s5326_s0 + $0x210] sm:$0xf] }
  0x81   :  { %1843 = vmatmul.bf16.gmra.mxu0 %v3065_v16 }
  0x82   :  { %1892 = vmatmul.bf16.gmra.mxu1 %v3069_v17  ;;  %v2769_v17 = vor.u32 %v3729_v7, %v2768_v6  ;;  %v2898_v6 = vld [vmem:[%s5326_s0 + $0x1d8] sm:$0xf0] }
  0x83   :  { %1941 = vmatmul.bf16.gmra.mxu2 %v3073_v18  ;;  %v2773_v18 = vor.u32 %v3721_v8, %v2770_v9 }
  0x84   :  { %1990 = vmatmul.bf16.gmra.mxu3 %v3077_v19 }
  0x91   :  { %1848 = vmatmul.bf16.gmra.mxu0 %v3129_v32  ;;  %v2824_v32 = vld [vmem:[%s5326_s0 + $0x110] sm:$0xf] }
  0x92   :  { %1897 = vmatmul.bf16.gmra.mxu1 %v3133_v33  ;;  %v3744_v33 = vld [vmem:[%s5326_s0 + $0x14c] sm:$0xf0] }
  0x93   :  { %1946 = vmatmul.bf16.gmra.mxu2 %v3137_v34  ;;  %v3736_v34 = vld [vmem:[%s5326_s0 + $0x114] sm:$0xf]  ;;  %v2825_v42 = vor.u32 %v3744_v33, %v2824_v32  ;;  %v3776_v32 = vld [vmem:[%s5326_s0 + $0x24c] sm:$0xf0] }
  0x94   :  { %1995 = vmatmul.bf16.gmra.mxu3 %v3141_v35  ;;  %v2826_v35 = vld [vmem:[%s5326_s0 + $0x150] sm:$0xf0] }
  0x95   :  { %v2829_v43 = vor.u32 %v3736_v34, %v2826_v35  ;;  %v3768_v33 = vld [vmem:[%s5326_s0 + $0x214] sm:$0xf]  ;;  %v2960_v35 = vld [vmem:[%s5326_s0 + $0x218] sm:$0xf] }
  0x96   :  { %v2954_v34 = vld [vmem:[%s5326_s0 + $0x250] sm:$0xf0] }
  0x9e   :  { %v1814_v50 = vpop.f32.mrf.mxu0 }
  0x9f   :  { %v1863_v51 = vpop.f32.mrf.mxu1 }
  0xa0   :  { %v1864_v54 = vadd.f32 %v1863_v51, %v1814_v50  ;;  %v3913_v51 = vld [vmem:[%s5325_s1 + $0x298] sm:$0xff] }
  0xa1   :  { %2009 = vmatmul.bf16.vlgmr.msrb.gmra.mxu0 %v2697_v48  ;;  %v2837_v48 = vor.u32 %v3737_v38, %v2834_v39  ;;  %2299 = vmatpush.bf16.msra.mxu2 %v3913_v51  ;;  %v2962_v38 = vld [vmem:[%s5326_s0 + $0x258] sm:$0xf0]  ;;  %v3911_v51 = vld [vmem:[%s5325_s1 + $0x288] sm:$0xff] }
  0xa2   :  { %2058 = vmatmul.bf16.vlgmr.msrb.gmra.mxu1 %v2701_v49 }
  0xa3   :  { %2107 = vmatmul.bf16.vlgmr.msrb.gmra.mxu2 %v2705_v52  ;;  %v3897_v52 = vld [vmem:[%s5325_s1 + $0x218] sm:$0xff] }
  0xa4   :  { %2156 = vmatmul.bf16.vlgmr.msrb.gmra.mxu3 %v2709_v53  ;;  %v3921_v53 = vld [vmem:[%s5325_s1 + $0x2d8] sm:$0xff]  ;;  %2201 = vmatpush.bf16.msra.mxu0 %v3897_v52  ;;  %v3895_v52 = vld [vmem:[%s5325_s1 + $0x208] sm:$0xff] }
  0xa5   :  { %2348 = vmatpush.bf16.msra.mxu3 %v3921_v53  ;;  %v3919_v53 = vld [vmem:[%s5325_s1 + $0x2c8] sm:$0xff] }
  0xa6   :  { %v1912_v58 = vpop.f32.mrf.mxu2  ;;  %v1816_v61 = vpop.f32.mrf.mxu0 }
  0xa7   :  { %v1961_v59 = vpop.f32.mrf.mxu3  ;;  %v1913_v60 = vadd.f32 %v1912_v58, %v1864_v54  ;;  %v1865_v62 = vpop.f32.mrf.mxu1 }
  0xa8   :  { %v1866_v63 = vadd.f32 %v1865_v62, %v1816_v61  ;;  %v3905_v61 = vld [vmem:[%s5325_s1 + $0x258] sm:$0xff]  ;;  %v2888_v62 = vld [vmem:[%s5326_s0 + $0x190] sm:$0xf] }
  0xa9   :  { %v4419_v0 = vadd.f32 %v1961_v59, %v1913_v60  ;;  %2250 = vmatpush.bf16.msra.mxu1 %v3905_v61  ;;  %2349 = vmatpush.bf16.msra.mxu3 %v3920_v21  ;;  %v3910_v21 = vld [vmem:[%s5325_s1 + $0x280] sm:$0xff] }
  0xad   :  { %2350 = vmatpush.bf16.msra.mxu3 %v3919_v53 }
  0xae   :  { %v1914_v10 = vpop.f32.mrf.mxu2  ;;  %v1819_v15 = vpop.f32.mrf.mxu0 }
  0xaf   :  { %v1963_v11 = vpop.f32.mrf.mxu3  ;;  %v1915_v14 = vadd.f32 %v1914_v10, %v1866_v63  ;;  %v1868_v16 = vpop.f32.mrf.mxu1  ;;  %v3760_v63 = vld [vmem:[%s5326_s0 + $0x1cc] sm:$0xf0]  ;;  %v2893_v10 = vor.u32 %v3752_v1, %v2890_v2  ;;  %v3784_v2 = vld [vmem:[%s5326_s0 + $0x294] sm:$0xf] }
  0xb0   :  { %v1869_v19 = vadd.f32 %v1868_v16, %v1819_v15  ;;  %v2889_v9 = vor.u32 %v3760_v63, %v2888_v62  ;;  %v2901_v15 = vor.u32 %v3753_v5, %v2898_v6  ;;  %v3903_v62 = vld [vmem:[%s5325_s1 + $0x248] sm:$0xff]  ;;  %v3016_v63 = vld [vmem:[%s5326_s0 + $0x290] sm:$0xf]  ;;  %v3793_v5 = vld [vmem:[%s5326_s0 + $0x2d4] sm:$0xf0] }
  0xb1   :  { %v4448_v20 = vadd.f32 %v1963_v11, %v1915_v14  ;;  %2014 = vmatmul.bf16.gmra.mxu0 %v2761_v12  ;;  %v2897_v14 = vor.u32 %v3761_v4, %v2896_v3  ;;  %v3792_v1 = vld [vmem:[%s5326_s0 + $0x2cc] sm:$0xf0]  ;;  %v3018_v3 = vld [vmem:[%s5326_s0 + $0x2d0] sm:$0xf0]  ;;  %v3024_v4 = vld [vmem:[%s5326_s0 + $0x298] sm:$0xf] }
  0xb2   :  { %2063 = vmatmul.bf16.gmra.mxu1 %v2765_v13  ;;  %v3785_v6 = vld [vmem:[%s5326_s0 + $0x29c] sm:$0xf] }
  0xb3   :  { %2112 = vmatmul.bf16.gmra.mxu2 %v2769_v17 }
  0xb4   :  { %2161 = vmatmul.bf16.gmra.mxu3 %v2773_v18  ;;  %v3912_v18 = vld [vmem:[%s5325_s1 + $0x290] sm:$0xff] }
  0xb5   :  { %2300 = vmatpush.bf16.msra.mxu2 %v3912_v18 }
  0xb6   :  { %v1917_v24 = vpop.f32.mrf.mxu2  ;;  %v1821_v27 = vpop.f32.mrf.mxu0 }
  0xb7   :  { %v1966_v25 = vpop.f32.mrf.mxu3  ;;  %v1918_v26 = vadd.f32 %v1917_v24, %v1869_v19  ;;  %v1870_v28 = vpop.f32.mrf.mxu1  ;;  %v3896_v19 = vld [vmem:[%s5325_s1 + $0x210] sm:$0xff] }
  0xb8   :  { %v1871_v29 = vadd.f32 %v1870_v28, %v1821_v27  ;;  %2202 = vmatpush.bf16.msra.mxu0 %v3896_v19 }
  0xb9   :  { %v4459_v30 = vadd.f32 %v1966_v25, %v1918_v26  ;;  %2301 = vmatpush.bf16.msra.mxu2 %v3911_v51 }
  0xbc   :  { %2203 = vmatpush.bf16.msra.mxu0 %v3895_v52 }
  0xbd   :  { %2302 = vmatpush.bf16.msra.mxu2 %v3910_v21 }
  0xbe   :  { %v1919_v40 = vpop.f32.mrf.mxu2  ;;  %v1824_v45 = vpop.f32.mrf.mxu0 }
  0xbf   :  { %v1968_v41 = vpop.f32.mrf.mxu3  ;;  %v1920_v44 = vadd.f32 %v1919_v40, %v1871_v29  ;;  %v1873_v46 = vpop.f32.mrf.mxu1  ;;  %v3904_v29 = vld [vmem:[%s5325_s1 + $0x250] sm:$0xff] }
  0xc0   :  { %v1874_v49 = vadd.f32 %v1873_v46, %v1824_v45  ;;  %2251 = vmatpush.bf16.msra.mxu1 %v3904_v29  ;;  %v2961_v46 = vor.u32 %v3777_v36, %v2960_v35  ;;  %v3808_v35 = vld [vmem:[%s5326_s0 + $0x34c] sm:$0xf0]  ;;  %v3800_v36 = vld [vmem:[%s5326_s0 + $0x314] sm:$0xf] }
  0xc1   :  { %v4488_v50 = vadd.f32 %v1968_v41, %v1920_v44  ;;  %2019 = vmatmul.bf16.gmra.mxu0 %v2825_v42  ;;  %v2953_v41 = vor.u32 %v3776_v32, %v2952_v31  ;;  %v2957_v42 = vor.u32 %v3768_v33, %v2954_v34  ;;  %v3902_v33 = vld [vmem:[%s5325_s1 + $0x240] sm:$0xff]  ;;  %v3080_v34 = vld [vmem:[%s5326_s0 + $0x310] sm:$0xf] }
  0xc2   :  { %2068 = vmatmul.bf16.gmra.mxu1 %v2829_v43 }
  0xc3   :  { %2117 = vmatmul.bf16.gmra.mxu2 %v2833_v47  ;;  %v2965_v47 = vor.u32 %v3769_v37, %v2962_v38  ;;  %v3082_v37 = vld [vmem:[%s5326_s0 + $0x350] sm:$0xf0]  ;;  %v3088_v38 = vld [vmem:[%s5326_s0 + $0x318] sm:$0xf] }
  0xc4   :  { %2166 = vmatmul.bf16.gmra.mxu3 %v2837_v48  ;;  %2252 = vmatpush.bf16.msra.mxu1 %v3903_v62 }
  0xc6   :  { %v1922_v54 = vpop.f32.mrf.mxu2  ;;  %v1826_v57 = vpop.f32.mrf.mxu0 }
  0xc7   :  { %v1971_v55 = vpop.f32.mrf.mxu3  ;;  %v1923_v56 = vadd.f32 %v1922_v54, %v1874_v49  ;;  %v1875_v58 = vpop.f32.mrf.mxu1 }
  0xc8   :  { %v1876_v59 = vadd.f32 %v1875_v58, %v1826_v57  ;;  %2253 = vmatpush.bf16.msra.mxu1 %v3902_v33 }
  0xc9   :  { %v4499_v60 = vadd.f32 %v1971_v55, %v1923_v56 }
  0xce   :  { %v1924_v7 = vpop.f32.mrf.mxu2  ;;  %v1829_v12 = vpop.f32.mrf.mxu0 }
  0xcf   :  { %v1973_v8 = vpop.f32.mrf.mxu3  ;;  %v1925_v11 = vadd.f32 %v1924_v7, %v1876_v59  ;;  %v1878_v13 = vpop.f32.mrf.mxu1  ;;  %v3026_v7 = vld [vmem:[%s5326_s0 + $0x2d8] sm:$0xf0] }
  0xd0   :  { %v1879_v16 = vadd.f32 %v1878_v13, %v1829_v12 }
  0xd1   :  { %v4528_v17 = vadd.f32 %v1973_v8, %v1925_v11  ;;  %2024 = vmatmul.bf16.gmra.mxu0 %v2889_v9  ;;  %v3021_v11 = vor.u32 %v3784_v2, %v3018_v3 }
  0xd2   :  { %2073 = vmatmul.bf16.gmra.mxu1 %v2893_v10  ;;  %v3017_v10 = vor.u32 %v3792_v1, %v3016_v63 }
  0xd3   :  { %2122 = vmatmul.bf16.gmra.mxu2 %v2897_v14 }
  0xd4   :  { %2171 = vmatmul.bf16.gmra.mxu3 %v2901_v15  ;;  %v3025_v15 = vor.u32 %v3793_v5, %v3024_v4  ;;  %v3941_v4 = vld [vmem:[%s5325_s1 + $0x378] sm:$0xff]  ;;  %v3144_v5 = vld [vmem:[%s5326_s0 + $0x390] sm:$0xf] }
  0xd5   :  { %2442 = vmatpush.bf16.msrb.mxu1 %v3941_v4  ;;  %v3947_v4 = vld [vmem:[%s5325_s1 + $0x3a8] sm:$0xff] }
  0xd6   :  { %v1927_v22 = vpop.f32.mrf.mxu2  ;;  %v1831_v25 = vpop.f32.mrf.mxu0 }
  0xd7   :  { %v1976_v23 = vpop.f32.mrf.mxu3  ;;  %v1928_v24 = vadd.f32 %v1927_v22, %v1879_v16  ;;  %v1880_v26 = vpop.f32.mrf.mxu1  ;;  %v3029_v16 = vor.u32 %v3785_v6, %v3026_v7  ;;  %v3894_v22 = vld [vmem:[%s5325_s1 + $0x200] sm:$0xff]  ;;  %v3824_v6 = vld [vmem:[%s5326_s0 + $0x3cc] sm:$0xf0]  ;;  %v3816_v7 = vld [vmem:[%s5326_s0 + $0x394] sm:$0xf] }
  0xd8   :  { %v1881_v27 = vadd.f32 %v1880_v26, %v1831_v25  ;;  %2204 = vmatpush.bf16.msra.mxu0 %v3894_v22 }
  0xd9   :  { %v4539_v28 = vadd.f32 %v1976_v23, %v1928_v24  ;;  %v3918_v23 = vld [vmem:[%s5325_s1 + $0x2c0] sm:$0xff] }
  0xda   :  { %2351 = vmatpush.bf16.msra.mxu3 %v3918_v23 }
  0xde   :  { %v1929_v39 = vpop.f32.mrf.mxu2  ;;  %v1834_v44 = vpop.f32.mrf.mxu0 }
  0xdf   :  { %v1978_v40 = vpop.f32.mrf.mxu3  ;;  %v1930_v43 = vadd.f32 %v1929_v39, %v1881_v27  ;;  %v1883_v45 = vpop.f32.mrf.mxu1  ;;  %v3809_v39 = vld [vmem:[%s5326_s0 + $0x354] sm:$0xf0] }
  0xe0   :  { %v1884_v48 = vadd.f32 %v1883_v45, %v1834_v44  ;;  %v3081_v44 = vor.u32 %v3808_v35, %v3080_v34  ;;  %v3085_v45 = vor.u32 %v3800_v36, %v3082_v37  ;;  %v3089_v51 = vor.u32 %v3809_v39, %v3088_v38 }
  0xe1   :  { %v4568_v49 = vadd.f32 %v1978_v40, %v1930_v43  ;;  %2029 = vmatmul.bf16.gmra.mxu0 %v2953_v41  ;;  %v3801_v40 = vld [vmem:[%s5326_s0 + $0x31c] sm:$0xf] }
  0xe2   :  { %2078 = vmatmul.bf16.gmra.mxu1 %v2957_v42  ;;  %v3090_v41 = vld [vmem:[%s5326_s0 + $0x358] sm:$0xf0] }
  0xe3   :  { %2127 = vmatmul.bf16.gmra.mxu2 %v2961_v46  ;;  %v3093_v52 = vor.u32 %v3801_v40, %v3090_v41  ;;  %v3940_v40 = vld [vmem:[%s5325_s1 + $0x370] sm:$0xff]  ;;  %v2712_v41 = vld [vmem:[%s5326_s0 + $0x20] sm:$0xf] }
  0xe4   :  { %2176 = vmatmul.bf16.gmra.mxu3 %v2965_v47  ;;  %2443 = vmatpush.bf16.msrb.mxu1 %v3940_v40 }
  0xe6   :  { %v1932_v54 = vpop.f32.mrf.mxu2  ;;  %v1836_v57 = vpop.f32.mrf.mxu0 }
  0xe7   :  { %v1981_v55 = vpop.f32.mrf.mxu3  ;;  %v1933_v56 = vadd.f32 %v1932_v54, %v1884_v48  ;;  %v1885_v58 = vpop.f32.mrf.mxu1 }
  0xe8   :  { %v1886_v59 = vadd.f32 %v1885_v58, %v1836_v57  ;;  %v3957_v57 = vld [vmem:[%s5325_s1 + $0x3f8] sm:$0xff] }
  0xe9   :  { %v4579_v61 = vadd.f32 %v1981_v55, %v1933_v56  ;;  %v3949_v55 = vld [vmem:[%s5325_s1 + $0x3b8] sm:$0xff]  ;;  %2540 = vmatpush.bf16.msrb.mxu3 %v3957_v57 }
  0xea   :  { %v3933_v56 = vld [vmem:[%s5325_s1 + $0x338] sm:$0xff]  ;;  %2491 = vmatpush.bf16.msrb.mxu2 %v3949_v55 }
  0xeb   :  { %2393 = vmatpush.bf16.msrb.mxu0 %v3933_v56 }
  0xee   :  { %v1934_v8 = vpop.f32.mrf.mxu2  ;;  %v1839_v13 = vpop.f32.mrf.mxu0 }
  0xef   :  { %v1983_v9 = vpop.f32.mrf.mxu3  ;;  %v1935_v12 = vadd.f32 %v1934_v8, %v1886_v59  ;;  %v1888_v14 = vpop.f32.mrf.mxu1  ;;  %v3146_v8 = vld [vmem:[%s5326_s0 + $0x3d0] sm:$0xf0] }
  0xf0   :  { %v1889_v18 = vadd.f32 %v1888_v14, %v1839_v13 }
  0xf1   :  { %v4608_v19 = vadd.f32 %v1983_v9, %v1935_v12  ;;  %2034 = vmatmul.bf16.gmra.mxu0 %v3017_v10  ;;  %v3152_v9 = vld [vmem:[%s5326_s0 + $0x398] sm:$0xf]  ;;  %v3154_v12 = vld [vmem:[%s5326_s0 + $0x3d8] sm:$0xf0] }
  0xf2   :  { %2083 = vmatmul.bf16.gmra.mxu1 %v3021_v11  ;;  %v3825_v10 = vld [vmem:[%s5326_s0 + $0x3d4] sm:$0xf0]  ;;  %v3817_v11 = vld [vmem:[%s5326_s0 + $0x39c] sm:$0xf] }
  0xf3   :  { %2132 = vmatmul.bf16.gmra.mxu2 %v3025_v15  ;;  %v3145_v15 = vor.u32 %v3824_v6, %v3144_v5  ;;  %v3153_v23 = vor.u32 %v3825_v10, %v3152_v9  ;;  %v3931_v5 = vld [vmem:[%s5325_s1 + $0x328] sm:$0xff] }
  0xf4   :  { %2181 = vmatmul.bf16.gmra.mxu3 %v3029_v16  ;;  %v3149_v16 = vor.u32 %v3816_v7, %v3146_v8  ;;  %v3955_v6 = vld [vmem:[%s5325_s1 + $0x3e8] sm:$0xff] }
  0xf6   :  { %v1937_v24 = vpop.f32.mrf.mxu2  ;;  %v1841_v27 = vpop.f32.mrf.mxu0 }
  0xf7   :  { %v1986_v25 = vpop.f32.mrf.mxu3  ;;  %v1938_v26 = vadd.f32 %v1937_v24, %v1889_v18  ;;  %v1890_v29 = vpop.f32.mrf.mxu1  ;;  %v3157_v24 = vor.u32 %v3817_v11, %v3154_v12 }
  0xf8   :  { %v1891_v31 = vadd.f32 %v1890_v29, %v1841_v27  ;;  %v3948_v27 = vld [vmem:[%s5325_s1 + $0x3b0] sm:$0xff] }
  0xf9   :  { %v4619_v32 = vadd.f32 %v1986_v25, %v1938_v26  ;;  %v3932_v29 = vld [vmem:[%s5325_s1 + $0x330] sm:$0xff]  ;;  %2492 = vmatpush.bf16.msrb.mxu2 %v3948_v27 }
  0xfa   :  { %2394 = vmatpush.bf16.msrb.mxu0 %v3932_v29 }
  0xfd   :  { %2493 = vmatpush.bf16.msrb.mxu2 %v3947_v4 }
  0xfe   :  { %v1939_v42 = vpop.f32.mrf.mxu2  ;;  %v1844_v47 = vpop.f32.mrf.mxu0  ;;  %2395 = vmatpush.bf16.msrb.mxu0 %v3931_v5 }
  0xff   :  { %v1988_v43 = vpop.f32.mrf.mxu3  ;;  %v1940_v46 = vadd.f32 %v1939_v42, %v1891_v31  ;;  %v1893_v48 = vpop.f32.mrf.mxu1  ;;  %v3956_v31 = vld [vmem:[%s5325_s1 + $0x3f0] sm:$0xff]  ;;  %v3714_v42 = vld [vmem:[%s5326_s0 + $0x5c] sm:$0xf0] }
 0x100   :  { %v1894_v53 = vadd.f32 %v1893_v48, %v1844_v47  ;;  %2541 = vmatpush.bf16.msrb.mxu3 %v3956_v31  ;;  %v3707_v47 = vld [vmem:[%s5326_s0 + $0x2c] sm:$0xf] }
 0x101   :  { %v4648_v54 = vadd.f32 %v1988_v43, %v1940_v46  ;;  %2039 = vmatmul.bf16.gmra.mxu0 %v3081_v44  ;;  %v3706_v43 = vld [vmem:[%s5326_s0 + $0x24] sm:$0xf]  ;;  %v3715_v46 = vld [vmem:[%s5326_s0 + $0x64] sm:$0xf0]  ;;  %v2722_v48 = vld [vmem:[%s5326_s0 + $0x68] sm:$0xf0] }
 0x102   :  { %2088 = vmatmul.bf16.gmra.mxu1 %v3085_v45  ;;  %v2714_v44 = vld [vmem:[%s5326_s0 + $0x60] sm:$0xf0]  ;;  %v2720_v45 = vld [vmem:[%s5326_s0 + $0x28] sm:$0xf] }
 0x103   :  { %2137 = vmatmul.bf16.gmra.mxu2 %v3089_v51  ;;  %v2717_v55 = vor.u32 %v3706_v43, %v2714_v44  ;;  %v3930_v43 = vld [vmem:[%s5325_s1 + $0x320] sm:$0xff] }
 0x104   :  { %2186 = vmatmul.bf16.gmra.mxu3 %v3093_v52  ;;  %v3954_v44 = vld [vmem:[%s5325_s1 + $0x3e0] sm:$0xff]  ;;  %2396 = vmatpush.bf16.msrb.mxu0 %v3930_v43 }
 0x105   :  { %2542 = vmatpush.bf16.msrb.mxu3 %v3955_v6 }
 0x106   :  { %v1942_v58 = vpop.f32.mrf.mxu2  ;;  %v1846_v63 = vpop.f32.mrf.mxu0 }
 0x107   :  { %v1991_v59 = vpop.f32.mrf.mxu3  ;;  %v1943_v62 = vadd.f32 %v1942_v58, %v1894_v53  ;;  %v1895_v1 = vpop.f32.mrf.mxu1  ;;  %v2713_v53 = vor.u32 %v3714_v42, %v2712_v41  ;;  %v3946_v42 = vld [vmem:[%s5325_s1 + $0x3a0] sm:$0xff] }
 0x108   :  { %v1896_v2 = vadd.f32 %v1895_v1, %v1846_v63  ;;  %2494 = vmatpush.bf16.msrb.mxu2 %v3946_v42 }
 0x109   :  { %v4659_v3 = vadd.f32 %v1991_v59, %v1943_v62  ;;  %v2721_v59 = vor.u32 %v3715_v46, %v2720_v45  ;;  %v2725_v62 = vor.u32 %v3707_v47, %v2722_v48  ;;  %2543 = vmatpush.bf16.msrb.mxu3 %v3954_v44 }
 0x10e   :  { %v1944_v13 = vpop.f32.mrf.mxu2  ;;  %v1849_v21 = vpop.f32.mrf.mxu0 }
 0x10f   :  { %v1993_v14 = vpop.f32.mrf.mxu3  ;;  %v1945_v18 = vadd.f32 %v1944_v13, %v1896_v2  ;;  %v1898_v22 = vpop.f32.mrf.mxu1  ;;  %v3939_v13 = vld [vmem:[%s5325_s1 + $0x368] sm:$0xff] }
 0x110   :  { %v1899_v25 = vadd.f32 %v1898_v22, %v1849_v21  ;;  %v2784_v21 = vld [vmem:[%s5326_s0 + $0xa8] sm:$0xf]  ;;  %2444 = vmatpush.bf16.msrb.mxu1 %v3939_v13 }
 0x111   :  { %v4688_v26 = vadd.f32 %v1993_v14, %v1945_v18  ;;  %2044 = vmatmul.bf16.gmra.mxu0 %v3145_v15  ;;  %v2776_v15 = vld [vmem:[%s5326_s0 + $0xa0] sm:$0xf]  ;;  %v3722_v18 = vld [vmem:[%s5326_s0 + $0xa4] sm:$0xf]  ;;  %v3731_v22 = vld [vmem:[%s5326_s0 + $0xe4] sm:$0xf0] }
 0x112   :  { %2093 = vmatmul.bf16.gmra.mxu1 %v3149_v16  ;;  %v3730_v16 = vld [vmem:[%s5326_s0 + $0xdc] sm:$0xf0] }
 0x113   :  { %2142 = vmatmul.bf16.gmra.mxu2 %v3153_v23  ;;  %v3723_v23 = vld [vmem:[%s5326_s0 + $0xac] sm:$0xf]  ;;  %v2777_v29 = vor.u32 %v3730_v16, %v2776_v15  ;;  %v3945_v16 = vld [vmem:[%s5325_s1 + $0x398] sm:$0xff] }
 0x114   :  { %2191 = vmatmul.bf16.gmra.mxu3 %v3157_v24  ;;  %v2786_v24 = vld [vmem:[%s5326_s0 + $0xe8] sm:$0xf0]  ;;  %2495 = vmatpush.bf16.msrb.mxu2 %v3945_v16 }
 0x116   :  { %v1947_v33 = vpop.f32.mrf.mxu2  ;;  %v1851_v36 = vpop.f32.mrf.mxu0 }
 0x117   :  { %v1996_v34 = vpop.f32.mrf.mxu3  ;;  %v1948_v35 = vadd.f32 %v1947_v33, %v1899_v25  ;;  %v1900_v37 = vpop.f32.mrf.mxu1 }
 0x118   :  { %v1901_v38 = vadd.f32 %v1900_v37, %v1851_v36  ;;  %v2785_v36 = vor.u32 %v3731_v22, %v2784_v21  ;;  %v2789_v37 = vor.u32 %v3723_v23, %v2786_v24 }
 0x119   :  { %v4699_v39 = vadd.f32 %v1996_v34, %v1948_v35 }
 0x11e   :  { %v1949_v51 = vpop.f32.mrf.mxu2  ;;  %v2010_v57 = vpop.f32.mrf.mxu0 }
 0x11f   :  { %v1998_v52 = vpop.f32.mrf.mxu3  ;;  %v1950_v56 = vadd.f32 %v1949_v51, %v1901_v38  ;;  %v2059_v58 = vpop.f32.mrf.mxu1  ;;  %v2011_v63 = vadd.f32 %v2010_v57, %v4419_v0  ;;  %v3746_v57 = vld [vmem:[%s5326_s0 + $0x15c] sm:$0xf0] }
 0x121   :  { %v4729_v1 = vadd.f32 %v1998_v52, %v1950_v56  ;;  %v2060_v2 = vadd.f32 %v2059_v58, %v2011_v63  ;;  %2205 = vmatmul.bf16.vlgmr.msra.gmra.mxu0 %v2713_v53  ;;  %v3938_v53 = vld [vmem:[%s5325_s1 + $0x360] sm:$0xff]  ;;  %v3739_v63 = vld [vmem:[%s5326_s0 + $0x12c] sm:$0xf] }
 0x122   :  { %2254 = vmatmul.bf16.vlgmr.msra.gmra.mxu1 %v2717_v55  ;;  %v2840_v56 = vld [vmem:[%s5326_s0 + $0x120] sm:$0xf]  ;;  %v3738_v58 = vld [vmem:[%s5326_s0 + $0x124] sm:$0xf] }
 0x123   :  { %2303 = vmatmul.bf16.vlgmr.msra.gmra.mxu2 %v2721_v59  ;;  %v2848_v59 = vld [vmem:[%s5326_s0 + $0x128] sm:$0xf]  ;;  %2445 = vmatpush.bf16.msrb.mxu1 %v3938_v53  ;;  %v2841_v6 = vor.u32 %v3746_v57, %v2840_v56  ;;  %v3944_v57 = vld [vmem:[%s5325_s1 + $0x390] sm:$0xff] }
 0x124   :  { %2352 = vmatmul.bf16.vlgmr.msra.gmra.mxu3 %v2725_v62  ;;  %v3747_v62 = vld [vmem:[%s5326_s0 + $0x164] sm:$0xf0]  ;;  %2496 = vmatpush.bf16.msrb.mxu2 %v3944_v57 }
 0x126   :  { %v2108_v0 = vpop.f32.mrf.mxu2  ;;  %v2012_v9 = vpop.f32.mrf.mxu0 }
 0x127   :  { %v2157_v7 = vpop.f32.mrf.mxu3  ;;  %v2109_v8 = vadd.f32 %v2108_v0, %v2060_v2  ;;  %v2061_v10 = vpop.f32.mrf.mxu1  ;;  %v2013_v11 = vadd.f32 %v2012_v9, %v4448_v20  ;;  %v2778_v20 = vld [vmem:[%s5326_s0 + $0xe0] sm:$0xf0]  ;;  %v2850_v2 = vld [vmem:[%s5326_s0 + $0x168] sm:$0xf0] }
 0x128   :  { %v2781_v31 = vor.u32 %v3722_v18, %v2778_v20  ;;  %v3929_v18 = vld [vmem:[%s5325_s1 + $0x318] sm:$0xff] }
 0x129   :  { %v4741_v12 = vadd.f32 %v2157_v7, %v2109_v8  ;;  %v2062_v14 = vadd.f32 %v2061_v10, %v2013_v11  ;;  %v2849_v10 = vor.u32 %v3747_v62, %v2848_v59  ;;  %v2853_v11 = vor.u32 %v3739_v63, %v2850_v2  ;;  %v3953_v20 = vld [vmem:[%s5325_s1 + $0x3d8] sm:$0xff]  ;;  %2397 = vmatpush.bf16.msrb.mxu0 %v3929_v18 }
 0x12a   :  { %2544 = vmatpush.bf16.msrb.mxu3 %v3953_v20 }
 0x12e   :  { %v2110_v25 = vpop.f32.mrf.mxu2  ;;  %v2015_v34 = vpop.f32.mrf.mxu0 }
 0x12f   :  { %v2159_v27 = vpop.f32.mrf.mxu3  ;;  %v2111_v33 = vadd.f32 %v2110_v25, %v2062_v14  ;;  %v2064_v35 = vpop.f32.mrf.mxu1  ;;  %v2016_v38 = vadd.f32 %v2015_v34, %v4459_v30  ;;  %v3762_v34 = vld [vmem:[%s5326_s0 + $0x1dc] sm:$0xf0] }
 0x131   :  { %v4771_v40 = vadd.f32 %v2159_v27, %v2111_v33  ;;  %v2065_v41 = vadd.f32 %v2064_v35, %v2016_v38  ;;  %2210 = vmatmul.bf16.gmra.mxu0 %v2777_v29  ;;  %v3937_v29 = vld [vmem:[%s5325_s1 + $0x358] sm:$0xff]  ;;  %v2904_v33 = vld [vmem:[%s5326_s0 + $0x1a0] sm:$0xf]  ;;  %v3754_v35 = vld [vmem:[%s5326_s0 + $0x1a4] sm:$0xf] }
 0x132   :  { %2259 = vmatmul.bf16.gmra.mxu1 %v2781_v31  ;;  %v3755_v38 = vld [vmem:[%s5326_s0 + $0x1ac] sm:$0xf]  ;;  %v2905_v44 = vor.u32 %v3762_v34, %v2904_v33 }
 0x133   :  { %2308 = vmatmul.bf16.gmra.mxu2 %v2785_v36  ;;  %v2912_v36 = vld [vmem:[%s5326_s0 + $0x1a8] sm:$0xf]  ;;  %2446 = vmatpush.bf16.msrb.mxu1 %v3937_v29 }
 0x134   :  { %2357 = vmatmul.bf16.gmra.mxu3 %v2789_v37  ;;  %v3763_v37 = vld [vmem:[%s5326_s0 + $0x1e4] sm:$0xf0] }
 0x135   :  { %v3943_v34 = vld [vmem:[%s5325_s1 + $0x388] sm:$0xff] }
 0x136   :  { %v2113_v30 = vpop.f32.mrf.mxu2  ;;  %v2017_v47 = vpop.f32.mrf.mxu0  ;;  %2497 = vmatpush.bf16.msrb.mxu2 %v3943_v34 }
 0x137   :  { %v2162_v45 = vpop.f32.mrf.mxu3  ;;  %v2114_v46 = vadd.f32 %v2113_v30, %v2065_v41  ;;  %v2066_v48 = vpop.f32.mrf.mxu1  ;;  %v2018_v51 = vadd.f32 %v2017_v47, %v4488_v50  ;;  %v2842_v50 = vld [vmem:[%s5326_s0 + $0x160] sm:$0xf0]  ;;  %v2914_v41 = vld [vmem:[%s5326_s0 + $0x1e8] sm:$0xf0] }
 0x138   :  { %v2845_v0 = vor.u32 %v3738_v58, %v2842_v50  ;;  %v3928_v58 = vld [vmem:[%s5325_s1 + $0x310] sm:$0xff] }
 0x139   :  { %v4783_v52 = vadd.f32 %v2162_v45, %v2114_v46  ;;  %v2067_v55 = vadd.f32 %v2066_v48, %v2018_v51  ;;  %v2913_v48 = vor.u32 %v3763_v37, %v2912_v36  ;;  %v2917_v51 = vor.u32 %v3755_v38, %v2914_v41  ;;  %v3952_v50 = vld [vmem:[%s5325_s1 + $0x3d0] sm:$0xff]  ;;  %2398 = vmatpush.bf16.msrb.mxu0 %v3928_v58 }
 0x13a   :  { %2545 = vmatpush.bf16.msrb.mxu3 %v3952_v50 }
 0x13e   :  { %v2115_v4 = vpop.f32.mrf.mxu2  ;;  %v2020_v8 = vpop.f32.mrf.mxu0 }
 0x13f   :  { %v2164_v5 = vpop.f32.mrf.mxu3  ;;  %v2116_v7 = vadd.f32 %v2115_v4, %v2067_v55  ;;  %v2069_v9 = vpop.f32.mrf.mxu1  ;;  %v2021_v13 = vadd.f32 %v2020_v8, %v4499_v60  ;;  %v3778_v8 = vld [vmem:[%s5326_s0 + $0x25c] sm:$0xf0] }
 0x141   :  { %v4813_v14 = vadd.f32 %v2164_v5, %v2116_v7  ;;  %v2070_v15 = vadd.f32 %v2069_v9, %v2021_v13  ;;  %2215 = vmatmul.bf16.gmra.mxu0 %v2841_v6  ;;  %v3936_v6 = vld [vmem:[%s5325_s1 + $0x350] sm:$0xff]  ;;  %v2968_v7 = vld [vmem:[%s5326_s0 + $0x220] sm:$0xf]  ;;  %v3770_v9 = vld [vmem:[%s5326_s0 + $0x224] sm:$0xf] }
 0x142   :  { %2264 = vmatmul.bf16.gmra.mxu1 %v2845_v0  ;;  %v3771_v13 = vld [vmem:[%s5326_s0 + $0x22c] sm:$0xf]  ;;  %v2969_v20 = vor.u32 %v3778_v8, %v2968_v7  ;;  %v3942_v8 = vld [vmem:[%s5325_s1 + $0x380] sm:$0xff] }
 0x143   :  { %2313 = vmatmul.bf16.gmra.mxu2 %v2849_v10  ;;  %v2976_v10 = vld [vmem:[%s5326_s0 + $0x228] sm:$0xf]  ;;  %2447 = vmatpush.bf16.msrb.mxu1 %v3936_v6 }
 0x144   :  { %2362 = vmatmul.bf16.gmra.mxu3 %v2853_v11  ;;  %v3779_v11 = vld [vmem:[%s5326_s0 + $0x264] sm:$0xf0]  ;;  %2498 = vmatpush.bf16.msrb.mxu2 %v3942_v8 }
 0x146   :  { %v2118_v60 = vpop.f32.mrf.mxu2  ;;  %v2022_v23 = vpop.f32.mrf.mxu0 }
 0x147   :  { %v2167_v21 = vpop.f32.mrf.mxu3  ;;  %v2119_v22 = vadd.f32 %v2118_v60, %v2070_v15  ;;  %v2071_v24 = vpop.f32.mrf.mxu1  ;;  %v2023_v25 = vadd.f32 %v2022_v23, %v4528_v17  ;;  %v2906_v17 = vld [vmem:[%s5326_s0 + $0x1e0] sm:$0xf0]  ;;  %v2978_v15 = vld [vmem:[%s5326_s0 + $0x268] sm:$0xf0] }
 0x148   :  { %v2909_v30 = vor.u32 %v3754_v35, %v2906_v17  ;;  %v3927_v35 = vld [vmem:[%s5325_s1 + $0x308] sm:$0xff] }
 0x149   :  { %v4825_v27 = vadd.f32 %v2167_v21, %v2119_v22  ;;  %v2072_v31 = vadd.f32 %v2071_v24, %v2023_v25  ;;  %v2977_v24 = vor.u32 %v3779_v11, %v2976_v10  ;;  %v2981_v25 = vor.u32 %v3771_v13, %v2978_v15  ;;  %v3951_v17 = vld [vmem:[%s5325_s1 + $0x3c8] sm:$0xff]  ;;  %2399 = vmatpush.bf16.msrb.mxu0 %v3927_v35 }
 0x14a   :  { %2546 = vmatpush.bf16.msrb.mxu3 %v3951_v17 }
 0x14e   :  { %v2120_v42 = vpop.f32.mrf.mxu2  ;;  %v2025_v46 = vpop.f32.mrf.mxu0 }
 0x14f   :  { %v2169_v43 = vpop.f32.mrf.mxu3  ;;  %v2121_v45 = vadd.f32 %v2120_v42, %v2072_v31  ;;  %v2074_v47 = vpop.f32.mrf.mxu1  ;;  %v2026_v53 = vadd.f32 %v2025_v46, %v4539_v28  ;;  %v3794_v46 = vld [vmem:[%s5326_s0 + $0x2dc] sm:$0xf0] }
 0x151   :  { %v4855_v55 = vadd.f32 %v2169_v43, %v2121_v45  ;;  %v2075_v56 = vadd.f32 %v2074_v47, %v2026_v53  ;;  %2220 = vmatmul.bf16.gmra.mxu0 %v2905_v44  ;;  %v3935_v44 = vld [vmem:[%s5325_s1 + $0x348] sm:$0xff]  ;;  %v3032_v45 = vld [vmem:[%s5326_s0 + $0x2a0] sm:$0xf]  ;;  %v3786_v47 = vld [vmem:[%s5326_s0 + $0x2a4] sm:$0xf] }
 0x152   :  { %2269 = vmatmul.bf16.gmra.mxu1 %v2909_v30  ;;  %v3787_v53 = vld [vmem:[%s5326_s0 + $0x2ac] sm:$0xf]  ;;  %v3033_v50 = vor.u32 %v3794_v46, %v3032_v45 }
 0x153   :  { %2318 = vmatmul.bf16.gmra.mxu2 %v2913_v48  ;;  %v3040_v48 = vld [vmem:[%s5326_s0 + $0x2a8] sm:$0xf]  ;;  %2448 = vmatpush.bf16.msrb.mxu1 %v3935_v44 }
 0x154   :  { %2367 = vmatmul.bf16.gmra.mxu3 %v2917_v51  ;;  %v3795_v51 = vld [vmem:[%s5326_s0 + $0x2e4] sm:$0xf0] }
 0x156   :  { %v2123_v28 = vpop.f32.mrf.mxu2  ;;  %v2027_v63 = vpop.f32.mrf.mxu0 }
 0x157   :  { %v2172_v59 = vpop.f32.mrf.mxu3  ;;  %v2124_v62 = vadd.f32 %v2123_v28, %v2075_v56  ;;  %v2076_v2 = vpop.f32.mrf.mxu1  ;;  %v2028_v4 = vadd.f32 %v2027_v63, %v4568_v49  ;;  %v2970_v49 = vld [vmem:[%s5326_s0 + $0x260] sm:$0xf0]  ;;  %v3042_v56 = vld [vmem:[%s5326_s0 + $0x2e8] sm:$0xf0] }
 0x158   :  { %v2973_v60 = vor.u32 %v3770_v9, %v2970_v49  ;;  %v3926_v9 = vld [vmem:[%s5325_s1 + $0x300] sm:$0xff] }
 0x159   :  { %v4867_v5 = vadd.f32 %v2172_v59, %v2124_v62  ;;  %v2077_v0 = vadd.f32 %v2076_v2, %v2028_v4  ;;  %v3041_v2 = vor.u32 %v3795_v51, %v3040_v48  ;;  %v3045_v4 = vor.u32 %v3787_v53, %v3042_v56  ;;  %v3950_v49 = vld [vmem:[%s5325_s1 + $0x3c0] sm:$0xff]  ;;  %2400 = vmatpush.bf16.msrb.mxu0 %v3926_v9 }
 0x15a   :  { %2547 = vmatpush.bf16.msrb.mxu3 %v3950_v49 }
 0x15e   :  { %v2125_v16 = vpop.f32.mrf.mxu2  ;;  %v2030_v22 = vpop.f32.mrf.mxu0 }
 0x15f   :  { %v2174_v18 = vpop.f32.mrf.mxu3  ;;  %v2126_v21 = vadd.f32 %v2125_v16, %v2077_v0  ;;  %v2079_v23 = vpop.f32.mrf.mxu1  ;;  %v2031_v29 = vadd.f32 %v2030_v22, %v4579_v61  ;;  %v3810_v22 = vld [vmem:[%s5326_s0 + $0x35c] sm:$0xf0] }
 0x161   :  { %v4897_v31 = vadd.f32 %v2174_v18, %v2126_v21  ;;  %v2080_v33 = vadd.f32 %v2079_v23, %v2031_v29  ;;  %2225 = vmatmul.bf16.gmra.mxu0 %v2969_v20  ;;  %v3934_v20 = vld [vmem:[%s5325_s1 + $0x340] sm:$0xff]  ;;  %v3803_v29 = vld [vmem:[%s5326_s0 + $0x32c] sm:$0xf] }
 0x162   :  { %2274 = vmatmul.bf16.gmra.mxu1 %v2973_v60  ;;  %v3096_v21 = vld [vmem:[%s5326_s0 + $0x320] sm:$0xf]  ;;  %v3802_v23 = vld [vmem:[%s5326_s0 + $0x324] sm:$0xf] }
 0x163   :  { %2323 = vmatmul.bf16.gmra.mxu2 %v2977_v24  ;;  %v3104_v24 = vld [vmem:[%s5326_s0 + $0x328] sm:$0xf]  ;;  %2449 = vmatpush.bf16.msrb.mxu1 %v3934_v20  ;;  %v3097_v17 = vor.u32 %v3810_v22, %v3096_v21 }
 0x164   :  { %2372 = vmatmul.bf16.gmra.mxu3 %v2981_v25  ;;  %v3811_v25 = vld [vmem:[%s5326_s0 + $0x364] sm:$0xf0] }
 0x166   :  { %v2128_v61 = vpop.f32.mrf.mxu2  ;;  %v2032_v38 = vpop.f32.mrf.mxu0 }
 0x167   :  { %v2177_v36 = vpop.f32.mrf.mxu3  ;;  %v2129_v37 = vadd.f32 %v2128_v61, %v2080_v33  ;;  %v2081_v41 = vpop.f32.mrf.mxu1  ;;  %v2033_v42 = vadd.f32 %v2032_v38, %v4608_v19  ;;  %v3034_v19 = vld [vmem:[%s5326_s0 + $0x2e0] sm:$0xf0]  ;;  %v3106_v33 = vld [vmem:[%s5326_s0 + $0x368] sm:$0xf0] }
 0x168   :  { %v3037_v28 = vor.u32 %v3786_v47, %v3034_v19 }
 0x169   :  { %v4909_v43 = vadd.f32 %v2177_v36, %v2129_v37  ;;  %v2082_v30 = vadd.f32 %v2081_v41, %v2033_v42  ;;  %v3105_v41 = vor.u32 %v3811_v25, %v3104_v24  ;;  %v3109_v42 = vor.u32 %v3803_v29, %v3106_v33  ;;  %v3716_v25 = vld [vmem:[%s5326_s0 + $0x6c] sm:$0xf0]  ;;  %v3708_v29 = vld [vmem:[%s5326_s0 + $0x34] sm:$0xf] }
 0x16a   :  { %v2730_v33 = vld [vmem:[%s5326_s0 + $0x70] sm:$0xf0] }
 0x16e   :  { %v2130_v57 = vpop.f32.mrf.mxu2  ;;  %v2035_v62 = vpop.f32.mrf.mxu0 }
 0x16f   :  { %v2179_v58 = vpop.f32.mrf.mxu3  ;;  %v2131_v59 = vadd.f32 %v2130_v57, %v2082_v30  ;;  %v2084_v63 = vpop.f32.mrf.mxu1  ;;  %v2036_v6 = vadd.f32 %v2035_v62, %v4619_v32  ;;  %v3819_v62 = vld [vmem:[%s5326_s0 + $0x3ac] sm:$0xf] }
 0x171   :  { %v4939_v0 = vadd.f32 %v2179_v58, %v2131_v59  ;;  %v2085_v7 = vadd.f32 %v2084_v63, %v2036_v6  ;;  %2230 = vmatmul.bf16.gmra.mxu0 %v3033_v50  ;;  %v3826_v58 = vld [vmem:[%s5326_s0 + $0x3dc] sm:$0xf0]  ;;  %v3818_v50 = vld [vmem:[%s5326_s0 + $0x3a4] sm:$0xf]  ;;  %v3827_v59 = vld [vmem:[%s5326_s0 + $0x3e4] sm:$0xf0] }
 0x172   :  { %2279 = vmatmul.bf16.gmra.mxu1 %v3037_v28  ;;  %v3162_v28 = vld [vmem:[%s5326_s0 + $0x3e0] sm:$0xf0]  ;;  %v3170_v63 = vld [vmem:[%s5326_s0 + $0x3e8] sm:$0xf0] }
 0x173   :  { %2328 = vmatmul.bf16.gmra.mxu2 %v3041_v2 }
 0x174   :  { %2377 = vmatmul.bf16.gmra.mxu3 %v3045_v4 }
 0x176   :  { %v2133_v32 = vpop.f32.mrf.mxu2  ;;  %v2037_v13 = vpop.f32.mrf.mxu0 }
 0x177   :  { %v2182_v10 = vpop.f32.mrf.mxu3  ;;  %v2134_v11 = vadd.f32 %v2133_v32, %v2085_v7  ;;  %v2086_v15 = vpop.f32.mrf.mxu1  ;;  %v2038_v16 = vadd.f32 %v2037_v13, %v4648_v54  ;;  %v3098_v54 = vld [vmem:[%s5326_s0 + $0x360] sm:$0xf0]  ;;  %v3165_v7 = vor.u32 %v3818_v50, %v3162_v28 }
 0x178   :  { %v3101_v61 = vor.u32 %v3802_v23, %v3098_v54 }
 0x179   :  { %v4951_v18 = vadd.f32 %v2182_v10, %v2134_v11  ;;  %v2087_v60 = vadd.f32 %v2086_v15, %v2038_v16  ;;  %v3173_v10 = vor.u32 %v3819_v62, %v3170_v63  ;;  %v3724_v62 = vld [vmem:[%s5326_s0 + $0xb4] sm:$0xf] }
 0x17a   :  { %v2794_v63 = vld [vmem:[%s5326_s0 + $0xf0] sm:$0xf0] }
 0x17e   :  { %v2135_v34 = vpop.f32.mrf.mxu2  ;;  %v2040_v37 = vpop.f32.mrf.mxu0 }
 0x17f   :  { %v2184_v35 = vpop.f32.mrf.mxu3  ;;  %v2136_v36 = vadd.f32 %v2135_v34, %v2087_v60  ;;  %v2089_v38 = vpop.f32.mrf.mxu1  ;;  %v2041_v44 = vadd.f32 %v2040_v37, %v4659_v3  ;;  %v3160_v3 = vld [vmem:[%s5326_s0 + $0x3a0] sm:$0xf]  ;;  %v3717_v34 = vld [vmem:[%s5326_s0 + $0x74] sm:$0xf0] }
 0x180   :  { %v3161_v6 = vor.u32 %v3826_v58, %v3160_v3 }
 0x181   :  { %v4981_v30 = vadd.f32 %v2184_v35, %v2136_v36  ;;  %v2090_v45 = vadd.f32 %v2089_v38, %v2041_v44  ;;  %2235 = vmatmul.bf16.gmra.mxu0 %v3097_v17  ;;  %v3709_v35 = vld [vmem:[%s5326_s0 + $0x3c] sm:$0xf]  ;;  %v2733_v38 = vor.u32 %v3708_v29, %v2730_v33 }
 0x182   :  { %2284 = vmatmul.bf16.gmra.mxu1 %v3101_v61  ;;  %v2738_v17 = vld [vmem:[%s5326_s0 + $0x78] sm:$0xf0] }
 0x183   :  { %2333 = vmatmul.bf16.gmra.mxu2 %v3105_v41 }
 0x184   :  { %2382 = vmatmul.bf16.gmra.mxu3 %v3109_v42 }
 0x186   :  { %v2138_v46 = vpop.f32.mrf.mxu2  ;;  %v2042_v48 = vpop.f32.mrf.mxu0 }
 0x187   :  { %v2187_v47 = vpop.f32.mrf.mxu3  ;;  %v2139_v19 = vadd.f32 %v2138_v46, %v2090_v45  ;;  %v2091_v51 = vpop.f32.mrf.mxu1  ;;  %v2043_v53 = vadd.f32 %v2042_v48, %v4688_v26  ;;  %v3168_v26 = vld [vmem:[%s5326_s0 + $0x3a8] sm:$0xf]  ;;  %v2741_v46 = vor.u32 %v3709_v35, %v2738_v17  ;;  %v3740_v35 = vld [vmem:[%s5326_s0 + $0x134] sm:$0xf] }
 0x188   :  { %v3169_v32 = vor.u32 %v3827_v59, %v3168_v26  ;;  %v3732_v59 = vld [vmem:[%s5326_s0 + $0xec] sm:$0xf0]  ;;  %v2858_v17 = vld [vmem:[%s5326_s0 + $0x170] sm:$0xf0] }
 0x189   :  { %v4984_v56 = vadd.f32 %v2187_v47, %v2139_v19  ;;  %v2092_v57 = vadd.f32 %v2091_v51, %v2043_v53 }
 0x18e   :  { %v2140_v2 = vpop.f32.mrf.mxu2  ;;  %v2045_v9 = vpop.f32.mrf.mxu0 }
 0x18f   :  { %v2189_v4 = vpop.f32.mrf.mxu3  ;;  %v2141_v8 = vadd.f32 %v2140_v2, %v2092_v57  ;;  %v2094_v49 = vpop.f32.mrf.mxu1  ;;  %v2046_v11 = vadd.f32 %v2045_v9, %v4699_v39  ;;  %v2728_v39 = vld [vmem:[%s5326_s0 + $0x30] sm:$0xf]  ;;  %v3733_v2 = vld [vmem:[%s5326_s0 + $0xf4] sm:$0xf0] }
 0x190   :  { %v2729_v37 = vor.u32 %v3716_v25, %v2728_v39 }
 0x191   :  { %v5011_v13 = vadd.f32 %v2189_v4, %v2141_v8  ;;  %v2095_v15 = vadd.f32 %v2094_v49, %v2046_v11  ;;  %2240 = vmatmul.bf16.gmra.mxu0 %v3161_v6  ;;  %v3725_v4 = vld [vmem:[%s5326_s0 + $0xbc] sm:$0xf]  ;;  %v2797_v49 = vor.u32 %v3724_v62, %v2794_v63 }
 0x192   :  { %2289 = vmatmul.bf16.gmra.mxu1 %v3165_v7  ;;  %v2802_v6 = vld [vmem:[%s5326_s0 + $0xf8] sm:$0xf0] }
 0x193   :  { %2338 = vmatmul.bf16.gmra.mxu2 %v3169_v32 }
 0x194   :  { %2387 = vmatmul.bf16.gmra.mxu3 %v3173_v10 }
 0x196   :  { %v2143_v16 = vpop.f32.mrf.mxu2  ;;  %v2047_v21 = vpop.f32.mrf.mxu0 }
 0x197   :  { %v2192_v20 = vpop.f32.mrf.mxu3  ;;  %v2144_v60 = vadd.f32 %v2143_v16, %v2095_v15  ;;  %v2096_v22 = vpop.f32.mrf.mxu1  ;;  %v2048_v23 = vadd.f32 %v2047_v21, %v4729_v1  ;;  %v2736_v1 = vld [vmem:[%s5326_s0 + $0x38] sm:$0xf]  ;;  %v2805_v16 = vor.u32 %v3725_v4, %v2802_v6  ;;  %v3756_v4 = vld [vmem:[%s5326_s0 + $0x1b4] sm:$0xf] }
 0x198   :  { %v2737_v45 = vor.u32 %v3717_v34, %v2736_v1  ;;  %v3748_v34 = vld [vmem:[%s5326_s0 + $0x16c] sm:$0xf0]  ;;  %v2922_v6 = vld [vmem:[%s5326_s0 + $0x1f0] sm:$0xf0] }
 0x199   :  { %v5014_v54 = vadd.f32 %v2192_v20, %v2144_v60  ;;  %v2097_v24 = vadd.f32 %v2096_v22, %v2048_v23 }
 0x19e   :  { %v2145_v61 = vpop.f32.mrf.mxu2  ;;  %v2206_v42 = vpop.f32.mrf.mxu0 }
 0x19f   :  { %v2194_v36 = vpop.f32.mrf.mxu3  ;;  %v2146_v41 = vadd.f32 %v2145_v61, %v2097_v24  ;;  %v2255_v44 = vpop.f32.mrf.mxu1  ;;  %v2207_v47 = vadd.f32 %v2206_v42, %v4741_v12  ;;  %v2792_v12 = vld [vmem:[%s5326_s0 + $0xb0] sm:$0xf]  ;;  %v3749_v61 = vld [vmem:[%s5326_s0 + $0x174] sm:$0xf0] }
 0x1a0   :  { %v2793_v9 = vor.u32 %v3732_v59, %v2792_v12 }
 0x1a1   :  { %v5041_v19 = vadd.f32 %v2194_v36, %v2146_v41  ;;  %v2256_v48 = vadd.f32 %v2255_v44, %v2207_v47  ;;  %2401 = vmatmul.bf16.vlgmr.msrb.gmra.mxu0 %v2729_v37  ;;  %v3741_v36 = vld [vmem:[%s5326_s0 + $0x13c] sm:$0xf]  ;;  %v2861_v44 = vor.u32 %v3740_v35, %v2858_v17 }
 0x1a2   :  { %2450 = vmatmul.bf16.vlgmr.msrb.gmra.mxu1 %v2733_v38  ;;  %v2866_v37 = vld [vmem:[%s5326_s0 + $0x178] sm:$0xf0] }
 0x1a3   :  { %2499 = vmatmul.bf16.vlgmr.msrb.gmra.mxu2 %v2737_v45 }
 0x1a4   :  { %2548 = vmatmul.bf16.vlgmr.msrb.gmra.mxu3 %v2741_v46 }
 0x1a6   :  { %v2304_v51 = vpop.f32.mrf.mxu2  ;;  %v2208_v3 = vpop.f32.mrf.mxu0 }
 0x1a7   :  { %v2353_v53 = vpop.f32.mrf.mxu3  ;;  %v2305_v57 = vadd.f32 %v2304_v51, %v2256_v48  ;;  %v2257_v58 = vpop.f32.mrf.mxu1  ;;  %v2209_v50 = vadd.f32 %v2208_v3, %v4771_v40  ;;  %v2800_v40 = vld [vmem:[%s5326_s0 + $0xb8] sm:$0xf]  ;;  %v2869_v51 = vor.u32 %v3741_v36, %v2866_v37  ;;  %v3772_v36 = vld [vmem:[%s5326_s0 + $0x234] sm:$0xf] }
 0x1a8   :  { %v2801_v15 = vor.u32 %v3733_v2, %v2800_v40  ;;  %v3764_v2 = vld [vmem:[%s5326_s0 + $0x1ec] sm:$0xf0]  ;;  %v2986_v37 = vld [vmem:[%s5326_s0 + $0x270] sm:$0xf0] }
 0x1a9   :  { %v5044_v28 = vadd.f32 %v2353_v53, %v2305_v57  ;;  %v2258_v26 = vadd.f32 %v2257_v58, %v2209_v50 }
 0x1ae   :  { %v2306_v7 = vpop.f32.mrf.mxu2  ;;  %v2211_v10 = vpop.f32.mrf.mxu0 }
 0x1af   :  { %v2355_v8 = vpop.f32.mrf.mxu3  ;;  %v2307_v32 = vadd.f32 %v2306_v7, %v2258_v26  ;;  %v2260_v11 = vpop.f32.mrf.mxu1  ;;  %v2212_v20 = vadd.f32 %v2211_v10, %v4783_v52  ;;  %v2856_v52 = vld [vmem:[%s5326_s0 + $0x130] sm:$0xf]  ;;  %v3765_v7 = vld [vmem:[%s5326_s0 + $0x1f4] sm:$0xf0] }
 0x1b0   :  { %v2857_v42 = vor.u32 %v3748_v34, %v2856_v52 }
 0x1b1   :  { %v5071_v60 = vadd.f32 %v2355_v8, %v2307_v32  ;;  %v2261_v21 = vadd.f32 %v2260_v11, %v2212_v20  ;;  %2406 = vmatmul.bf16.gmra.mxu0 %v2793_v9  ;;  %v3757_v8 = vld [vmem:[%s5326_s0 + $0x1bc] sm:$0xf]  ;;  %v2925_v11 = vor.u32 %v3756_v4, %v2922_v6 }
 0x1b2   :  { %2455 = vmatmul.bf16.gmra.mxu1 %v2797_v49  ;;  %v2930_v9 = vld [vmem:[%s5326_s0 + $0x1f8] sm:$0xf0] }
 0x1b3   :  { %2504 = vmatmul.bf16.gmra.mxu2 %v2801_v15 }
 0x1b4   :  { %2553 = vmatmul.bf16.gmra.mxu3 %v2805_v16 }
 0x1b6   :  { %v2309_v22 = vpop.f32.mrf.mxu2  ;;  %v2213_v39 = vpop.f32.mrf.mxu0 }
 0x1b7   :  { %v2358_v23 = vpop.f32.mrf.mxu3  ;;  %v2310_v24 = vadd.f32 %v2309_v22, %v2261_v21  ;;  %v2262_v25 = vpop.f32.mrf.mxu1  ;;  %v2214_v29 = vadd.f32 %v2213_v39, %v4813_v14  ;;  %v2864_v14 = vld [vmem:[%s5326_s0 + $0x138] sm:$0xf]  ;;  %v2933_v22 = vor.u32 %v3757_v8, %v2930_v9  ;;  %v3788_v8 = vld [vmem:[%s5326_s0 + $0x2b4] sm:$0xf] }
 0x1b8   :  { %v2865_v48 = vor.u32 %v3749_v61, %v2864_v14  ;;  %v3780_v61 = vld [vmem:[%s5326_s0 + $0x26c] sm:$0xf0]  ;;  %v3050_v9 = vld [vmem:[%s5326_s0 + $0x2f0] sm:$0xf0] }
 0x1b9   :  { %v5074_v33 = vadd.f32 %v2358_v23, %v2310_v24  ;;  %v2263_v1 = vadd.f32 %v2262_v25, %v2214_v29 }
 0x1be   :  { %v2311_v38 = vpop.f32.mrf.mxu2  ;;  %v2216_v46 = vpop.f32.mrf.mxu0 }
 0x1bf   :  { %v2360_v41 = vpop.f32.mrf.mxu3  ;;  %v2312_v45 = vadd.f32 %v2311_v38, %v2263_v1  ;;  %v2265_v47 = vpop.f32.mrf.mxu1  ;;  %v2217_v53 = vadd.f32 %v2216_v46, %v4825_v27  ;;  %v2920_v27 = vld [vmem:[%s5326_s0 + $0x1b0] sm:$0xf]  ;;  %v3781_v38 = vld [vmem:[%s5326_s0 + $0x274] sm:$0xf0] }
 0x1c0   :  { %v2921_v10 = vor.u32 %v3764_v2, %v2920_v27 }
 0x1c1   :  { %v5101_v57 = vadd.f32 %v2360_v41, %v2312_v45  ;;  %v2266_v3 = vadd.f32 %v2265_v47, %v2217_v53  ;;  %2411 = vmatmul.bf16.gmra.mxu0 %v2857_v42  ;;  %v3773_v41 = vld [vmem:[%s5326_s0 + $0x23c] sm:$0xf]  ;;  %v2989_v47 = vor.u32 %v3772_v36, %v2986_v37 }
 0x1c2   :  { %2460 = vmatmul.bf16.gmra.mxu1 %v2861_v44  ;;  %v2994_v42 = vld [vmem:[%s5326_s0 + $0x278] sm:$0xf0] }
 0x1c3   :  { %2509 = vmatmul.bf16.gmra.mxu2 %v2865_v48 }
 0x1c4   :  { %2558 = vmatmul.bf16.gmra.mxu3 %v2869_v51 }
 0x1c6   :  { %v2314_v58 = vpop.f32.mrf.mxu2  ;;  %v2218_v12 = vpop.f32.mrf.mxu0 }
 0x1c7   :  { %v2363_v50 = vpop.f32.mrf.mxu3  ;;  %v2315_v26 = vadd.f32 %v2314_v58, %v2266_v3  ;;  %v2267_v59 = vpop.f32.mrf.mxu1  ;;  %v2219_v62 = vadd.f32 %v2218_v12, %v4855_v55  ;;  %v2928_v55 = vld [vmem:[%s5326_s0 + $0x1b8] sm:$0xf]  ;;  %v2997_v58 = vor.u32 %v3773_v41, %v2994_v42  ;;  %v3804_v41 = vld [vmem:[%s5326_s0 + $0x334] sm:$0xf] }
 0x1c8   :  { %v2929_v21 = vor.u32 %v3765_v7, %v2928_v55  ;;  %v3796_v7 = vld [vmem:[%s5326_s0 + $0x2ec] sm:$0xf0]  ;;  %v3114_v42 = vld [vmem:[%s5326_s0 + $0x370] sm:$0xf0] }
 0x1c9   :  { %v5104_v63 = vadd.f32 %v2363_v50, %v2315_v26  ;;  %v2268_v40 = vadd.f32 %v2267_v59, %v2219_v62 }
 0x1ce   :  { %v2316_v49 = vpop.f32.mrf.mxu2  ;;  %v2221_v16 = vpop.f32.mrf.mxu0 }
 0x1cf   :  { %v2365_v32 = vpop.f32.mrf.mxu3  ;;  %v2317_v15 = vadd.f32 %v2316_v49, %v2268_v40  ;;  %v2270_v20 = vpop.f32.mrf.mxu1  ;;  %v2222_v23 = vadd.f32 %v2221_v16, %v4867_v5  ;;  %v2984_v5 = vld [vmem:[%s5326_s0 + $0x230] sm:$0xf]  ;;  %v3797_v49 = vld [vmem:[%s5326_s0 + $0x2f4] sm:$0xf0] }
 0x1d0   :  { %v2985_v46 = vor.u32 %v3780_v61, %v2984_v5 }
 0x1d1   :  { %v5131_v24 = vadd.f32 %v2365_v32, %v2317_v15  ;;  %v2271_v39 = vadd.f32 %v2270_v20, %v2222_v23  ;;  %2416 = vmatmul.bf16.gmra.mxu0 %v2921_v10  ;;  %v3789_v32 = vld [vmem:[%s5326_s0 + $0x2bc] sm:$0xf]  ;;  %v3053_v20 = vor.u32 %v3788_v8, %v3050_v9 }
 0x1d2   :  { %2465 = vmatmul.bf16.gmra.mxu1 %v2925_v11  ;;  %v3058_v10 = vld [vmem:[%s5326_s0 + $0x2f8] sm:$0xf0] }
 0x1d3   :  { %2514 = vmatmul.bf16.gmra.mxu2 %v2929_v21 }
 0x1d4   :  { %2563 = vmatmul.bf16.gmra.mxu3 %v2933_v22 }
 0x1d6   :  { %v2319_v25 = vpop.f32.mrf.mxu2  ;;  %v2223_v52 = vpop.f32.mrf.mxu0 }
 0x1d7   :  { %v2368_v29 = vpop.f32.mrf.mxu3  ;;  %v2320_v1 = vadd.f32 %v2319_v25, %v2271_v39  ;;  %v2272_v34 = vpop.f32.mrf.mxu1  ;;  %v2224_v35 = vadd.f32 %v2223_v52, %v4897_v31  ;;  %v2992_v31 = vld [vmem:[%s5326_s0 + $0x238] sm:$0xf]  ;;  %v3061_v25 = vor.u32 %v3789_v32, %v3058_v10  ;;  %v3820_v32 = vld [vmem:[%s5326_s0 + $0x3b4] sm:$0xf] }
 0x1d8   :  { %v2993_v3 = vor.u32 %v3781_v38, %v2992_v31  ;;  %v3812_v38 = vld [vmem:[%s5326_s0 + $0x36c] sm:$0xf0]  ;;  %v3178_v10 = vld [vmem:[%s5326_s0 + $0x3f0] sm:$0xf0] }
 0x1d9   :  { %v5134_v17 = vadd.f32 %v2368_v29, %v2320_v1  ;;  %v2273_v14 = vadd.f32 %v2272_v34, %v2224_v35 }
 0x1de   :  { %v2321_v44 = vpop.f32.mrf.mxu2  ;;  %v2226_v51 = vpop.f32.mrf.mxu0 }
 0x1df   :  { %v2370_v45 = vpop.f32.mrf.mxu3  ;;  %v2322_v48 = vadd.f32 %v2321_v44, %v2273_v14  ;;  %v2275_v53 = vpop.f32.mrf.mxu1  ;;  %v2227_v50 = vadd.f32 %v2226_v51, %v4909_v43  ;;  %v3048_v43 = vld [vmem:[%s5326_s0 + $0x2b0] sm:$0xf]  ;;  %v3813_v44 = vld [vmem:[%s5326_s0 + $0x374] sm:$0xf0] }
 0x1e0   :  { %v3049_v16 = vor.u32 %v3796_v7, %v3048_v43 }
 0x1e1   :  { %v5161_v26 = vadd.f32 %v2370_v45, %v2322_v48  ;;  %v2276_v12 = vadd.f32 %v2275_v53, %v2227_v50  ;;  %2421 = vmatmul.bf16.gmra.mxu0 %v2985_v46  ;;  %v3805_v45 = vld [vmem:[%s5326_s0 + $0x33c] sm:$0xf]  ;;  %v3117_v53 = vor.u32 %v3804_v41, %v3114_v42 }
 0x1e2   :  { %2470 = vmatmul.bf16.gmra.mxu1 %v2989_v47  ;;  %v3122_v46 = vld [vmem:[%s5326_s0 + $0x378] sm:$0xf0] }
 0x1e3   :  { %2519 = vmatmul.bf16.gmra.mxu2 %v2993_v3 }
 0x1e4   :  { %2568 = vmatmul.bf16.gmra.mxu3 %v2997_v58 }
 0x1e6   :  { %v2324_v59 = vpop.f32.mrf.mxu2  ;;  %v2228_v27 = vpop.f32.mrf.mxu0 }
 0x1e7   :  { %v2373_v62 = vpop.f32.mrf.mxu3  ;;  %v2325_v40 = vadd.f32 %v2324_v59, %v2276_v12  ;;  %v2277_v2 = vpop.f32.mrf.mxu1  ;;  %v2229_v4 = vadd.f32 %v2228_v27, %v4939_v0  ;;  %v3056_v0 = vld [vmem:[%s5326_s0 + $0x2b8] sm:$0xf]  ;;  %v3125_v59 = vor.u32 %v3805_v45, %v3122_v46 }
 0x1e8   :  { %v3057_v39 = vor.u32 %v3797_v49, %v3056_v0  ;;  %v3828_v49 = vld [vmem:[%s5326_s0 + $0x3ec] sm:$0xf0] }
 0x1e9   :  { %v5164_v6 = vadd.f32 %v2373_v62, %v2325_v40  ;;  %v2278_v55 = vadd.f32 %v2277_v2, %v2229_v4 }
 0x1ee   :  { %v2326_v11 = vpop.f32.mrf.mxu2  ;;  %v2231_v22 = vpop.f32.mrf.mxu0 }
 0x1ef   :  { %v2375_v15 = vpop.f32.mrf.mxu3  ;;  %v2327_v21 = vadd.f32 %v2326_v11, %v2278_v55  ;;  %v2280_v23 = vpop.f32.mrf.mxu1  ;;  %v2232_v29 = vadd.f32 %v2231_v22, %v4951_v18  ;;  %v3112_v18 = vld [vmem:[%s5326_s0 + $0x330] sm:$0xf]  ;;  %v3829_v11 = vld [vmem:[%s5326_s0 + $0x3f4] sm:$0xf0] }
 0x1f0   :  { %v3113_v51 = vor.u32 %v3812_v38, %v3112_v18 }
 0x1f1   :  { %v5191_v1 = vadd.f32 %v2375_v15, %v2327_v21  ;;  %v2281_v52 = vadd.f32 %v2280_v23, %v2232_v29  ;;  %2426 = vmatmul.bf16.gmra.mxu0 %v3049_v16  ;;  %v3821_v15 = vld [vmem:[%s5326_s0 + $0x3bc] sm:$0xf]  ;;  %v3181_v23 = vor.u32 %v3820_v32, %v3178_v10 }
 0x1f2   :  { %2475 = vmatmul.bf16.gmra.mxu1 %v3053_v20  ;;  %v3186_v16 = vld [vmem:[%s5326_s0 + $0x3f8] sm:$0xf0] }
 0x1f3   :  { %2524 = vmatmul.bf16.gmra.mxu2 %v3057_v39 }
 0x1f4   :  { %2573 = vmatmul.bf16.gmra.mxu3 %v3061_v25 }
 0x1f6   :  { %v2329_v34 = vpop.f32.mrf.mxu2  ;;  %v2233_v5 = vpop.f32.mrf.mxu0 }
 0x1f7   :  { %v2378_v35 = vpop.f32.mrf.mxu3  ;;  %v2330_v14 = vadd.f32 %v2329_v34, %v2281_v52  ;;  %v2282_v61 = vpop.f32.mrf.mxu1  ;;  %v2234_v36 = vadd.f32 %v2233_v5, %v4981_v30  ;;  %v3120_v30 = vld [vmem:[%s5326_s0 + $0x338] sm:$0xf]  ;;  %v3189_v34 = vor.u32 %v3821_v15, %v3186_v16 }
 0x1f8   :  { %v3121_v12 = vor.u32 %v3813_v44, %v3120_v30 }
 0x1f9   :  { %v5194_v37 = vadd.f32 %v2378_v35, %v2330_v14  ;;  %v2283_v31 = vadd.f32 %v2282_v61, %v2234_v36 }
 0x1fe   :  { %v2331_v47 = vpop.f32.mrf.mxu2  ;;  %v2236_v58 = vpop.f32.mrf.mxu0 }
 0x1ff   :  { %v2380_v48 = vpop.f32.mrf.mxu3  ;;  %v2332_v3 = vadd.f32 %v2331_v47, %v2283_v31  ;;  %v2285_v50 = vpop.f32.mrf.mxu1  ;;  %v2237_v62 = vadd.f32 %v2236_v58, %v4984_v56  ;;  %v3176_v56 = vld [vmem:[%s5326_s0 + $0x3b0] sm:$0xf] }
 0x200   :  { %v3177_v22 = vor.u32 %v3828_v49, %v3176_v56 }
 0x201   :  { %v5221_v40 = vadd.f32 %v2380_v48, %v2332_v3  ;;  %v2286_v27 = vadd.f32 %v2285_v50, %v2237_v62  ;;  %2431 = vmatmul.bf16.gmra.mxu0 %v3113_v51 }
 0x202   :  { %2480 = vmatmul.bf16.gmra.mxu1 %v3117_v53 }
 0x203   :  { %2529 = vmatmul.bf16.gmra.mxu2 %v3121_v12 }
 0x204   :  { %2578 = vmatmul.bf16.gmra.mxu3 %v3125_v59 }
 0x206   :  { %v2334_v2 = vpop.f32.mrf.mxu2  ;;  %v2238_v43 = vpop.f32.mrf.mxu0 }
 0x207   :  { %v2383_v4 = vpop.f32.mrf.mxu3  ;;  %v2335_v55 = vadd.f32 %v2334_v2, %v2286_v27  ;;  %v2287_v7 = vpop.f32.mrf.mxu1  ;;  %v2239_v8 = vadd.f32 %v2238_v43, %v5011_v13  ;;  %v3184_v13 = vld [vmem:[%s5326_s0 + $0x3b8] sm:$0xf] }
 0x208   :  { %v3185_v52 = vor.u32 %v3829_v11, %v3184_v13 }
 0x209   :  { %v5224_v9 = vadd.f32 %v2383_v4, %v2335_v55  ;;  %v2288_v0 = vadd.f32 %v2287_v7, %v2239_v8 }
 0x20e   :  { %v2336_v20 = vpop.f32.mrf.mxu2  ;;  %v2241_v25 = vpop.f32.mrf.mxu0 }
 0x20f   :  { %v2385_v21 = vpop.f32.mrf.mxu3  ;;  %v2337_v39 = vadd.f32 %v2336_v20, %v2288_v0  ;;  %v2290_v29 = vpop.f32.mrf.mxu1  ;;  %v2242_v35 = vadd.f32 %v2241_v25, %v5014_v54 }
 0x211   :  { %v5251_v14 = vadd.f32 %v2385_v21, %v2337_v39  ;;  %v2291_v5 = vadd.f32 %v2290_v29, %v2242_v35  ;;  %2436 = vmatmul.bf16.gmra.mxu0 %v3177_v22 }
 0x212   :  { %2485 = vmatmul.bf16.gmra.mxu1 %v3181_v23 }
 0x213   :  { %2534 = vmatmul.bf16.gmra.mxu2 %v3185_v52 }
 0x214   :  { %2583 = vmatmul.bf16.gmra.mxu3 %v3189_v34 }
 0x216   :  { %v2339_v61 = vpop.f32.mrf.mxu2  ;;  %v2243_v18 = vpop.f32.mrf.mxu0 }
 0x217   :  { %v2388_v36 = vpop.f32.mrf.mxu3  ;;  %v2340_v31 = vadd.f32 %v2339_v61, %v2291_v5  ;;  %v2292_v38 = vpop.f32.mrf.mxu1  ;;  %v2244_v41 = vadd.f32 %v2243_v18, %v5041_v19 }
 0x219   :  { %v5254_v42 = vadd.f32 %v2388_v36, %v2340_v31  ;;  %v2293_v30 = vadd.f32 %v2292_v38, %v2244_v41 }
 0x21e   :  { %v2341_v44 = vpop.f32.mrf.mxu2  ;;  %v2402_v46 = vpop.f32.mrf.mxu0 }
 0x21f   :  { %v2390_v45 = vpop.f32.mrf.mxu3  ;;  %v2342_v54 = vadd.f32 %v2341_v44, %v2293_v30  ;;  %v2451_v47 = vpop.f32.mrf.mxu1  ;;  %v2403_v51 = vadd.f32 %v2402_v46, %v5044_v28 }
 0x221   :  { %v5256_v48 = vadd.f32 %v2390_v45, %v2342_v54  ;;  %v2452_v53 = vadd.f32 %v2451_v47, %v2403_v51 }
 0x226   :  { %v2500_v3 = vpop.f32.mrf.mxu2  ;;  %v2404_v12 = vpop.f32.mrf.mxu0 }
 0x227   :  { %v2549_v58 = vpop.f32.mrf.mxu3  ;;  %v2501_v50 = vadd.f32 %v2500_v3, %v2452_v53  ;;  %v2453_v59 = vpop.f32.mrf.mxu1  ;;  %v2405_v19 = vadd.f32 %v2404_v12, %v5071_v60 }
 0x229   :  { %v2550_v62 = vadd.f32 %v2549_v58, %v2501_v50  ;;  %v2454_v27 = vadd.f32 %v2453_v59, %v2405_v19 }
 0x22b   :  { %2589 = vst [vmem:[%s5327_s2] sm:$0xff] %v2550_v62  ;;  %v2626_v0 = vmul.f32 %v2550_v62, %v2550_v62 }
 0x22e   :  { %v2502_v2 = vpop.f32.mrf.mxu2  ;;  %v2407_v43 = vpop.f32.mrf.mxu0 }
 0x22f   :  { %v2551_v4 = vpop.f32.mrf.mxu3  ;;  %v2503_v55 = vadd.f32 %v2502_v2, %v2454_v27  ;;  %v2456_v7 = vpop.f32.mrf.mxu1  ;;  %v2408_v8 = vadd.f32 %v2407_v43, %v5074_v33 }
 0x231   :  { %v2552_v28 = vadd.f32 %v2551_v4, %v2503_v55  ;;  %v2457_v32 = vadd.f32 %v2456_v7, %v2408_v8 }
 0x233   :  { %2590 = vst [vmem:[%s5327_s2 + $0x8] sm:$0xff] %v2552_v28  ;;  %v2605_v56 = vadd.f32 %v2552_v28, %v2550_v62  ;;  %v2627_v60 = vmul.f32 %v2552_v28, %v2552_v28 }
 0x235   :  { %v2642_v49 = vadd.f32 %v2627_v60, %v2626_v0 }
 0x236   :  { %v2505_v10 = vpop.f32.mrf.mxu2  ;;  %v2409_v15 = vpop.f32.mrf.mxu0 }
 0x237   :  { %v2554_v13 = vpop.f32.mrf.mxu3  ;;  %v2506_v11 = vadd.f32 %v2505_v10, %v2457_v32  ;;  %v2458_v16 = vpop.f32.mrf.mxu1  ;;  %v2410_v21 = vadd.f32 %v2409_v15, %v5101_v57 }
 0x239   :  { %v2555_v20 = vadd.f32 %v2554_v13, %v2506_v11  ;;  %v2459_v39 = vadd.f32 %v2458_v16, %v2410_v21 }
 0x23b   :  { %2591 = vst [vmem:[%s5327_s2 + $0x10] sm:$0xff] %v2555_v20  ;;  %v2606_v33 = vadd.f32 %v2605_v56, %v2555_v20  ;;  %v2628_v22 = vmul.f32 %v2555_v20, %v2555_v20 }
 0x23d   :  { %v2643_v23 = vadd.f32 %v2642_v49, %v2628_v22 }
 0x23e   :  { %v2507_v25 = vpop.f32.mrf.mxu2  ;;  %v2412_v34 = vpop.f32.mrf.mxu0 }
 0x23f   :  { %v2556_v29 = vpop.f32.mrf.mxu3  ;;  %v2508_v52 = vadd.f32 %v2507_v25, %v2459_v39  ;;  %v2461_v35 = vpop.f32.mrf.mxu1  ;;  %v2413_v61 = vadd.f32 %v2412_v34, %v5104_v63 }
 0x241   :  { %v2557_v5 = vadd.f32 %v2556_v29, %v2508_v52  ;;  %v2462_v18 = vadd.f32 %v2461_v35, %v2413_v61 }
 0x243   :  { %2592 = vst [vmem:[%s5327_s2 + $0x18] sm:$0xff] %v2557_v5  ;;  %v2607_v57 = vadd.f32 %v2606_v33, %v2557_v5  ;;  %v2629_v36 = vmul.f32 %v2557_v5, %v2557_v5 }
 0x245   :  { %v2644_v31 = vadd.f32 %v2643_v23, %v2629_v36 }
 0x246   :  { %v2510_v38 = vpop.f32.mrf.mxu2  ;;  %v2414_v44 = vpop.f32.mrf.mxu0 }
 0x247   :  { %v2559_v41 = vpop.f32.mrf.mxu3  ;;  %v2511_v30 = vadd.f32 %v2510_v38, %v2462_v18  ;;  %v2463_v45 = vpop.f32.mrf.mxu1  ;;  %v2415_v46 = vadd.f32 %v2414_v44, %v5131_v24 }
 0x249   :  { %v2560_v54 = vadd.f32 %v2559_v41, %v2511_v30  ;;  %v2464_v53 = vadd.f32 %v2463_v45, %v2415_v46 }
 0x24b   :  { %2593 = vst [vmem:[%s5327_s2 + $0x20] sm:$0xff] %v2560_v54  ;;  %v2608_v63 = vadd.f32 %v2607_v57, %v2560_v54  ;;  %v2630_v47 = vmul.f32 %v2560_v54, %v2560_v54 }
 0x24d   :  { %v2645_v51 = vadd.f32 %v2644_v31, %v2630_v47 }
 0x24e   :  { %v2512_v3 = vpop.f32.mrf.mxu2  ;;  %v2417_v12 = vpop.f32.mrf.mxu0 }
 0x24f   :  { %v2561_v58 = vpop.f32.mrf.mxu3  ;;  %v2513_v50 = vadd.f32 %v2512_v3, %v2464_v53  ;;  %v2466_v59 = vpop.f32.mrf.mxu1  ;;  %v2418_v19 = vadd.f32 %v2417_v12, %v5134_v17 }
 0x251   :  { %v2562_v62 = vadd.f32 %v2561_v58, %v2513_v50  ;;  %v2467_v4 = vadd.f32 %v2466_v59, %v2418_v19 }
 0x253   :  { %2594 = vst [vmem:[%s5327_s2 + $0x28] sm:$0xff] %v2562_v62  ;;  %v2609_v24 = vadd.f32 %v2608_v63, %v2562_v62  ;;  %v2631_v27 = vmul.f32 %v2562_v62, %v2562_v62 }
 0x255   :  { %v2646_v2 = vadd.f32 %v2645_v51, %v2631_v27 }
 0x256   :  { %v2515_v55 = vpop.f32.mrf.mxu2  ;;  %v2419_v28 = vpop.f32.mrf.mxu0 }
 0x257   :  { %v2564_v43 = vpop.f32.mrf.mxu3  ;;  %v2516_v7 = vadd.f32 %v2515_v55, %v2467_v4  ;;  %v2468_v8 = vpop.f32.mrf.mxu1  ;;  %v2420_v56 = vadd.f32 %v2419_v28, %v5161_v26 }
 0x259   :  { %v2565_v0 = vadd.f32 %v2564_v43, %v2516_v7  ;;  %v2469_v32 = vadd.f32 %v2468_v8, %v2420_v56 }
 0x25b   :  { %2595 = vst [vmem:[%s5327_s2 + $0x30] sm:$0xff] %v2565_v0  ;;  %v2610_v17 = vadd.f32 %v2609_v24, %v2565_v0  ;;  %v2632_v60 = vmul.f32 %v2565_v0, %v2565_v0 }
 0x25d   :  { %v2647_v49 = vadd.f32 %v2646_v2, %v2632_v60 }
 0x25e   :  { %v2517_v10 = vpop.f32.mrf.mxu2  ;;  %v2422_v15 = vpop.f32.mrf.mxu0 }
 0x25f   :  { %v2566_v13 = vpop.f32.mrf.mxu3  ;;  %v2518_v11 = vadd.f32 %v2517_v10, %v2469_v32  ;;  %v2471_v16 = vpop.f32.mrf.mxu1  ;;  %v2423_v21 = vadd.f32 %v2422_v15, %v5164_v6 }
 0x261   :  { %v2567_v20 = vadd.f32 %v2566_v13, %v2518_v11  ;;  %v2472_v23 = vadd.f32 %v2471_v16, %v2423_v21 }
 0x263   :  { %2596 = vst [vmem:[%s5327_s2 + $0x38] sm:$0xff] %v2567_v20  ;;  %v2611_v26 = vadd.f32 %v2610_v17, %v2567_v20  ;;  %v2633_v33 = vmul.f32 %v2567_v20, %v2567_v20 }
 0x265   :  { %v2648_v22 = vadd.f32 %v2647_v49, %v2633_v33 }
 0x266   :  { %v2520_v39 = vpop.f32.mrf.mxu2  ;;  %v2424_v52 = vpop.f32.mrf.mxu0 }
 0x267   :  { %v2569_v25 = vpop.f32.mrf.mxu3  ;;  %v2521_v29 = vadd.f32 %v2520_v39, %v2472_v23  ;;  %v2473_v34 = vpop.f32.mrf.mxu1  ;;  %v2425_v5 = vadd.f32 %v2424_v52, %v5191_v1 }
 0x269   :  { %v2570_v35 = vadd.f32 %v2569_v25, %v2521_v29  ;;  %v2474_v36 = vadd.f32 %v2473_v34, %v2425_v5 }
 0x26b   :  { %2597 = vst [vmem:[%s5327_s2 + $0x40] sm:$0xff] %v2570_v35  ;;  %v2612_v6 = vadd.f32 %v2611_v26, %v2570_v35  ;;  %v2634_v61 = vmul.f32 %v2570_v35, %v2570_v35 }
 0x26d   :  { %v2649_v57 = vadd.f32 %v2648_v22, %v2634_v61 }
 0x26e   :  { %v2522_v31 = vpop.f32.mrf.mxu2  ;;  %v2427_v41 = vpop.f32.mrf.mxu0 }
 0x26f   :  { %v2571_v18 = vpop.f32.mrf.mxu3  ;;  %v2523_v38 = vadd.f32 %v2522_v31, %v2474_v36  ;;  %v2476_v30 = vpop.f32.mrf.mxu1  ;;  %v2428_v45 = vadd.f32 %v2427_v41, %v5194_v37 }
 0x271   :  { %v2572_v44 = vadd.f32 %v2571_v18, %v2523_v38  ;;  %v2477_v63 = vadd.f32 %v2476_v30, %v2428_v45 }
 0x273   :  { %2598 = vst [vmem:[%s5327_s2 + $0x48] sm:$0xff] %v2572_v44  ;;  %v2613_v1 = vadd.f32 %v2612_v6, %v2572_v44  ;;  %v2635_v54 = vmul.f32 %v2572_v44, %v2572_v44 }
 0x275   :  { %v2650_v46 = vadd.f32 %v2649_v57, %v2635_v54 }
 0x276   :  { %v2525_v47 = vpop.f32.mrf.mxu2  ;;  %v2429_v3 = vpop.f32.mrf.mxu0 }
 0x277   :  { %v2574_v51 = vpop.f32.mrf.mxu3  ;;  %v2526_v53 = vadd.f32 %v2525_v47, %v2477_v63  ;;  %v2478_v58 = vpop.f32.mrf.mxu1  ;;  %v2430_v12 = vadd.f32 %v2429_v3, %v5221_v40 }
 0x279   :  { %v2575_v50 = vadd.f32 %v2574_v51, %v2526_v53  ;;  %v2479_v19 = vadd.f32 %v2478_v58, %v2430_v12  ;;  %v2663_v51 = vlaneseq }
 0x27b   :  { %2599 = vst [vmem:[%s5327_s2 + $0x50] sm:$0xff] %v2575_v50  ;;  %v2614_v37 = vadd.f32 %v2613_v1, %v2575_v50  ;;  %v2636_v59 = vmul.f32 %v2575_v50, %v2575_v50  ;;  %v2664_v12 = vshrl.u32 %v2663_v51, 7 }
 0x27d   :  { %v2651_v62 = vadd.f32 %v2650_v46, %v2636_v59  ;;  %vm2666_vm0 = vcmp.eq.s32.totalorder %v2664_v12, 1  ;;  %vm2665_vm1 = vcmp.eq.s32.totalorder %v2664_v12, 0 }
 0x27e   :  { %v2527_v24 = vpop.f32.mrf.mxu2  ;;  %v2432_v4 = vpop.f32.mrf.mxu0 }
 0x27f   :  { %v2576_v27 = vpop.f32.mrf.mxu3  ;;  %v2528_v2 = vadd.f32 %v2527_v24, %v2479_v19  ;;  %v2481_v55 = vpop.f32.mrf.mxu1  ;;  %v2433_v7 = vadd.f32 %v2432_v4, %v5224_v9 }
 0x281   :  { %v2577_v43 = vadd.f32 %v2576_v27, %v2528_v2  ;;  %v2482_v0 = vadd.f32 %v2481_v55, %v2433_v7 }
 0x283   :  { %2600 = vst [vmem:[%s5327_s2 + $0x58] sm:$0xff] %v2577_v43  ;;  %v2615_v40 = vadd.f32 %v2614_v37, %v2577_v43  ;;  %v2637_v28 = vmul.f32 %v2577_v43, %v2577_v43 }
 0x285   :  { %v2652_v8 = vadd.f32 %v2651_v62, %v2637_v28 }
 0x286   :  { %v2530_v56 = vpop.f32.mrf.mxu2  ;;  %v2434_v49 = vpop.f32.mrf.mxu0 }
 0x287   :  { %v2579_v17 = vpop.f32.mrf.mxu3  ;;  %v2531_v60 = vadd.f32 %v2530_v56, %v2482_v0  ;;  %v2483_v32 = vpop.f32.mrf.mxu1  ;;  %v2435_v13 = vadd.f32 %v2434_v49, %v5251_v14 }
 0x289   :  { %v2580_v10 = vadd.f32 %v2579_v17, %v2531_v60  ;;  %v2484_v16 = vadd.f32 %v2483_v32, %v2435_v13 }
 0x28b   :  { %2601 = vst [vmem:[%s5327_s2 + $0x60] sm:$0xff] %v2580_v10  ;;  %v2616_v9 = vadd.f32 %v2615_v40, %v2580_v10  ;;  %v2638_v11 = vmul.f32 %v2580_v10, %v2580_v10 }
 0x28d   :  { %v2653_v15 = vadd.f32 %v2652_v8, %v2638_v11 }
 0x28e   :  { %v2532_v20 = vpop.f32.mrf.mxu2  ;;  %v2437_v33 = vpop.f32.mrf.mxu0 }
 0x28f   :  { %v2581_v21 = vpop.f32.mrf.mxu3  ;;  %v2533_v26 = vadd.f32 %v2532_v20, %v2484_v16  ;;  %v2438_v23 = vadd.f32 %v2437_v33, %v5254_v42  ;;  %v2486_v39 = vpop.f32.mrf.mxu1 }
 0x291   :  { %v2582_v22 = vadd.f32 %v2581_v21, %v2533_v26  ;;  %v2487_v52 = vadd.f32 %v2486_v39, %v2438_v23 }
 0x293   :  { %2602 = vst [vmem:[%s5327_s2 + $0x68] sm:$0xff] %v2582_v22  ;;  %v2617_v14 = vadd.f32 %v2616_v9, %v2582_v22  ;;  %v2639_v25 = vmul.f32 %v2582_v22, %v2582_v22 }
 0x295   :  { %v2654_v29 = vadd.f32 %v2653_v15, %v2639_v25 }
 0x296   :  { %v2535_v34 = vpop.f32.mrf.mxu2  ;;  %v2439_v6 = vpop.f32.mrf.mxu0 }
 0x297   :  { %v2584_v35 = vpop.f32.mrf.mxu3  ;;  %v2536_v5 = vadd.f32 %v2535_v34, %v2487_v52  ;;  %v2440_v57 = vadd.f32 %v2439_v6, %v5256_v48  ;;  %v2488_v31 = vpop.f32.mrf.mxu1 }
 0x299   :  { %v2585_v61 = vadd.f32 %v2584_v35, %v2536_v5  ;;  %v2489_v38 = vadd.f32 %v2488_v31, %v2440_v57 }
 0x29b   :  { %2603 = vst [vmem:[%s5327_s2 + $0x70] sm:$0xff] %v2585_v61  ;;  %v2618_v42 = vadd.f32 %v2617_v14, %v2585_v61  ;;  %v2640_v36 = vmul.f32 %v2585_v61, %v2585_v61 }
 0x29d   :  { %v2655_v18 = vadd.f32 %v2654_v29, %v2640_v36 }
 0x29e   :  { %v2537_v41 = vpop.f32.mrf.mxu2 }
 0x29f   :  { %v2538_v30 = vadd.f32 %v2537_v41, %v2489_v38  ;;  %v2586_v44 = vpop.f32.mrf.mxu3 }
 0x2a1   :  { %v2587_v45 = vadd.f32 %v2586_v44, %v2538_v30 }
 0x2a3   :  { %2604 = vst [vmem:[%s5327_s2 + $0x78] sm:$0xff] %v2587_v45  ;;  %v2619_v1 = vadd.f32 %v2618_v42, %v2587_v45  ;;  %v2641_v54 = vmul.f32 %v2587_v45, %v2587_v45 }
 0x2a5   :  { %v2620_v48 = vrot.slane %v2619_v1, 4  ;;  %v2656_v46 = vadd.f32 %v2655_v18, %v2641_v54 }
 0x2a7   :  { %v2621_v63 = vadd.f32 %v2620_v48, %v2619_v1  ;;  %v2657_v47 = vrot.slane %v2656_v46, 4 }
 0x2a9   :  { %v2622_v53 = vrot.slane %v2621_v63, 2  ;;  %v2658_v3 = vadd.f32 %v2657_v47, %v2656_v46 }
 0x2ab   :  { %v2623_v58 = vadd.f32 %v2622_v53, %v2621_v63  ;;  %v2659_v50 = vrot.slane %v2658_v3, 2 }
 0x2ad   :  { %v2660_v37 = vadd.f32 %v2659_v50, %v2658_v3  ;;  %v2624_v59 = vrot.slane %v2623_v58, 1 }
 0x2af   :  { %v2661_v62 = vrot.slane %v2660_v37, 1  ;;  %v2625_v24 = vadd.f32 %v2624_v59, %v2623_v58 }
 0x2b1   :  { %v2662_v19 = vadd.f32 %v2661_v62, %v2660_v37 }
 0x2b3   :  { %v2667_v27 = vsel %vm2666_vm0, %v2662_v19, 0.0 }
 0x2b4   :  { %v2668_v2 = vsel %vm2665_vm1, %v2625_v24, %v2667_v27 }
 0x2b5   :  { %2669 = vst [vmem:[%s5328_s3] sm:$0xff] %v2668_v2 }

// kernel: discriminator_forward.14
= control target key start
LH: loop header
LB: loop body
LE: loop exit
PB: predicated region body
PF: predicated region fallthrough
CT: control target
= control target key end

     0   :  { %s115_s0 = inlined_call_operand.vmem [shape: f32[32,128], index: 0, kind: input, shape index: {}]   ;;  %s116_s1 = inlined_call_operand.vmem [shape: f32[1,128], index: 1, kind: input, shape index: {}]   ;;  %s117_s2 = inlined_call_operand.vmem [shape: f32[1,128], index: 2, kind: input, shape index: {}]   ;;  %s118_s3 = inlined_call_operand.vmem [shape: bf16[32,128], index: 3, kind: output, shape index: {}]  }
   0x1   :  { %v14_v0 = vld [vmem:[%s115_s0] sm:$0xff]  ;;  %v15_v1 = vld [vmem:[%s115_s0 + $0x8] sm:$0xff]  ;;  %v16_v4 = vld [vmem:[%s115_s0 + $0x10] sm:$0xff] }
   0x2   :  { %v69_v2 = vld [vmem:[%s116_s1] ss:$0 sm:$0xff]  ;;  %v17_v5 = vld [vmem:[%s115_s0 + $0x18] sm:$0xff] }
   0x3   :  { %v70_v3 = vld [vmem:[%s117_s2] ss:$0 sm:$0xff]  ;;  %v22_v6 = vmul.f32 %v69_v2, %v14_v0  ;;  %v23_v7 = vmul.f32 %v69_v2, %v15_v1  ;;  %v24_v8 = vmul.f32 %v69_v2, %v16_v4  ;;  %v25_v9 = vmul.f32 %v69_v2, %v17_v5 }
   0x5   :  { %v30_v10 = vadd.f32 %v70_v3, %v22_v6  ;;  %v31_v11 = vadd.f32 %v70_v3, %v23_v7  ;;  %v32_v12 = vadd.f32 %v70_v3, %v24_v8  ;;  %v33_v13 = vadd.f32 %v70_v3, %v25_v9 }
   0x7   :  { %vm34_vm0 = vcmp.ge.f32.partialorder %v30_v10, 0.0  ;;  %vm35_vm1 = vcmp.ge.f32.partialorder %v31_v11, 0.0  ;;  %v38_v14 = vmul.f32 0.2, %v30_v10  ;;  %v39_v15 = vmul.f32 0.2, %v31_v11 }
   0x8   :  { %vm36_vm2 = vcmp.ge.f32.partialorder %v32_v12, 0.0  ;;  %vm37_vm3 = vcmp.ge.f32.partialorder %v33_v13, 0.0  ;;  %v40_v16 = vmul.f32 0.2, %v32_v12  ;;  %v41_v17 = vmul.f32 0.2, %v33_v13 }
   0x9   :  { %v42_v18 = vsel %vm34_vm0, %v30_v10, %v38_v14  ;;  %v43_v19 = vsel %vm35_vm1, %v31_v11, %v39_v15 }
   0xa   :  { %v61_v20 = vpack.c.bf16 %v43_v19, %v42_v18  ;;  %v44_v21 = vsel %vm36_vm2, %v32_v12, %v40_v16  ;;  %v45_v22 = vsel %vm37_vm3, %v33_v13, %v41_v17 }
   0xb   :  { %v66_v23 = vpack.c.bf16 %v45_v22, %v44_v21 }
   0xc   :  { %62 = vst [vmem:[%s118_s3] sm:$0xff] %v61_v20  }
   0xd   :  { %68 = vst [vmem:[%s118_s3 + $0x8] sm:$0xff] %v66_v23  }

// kernel: discriminator_forward.13
= control target key start
LH: loop header
LB: loop body
LE: loop exit
PB: predicated region body
PF: predicated region fallthrough
CT: control target
= control target key end

     0   :  { %s2985_s1 = inlined_call_operand.vmem [shape: bf16[2048,128], index: 1, kind: input, shape index: {}]   ;;  %s2986_s0 = inlined_call_operand.vmem [shape: bf16[32,2048], index: 0, kind: input, shape index: {}]   ;;  %s2987_s2 = inlined_call_operand.vmem [shape: f32[32,128], index: 2, kind: output, shape index: {0}]   ;;  %s2988_s3 = inlined_call_operand.vmem [shape: f32[1,8,128], index: 3, kind: output, shape index: {1}]  }
   0x1   :  { %v2253_v0 = vld [vmem:[%s2985_s1 + $0x38] sm:$0xff]  ;;  %v2252_v4 = vld [vmem:[%s2985_s1 + $0x30] sm:$0xff]  ;;  %v2251_v8 = vld [vmem:[%s2985_s1 + $0x28] sm:$0xff] }
   0x2   :  { %v2261_v1 = vld [vmem:[%s2985_s1 + $0x78] sm:$0xff]  ;;  %1229 = vmatpush.bf16.msra.mxu0 %v2253_v0  ;;  %v2260_v5 = vld [vmem:[%s2985_s1 + $0x70] sm:$0xff]  ;;  %v2259_v9 = vld [vmem:[%s2985_s1 + $0x68] sm:$0xff] }
   0x3   :  { %v2269_v2 = vld [vmem:[%s2985_s1 + $0xb8] sm:$0xff]  ;;  %1248 = vmatpush.bf16.msra.mxu1 %v2261_v1  ;;  %v2268_v6 = vld [vmem:[%s2985_s1 + $0xb0] sm:$0xff]  ;;  %v2267_v10 = vld [vmem:[%s2985_s1 + $0xa8] sm:$0xff] }
   0x4   :  { %v2277_v3 = vld [vmem:[%s2985_s1 + $0xf8] sm:$0xff]  ;;  %1267 = vmatpush.bf16.msra.mxu2 %v2269_v2  ;;  %v2276_v7 = vld [vmem:[%s2985_s1 + $0xf0] sm:$0xff]  ;;  %v2275_v11 = vld [vmem:[%s2985_s1 + $0xe8] sm:$0xff] }
   0x5   :  { %1286 = vmatpush.bf16.msra.mxu3 %v2277_v3  ;;  %v2250_v12 = vld [vmem:[%s2985_s1 + $0x20] sm:$0xff]  ;;  %v2249_v16 = vld [vmem:[%s2985_s1 + $0x18] sm:$0xff]  ;;  %v2248_v20 = vld [vmem:[%s2985_s1 + $0x10] sm:$0xff] }
   0x6   :  { %1230 = vmatpush.bf16.msra.mxu0 %v2252_v4  ;;  %v2258_v13 = vld [vmem:[%s2985_s1 + $0x60] sm:$0xff]  ;;  %v2257_v17 = vld [vmem:[%s2985_s1 + $0x58] sm:$0xff]  ;;  %v2256_v21 = vld [vmem:[%s2985_s1 + $0x50] sm:$0xff] }
   0x7   :  { %1249 = vmatpush.bf16.msra.mxu1 %v2260_v5  ;;  %v2266_v14 = vld [vmem:[%s2985_s1 + $0xa0] sm:$0xff]  ;;  %v2265_v18 = vld [vmem:[%s2985_s1 + $0x98] sm:$0xff]  ;;  %v2264_v22 = vld [vmem:[%s2985_s1 + $0x90] sm:$0xff] }
   0x8   :  { %1268 = vmatpush.bf16.msra.mxu2 %v2268_v6  ;;  %v2274_v15 = vld [vmem:[%s2985_s1 + $0xe0] sm:$0xff]  ;;  %v2273_v19 = vld [vmem:[%s2985_s1 + $0xd8] sm:$0xff]  ;;  %v2272_v23 = vld [vmem:[%s2985_s1 + $0xd0] sm:$0xff] }
   0x9   :  { %1287 = vmatpush.bf16.msra.mxu3 %v2276_v7  ;;  %v2247_v24 = vld [vmem:[%s2985_s1 + $0x8] sm:$0xff]  ;;  %v2246_v28 = vld [vmem:[%s2985_s1] sm:$0xff]  ;;  %v2301_v40 = vld [vmem:[%s2985_s1 + $0x1b8] sm:$0xff] }
   0xa   :  { %1231 = vmatpush.bf16.msra.mxu0 %v2251_v8  ;;  %v2255_v25 = vld [vmem:[%s2985_s1 + $0x48] sm:$0xff]  ;;  %v2254_v29 = vld [vmem:[%s2985_s1 + $0x40] sm:$0xff]  ;;  %v2285_v41 = vld [vmem:[%s2985_s1 + $0x138] sm:$0xff] }
   0xb   :  { %1250 = vmatpush.bf16.msra.mxu1 %v2259_v9  ;;  %v2263_v26 = vld [vmem:[%s2985_s1 + $0x88] sm:$0xff]  ;;  %v2262_v30 = vld [vmem:[%s2985_s1 + $0x80] sm:$0xff]  ;;  %v2293_v46 = vld [vmem:[%s2985_s1 + $0x178] sm:$0xff] }
   0xc   :  { %1269 = vmatpush.bf16.msra.mxu2 %v2267_v10  ;;  %v2271_v27 = vld [vmem:[%s2985_s1 + $0xc8] sm:$0xff]  ;;  %v2270_v31 = vld [vmem:[%s2985_s1 + $0xc0] sm:$0xff]  ;;  %v2309_v47 = vld [vmem:[%s2985_s1 + $0x1f8] sm:$0xff] }
   0xd   :  { %1288 = vmatpush.bf16.msra.mxu3 %v2275_v11  ;;  %v1576_v32 = vld [vmem:[%s2986_s0] sm:$0xf]  ;;  %v2214_v34 = vld [vmem:[%s2986_s0 + $0x4] sm:$0xf]  ;;  %v1584_v36 = vld [vmem:[%s2986_s0 + $0x8] sm:$0xf] }
   0xe   :  { %1232 = vmatpush.bf16.msra.mxu0 %v2250_v12  ;;  %v2222_v33 = vld [vmem:[%s2986_s0 + $0x3c] sm:$0xf0]  ;;  %v1578_v35 = vld [vmem:[%s2986_s0 + $0x40] sm:$0xf0]  ;;  %v2223_v37 = vld [vmem:[%s2986_s0 + $0x44] sm:$0xf0] }
   0xf   :  { %1251 = vmatpush.bf16.msra.mxu1 %v2258_v13  ;;  %v2215_v38 = vld [vmem:[%s2986_s0 + $0xc] sm:$0xf]  ;;  %v1577_v42 = vor.u32 %v2222_v33, %v1576_v32  ;;  %v1581_v43 = vor.u32 %v2214_v34, %v1578_v35  ;;  %v1585_v44 = vor.u32 %v2223_v37, %v1584_v36  ;;  %v2300_v48 = vld [vmem:[%s2985_s1 + $0x1b0] sm:$0xff]  ;;  %v2298_v56 = vld [vmem:[%s2985_s1 + $0x1a0] sm:$0xff] }
  0x10   :  { %1270 = vmatpush.bf16.msra.mxu2 %v2266_v14  ;;  %v1586_v39 = vld [vmem:[%s2986_s0 + $0x48] sm:$0xf0]  ;;  %v2284_v49 = vld [vmem:[%s2985_s1 + $0x130] sm:$0xff]  ;;  %v2282_v57 = vld [vmem:[%s2985_s1 + $0x120] sm:$0xff] }
  0x11   :  { %1289 = vmatpush.bf16.msra.mxu3 %v2274_v15  ;;  %v1589_v45 = vor.u32 %v2215_v38, %v1586_v39  ;;  %v2292_v50 = vld [vmem:[%s2985_s1 + $0x170] sm:$0xff]  ;;  %v2299_v52 = vld [vmem:[%s2985_s1 + $0x1a8] sm:$0xff]  ;;  %v2290_v58 = vld [vmem:[%s2985_s1 + $0x160] sm:$0xff] }
  0x12   :  { %1233 = vmatpush.bf16.msra.mxu0 %v2249_v16  ;;  %v2308_v51 = vld [vmem:[%s2985_s1 + $0x1f0] sm:$0xff]  ;;  %v2283_v53 = vld [vmem:[%s2985_s1 + $0x128] sm:$0xff]  ;;  %v2306_v59 = vld [vmem:[%s2985_s1 + $0x1e0] sm:$0xff] }
  0x13   :  { %1252 = vmatpush.bf16.msra.mxu1 %v2257_v17  ;;  %v2291_v54 = vld [vmem:[%s2985_s1 + $0x168] sm:$0xff]  ;;  %v1640_v60 = vld [vmem:[%s2986_s0 + $0x80] sm:$0xf]  ;;  %v2230_v62 = vld [vmem:[%s2986_s0 + $0x84] sm:$0xf] }
  0x14   :  { %1271 = vmatpush.bf16.msra.mxu2 %v2265_v18  ;;  %v2307_v55 = vld [vmem:[%s2985_s1 + $0x1e8] sm:$0xff]  ;;  %v2238_v61 = vld [vmem:[%s2986_s0 + $0xbc] sm:$0xf0]  ;;  %v1642_v63 = vld [vmem:[%s2986_s0 + $0xc0] sm:$0xf0] }
  0x15   :  { %1290 = vmatpush.bf16.msra.mxu3 %v2273_v19  ;;  %v1648_v0 = vld [vmem:[%s2986_s0 + $0x88] sm:$0xf]  ;;  %v2231_v2 = vld [vmem:[%s2986_s0 + $0x8c] sm:$0xf]  ;;  %v2297_v4 = vld [vmem:[%s2985_s1 + $0x198] sm:$0xff]  ;;  %v1641_v6 = vor.u32 %v2238_v61, %v1640_v60  ;;  %v1645_v7 = vor.u32 %v2230_v62, %v1642_v63 }
  0x16   :  { %1234 = vmatpush.bf16.msra.mxu0 %v2248_v20  ;;  %v2239_v1 = vld [vmem:[%s2986_s0 + $0xc4] sm:$0xf0]  ;;  %v1650_v3 = vld [vmem:[%s2986_s0 + $0xc8] sm:$0xf0]  ;;  %v2281_v5 = vld [vmem:[%s2985_s1 + $0x118] sm:$0xff] }
  0x17   :  { %1253 = vmatpush.bf16.msra.mxu1 %v2256_v21  ;;  %v1649_v8 = vor.u32 %v2239_v1, %v1648_v0  ;;  %v1653_v9 = vor.u32 %v2231_v2, %v1650_v3  ;;  %v2289_v10 = vld [vmem:[%s2985_s1 + $0x158] sm:$0xff]  ;;  %v2296_v12 = vld [vmem:[%s2985_s1 + $0x190] sm:$0xff]  ;;  %v2295_v16 = vld [vmem:[%s2985_s1 + $0x188] sm:$0xff] }
  0x18   :  { %1272 = vmatpush.bf16.msra.mxu2 %v2264_v22  ;;  %v2305_v11 = vld [vmem:[%s2985_s1 + $0x1d8] sm:$0xff]  ;;  %v2280_v13 = vld [vmem:[%s2985_s1 + $0x110] sm:$0xff]  ;;  %v2279_v17 = vld [vmem:[%s2985_s1 + $0x108] sm:$0xff] }
  0x19   :  { %1291 = vmatpush.bf16.msra.mxu3 %v2272_v23  ;;  %v2288_v14 = vld [vmem:[%s2985_s1 + $0x150] sm:$0xff]  ;;  %v2287_v18 = vld [vmem:[%s2985_s1 + $0x148] sm:$0xff]  ;;  %v2294_v20 = vld [vmem:[%s2985_s1 + $0x180] sm:$0xff] }
  0x1a   :  { %1235 = vmatpush.bf16.msra.mxu0 %v2247_v24  ;;  %v2304_v15 = vld [vmem:[%s2985_s1 + $0x1d0] sm:$0xff]  ;;  %v2303_v19 = vld [vmem:[%s2985_s1 + $0x1c8] sm:$0xff]  ;;  %v2278_v21 = vld [vmem:[%s2985_s1 + $0x100] sm:$0xff] }
  0x1b   :  { %1254 = vmatpush.bf16.msra.mxu1 %v2255_v25  ;;  %v2286_v22 = vld [vmem:[%s2985_s1 + $0x140] sm:$0xff]  ;;  %v1592_v24 = vld [vmem:[%s2986_s0 + $0x10] sm:$0xf]  ;;  %v2333_v25 = vld [vmem:[%s2985_s1 + $0x2b8] sm:$0xff] }
  0x1c   :  { %1273 = vmatpush.bf16.msra.mxu2 %v2263_v26  ;;  %v2302_v23 = vld [vmem:[%s2985_s1 + $0x1c0] sm:$0xff]  ;;  %v2317_v26 = vld [vmem:[%s2985_s1 + $0x238] sm:$0xff]  ;;  %v2332_v37 = vld [vmem:[%s2985_s1 + $0x2b0] sm:$0xff] }
  0x1d   :  { %1292 = vmatpush.bf16.msra.mxu3 %v2271_v27  ;;  %v2224_v27 = vld [vmem:[%s2986_s0 + $0x4c] sm:$0xf0]  ;;  %v2217_v32 = vld [vmem:[%s2986_s0 + $0x1c] sm:$0xf] }
  0x1e   :  { %1236 = vmatpush.bf16.msra.mxu0 %v2246_v28  ;;  %v2216_v28 = vld [vmem:[%s2986_s0 + $0x14] sm:$0xf]  ;;  %v1602_v33 = vld [vmem:[%s2986_s0 + $0x58] sm:$0xf0]  ;;  %v1593_v36 = vor.u32 %v2224_v27, %v1592_v24  ;;  %v1610_v24 = vld [vmem:[%s2986_s0 + $0x60] sm:$0xf0] }
  0x1f   :  { %1255 = vmatpush.bf16.msra.mxu1 %v2254_v29  ;;  %v1594_v29 = vld [vmem:[%s2986_s0 + $0x50] sm:$0xf0]  ;;  %v2325_v34 = vld [vmem:[%s2985_s1 + $0x278] sm:$0xff]  ;;  %v2219_v27 = vld [vmem:[%s2986_s0 + $0x2c] sm:$0xf] }
  0x20   :  { %1274 = vmatpush.bf16.msra.mxu2 %v2262_v30  ;;  %v1600_v30 = vld [vmem:[%s2986_s0 + $0x18] sm:$0xf]  ;;  %v1597_v38 = vor.u32 %v2216_v28, %v1594_v29  ;;  %v1666_v61 = vld [vmem:[%s2986_s0 + $0xd8] sm:$0xf0]  ;;  %v2328_v1 = vld [vmem:[%s2985_s1 + $0x290] sm:$0xff] }
  0x21   :  { %1293 = vmatpush.bf16.msra.mxu3 %v2270_v31  ;;  %1237 = vmatmul.bf16.vlgmr.msra.gmra.mxu0 %v1577_v42  ;;  %v2225_v31 = vld [vmem:[%s2986_s0 + $0x54] sm:$0xf0]  ;;  %v2324_v42 = vld [vmem:[%s2985_s1 + $0x270] sm:$0xff]  ;;  %v1618_v28 = vld [vmem:[%s2986_s0 + $0x68] sm:$0xf0] }
  0x22   :  { %1305 = vmatpush.bf16.msrb.mxu0 %v2285_v41  ;;  %1256 = vmatmul.bf16.vlgmr.msra.gmra.mxu1 %v1581_v43  ;;  %v2341_v35 = vld [vmem:[%s2985_s1 + $0x2f8] sm:$0xff]  ;;  %v1601_v39 = vor.u32 %v2225_v31, %v1600_v30  ;;  %v2316_v41 = vld [vmem:[%s2985_s1 + $0x230] sm:$0xff] }
  0x23   :  { %1275 = vmatmul.bf16.vlgmr.msra.gmra.mxu2 %v1585_v44  ;;  %1324 = vmatpush.bf16.msrb.mxu1 %v2293_v46  ;;  %v2340_v43 = vld [vmem:[%s2985_s1 + $0x2f0] sm:$0xff]  ;;  %v2331_v44 = vld [vmem:[%s2985_s1 + $0x2a8] sm:$0xff]  ;;  %v2313_v60 = vld [vmem:[%s2985_s1 + $0x218] sm:$0xff] }
  0x24   :  { %1343 = vmatpush.bf16.msrb.mxu2 %v2301_v40  ;;  %1294 = vmatmul.bf16.vlgmr.msra.gmra.mxu3 %v1589_v45  ;;  %v1605_v40 = vor.u32 %v2217_v32, %v1602_v33  ;;  %v2315_v45 = vld [vmem:[%s2985_s1 + $0x228] sm:$0xff]  ;;  %v2321_v62 = vld [vmem:[%s2985_s1 + $0x258] sm:$0xff]  ;;  %v2356_v30 = vld [vmem:[%s2985_s1 + $0x370] sm:$0xff]  ;;  %v1621_v33 = vor.u32 %v2219_v27, %v1618_v28 }
  0x25   :  { %1362 = vmatpush.bf16.msrb.mxu3 %v2309_v47  ;;  %v2323_v46 = vld [vmem:[%s2985_s1 + $0x268] sm:$0xff]  ;;  %v2337_v63 = vld [vmem:[%s2985_s1 + $0x2d8] sm:$0xff] }
  0x26   :  { %1306 = vmatpush.bf16.msrb.mxu0 %v2284_v49  ;;  %v2339_v47 = vld [vmem:[%s2985_s1 + $0x2e8] sm:$0xff]  ;;  %v2314_v49 = vld [vmem:[%s2985_s1 + $0x220] sm:$0xff]  ;;  %v1698_v27 = vld [vmem:[%s2986_s0 + $0xf8] sm:$0xf0] }
  0x27   :  { %1325 = vmatpush.bf16.msrb.mxu1 %v2292_v50  ;;  %v2322_v50 = vld [vmem:[%s2985_s1 + $0x260] sm:$0xff] }
  0x28   :  { %1344 = vmatpush.bf16.msrb.mxu2 %v2300_v48  ;;  %v2330_v48 = vld [vmem:[%s2985_s1 + $0x2a0] sm:$0xff] }
  0x29   :  { %1363 = vmatpush.bf16.msrb.mxu3 %v2308_v51  ;;  %v2338_v51 = vld [vmem:[%s2985_s1 + $0x2e0] sm:$0xff] }
  0x2a   :  { %1307 = vmatpush.bf16.msrb.mxu0 %v2283_v53  ;;  %v2240_v53 = vld [vmem:[%s2986_s0 + $0xcc] sm:$0xf0] }
  0x2b   :  { %1326 = vmatpush.bf16.msrb.mxu1 %v2291_v54  ;;  %v2329_v54 = vld [vmem:[%s2985_s1 + $0x298] sm:$0xff] }
  0x2c   :  { %1345 = vmatpush.bf16.msrb.mxu2 %v2299_v52  ;;  %v1656_v52 = vld [vmem:[%s2986_s0 + $0x90] sm:$0xf] }
  0x2d   :  { %1364 = vmatpush.bf16.msrb.mxu3 %v2307_v55  ;;  %v2232_v55 = vld [vmem:[%s2986_s0 + $0x94] sm:$0xf]  ;;  %v1657_v0 = vor.u32 %v2240_v53, %v1656_v52  ;;  %v2235_v52 = vld [vmem:[%s2986_s0 + $0xac] sm:$0xf]  ;;  %v2345_v53 = vld [vmem:[%s2985_s1 + $0x318] sm:$0xff] }
  0x2e   :  { %1308 = vmatpush.bf16.msrb.mxu0 %v2282_v57  ;;  %v1664_v57 = vld [vmem:[%s2986_s0 + $0x98] sm:$0xf] }
  0x2f   :  { %1327 = vmatpush.bf16.msrb.mxu1 %v2290_v58  ;;  %v2241_v58 = vld [vmem:[%s2986_s0 + $0xd4] sm:$0xf0] }
  0x30   :  { %1346 = vmatpush.bf16.msrb.mxu2 %v2298_v56  ;;  %v1658_v56 = vld [vmem:[%s2986_s0 + $0xd0] sm:$0xf0]  ;;  %v1665_v3 = vor.u32 %v2241_v58, %v1664_v57 }
  0x31   :  { %1365 = vmatpush.bf16.msrb.mxu3 %v2306_v59  ;;  %1242 = vmatmul.bf16.gmra.mxu0 %v1641_v6  ;;  %v2233_v59 = vld [vmem:[%s2986_s0 + $0x9c] sm:$0xf]  ;;  %v1661_v2 = vor.u32 %v2232_v55, %v1658_v56  ;;  %v2320_v6 = vld [vmem:[%s2985_s1 + $0x250] sm:$0xff] }
  0x32   :  { %1309 = vmatpush.bf16.msrb.mxu0 %v2281_v5  ;;  %1261 = vmatmul.bf16.gmra.mxu1 %v1645_v7  ;;  %v2312_v5 = vld [vmem:[%s2985_s1 + $0x210] sm:$0xff]  ;;  %v2369_v55 = vld [vmem:[%s2985_s1 + $0x3d8] sm:$0xff] }
  0x33   :  { %1280 = vmatmul.bf16.gmra.mxu2 %v1649_v8  ;;  %1328 = vmatpush.bf16.msrb.mxu1 %v2289_v10  ;;  %v2336_v7 = vld [vmem:[%s2985_s1 + $0x2d0] sm:$0xff]  ;;  %v2327_v8 = vld [vmem:[%s2985_s1 + $0x288] sm:$0xff] }
  0x34   :  { %1347 = vmatpush.bf16.msrb.mxu2 %v2297_v4  ;;  %1299 = vmatmul.bf16.gmra.mxu3 %v1653_v9  ;;  %v1669_v4 = vor.u32 %v2233_v59, %v1666_v61  ;;  %v2311_v9 = vld [vmem:[%s2985_s1 + $0x208] sm:$0xff]  ;;  %v2360_v56 = vld [vmem:[%s2985_s1 + $0x390] sm:$0xff] }
  0x35   :  { %1366 = vmatpush.bf16.msrb.mxu3 %v2305_v11  ;;  %v2319_v10 = vld [vmem:[%s2985_s1 + $0x248] sm:$0xff]  ;;  %v2352_v58 = vld [vmem:[%s2985_s1 + $0x350] sm:$0xff] }
  0x36   :  { %1310 = vmatpush.bf16.msrb.mxu0 %v2280_v13  ;;  %v2335_v11 = vld [vmem:[%s2985_s1 + $0x2c8] sm:$0xff]  ;;  %v2365_v13 = vld [vmem:[%s2985_s1 + $0x3b8] sm:$0xff] }
  0x37   :  { %1329 = vmatpush.bf16.msrb.mxu1 %v2288_v14  ;;  %v2310_v14 = vld [vmem:[%s2985_s1 + $0x200] sm:$0xff] }
  0x38   :  { %1348 = vmatpush.bf16.msrb.mxu2 %v2296_v12  ;;  %v2326_v12 = vld [vmem:[%s2985_s1 + $0x280] sm:$0xff] }
  0x39   :  { %1367 = vmatpush.bf16.msrb.mxu3 %v2304_v15  ;;  %v2318_v15 = vld [vmem:[%s2985_s1 + $0x240] sm:$0xff] }
  0x3a   :  { %1311 = vmatpush.bf16.msrb.mxu0 %v2279_v17  ;;  %v1608_v17 = vld [vmem:[%s2986_s0 + $0x20] sm:$0xf] }
  0x3b   :  { %1330 = vmatpush.bf16.msrb.mxu1 %v2287_v18  ;;  %v2226_v18 = vld [vmem:[%s2986_s0 + $0x5c] sm:$0xf0] }
  0x3c   :  { %1349 = vmatpush.bf16.msrb.mxu2 %v2295_v16  ;;  %v2334_v16 = vld [vmem:[%s2985_s1 + $0x2c0] sm:$0xff]  ;;  %v1609_v29 = vor.u32 %v2226_v18, %v1608_v17 }
  0x3d   :  { %1368 = vmatpush.bf16.msrb.mxu3 %v2303_v19  ;;  %v2349_v19 = vld [vmem:[%s2985_s1 + $0x338] sm:$0xff] }
  0x3e   :  { %1312 = vmatpush.bf16.msrb.mxu0 %v2278_v21  ;;  %v2218_v21 = vld [vmem:[%s2986_s0 + $0x24] sm:$0xf] }
  0x3f   :  { %1331 = vmatpush.bf16.msrb.mxu1 %v2286_v22  ;;  %v2373_v22 = vld [vmem:[%s2985_s1 + $0x3f8] sm:$0xff]  ;;  %v1613_v31 = vor.u32 %v2218_v21, %v1610_v24  ;;  %v2244_v21 = vld [vmem:[%s2986_s0 + $0xec] sm:$0xf0] }
  0x40   :  { %1350 = vmatpush.bf16.msrb.mxu2 %v2294_v20  ;;  %v2357_v20 = vld [vmem:[%s2985_s1 + $0x378] sm:$0xff] }
  0x41   :  { %1369 = vmatpush.bf16.msrb.mxu3 %v2302_v23  ;;  %1313 = vmatmul.bf16.vlgmr.msrb.gmra.mxu0 %v1593_v36  ;;  %v2364_v23 = vld [vmem:[%s2985_s1 + $0x3b0] sm:$0xff]  ;;  %v2363_v36 = vld [vmem:[%s2985_s1 + $0x3a8] sm:$0xff]  ;;  %v1696_v24 = vld [vmem:[%s2986_s0 + $0xb8] sm:$0xf] }
  0x42   :  { %1381 = vmatpush.bf16.msra.mxu0 %v2317_v26  ;;  %1332 = vmatmul.bf16.vlgmr.msrb.gmra.mxu1 %v1597_v38  ;;  %v2227_v26 = vld [vmem:[%s2986_s0 + $0x64] sm:$0xf0] }
  0x43   :  { %1400 = vmatpush.bf16.msra.mxu1 %v2325_v34  ;;  %1351 = vmatmul.bf16.vlgmr.msrb.gmra.mxu2 %v1601_v39  ;;  %v2348_v34 = vld [vmem:[%s2985_s1 + $0x330] sm:$0xff]  ;;  %v2347_v38 = vld [vmem:[%s2985_s1 + $0x328] sm:$0xff] }
  0x44   :  { %1419 = vmatpush.bf16.msra.mxu2 %v2333_v25  ;;  %1370 = vmatmul.bf16.vlgmr.msrb.gmra.mxu3 %v1605_v40  ;;  %v1616_v25 = vld [vmem:[%s2986_s0 + $0x28] sm:$0xf]  ;;  %v2362_v40 = vld [vmem:[%s2985_s1 + $0x3a0] sm:$0xff] }
  0x45   :  { %1438 = vmatpush.bf16.msra.mxu3 %v2341_v35  ;;  %v1617_v32 = vor.u32 %v2227_v26, %v1616_v25  ;;  %v2372_v35 = vld [vmem:[%s2985_s1 + $0x3f0] sm:$0xff]  ;;  %v2371_v39 = vld [vmem:[%s2985_s1 + $0x3e8] sm:$0xff]  ;;  %v2245_v25 = vld [vmem:[%s2986_s0 + $0xf4] sm:$0xf0] }
  0x46   :  { %1382 = vmatpush.bf16.msra.mxu0 %v2316_v41  ;;  %v2354_v41 = vld [vmem:[%s2985_s1 + $0x360] sm:$0xff]  ;;  %v2237_v26 = vld [vmem:[%s2986_s0 + $0xbc] sm:$0xf] }
  0x47   :  { %1401 = vmatpush.bf16.msra.mxu1 %v2324_v42  ;;  %v2346_v42 = vld [vmem:[%s2985_s1 + $0x320] sm:$0xff] }
  0x48   :  { %1420 = vmatpush.bf16.msra.mxu2 %v2332_v37  ;;  %v2355_v37 = vld [vmem:[%s2985_s1 + $0x368] sm:$0xff] }
  0x49   :  { %1439 = vmatpush.bf16.msra.mxu3 %v2340_v43  ;;  %v2370_v43 = vld [vmem:[%s2985_s1 + $0x3e0] sm:$0xff] }
  0x4a   :  { %1383 = vmatpush.bf16.msra.mxu0 %v2315_v45  ;;  %v1672_v45 = vld [vmem:[%s2986_s0 + $0xa0] sm:$0xf] }
  0x4b   :  { %1402 = vmatpush.bf16.msra.mxu1 %v2323_v46  ;;  %v2242_v46 = vld [vmem:[%s2986_s0 + $0xdc] sm:$0xf0] }
  0x4c   :  { %1421 = vmatpush.bf16.msra.mxu2 %v2331_v44  ;;  %v2361_v44 = vld [vmem:[%s2985_s1 + $0x398] sm:$0xff]  ;;  %v1673_v57 = vor.u32 %v2242_v46, %v1672_v45 }
  0x4d   :  { %1440 = vmatpush.bf16.msra.mxu3 %v2339_v47  ;;  %v2353_v47 = vld [vmem:[%s2985_s1 + $0x358] sm:$0xff] }
  0x4e   :  { %1384 = vmatpush.bf16.msra.mxu0 %v2314_v49  ;;  %v1674_v49 = vld [vmem:[%s2986_s0 + $0xe0] sm:$0xf0] }
  0x4f   :  { %1403 = vmatpush.bf16.msra.mxu1 %v2322_v50  ;;  %v1680_v50 = vld [vmem:[%s2986_s0 + $0xa8] sm:$0xf] }
  0x50   :  { %1422 = vmatpush.bf16.msra.mxu2 %v2330_v48  ;;  %v2234_v48 = vld [vmem:[%s2986_s0 + $0xa4] sm:$0xf] }
  0x51   :  { %1441 = vmatpush.bf16.msra.mxu3 %v2338_v51  ;;  %1318 = vmatmul.bf16.gmra.mxu0 %v1657_v0  ;;  %v2243_v51 = vld [vmem:[%s2986_s0 + $0xe4] sm:$0xf0]  ;;  %v1677_v59 = vor.u32 %v2234_v48, %v1674_v49 }
  0x52   :  { %1385 = vmatpush.bf16.msra.mxu0 %v2313_v60  ;;  %1337 = vmatmul.bf16.gmra.mxu1 %v1661_v2  ;;  %v1681_v60 = vor.u32 %v2243_v51, %v1680_v50  ;;  %v2359_v0 = vld [vmem:[%s2985_s1 + $0x388] sm:$0xff] }
  0x53   :  { %1404 = vmatpush.bf16.msra.mxu1 %v2321_v62  ;;  %1356 = vmatmul.bf16.gmra.mxu2 %v1665_v3  ;;  %v2344_v62 = vld [vmem:[%s2985_s1 + $0x310] sm:$0xff]  ;;  %v2343_v2 = vld [vmem:[%s2985_s1 + $0x308] sm:$0xff] }
  0x54   :  { %1423 = vmatpush.bf16.msra.mxu2 %v2329_v54  ;;  %1375 = vmatmul.bf16.gmra.mxu3 %v1669_v4  ;;  %v1682_v54 = vld [vmem:[%s2986_s0 + $0xe8] sm:$0xf0]  ;;  %v2358_v4 = vld [vmem:[%s2985_s1 + $0x380] sm:$0xff] }
  0x55   :  { %1442 = vmatpush.bf16.msra.mxu3 %v2337_v63  ;;  %v1685_v61 = vor.u32 %v2235_v52, %v1682_v54  ;;  %v2368_v63 = vld [vmem:[%s2985_s1 + $0x3d0] sm:$0xff]  ;;  %v2367_v3 = vld [vmem:[%s2985_s1 + $0x3c8] sm:$0xff] }
  0x56   :  { %1386 = vmatpush.bf16.msra.mxu0 %v2312_v5  ;;  %v2350_v5 = vld [vmem:[%s2985_s1 + $0x340] sm:$0xff] }
  0x57   :  { %1405 = vmatpush.bf16.msra.mxu1 %v2320_v6  ;;  %v2342_v6 = vld [vmem:[%s2985_s1 + $0x300] sm:$0xff] }
  0x58   :  { %1424 = vmatpush.bf16.msra.mxu2 %v2328_v1  ;;  %v2351_v1 = vld [vmem:[%s2985_s1 + $0x348] sm:$0xff] }
  0x59   :  { %1443 = vmatpush.bf16.msra.mxu3 %v2336_v7  ;;  %v2366_v7 = vld [vmem:[%s2985_s1 + $0x3c0] sm:$0xff] }
  0x5a   :  { %1387 = vmatpush.bf16.msra.mxu0 %v2311_v9  ;;  %v2228_v9 = vld [vmem:[%s2986_s0 + $0x6c] sm:$0xf0] }
  0x5b   :  { %1406 = vmatpush.bf16.msra.mxu1 %v2319_v10  ;;  %v2220_v10 = vld [vmem:[%s2986_s0 + $0x34] sm:$0xf] }
  0x5c   :  { %1425 = vmatpush.bf16.msra.mxu2 %v2327_v8  ;;  %v1624_v8 = vld [vmem:[%s2986_s0 + $0x30] sm:$0xf] }
  0x5d   :  { %1444 = vmatpush.bf16.msra.mxu3 %v2335_v11  ;;  %v1626_v11 = vld [vmem:[%s2986_s0 + $0x70] sm:$0xf0] }
  0x5e   :  { %1388 = vmatpush.bf16.msra.mxu0 %v2310_v14  ;;  %v2221_v14 = vld [vmem:[%s2986_s0 + $0x3c] sm:$0xf]  ;;  %v1629_v17 = vor.u32 %v2220_v10, %v1626_v11 }
  0x5f   :  { %1407 = vmatpush.bf16.msra.mxu1 %v2318_v15  ;;  %v1634_v15 = vld [vmem:[%s2986_s0 + $0x78] sm:$0xf0] }
  0x60   :  { %1426 = vmatpush.bf16.msra.mxu2 %v2326_v12  ;;  %v1632_v12 = vld [vmem:[%s2986_s0 + $0x38] sm:$0xf] }
  0x61   :  { %1445 = vmatpush.bf16.msra.mxu3 %v2334_v16  ;;  %1389 = vmatmul.bf16.vlgmr.msra.gmra.mxu0 %v1609_v29  ;;  %v1625_v16 = vor.u32 %v2228_v9, %v1624_v8 }
  0x62   :  { %1457 = vmatpush.bf16.msrb.mxu0 %v2349_v19  ;;  %1408 = vmatmul.bf16.vlgmr.msra.gmra.mxu1 %v1613_v31  ;;  %v1637_v19 = vor.u32 %v2221_v14, %v1634_v15  ;;  %v1701_v31 = vor.u32 %v2237_v26, %v1698_v27 }
  0x63   :  { %1476 = vmatpush.bf16.msrb.mxu1 %v2357_v20  ;;  %1427 = vmatmul.bf16.vlgmr.msra.gmra.mxu2 %v1617_v32  ;;  %v1688_v20 = vld [vmem:[%s2986_s0 + $0xb0] sm:$0xf] }
  0x64   :  { %1495 = vmatpush.bf16.msrb.mxu2 %v2365_v13  ;;  %1446 = vmatmul.bf16.vlgmr.msra.gmra.mxu3 %v1621_v33  ;;  %v2229_v13 = vld [vmem:[%s2986_s0 + $0x74] sm:$0xf0]  ;;  %v1689_v28 = vor.u32 %v2244_v21, %v1688_v20 }
  0x65   :  { %1514 = vmatpush.bf16.msrb.mxu3 %v2373_v22  ;;  %v1633_v18 = vor.u32 %v2229_v13, %v1632_v12  ;;  %v2236_v22 = vld [vmem:[%s2986_s0 + $0xb4] sm:$0xf] }
  0x66   :  { %1458 = vmatpush.bf16.msrb.mxu0 %v2348_v34 }
  0x67   :  { %1477 = vmatpush.bf16.msrb.mxu1 %v2356_v30  ;;  %v1697_v30 = vor.u32 %v2245_v25, %v1696_v24 }
  0x68   :  { %1496 = vmatpush.bf16.msrb.mxu2 %v2364_v23  ;;  %v1690_v23 = vld [vmem:[%s2986_s0 + $0xf0] sm:$0xf0] }
  0x69   :  { %1515 = vmatpush.bf16.msrb.mxu3 %v2372_v35  ;;  %v1693_v29 = vor.u32 %v2236_v22, %v1690_v23 }
  0x6a   :  { %1459 = vmatpush.bf16.msrb.mxu0 %v2347_v38 }
  0x6b   :  { %1478 = vmatpush.bf16.msrb.mxu1 %v2355_v37 }
  0x6c   :  { %1497 = vmatpush.bf16.msrb.mxu2 %v2363_v36 }
  0x6d   :  { %1516 = vmatpush.bf16.msrb.mxu3 %v2371_v39 }
  0x6e   :  { %1460 = vmatpush.bf16.msrb.mxu0 %v2346_v42 }
  0x6f   :  { %1479 = vmatpush.bf16.msrb.mxu1 %v2354_v41 }
  0x70   :  { %1498 = vmatpush.bf16.msrb.mxu2 %v2362_v40 }
  0x71   :  { %1517 = vmatpush.bf16.msrb.mxu3 %v2370_v43  ;;  %1394 = vmatmul.bf16.gmra.mxu0 %v1673_v57 }
  0x72   :  { %1461 = vmatpush.bf16.msrb.mxu0 %v2345_v53  ;;  %1413 = vmatmul.bf16.gmra.mxu1 %v1677_v59 }
  0x73   :  { %1480 = vmatpush.bf16.msrb.mxu1 %v2353_v47  ;;  %1432 = vmatmul.bf16.gmra.mxu2 %v1681_v60 }
  0x74   :  { %1499 = vmatpush.bf16.msrb.mxu2 %v2361_v44  ;;  %1451 = vmatmul.bf16.gmra.mxu3 %v1685_v61 }
  0x75   :  { %1518 = vmatpush.bf16.msrb.mxu3 %v2369_v55 }
  0x76   :  { %1462 = vmatpush.bf16.msrb.mxu0 %v2344_v62 }
  0x77   :  { %1481 = vmatpush.bf16.msrb.mxu1 %v2352_v58 }
  0x78   :  { %1500 = vmatpush.bf16.msrb.mxu2 %v2360_v56 }
  0x79   :  { %1519 = vmatpush.bf16.msrb.mxu3 %v2368_v63 }
  0x7a   :  { %1463 = vmatpush.bf16.msrb.mxu0 %v2343_v2 }
  0x7b   :  { %1482 = vmatpush.bf16.msrb.mxu1 %v2351_v1 }
  0x7c   :  { %1501 = vmatpush.bf16.msrb.mxu2 %v2359_v0 }
  0x7d   :  { %1520 = vmatpush.bf16.msrb.mxu3 %v2367_v3 }
  0x7e   :  { %1464 = vmatpush.bf16.msrb.mxu0 %v2342_v6 }
  0x7f   :  { %1483 = vmatpush.bf16.msrb.mxu1 %v2350_v5 }
  0x80   :  { %1502 = vmatpush.bf16.msrb.mxu2 %v2358_v4 }
  0x81   :  { %1521 = vmatpush.bf16.msrb.mxu3 %v2366_v7  ;;  %1465 = vmatmul.bf16.vlgmr.msrb.gmra.mxu0 %v1625_v16 }
  0x82   :  { %1484 = vmatmul.bf16.vlgmr.msrb.gmra.mxu1 %v1629_v17 }
  0x83   :  { %1503 = vmatmul.bf16.vlgmr.msrb.gmra.mxu2 %v1633_v18 }
  0x84   :  { %1522 = vmatmul.bf16.vlgmr.msrb.gmra.mxu3 %v1637_v19 }
  0x91   :  { %1470 = vmatmul.bf16.gmra.mxu0 %v1689_v28 }
  0x92   :  { %1489 = vmatmul.bf16.gmra.mxu1 %v1693_v29 }
  0x93   :  { %1508 = vmatmul.bf16.gmra.mxu2 %v1697_v30 }
  0x94   :  { %1527 = vmatmul.bf16.gmra.mxu3 %v1701_v31 }
  0x9e   :  { %v1238_v32 = vpop.f32.mrf.mxu0 }
  0x9f   :  { %v1257_v33 = vpop.f32.mrf.mxu1 }
  0xa0   :  { %v1258_v34 = vadd.f32 %v1257_v33, %v1238_v32 }
  0xa6   :  { %v1276_v35 = vpop.f32.mrf.mxu2  ;;  %v1240_v38 = vpop.f32.mrf.mxu0 }
  0xa7   :  { %v1295_v36 = vpop.f32.mrf.mxu3  ;;  %v1277_v37 = vadd.f32 %v1276_v35, %v1258_v34  ;;  %v1259_v39 = vpop.f32.mrf.mxu1 }
  0xa8   :  { %v1260_v40 = vadd.f32 %v1259_v39, %v1240_v38 }
  0xa9   :  { %v1296_v41 = vadd.f32 %v1295_v36, %v1277_v37 }
  0xae   :  { %v1278_v42 = vpop.f32.mrf.mxu2  ;;  %v1243_v45 = vpop.f32.mrf.mxu0 }
  0xaf   :  { %v1297_v43 = vpop.f32.mrf.mxu3  ;;  %v1279_v44 = vadd.f32 %v1278_v42, %v1260_v40  ;;  %v1262_v46 = vpop.f32.mrf.mxu1 }
  0xb0   :  { %v1263_v47 = vadd.f32 %v1262_v46, %v1243_v45 }
  0xb1   :  { %v1298_v48 = vadd.f32 %v1297_v43, %v1279_v44 }
  0xb6   :  { %v1281_v49 = vpop.f32.mrf.mxu2  ;;  %v1245_v52 = vpop.f32.mrf.mxu0 }
  0xb7   :  { %v1300_v50 = vpop.f32.mrf.mxu3  ;;  %v1282_v51 = vadd.f32 %v1281_v49, %v1263_v47  ;;  %v1264_v53 = vpop.f32.mrf.mxu1 }
  0xb8   :  { %v1265_v54 = vadd.f32 %v1264_v53, %v1245_v52 }
  0xb9   :  { %v1301_v55 = vadd.f32 %v1300_v50, %v1282_v51 }
  0xbe   :  { %v1283_v56 = vpop.f32.mrf.mxu2  ;;  %v1314_v59 = vpop.f32.mrf.mxu0 }
  0xbf   :  { %v1302_v57 = vpop.f32.mrf.mxu3  ;;  %v1284_v58 = vadd.f32 %v1283_v56, %v1265_v54  ;;  %v1333_v60 = vpop.f32.mrf.mxu1  ;;  %v1315_v18 = vadd.f32 %v1314_v59, %v1296_v41 }
  0xc1   :  { %v1303_v61 = vadd.f32 %v1302_v57, %v1284_v58  ;;  %v1334_v19 = vadd.f32 %v1333_v60, %v1315_v18 }
  0xc6   :  { %v1352_v62 = vpop.f32.mrf.mxu2  ;;  %v1316_v0 = vpop.f32.mrf.mxu0 }
  0xc7   :  { %v1371_v63 = vpop.f32.mrf.mxu3  ;;  %v1335_v1 = vpop.f32.mrf.mxu1  ;;  %v1353_v21 = vadd.f32 %v1352_v62, %v1334_v19  ;;  %v1317_v25 = vadd.f32 %v1316_v0, %v1298_v48 }
  0xc9   :  { %v1372_v26 = vadd.f32 %v1371_v63, %v1353_v21  ;;  %v1336_v27 = vadd.f32 %v1335_v1, %v1317_v25 }
  0xce   :  { %v1354_v2 = vpop.f32.mrf.mxu2  ;;  %v1319_v4 = vpop.f32.mrf.mxu0 }
  0xcf   :  { %v1373_v3 = vpop.f32.mrf.mxu3  ;;  %v1338_v5 = vpop.f32.mrf.mxu1  ;;  %v1355_v30 = vadd.f32 %v1354_v2, %v1336_v27  ;;  %v1320_v34 = vadd.f32 %v1319_v4, %v1301_v55 }
  0xd1   :  { %v1374_v36 = vadd.f32 %v1373_v3, %v1355_v30  ;;  %v1339_v38 = vadd.f32 %v1338_v5, %v1320_v34 }
  0xd6   :  { %v1357_v6 = vpop.f32.mrf.mxu2  ;;  %v1321_v8 = vpop.f32.mrf.mxu0 }
  0xd7   :  { %v1376_v7 = vpop.f32.mrf.mxu3  ;;  %v1340_v9 = vpop.f32.mrf.mxu1  ;;  %v1358_v41 = vadd.f32 %v1357_v6, %v1339_v38  ;;  %v1322_v46 = vadd.f32 %v1321_v8, %v1303_v61 }
  0xd9   :  { %v1377_v49 = vadd.f32 %v1376_v7, %v1358_v41  ;;  %v1341_v51 = vadd.f32 %v1340_v9, %v1322_v46  ;;  %v1559_v41 = vlaneseq }
  0xdb   :  { %v1560_v46 = vshrl.u32 %v1559_v41, 7 }
  0xdd   :  { %vm1562_vm0 = vcmp.eq.s32.totalorder %v1560_v46, 1  ;;  %vm1561_vm1 = vcmp.eq.s32.totalorder %v1560_v46, 0 }
  0xde   :  { %v1359_v10 = vpop.f32.mrf.mxu2  ;;  %v1390_v12 = vpop.f32.mrf.mxu0 }
  0xdf   :  { %v1378_v11 = vpop.f32.mrf.mxu3  ;;  %v1409_v13 = vpop.f32.mrf.mxu1  ;;  %v1391_v28 = vadd.f32 %v1390_v12, %v1372_v26  ;;  %v1360_v55 = vadd.f32 %v1359_v10, %v1341_v51 }
  0xe1   :  { %v1410_v35 = vadd.f32 %v1409_v13, %v1391_v28  ;;  %v1379_v1 = vadd.f32 %v1378_v11, %v1360_v55 }
  0xe6   :  { %v1428_v14 = vpop.f32.mrf.mxu2  ;;  %v1392_v16 = vpop.f32.mrf.mxu0 }
  0xe7   :  { %v1447_v15 = vpop.f32.mrf.mxu3  ;;  %v1411_v17 = vpop.f32.mrf.mxu1  ;;  %v1429_v37 = vadd.f32 %v1428_v14, %v1410_v35  ;;  %v1393_v39 = vadd.f32 %v1392_v16, %v1374_v36 }
  0xe9   :  { %v1448_v42 = vadd.f32 %v1447_v15, %v1429_v37  ;;  %v1412_v47 = vadd.f32 %v1411_v17, %v1393_v39 }
  0xee   :  { %v1430_v20 = vpop.f32.mrf.mxu2  ;;  %v1395_v23 = vpop.f32.mrf.mxu0 }
  0xef   :  { %v1449_v22 = vpop.f32.mrf.mxu3  ;;  %v1414_v24 = vpop.f32.mrf.mxu1  ;;  %v1431_v50 = vadd.f32 %v1430_v20, %v1412_v47  ;;  %v1396_v52 = vadd.f32 %v1395_v23, %v1377_v49 }
  0xf1   :  { %v1450_v56 = vadd.f32 %v1449_v22, %v1431_v50  ;;  %v1415_v62 = vadd.f32 %v1414_v24, %v1396_v52 }
  0xf6   :  { %v1433_v29 = vpop.f32.mrf.mxu2  ;;  %v1397_v32 = vpop.f32.mrf.mxu0 }
  0xf7   :  { %v1452_v31 = vpop.f32.mrf.mxu3  ;;  %v1416_v33 = vpop.f32.mrf.mxu1  ;;  %v1434_v2 = vadd.f32 %v1433_v29, %v1415_v62  ;;  %v1398_v61 = vadd.f32 %v1397_v32, %v1379_v1 }
  0xf9   :  { %v1453_v5 = vadd.f32 %v1452_v31, %v1434_v2  ;;  %v1417_v9 = vadd.f32 %v1416_v33, %v1398_v61 }
  0xfe   :  { %v1435_v40 = vpop.f32.mrf.mxu2  ;;  %v1466_v44 = vpop.f32.mrf.mxu0 }
  0xff   :  { %v1454_v43 = vpop.f32.mrf.mxu3  ;;  %v1485_v45 = vpop.f32.mrf.mxu1  ;;  %v1467_v48 = vadd.f32 %v1466_v44, %v1448_v42  ;;  %v1436_v14 = vadd.f32 %v1435_v40, %v1417_v9 }
 0x101   :  { %v1486_v53 = vadd.f32 %v1485_v45, %v1467_v48  ;;  %v1455_v20 = vadd.f32 %v1454_v43, %v1436_v14 }
 0x106   :  { %v1504_v54 = vpop.f32.mrf.mxu2  ;;  %v1468_v59 = vpop.f32.mrf.mxu0 }
 0x107   :  { %v1505_v57 = vadd.f32 %v1504_v54, %v1486_v53  ;;  %v1523_v58 = vpop.f32.mrf.mxu3  ;;  %v1487_v60 = vpop.f32.mrf.mxu1  ;;  %v1469_v0 = vadd.f32 %v1468_v59, %v1450_v56 }
 0x109   :  { %v1524_v63 = vadd.f32 %v1523_v58, %v1505_v57  ;;  %v1488_v3 = vadd.f32 %v1487_v60, %v1469_v0 }
 0x10b   :  { %1533 = vst [vmem:[%s2987_s2] sm:$0xff] %v1524_v63  ;;  %v1546_v15 = vmul.f32 %v1524_v63, %v1524_v63 }
 0x10e   :  { %v1506_v4 = vpop.f32.mrf.mxu2  ;;  %v1471_v8 = vpop.f32.mrf.mxu0 }
 0x10f   :  { %v1507_v6 = vadd.f32 %v1506_v4, %v1488_v3  ;;  %v1525_v7 = vpop.f32.mrf.mxu3  ;;  %v1472_v12 = vadd.f32 %v1471_v8, %v1453_v5  ;;  %v1490_v13 = vpop.f32.mrf.mxu1 }
 0x111   :  { %v1526_v10 = vadd.f32 %v1525_v7, %v1507_v6  ;;  %v1491_v18 = vadd.f32 %v1490_v13, %v1472_v12 }
 0x113   :  { %1534 = vst [vmem:[%s2987_s2 + $0x8] sm:$0xff] %v1526_v10  ;;  %v1537_v11 = vadd.f32 %v1526_v10, %v1524_v63  ;;  %v1547_v16 = vmul.f32 %v1526_v10, %v1526_v10 }
 0x115   :  { %v1550_v17 = vadd.f32 %v1547_v16, %v1546_v15 }
 0x116   :  { %v1509_v19 = vpop.f32.mrf.mxu2  ;;  %v1473_v23 = vpop.f32.mrf.mxu0 }
 0x117   :  { %v1510_v21 = vadd.f32 %v1509_v19, %v1491_v18  ;;  %v1528_v22 = vpop.f32.mrf.mxu3  ;;  %v1474_v25 = vadd.f32 %v1473_v23, %v1455_v20  ;;  %v1492_v28 = vpop.f32.mrf.mxu1 }
 0x119   :  { %v1529_v24 = vadd.f32 %v1528_v22, %v1510_v21  ;;  %v1493_v30 = vadd.f32 %v1492_v28, %v1474_v25 }
 0x11b   :  { %1535 = vst [vmem:[%s2987_s2 + $0x10] sm:$0xff] %v1529_v24  ;;  %v1538_v26 = vadd.f32 %v1537_v11, %v1529_v24  ;;  %v1548_v27 = vmul.f32 %v1529_v24, %v1529_v24 }
 0x11d   :  { %v1551_v29 = vadd.f32 %v1550_v17, %v1548_v27 }
 0x11e   :  { %v1511_v31 = vpop.f32.mrf.mxu2 }
 0x11f   :  { %v1512_v32 = vadd.f32 %v1511_v31, %v1493_v30  ;;  %v1530_v33 = vpop.f32.mrf.mxu3 }
 0x121   :  { %v1531_v34 = vadd.f32 %v1530_v33, %v1512_v32 }
 0x123   :  { %1536 = vst [vmem:[%s2987_s2 + $0x18] sm:$0xff] %v1531_v34  ;;  %v1539_v35 = vadd.f32 %v1538_v26, %v1531_v34  ;;  %v1549_v36 = vmul.f32 %v1531_v34, %v1531_v34 }
 0x125   :  { %v1540_v37 = vrot.slane %v1539_v35, 4  ;;  %v1552_v38 = vadd.f32 %v1551_v29, %v1549_v36 }
 0x127   :  { %v1541_v39 = vadd.f32 %v1540_v37, %v1539_v35  ;;  %v1553_v40 = vrot.slane %v1552_v38, 4 }
 0x129   :  { %v1542_v42 = vrot.slane %v1541_v39, 2  ;;  %v1554_v43 = vadd.f32 %v1553_v40, %v1552_v38 }
 0x12b   :  { %v1543_v44 = vadd.f32 %v1542_v42, %v1541_v39  ;;  %v1555_v45 = vrot.slane %v1554_v43, 2 }
 0x12d   :  { %v1556_v47 = vadd.f32 %v1555_v45, %v1554_v43  ;;  %v1544_v48 = vrot.slane %v1543_v44, 1 }
 0x12f   :  { %v1557_v49 = vrot.slane %v1556_v47, 1  ;;  %v1545_v51 = vadd.f32 %v1544_v48, %v1543_v44 }
 0x131   :  { %v1558_v50 = vadd.f32 %v1557_v49, %v1556_v47 }
 0x133   :  { %v1563_v52 = vsel %vm1562_vm0, %v1558_v50, 0.0 }
 0x134   :  { %v1564_v53 = vsel %vm1561_vm1, %v1545_v51, %v1563_v52 }
 0x135   :  { %1565 = vst [vmem:[%s2988_s3] sm:$0xff] %v1564_v53 }

// kernel: discriminator_forward.15
= control target key start
LH: loop header
LB: loop body
LE: loop exit
PB: predicated region body
PF: predicated region fallthrough
CT: control target
= control target key end

     0   :  { %s2400_s1 = inlined_call_operand.vmem [shape: bf16[2048,128], index: 1, kind: input, shape index: {}]   ;;  %s2401_s0 = inlined_call_operand.vmem [shape: bf16[8,2048], index: 0, kind: input, shape index: {}]   ;;  %s2402_s2 = inlined_call_operand.vmem [shape: f32[8,128], index: 2, kind: output, shape index: {}]  }
   0x1   :  { %v1849_v0 = vld [vmem:[%s2400_s1 + $0x38] sm:$0xff]  ;;  %v1848_v4 = vld [vmem:[%s2400_s1 + $0x30] sm:$0xff]  ;;  %v1847_v8 = vld [vmem:[%s2400_s1 + $0x28] sm:$0xff] }
   0x2   :  { %v1857_v1 = vld [vmem:[%s2400_s1 + $0x78] sm:$0xff]  ;;  %1099 = vmatpush.bf16.msra.mxu0 %v1849_v0  ;;  %v1856_v5 = vld [vmem:[%s2400_s1 + $0x70] sm:$0xff]  ;;  %v1855_v9 = vld [vmem:[%s2400_s1 + $0x68] sm:$0xff] }
   0x3   :  { %v1865_v2 = vld [vmem:[%s2400_s1 + $0xb8] sm:$0xff]  ;;  %1112 = vmatpush.bf16.msra.mxu1 %v1857_v1  ;;  %v1864_v6 = vld [vmem:[%s2400_s1 + $0xb0] sm:$0xff]  ;;  %v1863_v10 = vld [vmem:[%s2400_s1 + $0xa8] sm:$0xff] }
   0x4   :  { %v1873_v3 = vld [vmem:[%s2400_s1 + $0xf8] sm:$0xff]  ;;  %1125 = vmatpush.bf16.msra.mxu2 %v1865_v2  ;;  %v1872_v7 = vld [vmem:[%s2400_s1 + $0xf0] sm:$0xff]  ;;  %v1871_v11 = vld [vmem:[%s2400_s1 + $0xe8] sm:$0xff] }
   0x5   :  { %1138 = vmatpush.bf16.msra.mxu3 %v1873_v3  ;;  %v1846_v12 = vld [vmem:[%s2400_s1 + $0x20] sm:$0xff]  ;;  %v1845_v16 = vld [vmem:[%s2400_s1 + $0x18] sm:$0xff]  ;;  %v1844_v20 = vld [vmem:[%s2400_s1 + $0x10] sm:$0xff] }
   0x6   :  { %1100 = vmatpush.bf16.msra.mxu0 %v1848_v4  ;;  %v1854_v13 = vld [vmem:[%s2400_s1 + $0x60] sm:$0xff]  ;;  %v1853_v17 = vld [vmem:[%s2400_s1 + $0x58] sm:$0xff]  ;;  %v1852_v21 = vld [vmem:[%s2400_s1 + $0x50] sm:$0xff] }
   0x7   :  { %1113 = vmatpush.bf16.msra.mxu1 %v1856_v5  ;;  %v1862_v14 = vld [vmem:[%s2400_s1 + $0xa0] sm:$0xff]  ;;  %v1861_v18 = vld [vmem:[%s2400_s1 + $0x98] sm:$0xff]  ;;  %v1860_v22 = vld [vmem:[%s2400_s1 + $0x90] sm:$0xff] }
   0x8   :  { %1126 = vmatpush.bf16.msra.mxu2 %v1864_v6  ;;  %v1870_v15 = vld [vmem:[%s2400_s1 + $0xe0] sm:$0xff]  ;;  %v1869_v19 = vld [vmem:[%s2400_s1 + $0xd8] sm:$0xff]  ;;  %v1868_v23 = vld [vmem:[%s2400_s1 + $0xd0] sm:$0xff] }
   0x9   :  { %1139 = vmatpush.bf16.msra.mxu3 %v1872_v7  ;;  %v1843_v24 = vld [vmem:[%s2400_s1 + $0x8] sm:$0xff]  ;;  %v11_v29 = vld [vmem:[%s2401_s0] sm:$0xff]  ;;  %v1881_v38 = vld [vmem:[%s2400_s1 + $0x138] sm:$0xff] }
   0xa   :  { %1101 = vmatpush.bf16.msra.mxu0 %v1847_v8  ;;  %v1851_v25 = vld [vmem:[%s2400_s1 + $0x48] sm:$0xff]  ;;  %v1842_v30 = vld [vmem:[%s2400_s1] sm:$0xff]  ;;  %v283_v33 = vunpack.c.l.b16 %v11_v29  ;;  %v284_v37 = vunpack.c.h.b16 %v11_v29  ;;  %v1889_v39 = vld [vmem:[%s2400_s1 + $0x178] sm:$0xff] }
   0xb   :  { %1114 = vmatpush.bf16.msra.mxu1 %v1855_v9  ;;  %v1859_v26 = vld [vmem:[%s2400_s1 + $0x88] sm:$0xff]  ;;  %v1850_v31 = vld [vmem:[%s2400_s1 + $0x40] sm:$0xff]  ;;  %v1897_v40 = vld [vmem:[%s2400_s1 + $0x1b8] sm:$0xff] }
   0xc   :  { %1127 = vmatpush.bf16.msra.mxu2 %v1863_v10  ;;  %v1867_v27 = vld [vmem:[%s2400_s1 + $0xc8] sm:$0xff]  ;;  %v1858_v34 = vld [vmem:[%s2400_s1 + $0x80] sm:$0xff]  ;;  %v1905_v41 = vld [vmem:[%s2400_s1 + $0x1f8] sm:$0xff]  ;;  %v299_v43 = vpack.c.b16 %v283_v33, %v283_v33  ;;  %v300_v45 = vpack.c.b16 %v284_v37, %v284_v37 }
   0xd   :  { %1140 = vmatpush.bf16.msra.mxu3 %v1871_v11  ;;  %v12_v28 = vld [vmem:[%s2401_s0 + $0x8] sm:$0xff]  ;;  %v1866_v35 = vld [vmem:[%s2400_s1 + $0xc0] sm:$0xff]  ;;  %v1880_v46 = vld [vmem:[%s2400_s1 + $0x130] sm:$0xff] }
   0xe   :  { %1102 = vmatpush.bf16.msra.mxu0 %v1846_v12  ;;  %v285_v32 = vunpack.c.l.b16 %v12_v28  ;;  %v286_v36 = vunpack.c.h.b16 %v12_v28  ;;  %v1888_v47 = vld [vmem:[%s2400_s1 + $0x170] sm:$0xff]  ;;  %v1879_v50 = vld [vmem:[%s2400_s1 + $0x128] sm:$0xff]  ;;  %v1878_v54 = vld [vmem:[%s2400_s1 + $0x120] sm:$0xff] }
   0xf   :  { %1115 = vmatpush.bf16.msra.mxu1 %v1854_v13  ;;  %v1896_v48 = vld [vmem:[%s2400_s1 + $0x1b0] sm:$0xff]  ;;  %v1887_v51 = vld [vmem:[%s2400_s1 + $0x168] sm:$0xff]  ;;  %v1886_v55 = vld [vmem:[%s2400_s1 + $0x160] sm:$0xff] }
  0x10   :  { %1128 = vmatpush.bf16.msra.mxu2 %v1862_v14  ;;  %v301_v42 = vpack.c.b16 %v285_v32, %v285_v32  ;;  %v302_v44 = vpack.c.b16 %v286_v36, %v286_v36  ;;  %v1904_v49 = vld [vmem:[%s2400_s1 + $0x1f0] sm:$0xff]  ;;  %v1895_v52 = vld [vmem:[%s2400_s1 + $0x1a8] sm:$0xff]  ;;  %v1894_v56 = vld [vmem:[%s2400_s1 + $0x1a0] sm:$0xff] }
  0x11   :  { %1141 = vmatpush.bf16.msra.mxu3 %v1870_v15  ;;  %v1903_v53 = vld [vmem:[%s2400_s1 + $0x1e8] sm:$0xff]  ;;  %v1902_v57 = vld [vmem:[%s2400_s1 + $0x1e0] sm:$0xff]  ;;  %v1877_v58 = vld [vmem:[%s2400_s1 + $0x118] sm:$0xff] }
  0x12   :  { %1103 = vmatpush.bf16.msra.mxu0 %v1845_v16  ;;  %v1885_v59 = vld [vmem:[%s2400_s1 + $0x158] sm:$0xff]  ;;  %v1876_v62 = vld [vmem:[%s2400_s1 + $0x110] sm:$0xff]  ;;  %v1875_v2 = vld [vmem:[%s2400_s1 + $0x108] sm:$0xff] }
  0x13   :  { %1116 = vmatpush.bf16.msra.mxu1 %v1853_v17  ;;  %v1893_v60 = vld [vmem:[%s2400_s1 + $0x198] sm:$0xff]  ;;  %v1884_v63 = vld [vmem:[%s2400_s1 + $0x150] sm:$0xff]  ;;  %v1883_v3 = vld [vmem:[%s2400_s1 + $0x148] sm:$0xff] }
  0x14   :  { %1129 = vmatpush.bf16.msra.mxu2 %v1861_v18  ;;  %v1901_v61 = vld [vmem:[%s2400_s1 + $0x1d8] sm:$0xff]  ;;  %v1892_v0 = vld [vmem:[%s2400_s1 + $0x190] sm:$0xff]  ;;  %v1891_v4 = vld [vmem:[%s2400_s1 + $0x188] sm:$0xff] }
  0x15   :  { %1142 = vmatpush.bf16.msra.mxu3 %v1869_v19  ;;  %v1900_v1 = vld [vmem:[%s2400_s1 + $0x1d0] sm:$0xff]  ;;  %v1899_v5 = vld [vmem:[%s2400_s1 + $0x1c8] sm:$0xff]  ;;  %v14_v6 = vld [vmem:[%s2401_s0 + $0x18] sm:$0xff] }
  0x16   :  { %1104 = vmatpush.bf16.msra.mxu0 %v1844_v20  ;;  %v13_v7 = vld [vmem:[%s2401_s0 + $0x10] sm:$0xff]  ;;  %v1874_v8 = vld [vmem:[%s2400_s1 + $0x100] sm:$0xff]  ;;  %v289_v10 = vunpack.c.l.b16 %v14_v6  ;;  %v290_v14 = vunpack.c.h.b16 %v14_v6  ;;  %v1913_v16 = vld [vmem:[%s2400_s1 + $0x238] sm:$0xff] }
  0x17   :  { %1117 = vmatpush.bf16.msra.mxu1 %v1852_v21  ;;  %v1882_v9 = vld [vmem:[%s2400_s1 + $0x140] sm:$0xff]  ;;  %v287_v11 = vunpack.c.l.b16 %v13_v7  ;;  %v288_v15 = vunpack.c.h.b16 %v13_v7  ;;  %v1921_v17 = vld [vmem:[%s2400_s1 + $0x278] sm:$0xff]  ;;  %v1911_v28 = vld [vmem:[%s2400_s1 + $0x228] sm:$0xff] }
  0x18   :  { %1130 = vmatpush.bf16.msra.mxu2 %v1860_v22  ;;  %v1890_v12 = vld [vmem:[%s2400_s1 + $0x180] sm:$0xff]  ;;  %v1929_v18 = vld [vmem:[%s2400_s1 + $0x2b8] sm:$0xff]  ;;  %v305_v20 = vpack.c.b16 %v289_v10, %v289_v10  ;;  %v306_v22 = vpack.c.b16 %v290_v14, %v290_v14  ;;  %v1919_v29 = vld [vmem:[%s2400_s1 + $0x268] sm:$0xff] }
  0x19   :  { %1143 = vmatpush.bf16.msra.mxu3 %v1868_v23  ;;  %v1898_v13 = vld [vmem:[%s2400_s1 + $0x1c0] sm:$0xff]  ;;  %v1937_v19 = vld [vmem:[%s2400_s1 + $0x2f8] sm:$0xff]  ;;  %v303_v21 = vpack.c.b16 %v287_v11, %v287_v11  ;;  %v304_v23 = vpack.c.b16 %v288_v15, %v288_v15  ;;  %v1943_v6 = vld [vmem:[%s2400_s1 + $0x328] sm:$0xff] }
  0x1a   :  { %1105 = vmatpush.bf16.msra.mxu0 %v1843_v24  ;;  %v1912_v24 = vld [vmem:[%s2400_s1 + $0x230] sm:$0xff]  ;;  %v1910_v32 = vld [vmem:[%s2400_s1 + $0x220] sm:$0xff]  ;;  %v1909_v36 = vld [vmem:[%s2400_s1 + $0x218] sm:$0xff] }
  0x1b   :  { %1118 = vmatpush.bf16.msra.mxu1 %v1851_v25  ;;  %v1920_v25 = vld [vmem:[%s2400_s1 + $0x270] sm:$0xff]  ;;  %v1918_v33 = vld [vmem:[%s2400_s1 + $0x260] sm:$0xff]  ;;  %v1917_v37 = vld [vmem:[%s2400_s1 + $0x258] sm:$0xff] }
  0x1c   :  { %1131 = vmatpush.bf16.msra.mxu2 %v1859_v26  ;;  %v1928_v26 = vld [vmem:[%s2400_s1 + $0x2b0] sm:$0xff]  ;;  %v1951_v7 = vld [vmem:[%s2400_s1 + $0x368] sm:$0xff]  ;;  %v1942_v10 = vld [vmem:[%s2400_s1 + $0x320] sm:$0xff] }
  0x1d   :  { %1144 = vmatpush.bf16.msra.mxu3 %v1867_v27  ;;  %v1936_v27 = vld [vmem:[%s2400_s1 + $0x2f0] sm:$0xff]  ;;  %v1950_v11 = vld [vmem:[%s2400_s1 + $0x360] sm:$0xff]  ;;  %v1941_v14 = vld [vmem:[%s2400_s1 + $0x318] sm:$0xff] }
  0x1e   :  { %1106 = vmatpush.bf16.msra.mxu0 %v1842_v30  ;;  %v1927_v30 = vld [vmem:[%s2400_s1 + $0x2a8] sm:$0xff]  ;;  %v1949_v15 = vld [vmem:[%s2400_s1 + $0x358] sm:$0xff] }
  0x1f   :  { %1119 = vmatpush.bf16.msra.mxu1 %v1850_v31  ;;  %v1935_v31 = vld [vmem:[%s2400_s1 + $0x2e8] sm:$0xff] }
  0x20   :  { %1132 = vmatpush.bf16.msra.mxu2 %v1858_v34  ;;  %v1926_v34 = vld [vmem:[%s2400_s1 + $0x2a0] sm:$0xff] }
  0x21   :  { %1145 = vmatpush.bf16.msra.mxu3 %v1866_v35  ;;  %1107 = vmatmul.bf16.vlgmr.msra.gmra.mxu0 %v299_v43  ;;  %v1934_v35 = vld [vmem:[%s2400_s1 + $0x2e0] sm:$0xff]  ;;  %v1932_v43 = vld [vmem:[%s2400_s1 + $0x2d0] sm:$0xff] }
  0x22   :  { %1151 = vmatpush.bf16.msrb.mxu0 %v1881_v38  ;;  %1120 = vmatmul.bf16.vlgmr.msra.gmra.mxu1 %v300_v45  ;;  %v1925_v38 = vld [vmem:[%s2400_s1 + $0x298] sm:$0xff]  ;;  %v1915_v45 = vld [vmem:[%s2400_s1 + $0x248] sm:$0xff] }
  0x23   :  { %1164 = vmatpush.bf16.msrb.mxu1 %v1889_v39  ;;  %1133 = vmatmul.bf16.vlgmr.msra.gmra.mxu2 %v301_v42  ;;  %v1933_v39 = vld [vmem:[%s2400_s1 + $0x2d8] sm:$0xff]  ;;  %v1924_v42 = vld [vmem:[%s2400_s1 + $0x290] sm:$0xff] }
  0x24   :  { %1177 = vmatpush.bf16.msrb.mxu2 %v1897_v40  ;;  %1146 = vmatmul.bf16.vlgmr.msra.gmra.mxu3 %v302_v44  ;;  %v1908_v40 = vld [vmem:[%s2400_s1 + $0x210] sm:$0xff]  ;;  %v1907_v44 = vld [vmem:[%s2400_s1 + $0x208] sm:$0xff] }
  0x25   :  { %1190 = vmatpush.bf16.msrb.mxu3 %v1905_v41  ;;  %v1916_v41 = vld [vmem:[%s2400_s1 + $0x250] sm:$0xff] }
  0x26   :  { %1152 = vmatpush.bf16.msrb.mxu0 %v1880_v46  ;;  %v1923_v46 = vld [vmem:[%s2400_s1 + $0x288] sm:$0xff] }
  0x27   :  { %1165 = vmatpush.bf16.msrb.mxu1 %v1888_v47  ;;  %v1931_v47 = vld [vmem:[%s2400_s1 + $0x2c8] sm:$0xff] }
  0x28   :  { %1178 = vmatpush.bf16.msrb.mxu2 %v1896_v48  ;;  %v15_v48 = vld [vmem:[%s2401_s0 + $0x20] sm:$0xff] }
  0x29   :  { %1191 = vmatpush.bf16.msrb.mxu3 %v1904_v49  ;;  %v16_v49 = vld [vmem:[%s2401_s0 + $0x28] sm:$0xff] }
  0x2a   :  { %1153 = vmatpush.bf16.msrb.mxu0 %v1879_v50  ;;  %v1906_v50 = vld [vmem:[%s2400_s1 + $0x200] sm:$0xff] }
  0x2b   :  { %1166 = vmatpush.bf16.msrb.mxu1 %v1887_v51  ;;  %v1914_v51 = vld [vmem:[%s2400_s1 + $0x240] sm:$0xff] }
  0x2c   :  { %1179 = vmatpush.bf16.msrb.mxu2 %v1895_v52  ;;  %v291_v52 = vunpack.c.l.b16 %v15_v48 }
  0x2d   :  { %1192 = vmatpush.bf16.msrb.mxu3 %v1903_v53  ;;  %v293_v53 = vunpack.c.l.b16 %v16_v49 }
  0x2e   :  { %1154 = vmatpush.bf16.msrb.mxu0 %v1878_v54  ;;  %v1922_v54 = vld [vmem:[%s2400_s1 + $0x280] sm:$0xff] }
  0x2f   :  { %1167 = vmatpush.bf16.msrb.mxu1 %v1886_v55  ;;  %v1930_v55 = vld [vmem:[%s2400_s1 + $0x2c0] sm:$0xff] }
  0x30   :  { %1180 = vmatpush.bf16.msrb.mxu2 %v1894_v56  ;;  %v292_v56 = vunpack.c.h.b16 %v15_v48 }
  0x31   :  { %1193 = vmatpush.bf16.msrb.mxu3 %v1902_v57  ;;  %v294_v57 = vunpack.c.h.b16 %v16_v49 }
  0x32   :  { %1155 = vmatpush.bf16.msrb.mxu0 %v1877_v58  ;;  %v1945_v58 = vld [vmem:[%s2400_s1 + $0x338] sm:$0xff] }
  0x33   :  { %1168 = vmatpush.bf16.msrb.mxu1 %v1885_v59  ;;  %v1953_v59 = vld [vmem:[%s2400_s1 + $0x378] sm:$0xff] }
  0x34   :  { %1181 = vmatpush.bf16.msrb.mxu2 %v1893_v60  ;;  %v1961_v60 = vld [vmem:[%s2400_s1 + $0x3b8] sm:$0xff] }
  0x35   :  { %1194 = vmatpush.bf16.msrb.mxu3 %v1901_v61  ;;  %v1969_v61 = vld [vmem:[%s2400_s1 + $0x3f8] sm:$0xff] }
  0x36   :  { %1156 = vmatpush.bf16.msrb.mxu0 %v1876_v62  ;;  %v307_v62 = vpack.c.b16 %v291_v52, %v291_v52 }
  0x37   :  { %1169 = vmatpush.bf16.msrb.mxu1 %v1884_v63  ;;  %v309_v63 = vpack.c.b16 %v293_v53, %v293_v53 }
  0x38   :  { %1182 = vmatpush.bf16.msrb.mxu2 %v1892_v0  ;;  %v308_v0 = vpack.c.b16 %v292_v56, %v292_v56 }
  0x39   :  { %1195 = vmatpush.bf16.msrb.mxu3 %v1900_v1  ;;  %v310_v1 = vpack.c.b16 %v294_v57, %v294_v57 }
  0x3a   :  { %1157 = vmatpush.bf16.msrb.mxu0 %v1875_v2  ;;  %v1944_v2 = vld [vmem:[%s2400_s1 + $0x330] sm:$0xff] }
  0x3b   :  { %1170 = vmatpush.bf16.msrb.mxu1 %v1883_v3  ;;  %v1952_v3 = vld [vmem:[%s2400_s1 + $0x370] sm:$0xff] }
  0x3c   :  { %1183 = vmatpush.bf16.msrb.mxu2 %v1891_v4  ;;  %v1960_v4 = vld [vmem:[%s2400_s1 + $0x3b0] sm:$0xff] }
  0x3d   :  { %1196 = vmatpush.bf16.msrb.mxu3 %v1899_v5  ;;  %v1968_v5 = vld [vmem:[%s2400_s1 + $0x3f0] sm:$0xff] }
  0x3e   :  { %1158 = vmatpush.bf16.msrb.mxu0 %v1874_v8  ;;  %v1959_v8 = vld [vmem:[%s2400_s1 + $0x3a8] sm:$0xff] }
  0x3f   :  { %1171 = vmatpush.bf16.msrb.mxu1 %v1882_v9  ;;  %v1967_v9 = vld [vmem:[%s2400_s1 + $0x3e8] sm:$0xff] }
  0x40   :  { %1184 = vmatpush.bf16.msrb.mxu2 %v1890_v12  ;;  %v1958_v12 = vld [vmem:[%s2400_s1 + $0x3a0] sm:$0xff] }
  0x41   :  { %1197 = vmatpush.bf16.msrb.mxu3 %v1898_v13  ;;  %1159 = vmatmul.bf16.vlgmr.msrb.gmra.mxu0 %v303_v21  ;;  %v1966_v13 = vld [vmem:[%s2400_s1 + $0x3e0] sm:$0xff]  ;;  %v1964_v21 = vld [vmem:[%s2400_s1 + $0x3d0] sm:$0xff] }
  0x42   :  { %1203 = vmatpush.bf16.msra.mxu0 %v1913_v16  ;;  %1172 = vmatmul.bf16.vlgmr.msrb.gmra.mxu1 %v304_v23  ;;  %v1957_v16 = vld [vmem:[%s2400_s1 + $0x398] sm:$0xff]  ;;  %v1947_v23 = vld [vmem:[%s2400_s1 + $0x348] sm:$0xff] }
  0x43   :  { %1216 = vmatpush.bf16.msra.mxu1 %v1921_v17  ;;  %1185 = vmatmul.bf16.vlgmr.msrb.gmra.mxu2 %v305_v20  ;;  %v1965_v17 = vld [vmem:[%s2400_s1 + $0x3d8] sm:$0xff]  ;;  %v1956_v20 = vld [vmem:[%s2400_s1 + $0x390] sm:$0xff] }
  0x44   :  { %1229 = vmatpush.bf16.msra.mxu2 %v1929_v18  ;;  %1198 = vmatmul.bf16.vlgmr.msrb.gmra.mxu3 %v306_v22  ;;  %v1940_v18 = vld [vmem:[%s2400_s1 + $0x310] sm:$0xff]  ;;  %v1939_v22 = vld [vmem:[%s2400_s1 + $0x308] sm:$0xff] }
  0x45   :  { %1242 = vmatpush.bf16.msra.mxu3 %v1937_v19  ;;  %v1948_v19 = vld [vmem:[%s2400_s1 + $0x350] sm:$0xff] }
  0x46   :  { %1204 = vmatpush.bf16.msra.mxu0 %v1912_v24  ;;  %v17_v24 = vld [vmem:[%s2401_s0 + $0x30] sm:$0xff] }
  0x47   :  { %1217 = vmatpush.bf16.msra.mxu1 %v1920_v25  ;;  %v1955_v25 = vld [vmem:[%s2400_s1 + $0x388] sm:$0xff] }
  0x48   :  { %1230 = vmatpush.bf16.msra.mxu2 %v1928_v26  ;;  %v1963_v26 = vld [vmem:[%s2400_s1 + $0x3c8] sm:$0xff] }
  0x49   :  { %1243 = vmatpush.bf16.msra.mxu3 %v1936_v27  ;;  %v18_v27 = vld [vmem:[%s2401_s0 + $0x38] sm:$0xff] }
  0x4a   :  { %1205 = vmatpush.bf16.msra.mxu0 %v1911_v28  ;;  %v295_v28 = vunpack.c.l.b16 %v17_v24 }
  0x4b   :  { %1218 = vmatpush.bf16.msra.mxu1 %v1919_v29  ;;  %v296_v29 = vunpack.c.h.b16 %v17_v24 }
  0x4c   :  { %1231 = vmatpush.bf16.msra.mxu2 %v1927_v30  ;;  %v1938_v30 = vld [vmem:[%s2400_s1 + $0x300] sm:$0xff] }
  0x4d   :  { %1244 = vmatpush.bf16.msra.mxu3 %v1935_v31  ;;  %v1946_v31 = vld [vmem:[%s2400_s1 + $0x340] sm:$0xff] }
  0x4e   :  { %1206 = vmatpush.bf16.msra.mxu0 %v1910_v32  ;;  %v297_v32 = vunpack.c.l.b16 %v18_v27 }
  0x4f   :  { %1219 = vmatpush.bf16.msra.mxu1 %v1918_v33  ;;  %v298_v33 = vunpack.c.h.b16 %v18_v27 }
  0x50   :  { %1232 = vmatpush.bf16.msra.mxu2 %v1926_v34  ;;  %v1954_v34 = vld [vmem:[%s2400_s1 + $0x380] sm:$0xff] }
  0x51   :  { %1245 = vmatpush.bf16.msra.mxu3 %v1934_v35  ;;  %v1962_v35 = vld [vmem:[%s2400_s1 + $0x3c0] sm:$0xff] }
  0x52   :  { %1207 = vmatpush.bf16.msra.mxu0 %v1909_v36  ;;  %v311_v36 = vpack.c.b16 %v295_v28, %v295_v28 }
  0x53   :  { %1220 = vmatpush.bf16.msra.mxu1 %v1917_v37  ;;  %v312_v37 = vpack.c.b16 %v296_v29, %v296_v29 }
  0x54   :  { %1233 = vmatpush.bf16.msra.mxu2 %v1925_v38  ;;  %v313_v38 = vpack.c.b16 %v297_v32, %v297_v32 }
  0x55   :  { %1246 = vmatpush.bf16.msra.mxu3 %v1933_v39  ;;  %v314_v39 = vpack.c.b16 %v298_v33, %v298_v33 }
  0x56   :  { %1208 = vmatpush.bf16.msra.mxu0 %v1908_v40 }
  0x57   :  { %1221 = vmatpush.bf16.msra.mxu1 %v1916_v41 }
  0x58   :  { %1234 = vmatpush.bf16.msra.mxu2 %v1924_v42 }
  0x59   :  { %1247 = vmatpush.bf16.msra.mxu3 %v1932_v43 }
  0x5a   :  { %1209 = vmatpush.bf16.msra.mxu0 %v1907_v44 }
  0x5b   :  { %1222 = vmatpush.bf16.msra.mxu1 %v1915_v45 }
  0x5c   :  { %1235 = vmatpush.bf16.msra.mxu2 %v1923_v46 }
  0x5d   :  { %1248 = vmatpush.bf16.msra.mxu3 %v1931_v47 }
  0x5e   :  { %1210 = vmatpush.bf16.msra.mxu0 %v1906_v50 }
  0x5f   :  { %1223 = vmatpush.bf16.msra.mxu1 %v1914_v51 }
  0x60   :  { %1236 = vmatpush.bf16.msra.mxu2 %v1922_v54 }
  0x61   :  { %1249 = vmatpush.bf16.msra.mxu3 %v1930_v55  ;;  %1211 = vmatmul.bf16.vlgmr.msra.gmra.mxu0 %v307_v62 }
  0x62   :  { %1255 = vmatpush.bf16.msrb.mxu0 %v1945_v58  ;;  %1224 = vmatmul.bf16.vlgmr.msra.gmra.mxu1 %v308_v0 }
  0x63   :  { %1268 = vmatpush.bf16.msrb.mxu1 %v1953_v59  ;;  %1237 = vmatmul.bf16.vlgmr.msra.gmra.mxu2 %v309_v63 }
  0x64   :  { %1281 = vmatpush.bf16.msrb.mxu2 %v1961_v60  ;;  %1250 = vmatmul.bf16.vlgmr.msra.gmra.mxu3 %v310_v1 }
  0x65   :  { %1294 = vmatpush.bf16.msrb.mxu3 %v1969_v61 }
  0x66   :  { %1256 = vmatpush.bf16.msrb.mxu0 %v1944_v2 }
  0x67   :  { %1269 = vmatpush.bf16.msrb.mxu1 %v1952_v3 }
  0x68   :  { %1282 = vmatpush.bf16.msrb.mxu2 %v1960_v4 }
  0x69   :  { %1295 = vmatpush.bf16.msrb.mxu3 %v1968_v5 }
  0x6a   :  { %1257 = vmatpush.bf16.msrb.mxu0 %v1943_v6 }
  0x6b   :  { %1270 = vmatpush.bf16.msrb.mxu1 %v1951_v7 }
  0x6c   :  { %1283 = vmatpush.bf16.msrb.mxu2 %v1959_v8 }
  0x6d   :  { %1296 = vmatpush.bf16.msrb.mxu3 %v1967_v9 }
  0x6e   :  { %1258 = vmatpush.bf16.msrb.mxu0 %v1942_v10 }
  0x6f   :  { %1271 = vmatpush.bf16.msrb.mxu1 %v1950_v11 }
  0x70   :  { %1284 = vmatpush.bf16.msrb.mxu2 %v1958_v12 }
  0x71   :  { %1297 = vmatpush.bf16.msrb.mxu3 %v1966_v13 }
  0x72   :  { %1259 = vmatpush.bf16.msrb.mxu0 %v1941_v14 }
  0x73   :  { %1272 = vmatpush.bf16.msrb.mxu1 %v1949_v15 }
  0x74   :  { %1285 = vmatpush.bf16.msrb.mxu2 %v1957_v16 }
  0x75   :  { %1298 = vmatpush.bf16.msrb.mxu3 %v1965_v17 }
  0x76   :  { %1260 = vmatpush.bf16.msrb.mxu0 %v1940_v18 }
  0x77   :  { %1273 = vmatpush.bf16.msrb.mxu1 %v1948_v19 }
  0x78   :  { %1286 = vmatpush.bf16.msrb.mxu2 %v1956_v20 }
  0x79   :  { %1299 = vmatpush.bf16.msrb.mxu3 %v1964_v21 }
  0x7a   :  { %1261 = vmatpush.bf16.msrb.mxu0 %v1939_v22 }
  0x7b   :  { %1274 = vmatpush.bf16.msrb.mxu1 %v1947_v23 }
  0x7c   :  { %1287 = vmatpush.bf16.msrb.mxu2 %v1955_v25 }
  0x7d   :  { %1300 = vmatpush.bf16.msrb.mxu3 %v1963_v26 }
  0x7e   :  { %1262 = vmatpush.bf16.msrb.mxu0 %v1938_v30 }
  0x7f   :  { %1275 = vmatpush.bf16.msrb.mxu1 %v1946_v31 }
  0x80   :  { %1288 = vmatpush.bf16.msrb.mxu2 %v1954_v34 }
  0x81   :  { %1301 = vmatpush.bf16.msrb.mxu3 %v1962_v35  ;;  %1263 = vmatmul.bf16.vlgmr.msrb.gmra.mxu0 %v311_v36 }
  0x82   :  { %1276 = vmatmul.bf16.vlgmr.msrb.gmra.mxu1 %v312_v37 }
  0x83   :  { %1289 = vmatmul.bf16.vlgmr.msrb.gmra.mxu2 %v313_v38 }
  0x84   :  { %1302 = vmatmul.bf16.vlgmr.msrb.gmra.mxu3 %v314_v39 }
  0x9e   :  { %v1108_v40 = vpop.f32.mrf.mxu0 }
  0x9f   :  { %v1121_v41 = vpop.f32.mrf.mxu1 }
  0xa0   :  { %v1122_v42 = vadd.f32 %v1121_v41, %v1108_v40 }
  0xa6   :  { %v1134_v43 = vpop.f32.mrf.mxu2  ;;  %v1110_v46 = vpop.f32.mrf.mxu0 }
  0xa7   :  { %v1135_v44 = vadd.f32 %v1134_v43, %v1122_v42  ;;  %v1147_v45 = vpop.f32.mrf.mxu3  ;;  %v1123_v48 = vpop.f32.mrf.mxu1 }
  0xa9   :  { %v1148_v47 = vadd.f32 %v1147_v45, %v1135_v44 }
  0xae   :  { %v1136_v49 = vpop.f32.mrf.mxu2 }
  0xaf   :  { %v1149_v50 = vpop.f32.mrf.mxu3 }
  0xbe   :  { %v1160_v51 = vpop.f32.mrf.mxu0 }
  0xbf   :  { %v1173_v52 = vpop.f32.mrf.mxu1  ;;  %v1161_v61 = vadd.f32 %v1160_v51, %v1148_v47 }
  0xc1   :  { %v1174_v1 = vadd.f32 %v1173_v52, %v1161_v61 }
  0xc6   :  { %v1186_v53 = vpop.f32.mrf.mxu2  ;;  %v1162_v55 = vpop.f32.mrf.mxu0 }
  0xc7   :  { %v1199_v54 = vpop.f32.mrf.mxu3  ;;  %v1175_v56 = vpop.f32.mrf.mxu1  ;;  %v1187_v3 = vadd.f32 %v1186_v53, %v1174_v1 }
  0xc9   :  { %v1200_v6 = vadd.f32 %v1199_v54, %v1187_v3 }
  0xce   :  { %v1188_v57 = vpop.f32.mrf.mxu2 }
  0xcf   :  { %v1201_v58 = vpop.f32.mrf.mxu3 }
  0xde   :  { %v1212_v59 = vpop.f32.mrf.mxu0 }
  0xdf   :  { %v1225_v60 = vpop.f32.mrf.mxu1  ;;  %v1213_v7 = vadd.f32 %v1212_v59, %v1200_v6 }
  0xe1   :  { %v1226_v8 = vadd.f32 %v1225_v60, %v1213_v7 }
  0xe6   :  { %v1238_v62 = vpop.f32.mrf.mxu2  ;;  %v1214_v0 = vpop.f32.mrf.mxu0 }
  0xe7   :  { %v1251_v63 = vpop.f32.mrf.mxu3  ;;  %v1227_v2 = vpop.f32.mrf.mxu1  ;;  %v1239_v9 = vadd.f32 %v1238_v62, %v1226_v8 }
  0xe9   :  { %v1252_v10 = vadd.f32 %v1251_v63, %v1239_v9 }
  0xee   :  { %v1240_v4 = vpop.f32.mrf.mxu2 }
  0xef   :  { %v1253_v5 = vpop.f32.mrf.mxu3 }
  0xfe   :  { %v1264_v11 = vpop.f32.mrf.mxu0 }
  0xff   :  { %v1277_v12 = vpop.f32.mrf.mxu1  ;;  %v1265_v13 = vadd.f32 %v1264_v11, %v1252_v10 }
 0x101   :  { %v1278_v14 = vadd.f32 %v1277_v12, %v1265_v13 }
 0x106   :  { %v1290_v15 = vpop.f32.mrf.mxu2  ;;  %v1266_v18 = vpop.f32.mrf.mxu0 }
 0x107   :  { %v1303_v16 = vpop.f32.mrf.mxu3  ;;  %v1291_v17 = vadd.f32 %v1290_v15, %v1278_v14  ;;  %v1279_v19 = vpop.f32.mrf.mxu1 }
 0x109   :  { %v1304_v20 = vadd.f32 %v1303_v16, %v1291_v17 }
 0x10b   :  { %v1307_v21 = vsub.f32 0.0, %v1304_v20 }
 0x10d   :  { %v1308_v22 = vmul.f32 1.442695, %v1307_v21 }
 0x10e   :  { %v1292_v23 = vpop.f32.mrf.mxu2 }
 0x10f   :  { %v1305_v24 = vpop.f32.mrf.mxu3  ;;  %1970 = vpow2.f32 %v1308_v22 }
 0x115   :  { %v1971_v25 = vpop.eup %1970 }
 0x116   :  { %v1310_v26 = vadd.f32 1.0, %v1971_v25 }
 0x118   :  { %1972 = vrcp.f32 %v1310_v26  ;;  %v1322_v30 = vand.u32 2147483648, %v1310_v26  ;;  %v1320_v32 = vand.u32 2147483647, %v1310_v26  ;;  %vm1316_vm1 = vweird.f32 %v1310_v26 }
 0x11a   :  { %v1323_v34 = vor.u32 1.1754944e-38, %v1322_v30  ;;  %vm1321_vm3 = vcmp.eq.f32.partialorder %v1320_v32, 8.507059e+37 }
 0x11e   :  { %v1973_v27 = vpop.eup %1972 }
 0x11f   :  { %v1312_v28 = vmul.f32 %v1973_v27, %v1310_v26  ;;  %vm1317_vm0 = vweird.f32 %v1973_v27 }
 0x120   :  { %vm1318_vm2 = vmor %vm1316_vm1, %vm1317_vm0 }
 0x121   :  { %v1313_v29 = vsub.f32 1.0, %v1312_v28 }
 0x123   :  { %v1314_v31 = vmul.f32 %v1973_v27, %v1313_v29 }
 0x125   :  { %v1315_v33 = vadd.f32 %v1973_v27, %v1314_v31 }
 0x127   :  { %v1319_v35 = vsel %vm1318_vm2, %v1973_v27, %v1315_v33 }
 0x128   :  { %v1324_v36 = vsel %vm1321_vm3, %v1323_v34, %v1319_v35 }
 0x129   :  { %1325 = vst [vmem:[%s2402_s2] sm:$0xff] %v1324_v36 }

</bundles_post_ra>
